<compile_context>
chip_gen: v6e
topology: v6e:2x2x1
jax: 0.10.0
libtpu: 0.0.40
codegen_flags: <defaults>
</compile_context>

<pallas_src>
import functools

import jax
import jax.numpy as jnp
from jax.experimental import pallas as pl
from jax.experimental.pallas import tpu as pltpu

NEG_INF = float("-inf")


# ----------------------------------------------------------------------------
# Fused attention chain kernel:
#   initial IAB (1->4)  then  nb1 x [ IAB(4->4) ; ChannelAttn ; SpatialAttn ]
# Planes are channel-stacked 2-D slabs: row index = c*H + y, lanes = W.
# ----------------------------------------------------------------------------
def _fused_attn_kernel(nb1, cin, H,
                       wc0_ref, bc0_ref, k30_ref, k50_ref, bk0_ref,
                       wc_ref, bc_ref, k3_ref, k5_ref, bk_ref,
                       we_ref, be_ref, wd_ref, bd_ref, ws_ref, bs_ref,
                       x_ref, o_ref):
    W = x_ref.shape[-1]
    C = 4  # channel count after the first inception block

    # ---- hoisted shifters: iota + boundary masks built once per invocation.
    # Row validity uses the within-channel row index (r % H), so masked rolls
    # of the stacked slab never leak data across channel boundaries.
    def make_shifters(nrows, dists):
        r = jax.lax.broadcasted_iota(jnp.int32, (nrows, W), 0) % H
        c = jax.lax.broadcasted_iota(jnp.int32, (nrows, W), 1)
        row_ok = {d: (r + d >= 0) & (r + d < H) for d in dists}
        col_ok = {d: (c + d >= 0) & (c + d < W) for d in dists}

        def sy(v, dy, fill):
            if dy == 0:
                return v
            return jnp.where(row_ok[dy],
                             pltpu.roll(v, (-dy) % nrows, axis=0), fill)

        def sx(v, dx, fill):
            if dx == 0:
                return v
            return jnp.where(col_ok[dx],
                             pltpu.roll(v, (-dx) % W, axis=1), fill)

        return sy, sx

    sy_p, sx_p = make_shifters(H, (-2, -1, 1, 2))            # per-plane convs
    sy_s0, sx_s0 = make_shifters((3 + cin) * H, (-1, 1))     # initial pool stack
    sy_s, sx_s = make_shifters((3 + C) * H, (-1, 1))         # per-block pool stack

    # ---- separable 3x3 max pool (stride 1, pad 1; padding acts as -inf) ----
    def maxpool3(v, sy, sx):
        h = jnp.maximum(v, jnp.maximum(sx(v, -1, NEG_INF), sx(v, 1, NEG_INF)))
        return jnp.maximum(h, jnp.maximum(sy(h, -1, NEG_INF),
                                          sy(h, 1, NEG_INF)))

    # ---- (2r+1)x(2r+1) conv on one (H, W) plane, zero padding, separable ----
    def convk(v, wk, bias, r):
        k = 2 * r + 1
        xs = [sx_p(v, kx - r, 0.0) for kx in range(k)]       # reused x-shifts
        acc = None
        for ky in range(k):
            row = wk(ky, 0) * xs[0]
            for kx in range(1, k):
                row = row + wk(ky, kx) * xs[kx]
            row = sy_p(row, ky - r, 0.0)                     # one y-shift / row
            acc = row if acc is None else acc + row
        return acc + bias

    def conv1x1(chs, w, b):
        acc = w(0) * chs[0]
        for c in range(1, len(chs)):
            acc = acc + w(c) * chs[c]
        return acc + b

    # ---- InceptionAttentionBlock on a stacked (ncin*H, W) slab --------------
    # One stacked maxpool covers path1/2/3 outputs AND path4's input pool.
    def iab(planes, ncin, sy_pool, sx_pool, wc, bc, wk3, wk5, bk):
        chans = [planes[c * H:(c + 1) * H] for c in range(ncin)]
        c1 = conv1x1(chans, lambda c: wc(0, c), bc(0))
        c2 = convk(conv1x1(chans, lambda c: wc(1, c), bc(1)), wk3, bk(0), 1)
        c3 = convk(conv1x1(chans, lambda c: wc(2, c), bc(2)), wk5, bk(1), 2)
        stack = jnp.concatenate([c1, c2, c3, planes], axis=0)
        pooled = maxpool3(stack, sy_pool, sx_pool)           # ((3+ncin)*H, W)
        px = [pooled[(3 + c) * H:(4 + c) * H] for c in range(ncin)]
        p4 = conv1x1(px, lambda c: wc(3, c), bc(3))
        return jnp.concatenate([pooled[:3 * H], p4], axis=0)  # (4*H, W)

    # ---- ChannelAttention + SpatialAttention (ReLU gating, as in the spec) --
    def cab_sab(planes, we, be, wd, bd, ws, bs):
        inv_hw = 1.0 / (H * W)
        chans = [planes[c * H:(c + 1) * H] for c in range(C)]

        def gmax(v):
            return jnp.max(jnp.max(v, axis=1, keepdims=True),
                           axis=0, keepdims=True)

        def gsum(v):
            return jnp.sum(jnp.sum(v, axis=1, keepdims=True),
                           axis=0, keepdims=True)

        maxp = [gmax(p) for p in chans]
        avgp = [gsum(p) * inv_hw for p in chans]

        def enc_dec(vs):  # shared encoder(4->1, relu) / decoder(1->4, relu)
            e = vs[0] * we(0)
            for c in range(1, C):
                e = e + vs[c] * we(c)
            e = jnp.maximum(e + be, 0.0)
            return [jnp.maximum(wd(c) * e + bd(c), 0.0) for c in range(C)]

        dm = enc_dec(maxp)
        da = enc_dec(avgp)
        ys = [chans[c] * jnp.maximum(dm[c] + da[c], 0.0) for c in range(C)]

        # spatial attention on ys (channel max / mean -> 1x1 conv -> relu)
        mx = jnp.maximum(jnp.maximum(ys[0], ys[1]), jnp.maximum(ys[2], ys[3]))
        sm = (ys[0] + ys[1]) + (ys[2] + ys[3])
        s = jnp.maximum(ws(0) * mx + ws(1) * (sm * (1.0 / C)) + bs, 0.0)
        return jnp.concatenate([ys[c] * s for c in range(C)], axis=0)

    # ---- initial block (cin -> 4); the resident output block doubles as the
    #      iteration buffer (stays in VMEM for this grid step).
    o_ref[0] = iab(x_ref[0], cin, sy_s0, sx_s0,
                   wc=lambda p, c: wc0_ref[p * cin + c],
                   bc=lambda p: bc0_ref[p],
                   wk3=lambda ky, kx: k30_ref[ky * 3 + kx],
                   wk5=lambda ky, kx: k50_ref[ky * 5 + kx],
                   bk=lambda i: bk0_ref[i])

    # ---- nb1 x [IAB(4->4); ChannelAttention; SpatialAttention] --------------
    # Dynamic loop: bounds live ranges; SMEM weights are b-strided.
    @pl.loop(0, nb1)
    def _(b):
        p = iab(o_ref[0], C, sy_s, sx_s,
                wc=lambda path, c: wc_ref[b * 16 + path * 4 + c],
                bc=lambda path: bc_ref[b * 4 + path],
                wk3=lambda ky, kx: k3_ref[b * 9 + ky * 3 + kx],
                wk5=lambda ky, kx: k5_ref[b * 25 + ky * 5 + kx],
                bk=lambda i: bk_ref[b * 2 + i])
        o_ref[0] = cab_sab(p,
                           we=lambda c: we_ref[b * 4 + c],
                           be=be_ref[b],
                           wd=lambda c: wd_ref[b * 4 + c],
                           bd=lambda c: bd_ref[b * 4 + c],
                           ws=lambda i: ws_ref[b * 2 + i],
                           bs=bs_ref[b])


def fused_attention_chain(x, p_init, p_blocks):
    """x: (B, Cin, H, W) -> (B, 4, H, W); whole attention chain in one kernel."""
    B, Cin, H, W = x.shape
    assert H % 8 == 0 and W % 128 == 0, "H must be sublane- and W lane-aligned"
    nb1 = len(p_blocks)

    wc0, bc0, k30, k50, bk0 = p_init
    flat0 = (wc0.reshape(-1), bc0.reshape(-1), k30.reshape(-1),
             k50.reshape(-1), bk0.reshape(-1))

    if nb1 == 0:
        z = lambda n: jnp.zeros((n,), jnp.float32)
        stacked = (z(16), z(4), z(9), z(25), z(2), z(4), z(1), z(4), z(4),
                   z(2), z(1))
    else:
        cat = lambda xs: jnp.concatenate([a.reshape(-1) for a in xs])
        stacked = (cat([p[0][0] for p in p_blocks]),   # wc  (nb1*16,)
                   cat([p[0][1] for p in p_blocks]),   # bc  (nb1*4,)
                   cat([p[0][2] for p in p_blocks]),   # k3  (nb1*9,)
                   cat([p[0][3] for p in p_blocks]),   # k5  (nb1*25,)
                   cat([p[0][4] for p in p_blocks]),   # bk  (nb1*2,)
                   cat([p[1][0] for p in p_blocks]),   # we  (nb1*4,)
                   cat([p[1][1] for p in p_blocks]),   # be  (nb1,)
                   cat([p[1][2] for p in p_blocks]),   # wd  (nb1*4,)
                   cat([p[1][3] for p in p_blocks]),   # bd  (nb1*4,)
                   cat([p[1][4] for p in p_blocks]),   # ws  (nb1*2,)
                   cat([p[1][5] for p in p_blocks]))   # bs  (nb1,)

    x2d = x.reshape(B, Cin * H, W)                     # channel-stacked layout
    smem = pl.BlockSpec(memory_space=pltpu.MemorySpace.SMEM)
    kernel = functools.partial(_fused_attn_kernel, nb1, Cin, H)
    out2d = pl.pallas_call(
        kernel,
        out_shape=jax.ShapeDtypeStruct((B, 4 * H, W), jnp.float32),
        grid=(B,),
        in_specs=[smem] * 16
                 + [pl.BlockSpec((1, Cin * H, W), lambda b: (b, 0, 0))],
        out_specs=pl.BlockSpec((1, 4 * H, W), lambda b: (b, 0, 0)),
        compiler_params=pltpu.CompilerParams(
            dimension_semantics=("parallel",),
            vmem_limit_bytes=32 * 1024 * 1024),
    )(*flat0, *stacked, x2d)
    return out2d.reshape(B, 4, H, W)


# ----------------------------------------------------------------------------
# Fused FC head: fc1 -> fc2 -> fc3 in one pallas_call (all f32, MXU matmuls).
# fc1 weights stream over K; the (B, 1024) activation lives in VMEM scratch;
# fc2/fc3 weights stay resident.  fc2/fc3 are lane-padded (zero rows/cols).
# ----------------------------------------------------------------------------
def _fc_head_kernel(x_ref, w1_ref, b1_ref, w2_ref, b2_ref, w3_ref, b3_ref,
                    o_ref, h1_ref):
    k = pl.program_id(0)

    @pl.when(k == 0)
    def _():
        h1_ref[...] = jnp.zeros_like(h1_ref) + b1_ref[...]

    h1_ref[...] += jnp.dot(x_ref[...], w1_ref[...],
                           preferred_element_type=jnp.float32)

    @pl.when(k == pl.num_programs(0) - 1)
    def _():
        h2 = jnp.dot(h1_ref[...], w2_ref[...],
                     preferred_element_type=jnp.float32) + b2_ref[...]
        o_ref[...] = (jnp.dot(h2, w3_ref[...],
                              preferred_element_type=jnp.float32)
                      + b3_ref[...])


def _pick_tile(d, cands):
    for c in cands:
        if d % c == 0:
            return c
    return d  # fall back to the full (unblocked) extent


def fc_head(x, w1, b1, w2, b2, w3, b3):
    """x: (B, K1) f32 -> (B, N3) f32 (N3 includes zero padding cols)."""
    B, K1 = x.shape
    N1 = w1.shape[1]
    N2 = w2.shape[1]
    N3 = w3.shape[1]
    tk = _pick_tile(K1, (1024, 512, 256, 128))
    grid = (K1 // tk,)
    return pl.pallas_call(
        _fc_head_kernel,
        out_shape=jax.ShapeDtypeStruct((B, N3), jnp.float32),
        grid=grid,
        in_specs=[
            pl.BlockSpec((B, tk), lambda k: (0, k)),     # activations (stream K)
            pl.BlockSpec((tk, N1), lambda k: (k, 0)),    # fc1 weights (stream K)
            pl.BlockSpec((1, N1), lambda k: (0, 0)),     # fc1 bias   (resident)
            pl.BlockSpec((N1, N2), lambda k: (0, 0)),    # fc2 weights (resident)
            pl.BlockSpec((1, N2), lambda k: (0, 0)),     # fc2 bias
            pl.BlockSpec((N2, N3), lambda k: (0, 0)),    # fc3 weights (resident)
            pl.BlockSpec((1, N3), lambda k: (0, 0)),     # fc3 bias
        ],
        out_specs=pl.BlockSpec((B, N3), lambda k: (0, 0)),
        scratch_shapes=[pltpu.VMEM((B, N1), jnp.float32)],
        compiler_params=pltpu.CompilerParams(
            dimension_semantics=("arbitrary",),
            vmem_limit_bytes=32 * 1024 * 1024),
    )(x, w1.astype(jnp.float32), b1.reshape(1, N1),
      w2, b2.reshape(1, N2), w3, b3.reshape(1, N3))


# ----------------------------------------------------------------------------
# Deterministic parameter init (shapes follow the PyTorch __init__)
# ----------------------------------------------------------------------------
def init_iab(key, cin):
    ks = jax.random.split(key, 5)
    wc = jax.random.normal(ks[0], (4, cin), jnp.float32) * (0.5 / cin)   # 1x1 convs
    bc = jax.random.normal(ks[1], (4,), jnp.float32) * 0.05
    k3 = jax.random.normal(ks[2], (3, 3), jnp.float32) * (1.0 / 9.0)     # path2 3x3
    k5 = jax.random.normal(ks[3], (5, 5), jnp.float32) * (1.0 / 25.0)    # path3 5x5
    bk = jax.random.normal(ks[4], (2,), jnp.float32) * 0.05
    return (wc, bc, k3, k5, bk)


def init_cab_sab(key):
    ks = jax.random.split(key, 6)
    we = jax.random.normal(ks[0], (4,), jnp.float32) * 0.3   # encoder 4->1
    be = jax.random.normal(ks[1], (1,), jnp.float32) * 0.05
    wd = jax.random.normal(ks[2], (4,), jnp.float32) * 0.3   # decoder 1->4
    bd = jax.random.normal(ks[3], (4,), jnp.float32) * 0.05
    ws = jax.random.normal(ks[4], (2,), jnp.float32) * 0.5   # spatial 2->1
    bs = jax.random.normal(ks[5], (1,), jnp.float32) * 0.05
    return (we, be, wd, bd, ws, bs)


def init_fc(key, fin, fout, pad_in=None, pad_out=None):
    """f32 weights/bias; optional zero-padding to lane-dense widths."""
    k1, k2 = jax.random.split(key)
    w = jax.random.normal(k1, (fin, fout), jnp.float32) * (1.0 / (fin ** 0.5))
    b = jax.random.normal(k2, (fout,), jnp.float32) * 0.05
    if pad_in is not None and pad_in > fin:        # zero rows: math unchanged
        w = jnp.pad(w, ((0, pad_in - fin), (0, 0)))
    if pad_out is not None and pad_out > fout:     # zero cols: math unchanged
        w = jnp.pad(w, ((0, 0), (0, pad_out - fout)))
        b = jnp.pad(b, (0, pad_out - fout))
    return w, b


# ----------------------------------------------------------------------------
# Full forward pass
# ----------------------------------------------------------------------------
def forward(x, params):
    p_init, p_blocks, p_fc = params
    feat = fused_attention_chain(x, p_init, p_blocks)    # (B, 4, H, W)
    B = feat.shape[0]
    flat = feat.reshape(B, -1)                           # NCHW flatten, like torch
    (w1, b1), (w2, b2), (w3, b3) = p_fc
    y = fc_head(flat, w1, b1, w2, b2, w3, b3)            # (B, 128) lane-padded
    return y[:, :2]                                      # drop zero padding cols


if __name__ == "__main__":
    B, H, W = 2, 16, 128
    num_blocks = 5

    key = jax.random.PRNGKey(0)
    kx, kp = jax.random.split(key)
    x = jax.random.normal(kx, (B, 1, H, W), jnp.float32)

    keys = jax.random.split(kp, 2 * num_blocks + 1)
    p_init = init_iab(keys[0], 1)
    p_blocks = []
    for i in range(num_blocks - 1):
        p_blocks.append((init_iab(keys[1 + 2 * i], 4),
                         init_cab_sab(keys[2 + 2 * i])))
    kfc = jax.random.split(keys[-1], 3)
    feat_dim = 4 * H * W   # torch hard-codes 256*256*4; scaled for test shape
    p_fc = (init_fc(kfc[0], feat_dim, 1024),
            init_fc(kfc[1], 1024, 250, pad_out=256),          # 250 -> 256 cols
            init_fc(kfc[2], 250, 2, pad_in=256, pad_out=128))  # lane-dense out

    fwd = jax.jit(forward)
    out = fwd(x, (p_init, tuple(p_blocks), p_fc))
    out = jax.block_until_ready(out)
    assert out.shape == (B, 2)
    assert bool(jnp.all(jnp.isfinite(out)))
    print("KERNEL_OK")
</pallas_src>

<mosaic_0001>
module attributes {stable_mosaic.version = 11 : i64} {
  func.func @_fc_head_kernel(%arg0: i32, %arg1: memref<2x1024xf32, #tpu.memory_space<vmem>>, %arg2: memref<1024x1024xf32, #tpu.memory_space<vmem>>, %arg3: memref<1x1024xf32, #tpu.memory_space<vmem>>, %arg4: memref<1024x256xf32, #tpu.memory_space<vmem>>, %arg5: memref<1x256xf32, #tpu.memory_space<vmem>>, %arg6: memref<256x128xf32, #tpu.memory_space<vmem>>, %arg7: memref<1x128xf32, #tpu.memory_space<vmem>>, %arg8: memref<2x128xf32, #tpu.memory_space<vmem>>, %arg9: memref<2x1024xf32, #tpu.memory_space<vmem>>) attributes {dimension_semantics = [#tpu.dimension_semantics<arbitrary>], iteration_bounds = array<i64: 8>, scalar_prefetch = 0 : i64, scratch_operands = 1 : i64, tpu.core_type = #tpu.core_type<tc>, window_params = [{transform_indices = @transform_0, window_bounds = array<i64: 2, 1024>}, {transform_indices = @transform_1, window_bounds = array<i64: 1024, 1024>}, {pipeline_mode = #tpu.pipeline_mode<synchronous>, transform_indices = @transform_2, window_bounds = array<i64: 1, 1024>}, {pipeline_mode = #tpu.pipeline_mode<synchronous>, transform_indices = @transform_3, window_bounds = array<i64: 1024, 256>}, {pipeline_mode = #tpu.pipeline_mode<synchronous>, transform_indices = @transform_4, window_bounds = array<i64: 1, 256>}, {pipeline_mode = #tpu.pipeline_mode<synchronous>, transform_indices = @transform_5, window_bounds = array<i64: 256, 128>}, {pipeline_mode = #tpu.pipeline_mode<synchronous>, transform_indices = @transform_6, window_bounds = array<i64: 1, 128>}, {pipeline_mode = #tpu.pipeline_mode<synchronous>, transform_indices = @transform_7, window_bounds = array<i64: 2, 128>}]} {
    %c0_i32 = arith.constant 0 : i32
    %0 = arith.cmpi eq, %arg0, %c0_i32 : i32
    %1 = arith.extui %0 : i1 to i32
    %c0_i32_0 = arith.constant 0 : i32
    %2 = arith.cmpi ne, %1, %c0_i32_0 : i32
    scf.if %2 {
      %cst_9 = arith.constant 0.000000e+00 : f32
      %12 = vector.broadcast %cst_9 : f32 to vector<2x1024xf32>
      %c0_10 = arith.constant 0 : index
      %c0_11 = arith.constant 0 : index
      %13 = vector.load %arg3[%c0_10, %c0_11] : memref<1x1024xf32, #tpu.memory_space<vmem>>, vector<1x1024xf32>
      %14 = vector.broadcast %13 : vector<1x1024xf32> to vector<2x1024xf32>
      %15 = arith.addf %12, %14 : vector<2x1024xf32>
      %c0_12 = arith.constant 0 : index
      %c0_13 = arith.constant 0 : index
      %16 = vector.load %arg9[%c0_12, %c0_13] : memref<2x1024xf32, #tpu.memory_space<vmem>>, vector<2x1024xf32>
      tpu.vector_store %arg9[%c0_12, %c0_13], %15 {strides = array<i32>} : memref<2x1024xf32, #tpu.memory_space<vmem>>, vector<2x1024xf32>,
    } else {
    }
    %c0 = arith.constant 0 : index
    %c0_1 = arith.constant 0 : index
    %3 = vector.load %arg9[%c0, %c0_1] : memref<2x1024xf32, #tpu.memory_space<vmem>>, vector<2x1024xf32>
    %c0_2 = arith.constant 0 : index
    %c0_3 = arith.constant 0 : index
    %4 = vector.load %arg1[%c0_2, %c0_3] : memref<2x1024xf32, #tpu.memory_space<vmem>>, vector<2x1024xf32>
    %c0_4 = arith.constant 0 : index
    %c0_5 = arith.constant 0 : index
    %5 = vector.load %arg2[%c0_4, %c0_5] : memref<1024x1024xf32, #tpu.memory_space<vmem>>, vector<1024x1024xf32>
    %cst = arith.constant dense<0.000000e+00> : vector<2x1024xf32>
    %6 = tpu.matmul %4, %5, %cst {dimension_numbers = #tpu.dot_dimension_numbers<[1], [0], [0], [1], [0, 0, 1, 1], [], []>} : vector<2x1024xf32>, vector<1024x1024xf32>, vector<2x1024xf32> -> vector<2x1024xf32>
    %7 = arith.addf %3, %6 : vector<2x1024xf32>
    %c0_6 = arith.constant 0 : index
    %c0_7 = arith.constant 0 : index
    %8 = vector.load %arg9[%c0_6, %c0_7] : memref<2x1024xf32, #tpu.memory_space<vmem>>, vector<2x1024xf32>
    tpu.vector_store %arg9[%c0_6, %c0_7], %7 {strides = array<i32>} : memref<2x1024xf32, #tpu.memory_space<vmem>>, vector<2x1024xf32>,
    %c7_i32 = arith.constant 7 : i32
    %9 = arith.cmpi eq, %arg0, %c7_i32 : i32
    %10 = arith.extui %9 : i1 to i32
    %c0_i32_8 = arith.constant 0 : i32
    %11 = arith.cmpi ne, %10, %c0_i32_8 : i32
    scf.if %11 {
      %c0_9 = arith.constant 0 : index
      %c0_10 = arith.constant 0 : index
      %12 = vector.load %arg9[%c0_9, %c0_10] : memref<2x1024xf32, #tpu.memory_space<vmem>>, vector<2x1024xf32>
      %c0_11 = arith.constant 0 : index
      %c0_12 = arith.constant 0 : index
      %13 = vector.load %arg4[%c0_11, %c0_12] : memref<1024x256xf32, #tpu.memory_space<vmem>>, vector<1024x256xf32>
      %cst_13 = arith.constant dense<0.000000e+00> : vector<2x256xf32>
      %14 = tpu.matmul %12, %13, %cst_13 {dimension_numbers = #tpu.dot_dimension_numbers<[1], [0], [0], [1], [0, 0, 1, 1], [], []>} : vector<2x1024xf32>, vector<1024x256xf32>, vector<2x256xf32> -> vector<2x256xf32>
      %c0_14 = arith.constant 0 : index
      %c0_15 = arith.constant 0 : index
      %15 = vector.load %arg5[%c0_14, %c0_15] : memref<1x256xf32, #tpu.memory_space<vmem>>, vector<1x256xf32>
      %16 = vector.broadcast %15 : vector<1x256xf32> to vector<2x256xf32>
      %17 = arith.addf %14, %16 : vector<2x256xf32>
      %c0_16 = arith.constant 0 : index
      %c0_17 = arith.constant 0 : index
      %18 = vector.load %arg6[%c0_16, %c0_17] : memref<256x128xf32, #tpu.memory_space<vmem>>, vector<256x128xf32>
      %cst_18 = arith.constant dense<0.000000e+00> : vector<2x128xf32>
      %19 = tpu.matmul %17, %18, %cst_18 {dimension_numbers = #tpu.dot_dimension_numbers<[1], [0], [0], [1], [0, 0, 1, 1], [], []>} : vector<2x256xf32>, vector<256x128xf32>, vector<2x128xf32> -> vector<2x128xf32>
      %c0_19 = arith.constant 0 : index
      %c0_20 = arith.constant 0 : index
      %20 = vector.load %arg7[%c0_19, %c0_20] : memref<1x128xf32, #tpu.memory_space<vmem>>, vector<1x128xf32>
      %21 = vector.broadcast %20 : vector<1x128xf32> to vector<2x128xf32>
      %22 = arith.addf %19, %21 : vector<2x128xf32>
      %c0_21 = arith.constant 0 : index
      %c0_22 = arith.constant 0 : index
      %23 = vector.load %arg8[%c0_21, %c0_22] : memref<2x128xf32, #tpu.memory_space<vmem>>, vector<2x128xf32>
      tpu.vector_store %arg8[%c0_21, %c0_22], %22 {strides = array<i32>} : memref<2x128xf32, #tpu.memory_space<vmem>>, vector<2x128xf32>,
    } else {
    }
    return
  }
  func.func @transform_0(%arg0: i32) -> (i32, i32) {
    %c0_i32 = arith.constant 0 : i32
    %c0_i32_0 = arith.constant 0 : i32
    return %c0_i32, %arg0 : i32, i32
  }
  func.func @transform_1(%arg0: i32) -> (i32, i32) {
    %c0_i32 = arith.constant 0 : i32
    %c0_i32_0 = arith.constant 0 : i32
    return %arg0, %c0_i32 : i32, i32
  }
  func.func @transform_2(%arg0: i32) -> (i32, i32) {
    %c0_i32 = arith.constant 0 : i32
    %c0_i32_0 = arith.constant 0 : i32
    %c0_i32_1 = arith.constant 0 : i32
    return %c0_i32, %c0_i32_0 : i32, i32
  }
  func.func @transform_3(%arg0: i32) -> (i32, i32) {
    %c0_i32 = arith.constant 0 : i32
    %c0_i32_0 = arith.constant 0 : i32
    %c0_i32_1 = arith.constant 0 : i32
    return %c0_i32, %c0_i32_0 : i32, i32
  }
  func.func @transform_4(%arg0: i32) -> (i32, i32) {
    %c0_i32 = arith.constant 0 : i32
    %c0_i32_0 = arith.constant 0 : i32
    %c0_i32_1 = arith.constant 0 : i32
    return %c0_i32, %c0_i32_0 : i32, i32
  }
  func.func @transform_5(%arg0: i32) -> (i32, i32) {
    %c0_i32 = arith.constant 0 : i32
    %c0_i32_0 = arith.constant 0 : i32
    %c0_i32_1 = arith.constant 0 : i32
    return %c0_i32, %c0_i32_0 : i32, i32
  }
  func.func @transform_6(%arg0: i32) -> (i32, i32) {
    %c0_i32 = arith.constant 0 : i32
    %c0_i32_0 = arith.constant 0 : i32
    %c0_i32_1 = arith.constant 0 : i32
    return %c0_i32, %c0_i32_0 : i32, i32
  }
  func.func @transform_7(%arg0: i32) -> (i32, i32) {
    %c0_i32 = arith.constant 0 : i32
    %c0_i32_0 = arith.constant 0 : i32
    %c0_i32_1 = arith.constant 0 : i32
    return %c0_i32, %c0_i32_0 : i32, i32
  }
}

module attributes {stable_mosaic.version = 11 : i64} {
  func.func @_fused_attn_kernel(%arg0: i32, %arg1: memref<4xf32, #tpu.memory_space<smem>>, %arg2: memref<4xf32, #tpu.memory_space<smem>>, %arg3: memref<9xf32, #tpu.memory_space<smem>>, %arg4: memref<25xf32, #tpu.memory_space<smem>>, %arg5: memref<2xf32, #tpu.memory_space<smem>>, %arg6: memref<64xf32, #tpu.memory_space<smem>>, %arg7: memref<16xf32, #tpu.memory_space<smem>>, %arg8: memref<36xf32, #tpu.memory_space<smem>>, %arg9: memref<100xf32, #tpu.memory_space<smem>>, %arg10: memref<8xf32, #tpu.memory_space<smem>>, %arg11: memref<16xf32, #tpu.memory_space<smem>>, %arg12: memref<4xf32, #tpu.memory_space<smem>>, %arg13: memref<16xf32, #tpu.memory_space<smem>>, %arg14: memref<16xf32, #tpu.memory_space<smem>>, %arg15: memref<8xf32, #tpu.memory_space<smem>>, %arg16: memref<4xf32, #tpu.memory_space<smem>>, %arg17: memref<1x16x128xf32, #tpu.memory_space<vmem>>, %arg18: memref<1x64x128xf32, #tpu.memory_space<vmem>>) attributes {dimension_semantics = [#tpu.dimension_semantics<parallel>], iteration_bounds = array<i64: 2>, scalar_prefetch = 0 : i64, scratch_operands = 0 : i64, tpu.core_type = #tpu.core_type<tc>, window_params = [{transform_indices = @transform_0, window_bounds = array<i64: 4>}, {transform_indices = @transform_1, window_bounds = array<i64: 4>}, {transform_indices = @transform_2, window_bounds = array<i64: 9>}, {transform_indices = @transform_3, window_bounds = array<i64: 25>}, {transform_indices = @transform_4, window_bounds = array<i64: 2>}, {transform_indices = @transform_5, window_bounds = array<i64: 64>}, {transform_indices = @transform_6, window_bounds = array<i64: 16>}, {transform_indices = @transform_7, window_bounds = array<i64: 36>}, {transform_indices = @transform_8, window_bounds = array<i64: 100>}, {transform_indices = @transform_9, window_bounds = array<i64: 8>}, {transform_indices = @transform_10, window_bounds = array<i64: 16>}, {transform_indices = @transform_11, window_bounds = array<i64: 4>}, {transform_indices = @transform_12, window_bounds = array<i64: 16>}, {transform_indices = @transform_13, window_bounds = array<i64: 16>}, {transform_indices = @transform_14, window_bounds = array<i64: 8>}, {transform_indices = @transform_15, window_bounds = array<i64: 4>}, {transform_indices = @transform_16, window_bounds = array<i64: 1, 16, 128>}, {transform_indices = @transform_17, window_bounds = array<i64: 1, 64, 128>}]} {
    %0 = tpu.iota {dimensions = array<i32: 0>} : vector<16x128xi32>
    %c16_i32 = arith.constant 16 : i32
    %c0_i32 = arith.constant 0 : i32
    %1 = arith.cmpi eq, %c16_i32, %c0_i32 : i32
    %c1_i32 = arith.constant 1 : i32
    %2 = arith.select %1, %c1_i32, %c16_i32 : i32
    %3 = vector.broadcast %2 : i32 to vector<16x128xi32>
    %4 = arith.remsi %0, %3 : vector<16x128xi32>
    %c0_i32_0 = arith.constant 0 : i32
    %5 = vector.broadcast %c0_i32_0 : i32 to vector<16x128xi32>
    %6 = arith.cmpi ne, %4, %5 : vector<16x128xi32>
    %c0_i32_1 = arith.constant 0 : i32
    %7 = vector.broadcast %c0_i32_1 : i32 to vector<16x128xi32>
    %8 = arith.cmpi slt, %4, %7 : vector<16x128xi32>
    %c0_i32_2 = arith.constant 0 : i32
    %9 = arith.cmpi slt, %2, %c0_i32_2 : i32
    %10 = vector.broadcast %9 : i1 to vector<16x128xi1>
    %11 = vector.broadcast %10 : vector<16x128xi1> to vector<16x128xi1>
    %12 = arith.xori %8, %11 : vector<16x128xi1>
    %13 = arith.andi %12, %6 : vector<16x128xi1>
    %14 = vector.broadcast %2 : i32 to vector<16x128xi32>
    %15 = arith.addi %4, %14 : vector<16x128xi32>
    %16 = arith.select %13, %15, %4 : vector<16x128xi1>, vector<16x128xi32>
    %17 = tpu.iota {dimensions = array<i32: 1>} : vector<16x128xi32>
    %c-2_i32 = arith.constant -2 : i32
    %18 = vector.broadcast %c-2_i32 : i32 to vector<16x128xi32>
    %19 = arith.addi %16, %18 : vector<16x128xi32>
    %c0_i32_3 = arith.constant 0 : i32
    %20 = vector.broadcast %c0_i32_3 : i32 to vector<16x128xi32>
    %21 = arith.cmpi sge, %19, %20 : vector<16x128xi32>
    %c-2_i32_4 = arith.constant -2 : i32
    %22 = vector.broadcast %c-2_i32_4 : i32 to vector<16x128xi32>
    %23 = arith.addi %16, %22 : vector<16x128xi32>
    %c16_i32_5 = arith.constant 16 : i32
    %24 = vector.broadcast %c16_i32_5 : i32 to vector<16x128xi32>
    %25 = arith.cmpi slt, %23, %24 : vector<16x128xi32>
    %26 = arith.andi %21, %25 : vector<16x128xi1>
    %c-1_i32 = arith.constant -1 : i32
    %27 = vector.broadcast %c-1_i32 : i32 to vector<16x128xi32>
    %28 = arith.addi %16, %27 : vector<16x128xi32>
    %c0_i32_6 = arith.constant 0 : i32
    %29 = vector.broadcast %c0_i32_6 : i32 to vector<16x128xi32>
    %30 = arith.cmpi sge, %28, %29 : vector<16x128xi32>
    %c-1_i32_7 = arith.constant -1 : i32
    %31 = vector.broadcast %c-1_i32_7 : i32 to vector<16x128xi32>
    %32 = arith.addi %16, %31 : vector<16x128xi32>
    %c16_i32_8 = arith.constant 16 : i32
    %33 = vector.broadcast %c16_i32_8 : i32 to vector<16x128xi32>
    %34 = arith.cmpi slt, %32, %33 : vector<16x128xi32>
    %35 = arith.andi %30, %34 : vector<16x128xi1>
    %c1_i32_9 = arith.constant 1 : i32
    %36 = vector.broadcast %c1_i32_9 : i32 to vector<16x128xi32>
    %37 = arith.addi %16, %36 : vector<16x128xi32>
    %c0_i32_10 = arith.constant 0 : i32
    %38 = vector.broadcast %c0_i32_10 : i32 to vector<16x128xi32>
    %39 = arith.cmpi sge, %37, %38 : vector<16x128xi32>
    %c1_i32_11 = arith.constant 1 : i32
    %40 = vector.broadcast %c1_i32_11 : i32 to vector<16x128xi32>
    %41 = arith.addi %16, %40 : vector<16x128xi32>
    %c16_i32_12 = arith.constant 16 : i32
    %42 = vector.broadcast %c16_i32_12 : i32 to vector<16x128xi32>
    %43 = arith.cmpi slt, %41, %42 : vector<16x128xi32>
    %44 = arith.andi %39, %43 : vector<16x128xi1>
    %c2_i32 = arith.constant 2 : i32
    %45 = vector.broadcast %c2_i32 : i32 to vector<16x128xi32>
    %46 = arith.addi %16, %45 : vector<16x128xi32>
    %c0_i32_13 = arith.constant 0 : i32
    %47 = vector.broadcast %c0_i32_13 : i32 to vector<16x128xi32>
    %48 = arith.cmpi sge, %46, %47 : vector<16x128xi32>
    %c2_i32_14 = arith.constant 2 : i32
    %49 = vector.broadcast %c2_i32_14 : i32 to vector<16x128xi32>
    %50 = arith.addi %16, %49 : vector<16x128xi32>
    %c16_i32_15 = arith.constant 16 : i32
    %51 = vector.broadcast %c16_i32_15 : i32 to vector<16x128xi32>
    %52 = arith.cmpi slt, %50, %51 : vector<16x128xi32>
    %53 = arith.andi %48, %52 : vector<16x128xi1>
    %c-2_i32_16 = arith.constant -2 : i32
    %54 = vector.broadcast %c-2_i32_16 : i32 to vector<16x128xi32>
    %55 = arith.addi %17, %54 : vector<16x128xi32>
    %c0_i32_17 = arith.constant 0 : i32
    %56 = vector.broadcast %c0_i32_17 : i32 to vector<16x128xi32>
    %57 = arith.cmpi sge, %55, %56 : vector<16x128xi32>
    %c-2_i32_18 = arith.constant -2 : i32
    %58 = vector.broadcast %c-2_i32_18 : i32 to vector<16x128xi32>
    %59 = arith.addi %17, %58 : vector<16x128xi32>
    %c128_i32 = arith.constant 128 : i32
    %60 = vector.broadcast %c128_i32 : i32 to vector<16x128xi32>
    %61 = arith.cmpi slt, %59, %60 : vector<16x128xi32>
    %62 = arith.andi %57, %61 : vector<16x128xi1>
    %c-1_i32_19 = arith.constant -1 : i32
    %63 = vector.broadcast %c-1_i32_19 : i32 to vector<16x128xi32>
    %64 = arith.addi %17, %63 : vector<16x128xi32>
    %c0_i32_20 = arith.constant 0 : i32
    %65 = vector.broadcast %c0_i32_20 : i32 to vector<16x128xi32>
    %66 = arith.cmpi sge, %64, %65 : vector<16x128xi32>
    %c-1_i32_21 = arith.constant -1 : i32
    %67 = vector.broadcast %c-1_i32_21 : i32 to vector<16x128xi32>
    %68 = arith.addi %17, %67 : vector<16x128xi32>
    %c128_i32_22 = arith.constant 128 : i32
    %69 = vector.broadcast %c128_i32_22 : i32 to vector<16x128xi32>
    %70 = arith.cmpi slt, %68, %69 : vector<16x128xi32>
    %71 = arith.andi %66, %70 : vector<16x128xi1>
    %c1_i32_23 = arith.constant 1 : i32
    %72 = vector.broadcast %c1_i32_23 : i32 to vector<16x128xi32>
    %73 = arith.addi %17, %72 : vector<16x128xi32>
    %c0_i32_24 = arith.constant 0 : i32
    %74 = vector.broadcast %c0_i32_24 : i32 to vector<16x128xi32>
    %75 = arith.cmpi sge, %73, %74 : vector<16x128xi32>
    %c1_i32_25 = arith.constant 1 : i32
    %76 = vector.broadcast %c1_i32_25 : i32 to vector<16x128xi32>
    %77 = arith.addi %17, %76 : vector<16x128xi32>
    %c128_i32_26 = arith.constant 128 : i32
    %78 = vector.broadcast %c128_i32_26 : i32 to vector<16x128xi32>
    %79 = arith.cmpi slt, %77, %78 : vector<16x128xi32>
    %80 = arith.andi %75, %79 : vector<16x128xi1>
    %c2_i32_27 = arith.constant 2 : i32
    %81 = vector.broadcast %c2_i32_27 : i32 to vector<16x128xi32>
    %82 = arith.addi %17, %81 : vector<16x128xi32>
    %c0_i32_28 = arith.constant 0 : i32
    %83 = vector.broadcast %c0_i32_28 : i32 to vector<16x128xi32>
    %84 = arith.cmpi sge, %82, %83 : vector<16x128xi32>
    %c2_i32_29 = arith.constant 2 : i32
    %85 = vector.broadcast %c2_i32_29 : i32 to vector<16x128xi32>
    %86 = arith.addi %17, %85 : vector<16x128xi32>
    %c128_i32_30 = arith.constant 128 : i32
    %87 = vector.broadcast %c128_i32_30 : i32 to vector<16x128xi32>
    %88 = arith.cmpi slt, %86, %87 : vector<16x128xi32>
    %89 = arith.andi %84, %88 : vector<16x128xi1>
    %90 = tpu.iota {dimensions = array<i32: 0>} : vector<64x128xi32>
    %c16_i32_31 = arith.constant 16 : i32
    %c0_i32_32 = arith.constant 0 : i32
    %91 = arith.cmpi eq, %c16_i32_31, %c0_i32_32 : i32
    %c1_i32_33 = arith.constant 1 : i32
    %92 = arith.select %91, %c1_i32_33, %c16_i32_31 : i32
    %93 = vector.broadcast %92 : i32 to vector<64x128xi32>
    %94 = arith.remsi %90, %93 : vector<64x128xi32>
    %c0_i32_34 = arith.constant 0 : i32
    %95 = vector.broadcast %c0_i32_34 : i32 to vector<64x128xi32>
    %96 = arith.cmpi ne, %94, %95 : vector<64x128xi32>
    %c0_i32_35 = arith.constant 0 : i32
    %97 = vector.broadcast %c0_i32_35 : i32 to vector<64x128xi32>
    %98 = arith.cmpi slt, %94, %97 : vector<64x128xi32>
    %c0_i32_36 = arith.constant 0 : i32
    %99 = arith.cmpi slt, %92, %c0_i32_36 : i32
    %100 = vector.broadcast %99 : i1 to vector<64x128xi1>
    %101 = vector.broadcast %100 : vector<64x128xi1> to vector<64x128xi1>
    %102 = arith.xori %98, %101 : vector<64x128xi1>
    %103 = arith.andi %102, %96 : vector<64x128xi1>
    %104 = vector.broadcast %92 : i32 to vector<64x128xi32>
    %105 = arith.addi %94, %104 : vector<64x128xi32>
    %106 = arith.select %103, %105, %94 : vector<64x128xi1>, vector<64x128xi32>
    %107 = tpu.iota {dimensions = array<i32: 1>} : vector<64x128xi32>
    %c-1_i32_37 = arith.constant -1 : i32
    %108 = vector.broadcast %c-1_i32_37 : i32 to vector<64x128xi32>
    %109 = arith.addi %106, %108 : vector<64x128xi32>
    %c0_i32_38 = arith.constant 0 : i32
    %110 = vector.broadcast %c0_i32_38 : i32 to vector<64x128xi32>
    %111 = arith.cmpi sge, %109, %110 : vector<64x128xi32>
    %c-1_i32_39 = arith.constant -1 : i32
    %112 = vector.broadcast %c-1_i32_39 : i32 to vector<64x128xi32>
    %113 = arith.addi %106, %112 : vector<64x128xi32>
    %c16_i32_40 = arith.constant 16 : i32
    %114 = vector.broadcast %c16_i32_40 : i32 to vector<64x128xi32>
    %115 = arith.cmpi slt, %113, %114 : vector<64x128xi32>
    %116 = arith.andi %111, %115 : vector<64x128xi1>
    %c1_i32_41 = arith.constant 1 : i32
    %117 = vector.broadcast %c1_i32_41 : i32 to vector<64x128xi32>
    %118 = arith.addi %106, %117 : vector<64x128xi32>
    %c0_i32_42 = arith.constant 0 : i32
    %119 = vector.broadcast %c0_i32_42 : i32 to vector<64x128xi32>
    %120 = arith.cmpi sge, %118, %119 : vector<64x128xi32>
    %c1_i32_43 = arith.constant 1 : i32
    %121 = vector.broadcast %c1_i32_43 : i32 to vector<64x128xi32>
    %122 = arith.addi %106, %121 : vector<64x128xi32>
    %c16_i32_44 = arith.constant 16 : i32
    %123 = vector.broadcast %c16_i32_44 : i32 to vector<64x128xi32>
    %124 = arith.cmpi slt, %122, %123 : vector<64x128xi32>
    %125 = arith.andi %120, %124 : vector<64x128xi1>
    %c-1_i32_45 = arith.constant -1 : i32
    %126 = vector.broadcast %c-1_i32_45 : i32 to vector<64x128xi32>
    %127 = arith.addi %107, %126 : vector<64x128xi32>
    %c0_i32_46 = arith.constant 0 : i32
    %128 = vector.broadcast %c0_i32_46 : i32 to vector<64x128xi32>
    %129 = arith.cmpi sge, %127, %128 : vector<64x128xi32>
    %c-1_i32_47 = arith.constant -1 : i32
    %130 = vector.broadcast %c-1_i32_47 : i32 to vector<64x128xi32>
    %131 = arith.addi %107, %130 : vector<64x128xi32>
    %c128_i32_48 = arith.constant 128 : i32
    %132 = vector.broadcast %c128_i32_48 : i32 to vector<64x128xi32>
    %133 = arith.cmpi slt, %131, %132 : vector<64x128xi32>
    %134 = arith.andi %129, %133 : vector<64x128xi1>
    %c1_i32_49 = arith.constant 1 : i32
    %135 = vector.broadcast %c1_i32_49 : i32 to vector<64x128xi32>
    %136 = arith.addi %107, %135 : vector<64x128xi32>
    %c0_i32_50 = arith.constant 0 : i32
    %137 = vector.broadcast %c0_i32_50 : i32 to vector<64x128xi32>
    %138 = arith.cmpi sge, %136, %137 : vector<64x128xi32>
    %c1_i32_51 = arith.constant 1 : i32
    %139 = vector.broadcast %c1_i32_51 : i32 to vector<64x128xi32>
    %140 = arith.addi %107, %139 : vector<64x128xi32>
    %c128_i32_52 = arith.constant 128 : i32
    %141 = vector.broadcast %c128_i32_52 : i32 to vector<64x128xi32>
    %142 = arith.cmpi slt, %140, %141 : vector<64x128xi32>
    %143 = arith.andi %138, %142 : vector<64x128xi1>
    %144 = tpu.iota {dimensions = array<i32: 0>} : vector<112x128xi32>
    %c16_i32_53 = arith.constant 16 : i32
    %c0_i32_54 = arith.constant 0 : i32
    %145 = arith.cmpi eq, %c16_i32_53, %c0_i32_54 : i32
    %c1_i32_55 = arith.constant 1 : i32
    %146 = arith.select %145, %c1_i32_55, %c16_i32_53 : i32
    %147 = vector.broadcast %146 : i32 to vector<112x128xi32>
    %148 = arith.remsi %144, %147 : vector<112x128xi32>
    %c0_i32_56 = arith.constant 0 : i32
    %149 = vector.broadcast %c0_i32_56 : i32 to vector<112x128xi32>
    %150 = arith.cmpi ne, %148, %149 : vector<112x128xi32>
    %c0_i32_57 = arith.constant 0 : i32
    %151 = vector.broadcast %c0_i32_57 : i32 to vector<112x128xi32>
    %152 = arith.cmpi slt, %148, %151 : vector<112x128xi32>
    %c0_i32_58 = arith.constant 0 : i32
    %153 = arith.cmpi slt, %146, %c0_i32_58 : i32
    %154 = vector.broadcast %153 : i1 to vector<112x128xi1>
    %155 = vector.broadcast %154 : vector<112x128xi1> to vector<112x128xi1>
    %156 = arith.xori %152, %155 : vector<112x128xi1>
    %157 = arith.andi %156, %150 : vector<112x128xi1>
    %158 = vector.broadcast %146 : i32 to vector<112x128xi32>
    %159 = arith.addi %148, %158 : vector<112x128xi32>
    %160 = arith.select %157, %159, %148 : vector<112x128xi1>, vector<112x128xi32>
    %161 = tpu.iota {dimensions = array<i32: 1>} : vector<112x128xi32>
    %c-1_i32_59 = arith.constant -1 : i32
    %162 = vector.broadcast %c-1_i32_59 : i32 to vector<112x128xi32>
    %163 = arith.addi %160, %162 : vector<112x128xi32>
    %c0_i32_60 = arith.constant 0 : i32
    %164 = vector.broadcast %c0_i32_60 : i32 to vector<112x128xi32>
    %165 = arith.cmpi sge, %163, %164 : vector<112x128xi32>
    %c-1_i32_61 = arith.constant -1 : i32
    %166 = vector.broadcast %c-1_i32_61 : i32 to vector<112x128xi32>
    %167 = arith.addi %160, %166 : vector<112x128xi32>
    %c16_i32_62 = arith.constant 16 : i32
    %168 = vector.broadcast %c16_i32_62 : i32 to vector<112x128xi32>
    %169 = arith.cmpi slt, %167, %168 : vector<112x128xi32>
    %170 = arith.andi %165, %169 : vector<112x128xi1>
    %c1_i32_63 = arith.constant 1 : i32
    %171 = vector.broadcast %c1_i32_63 : i32 to vector<112x128xi32>
    %172 = arith.addi %160, %171 : vector<112x128xi32>
    %c0_i32_64 = arith.constant 0 : i32
    %173 = vector.broadcast %c0_i32_64 : i32 to vector<112x128xi32>
    %174 = arith.cmpi sge, %172, %173 : vector<112x128xi32>
    %c1_i32_65 = arith.constant 1 : i32
    %175 = vector.broadcast %c1_i32_65 : i32 to vector<112x128xi32>
    %176 = arith.addi %160, %175 : vector<112x128xi32>
    %c16_i32_66 = arith.constant 16 : i32
    %177 = vector.broadcast %c16_i32_66 : i32 to vector<112x128xi32>
    %178 = arith.cmpi slt, %176, %177 : vector<112x128xi32>
    %179 = arith.andi %174, %178 : vector<112x128xi1>
    %c-1_i32_67 = arith.constant -1 : i32
    %180 = vector.broadcast %c-1_i32_67 : i32 to vector<112x128xi32>
    %181 = arith.addi %161, %180 : vector<112x128xi32>
    %c0_i32_68 = arith.constant 0 : i32
    %182 = vector.broadcast %c0_i32_68 : i32 to vector<112x128xi32>
    %183 = arith.cmpi sge, %181, %182 : vector<112x128xi32>
    %c-1_i32_69 = arith.constant -1 : i32
    %184 = vector.broadcast %c-1_i32_69 : i32 to vector<112x128xi32>
    %185 = arith.addi %161, %184 : vector<112x128xi32>
    %c128_i32_70 = arith.constant 128 : i32
    %186 = vector.broadcast %c128_i32_70 : i32 to vector<112x128xi32>
    %187 = arith.cmpi slt, %185, %186 : vector<112x128xi32>
    %188 = arith.andi %183, %187 : vector<112x128xi1>
    %c1_i32_71 = arith.constant 1 : i32
    %189 = vector.broadcast %c1_i32_71 : i32 to vector<112x128xi32>
    %190 = arith.addi %161, %189 : vector<112x128xi32>
    %c0_i32_72 = arith.constant 0 : i32
    %191 = vector.broadcast %c0_i32_72 : i32 to vector<112x128xi32>
    %192 = arith.cmpi sge, %190, %191 : vector<112x128xi32>
    %c1_i32_73 = arith.constant 1 : i32
    %193 = vector.broadcast %c1_i32_73 : i32 to vector<112x128xi32>
    %194 = arith.addi %161, %193 : vector<112x128xi32>
    %c128_i32_74 = arith.constant 128 : i32
    %195 = vector.broadcast %c128_i32_74 : i32 to vector<112x128xi32>
    %196 = arith.cmpi slt, %194, %195 : vector<112x128xi32>
    %197 = arith.andi %192, %196 : vector<112x128xi1>
    %c0 = arith.constant 0 : index
    %c0_75 = arith.constant 0 : index
    %c0_76 = arith.constant 0 : index
    %198 = vector.load %arg17[%c0, %c0_75, %c0_76] : memref<1x16x128xf32, #tpu.memory_space<vmem>>, vector<1x16x128xf32>
    %199 = vector.shape_cast %198 : vector<1x16x128xf32> to vector<16x128xf32>
    %c0_77 = arith.constant 0 : index
    %200 = memref.load %arg2[%c0_77] : memref<4xf32, #tpu.memory_space<smem>>
    %c0_78 = arith.constant 0 : index
    %201 = memref.load %arg1[%c0_78] : memref<4xf32, #tpu.memory_space<smem>>
    %202 = vector.broadcast %201 : f32 to vector<16x128xf32>
    %203 = arith.mulf %202, %199 : vector<16x128xf32>
    %204 = vector.broadcast %200 : f32 to vector<16x128xf32>
    %205 = arith.addf %203, %204 : vector<16x128xf32>
    %c1 = arith.constant 1 : index
    %206 = memref.load %arg2[%c1] : memref<4xf32, #tpu.memory_space<smem>>
    %c1_79 = arith.constant 1 : index
    %207 = memref.load %arg1[%c1_79] : memref<4xf32, #tpu.memory_space<smem>>
    %208 = vector.broadcast %207 : f32 to vector<16x128xf32>
    %209 = arith.mulf %208, %199 : vector<16x128xf32>
    %210 = vector.broadcast %206 : f32 to vector<16x128xf32>
    %211 = arith.addf %209, %210 : vector<16x128xf32>
    %c0_80 = arith.constant 0 : index
    %212 = memref.load %arg5[%c0_80] : memref<2xf32, #tpu.memory_space<smem>>
    %c1_i32_81 = arith.constant 1 : i32
    %213 = tpu.dynamic_rotate %211 by %c1_i32_81 dim 1 : vector<16x128xf32>, i32 -> vector<16x128xf32>
    %cst = arith.constant 0.000000e+00 : f32
    %214 = vector.broadcast %cst : f32 to vector<16x128xf32>
    %215 = arith.select %71, %213, %214 : vector<16x128xi1>, vector<16x128xf32>
    %c127_i32 = arith.constant 127 : i32
    %216 = tpu.dynamic_rotate %211 by %c127_i32 dim 1 : vector<16x128xf32>, i32 -> vector<16x128xf32>
    %cst_82 = arith.constant 0.000000e+00 : f32
    %217 = vector.broadcast %cst_82 : f32 to vector<16x128xf32>
    %218 = arith.select %80, %216, %217 : vector<16x128xi1>, vector<16x128xf32>
    %c0_83 = arith.constant 0 : index
    %219 = memref.load %arg3[%c0_83] : memref<9xf32, #tpu.memory_space<smem>>
    %220 = vector.broadcast %219 : f32 to vector<16x128xf32>
    %221 = arith.mulf %220, %215 : vector<16x128xf32>
    %c1_84 = arith.constant 1 : index
    %222 = memref.load %arg3[%c1_84] : memref<9xf32, #tpu.memory_space<smem>>
    %223 = vector.broadcast %222 : f32 to vector<16x128xf32>
    %224 = arith.mulf %223, %211 : vector<16x128xf32>
    %225 = arith.addf %221, %224 : vector<16x128xf32>
    %c2 = arith.constant 2 : index
    %226 = memref.load %arg3[%c2] : memref<9xf32, #tpu.memory_space<smem>>
    %227 = vector.broadcast %226 : f32 to vector<16x128xf32>
    %228 = arith.mulf %227, %218 : vector<16x128xf32>
    %229 = arith.addf %225, %228 : vector<16x128xf32>
    %c1_i32_85 = arith.constant 1 : i32
    %230 = tpu.dynamic_rotate %229 by %c1_i32_85 dim 0 : vector<16x128xf32>, i32 -> vector<16x128xf32>
    %cst_86 = arith.constant 0.000000e+00 : f32
    %231 = vector.broadcast %cst_86 : f32 to vector<16x128xf32>
    %232 = arith.select %35, %230, %231 : vector<16x128xi1>, vector<16x128xf32>
    %c3 = arith.constant 3 : index
    %233 = memref.load %arg3[%c3] : memref<9xf32, #tpu.memory_space<smem>>
    %234 = vector.broadcast %233 : f32 to vector<16x128xf32>
    %235 = arith.mulf %234, %215 : vector<16x128xf32>
    %c4 = arith.constant 4 : index
    %236 = memref.load %arg3[%c4] : memref<9xf32, #tpu.memory_space<smem>>
    %237 = vector.broadcast %236 : f32 to vector<16x128xf32>
    %238 = arith.mulf %237, %211 : vector<16x128xf32>
    %239 = arith.addf %235, %238 : vector<16x128xf32>
    %c5 = arith.constant 5 : index
    %240 = memref.load %arg3[%c5] : memref<9xf32, #tpu.memory_space<smem>>
    %241 = vector.broadcast %240 : f32 to vector<16x128xf32>
    %242 = arith.mulf %241, %218 : vector<16x128xf32>
    %243 = arith.addf %239, %242 : vector<16x128xf32>
    %244 = arith.addf %232, %243 : vector<16x128xf32>
    %c6 = arith.constant 6 : index
    %245 = memref.load %arg3[%c6] : memref<9xf32, #tpu.memory_space<smem>>
    %246 = vector.broadcast %245 : f32 to vector<16x128xf32>
    %247 = arith.mulf %246, %215 : vector<16x128xf32>
    %c7 = arith.constant 7 : index
    %248 = memref.load %arg3[%c7] : memref<9xf32, #tpu.memory_space<smem>>
    %249 = vector.broadcast %248 : f32 to vector<16x128xf32>
    %250 = arith.mulf %249, %211 : vector<16x128xf32>
    %251 = arith.addf %247, %250 : vector<16x128xf32>
    %c8 = arith.constant 8 : index
    %252 = memref.load %arg3[%c8] : memref<9xf32, #tpu.memory_space<smem>>
    %253 = vector.broadcast %252 : f32 to vector<16x128xf32>
    %254 = arith.mulf %253, %218 : vector<16x128xf32>
    %255 = arith.addf %251, %254 : vector<16x128xf32>
    %c15_i32 = arith.constant 15 : i32
    %256 = tpu.dynamic_rotate %255 by %c15_i32 dim 0 : vector<16x128xf32>, i32 -> vector<16x128xf32>
    %cst_87 = arith.constant 0.000000e+00 : f32
    %257 = vector.broadcast %cst_87 : f32 to vector<16x128xf32>
    %258 = arith.select %44, %256, %257 : vector<16x128xi1>, vector<16x128xf32>
    %259 = arith.addf %244, %258 : vector<16x128xf32>
    %260 = vector.broadcast %212 : f32 to vector<16x128xf32>
    %261 = arith.addf %259, %260 : vector<16x128xf32>
    %c2_88 = arith.constant 2 : index
    %262 = memref.load %arg2[%c2_88] : memref<4xf32, #tpu.memory_space<smem>>
    %c2_89 = arith.constant 2 : index
    %263 = memref.load %arg1[%c2_89] : memref<4xf32, #tpu.memory_space<smem>>
    %264 = vector.broadcast %263 : f32 to vector<16x128xf32>
    %265 = arith.mulf %264, %199 : vector<16x128xf32>
    %266 = vector.broadcast %262 : f32 to vector<16x128xf32>
    %267 = arith.addf %265, %266 : vector<16x128xf32>
    %c1_90 = arith.constant 1 : index
    %268 = memref.load %arg5[%c1_90] : memref<2xf32, #tpu.memory_space<smem>>
    %c2_i32_91 = arith.constant 2 : i32
    %269 = tpu.dynamic_rotate %267 by %c2_i32_91 dim 1 : vector<16x128xf32>, i32 -> vector<16x128xf32>
    %cst_92 = arith.constant 0.000000e+00 : f32
    %270 = vector.broadcast %cst_92 : f32 to vector<16x128xf32>
    %271 = arith.select %62, %269, %270 : vector<16x128xi1>, vector<16x128xf32>
    %c1_i32_93 = arith.constant 1 : i32
    %272 = tpu.dynamic_rotate %267 by %c1_i32_93 dim 1 : vector<16x128xf32>, i32 -> vector<16x128xf32>
    %cst_94 = arith.constant 0.000000e+00 : f32
    %273 = vector.broadcast %cst_94 : f32 to vector<16x128xf32>
    %274 = arith.select %71, %272, %273 : vector<16x128xi1>, vector<16x128xf32>
    %c127_i32_95 = arith.constant 127 : i32
    %275 = tpu.dynamic_rotate %267 by %c127_i32_95 dim 1 : vector<16x128xf32>, i32 -> vector<16x128xf32>
    %cst_96 = arith.constant 0.000000e+00 : f32
    %276 = vector.broadcast %cst_96 : f32 to vector<16x128xf32>
    %277 = arith.select %80, %275, %276 : vector<16x128xi1>, vector<16x128xf32>
    %c126_i32 = arith.constant 126 : i32
    %278 = tpu.dynamic_rotate %267 by %c126_i32 dim 1 : vector<16x128xf32>, i32 -> vector<16x128xf32>
    %cst_97 = arith.constant 0.000000e+00 : f32
    %279 = vector.broadcast %cst_97 : f32 to vector<16x128xf32>
    %280 = arith.select %89, %278, %279 : vector<16x128xi1>, vector<16x128xf32>
    %c0_98 = arith.constant 0 : index
    %281 = memref.load %arg4[%c0_98] : memref<25xf32, #tpu.memory_space<smem>>
    %282 = vector.broadcast %281 : f32 to vector<16x128xf32>
    %283 = arith.mulf %282, %271 : vector<16x128xf32>
    %c1_99 = arith.constant 1 : index
    %284 = memref.load %arg4[%c1_99] : memref<25xf32, #tpu.memory_space<smem>>
    %285 = vector.broadcast %284 : f32 to vector<16x128xf32>
    %286 = arith.mulf %285, %274 : vector<16x128xf32>
    %287 = arith.addf %283, %286 : vector<16x128xf32>
    %c2_100 = arith.constant 2 : index
    %288 = memref.load %arg4[%c2_100] : memref<25xf32, #tpu.memory_space<smem>>
    %289 = vector.broadcast %288 : f32 to vector<16x128xf32>
    %290 = arith.mulf %289, %267 : vector<16x128xf32>
    %291 = arith.addf %287, %290 : vector<16x128xf32>
    %c3_101 = arith.constant 3 : index
    %292 = memref.load %arg4[%c3_101] : memref<25xf32, #tpu.memory_space<smem>>
    %293 = vector.broadcast %292 : f32 to vector<16x128xf32>
    %294 = arith.mulf %293, %277 : vector<16x128xf32>
    %295 = arith.addf %291, %294 : vector<16x128xf32>
    %c4_102 = arith.constant 4 : index
    %296 = memref.load %arg4[%c4_102] : memref<25xf32, #tpu.memory_space<smem>>
    %297 = vector.broadcast %296 : f32 to vector<16x128xf32>
    %298 = arith.mulf %297, %280 : vector<16x128xf32>
    %299 = arith.addf %295, %298 : vector<16x128xf32>
    %c2_i32_103 = arith.constant 2 : i32
    %300 = tpu.dynamic_rotate %299 by %c2_i32_103 dim 0 : vector<16x128xf32>, i32 -> vector<16x128xf32>
    %cst_104 = arith.constant 0.000000e+00 : f32
    %301 = vector.broadcast %cst_104 : f32 to vector<16x128xf32>
    %302 = arith.select %26, %300, %301 : vector<16x128xi1>, vector<16x128xf32>
    %c5_105 = arith.constant 5 : index
    %303 = memref.load %arg4[%c5_105] : memref<25xf32, #tpu.memory_space<smem>>
    %304 = vector.broadcast %303 : f32 to vector<16x128xf32>
    %305 = arith.mulf %304, %271 : vector<16x128xf32>
    %c6_106 = arith.constant 6 : index
    %306 = memref.load %arg4[%c6_106] : memref<25xf32, #tpu.memory_space<smem>>
    %307 = vector.broadcast %306 : f32 to vector<16x128xf32>
    %308 = arith.mulf %307, %274 : vector<16x128xf32>
    %309 = arith.addf %305, %308 : vector<16x128xf32>
    %c7_107 = arith.constant 7 : index
    %310 = memref.load %arg4[%c7_107] : memref<25xf32, #tpu.memory_space<smem>>
    %311 = vector.broadcast %310 : f32 to vector<16x128xf32>
    %312 = arith.mulf %311, %267 : vector<16x128xf32>
    %313 = arith.addf %309, %312 : vector<16x128xf32>
    %c8_108 = arith.constant 8 : index
    %314 = memref.load %arg4[%c8_108] : memref<25xf32, #tpu.memory_space<smem>>
    %315 = vector.broadcast %314 : f32 to vector<16x128xf32>
    %316 = arith.mulf %315, %277 : vector<16x128xf32>
    %317 = arith.addf %313, %316 : vector<16x128xf32>
    %c9 = arith.constant 9 : index
    %318 = memref.load %arg4[%c9] : memref<25xf32, #tpu.memory_space<smem>>
    %319 = vector.broadcast %318 : f32 to vector<16x128xf32>
    %320 = arith.mulf %319, %280 : vector<16x128xf32>
    %321 = arith.addf %317, %320 : vector<16x128xf32>
    %c1_i32_109 = arith.constant 1 : i32
    %322 = tpu.dynamic_rotate %321 by %c1_i32_109 dim 0 : vector<16x128xf32>, i32 -> vector<16x128xf32>
    %cst_110 = arith.constant 0.000000e+00 : f32
    %323 = vector.broadcast %cst_110 : f32 to vector<16x128xf32>
    %324 = arith.select %35, %322, %323 : vector<16x128xi1>, vector<16x128xf32>
    %325 = arith.addf %302, %324 : vector<16x128xf32>
    %c10 = arith.constant 10 : index
    %326 = memref.load %arg4[%c10] : memref<25xf32, #tpu.memory_space<smem>>
    %327 = vector.broadcast %326 : f32 to vector<16x128xf32>
    %328 = arith.mulf %327, %271 : vector<16x128xf32>
    %c11 = arith.constant 11 : index
    %329 = memref.load %arg4[%c11] : memref<25xf32, #tpu.memory_space<smem>>
    %330 = vector.broadcast %329 : f32 to vector<16x128xf32>
    %331 = arith.mulf %330, %274 : vector<16x128xf32>
    %332 = arith.addf %328, %331 : vector<16x128xf32>
    %c12 = arith.constant 12 : index
    %333 = memref.load %arg4[%c12] : memref<25xf32, #tpu.memory_space<smem>>
    %334 = vector.broadcast %333 : f32 to vector<16x128xf32>
    %335 = arith.mulf %334, %267 : vector<16x128xf32>
    %336 = arith.addf %332, %335 : vector<16x128xf32>
    %c13 = arith.constant 13 : index
    %337 = memref.load %arg4[%c13] : memref<25xf32, #tpu.memory_space<smem>>
    %338 = vector.broadcast %337 : f32 to vector<16x128xf32>
    %339 = arith.mulf %338, %277 : vector<16x128xf32>
    %340 = arith.addf %336, %339 : vector<16x128xf32>
    %c14 = arith.constant 14 : index
    %341 = memref.load %arg4[%c14] : memref<25xf32, #tpu.memory_space<smem>>
    %342 = vector.broadcast %341 : f32 to vector<16x128xf32>
    %343 = arith.mulf %342, %280 : vector<16x128xf32>
    %344 = arith.addf %340, %343 : vector<16x128xf32>
    %345 = arith.addf %325, %344 : vector<16x128xf32>
    %c15 = arith.constant 15 : index
    %346 = memref.load %arg4[%c15] : memref<25xf32, #tpu.memory_space<smem>>
    %347 = vector.broadcast %346 : f32 to vector<16x128xf32>
    %348 = arith.mulf %347, %271 : vector<16x128xf32>
    %c16 = arith.constant 16 : index
    %349 = memref.load %arg4[%c16] : memref<25xf32, #tpu.memory_space<smem>>
    %350 = vector.broadcast %349 : f32 to vector<16x128xf32>
    %351 = arith.mulf %350, %274 : vector<16x128xf32>
    %352 = arith.addf %348, %351 : vector<16x128xf32>
    %c17 = arith.constant 17 : index
    %353 = memref.load %arg4[%c17] : memref<25xf32, #tpu.memory_space<smem>>
    %354 = vector.broadcast %353 : f32 to vector<16x128xf32>
    %355 = arith.mulf %354, %267 : vector<16x128xf32>
    %356 = arith.addf %352, %355 : vector<16x128xf32>
    %c18 = arith.constant 18 : index
    %357 = memref.load %arg4[%c18] : memref<25xf32, #tpu.memory_space<smem>>
    %358 = vector.broadcast %357 : f32 to vector<16x128xf32>
    %359 = arith.mulf %358, %277 : vector<16x128xf32>
    %360 = arith.addf %356, %359 : vector<16x128xf32>
    %c19 = arith.constant 19 : index
    %361 = memref.load %arg4[%c19] : memref<25xf32, #tpu.memory_space<smem>>
    %362 = vector.broadcast %361 : f32 to vector<16x128xf32>
    %363 = arith.mulf %362, %280 : vector<16x128xf32>
    %364 = arith.addf %360, %363 : vector<16x128xf32>
    %c15_i32_111 = arith.constant 15 : i32
    %365 = tpu.dynamic_rotate %364 by %c15_i32_111 dim 0 : vector<16x128xf32>, i32 -> vector<16x128xf32>
    %cst_112 = arith.constant 0.000000e+00 : f32
    %366 = vector.broadcast %cst_112 : f32 to vector<16x128xf32>
    %367 = arith.select %44, %365, %366 : vector<16x128xi1>, vector<16x128xf32>
    %368 = arith.addf %345, %367 : vector<16x128xf32>
    %c20 = arith.constant 20 : index
    %369 = memref.load %arg4[%c20] : memref<25xf32, #tpu.memory_space<smem>>
    %370 = vector.broadcast %369 : f32 to vector<16x128xf32>
    %371 = arith.mulf %370, %271 : vector<16x128xf32>
    %c21 = arith.constant 21 : index
    %372 = memref.load %arg4[%c21] : memref<25xf32, #tpu.memory_space<smem>>
    %373 = vector.broadcast %372 : f32 to vector<16x128xf32>
    %374 = arith.mulf %373, %274 : vector<16x128xf32>
    %375 = arith.addf %371, %374 : vector<16x128xf32>
    %c22 = arith.constant 22 : index
    %376 = memref.load %arg4[%c22] : memref<25xf32, #tpu.memory_space<smem>>
    %377 = vector.broadcast %376 : f32 to vector<16x128xf32>
    %378 = arith.mulf %377, %267 : vector<16x128xf32>
    %379 = arith.addf %375, %378 : vector<16x128xf32>
    %c23 = arith.constant 23 : index
    %380 = memref.load %arg4[%c23] : memref<25xf32, #tpu.memory_space<smem>>
    %381 = vector.broadcast %380 : f32 to vector<16x128xf32>
    %382 = arith.mulf %381, %277 : vector<16x128xf32>
    %383 = arith.addf %379, %382 : vector<16x128xf32>
    %c24 = arith.constant 24 : index
    %384 = memref.load %arg4[%c24] : memref<25xf32, #tpu.memory_space<smem>>
    %385 = vector.broadcast %384 : f32 to vector<16x128xf32>
    %386 = arith.mulf %385, %280 : vector<16x128xf32>
    %387 = arith.addf %383, %386 : vector<16x128xf32>
    %c14_i32 = arith.constant 14 : i32
    %388 = tpu.dynamic_rotate %387 by %c14_i32 dim 0 : vector<16x128xf32>, i32 -> vector<16x128xf32>
    %cst_113 = arith.constant 0.000000e+00 : f32
    %389 = vector.broadcast %cst_113 : f32 to vector<16x128xf32>
    %390 = arith.select %53, %388, %389 : vector<16x128xi1>, vector<16x128xf32>
    %391 = arith.addf %368, %390 : vector<16x128xf32>
    %392 = vector.broadcast %268 : f32 to vector<16x128xf32>
    %393 = arith.addf %391, %392 : vector<16x128xf32>
    %394 = tpu.concatenate %205, %261, %393, %199 in 0 : vector<16x128xf32>, vector<16x128xf32>, vector<16x128xf32>, vector<16x128xf32> -> vector<64x128xf32>
    %c1_i32_114 = arith.constant 1 : i32
    %395 = tpu.dynamic_rotate %394 by %c1_i32_114 dim 1 : vector<64x128xf32>, i32 -> vector<64x128xf32>
    %cst_115 = arith.constant 0xFF800000 : f32
    %396 = vector.broadcast %cst_115 : f32 to vector<64x128xf32>
    %397 = arith.select %134, %395, %396 : vector<64x128xi1>, vector<64x128xf32>
    %c127_i32_116 = arith.constant 127 : i32
    %398 = tpu.dynamic_rotate %394 by %c127_i32_116 dim 1 : vector<64x128xf32>, i32 -> vector<64x128xf32>
    %cst_117 = arith.constant 0xFF800000 : f32
    %399 = vector.broadcast %cst_117 : f32 to vector<64x128xf32>
    %400 = arith.select %143, %398, %399 : vector<64x128xi1>, vector<64x128xf32>
    %401 = arith.maximumf %397, %400 : vector<64x128xf32>
    %402 = arith.maximumf %394, %401 : vector<64x128xf32>
    %c1_i32_118 = arith.constant 1 : i32
    %403 = tpu.dynamic_rotate %402 by %c1_i32_118 dim 0 : vector<64x128xf32>, i32 -> vector<64x128xf32>
    %cst_119 = arith.constant 0xFF800000 : f32
    %404 = vector.broadcast %cst_119 : f32 to vector<64x128xf32>
    %405 = arith.select %116, %403, %404 : vector<64x128xi1>, vector<64x128xf32>
    %c63_i32 = arith.constant 63 : i32
    %406 = tpu.dynamic_rotate %402 by %c63_i32 dim 0 : vector<64x128xf32>, i32 -> vector<64x128xf32>
    %cst_120 = arith.constant 0xFF800000 : f32
    %407 = vector.broadcast %cst_120 : f32 to vector<64x128xf32>
    %408 = arith.select %125, %406, %407 : vector<64x128xi1>, vector<64x128xf32>
    %409 = arith.maximumf %405, %408 : vector<64x128xf32>
    %410 = arith.maximumf %402, %409 : vector<64x128xf32>
    %411 = vector.extract_strided_slice %410 {offsets = [48, 0], sizes = [16, 128], strides = [1, 1]} : vector<64x128xf32> to vector<16x128xf32>
    %c3_121 = arith.constant 3 : index
    %412 = memref.load %arg2[%c3_121] : memref<4xf32, #tpu.memory_space<smem>>
    %c3_122 = arith.constant 3 : index
    %413 = memref.load %arg1[%c3_122] : memref<4xf32, #tpu.memory_space<smem>>
    %414 = vector.broadcast %413 : f32 to vector<16x128xf32>
    %415 = arith.mulf %414, %411 : vector<16x128xf32>
    %416 = vector.broadcast %412 : f32 to vector<16x128xf32>
    %417 = arith.addf %415, %416 : vector<16x128xf32>
    %418 = vector.extract_strided_slice %410 {offsets = [0, 0], sizes = [48, 128], strides = [1, 1]} : vector<64x128xf32> to vector<48x128xf32>
    %419 = tpu.concatenate %418, %417 in 0 : vector<48x128xf32>, vector<16x128xf32> -> vector<64x128xf32>
    %c0_123 = arith.constant 0 : index
    %c0_124 = arith.constant 0 : index
    %c0_125 = arith.constant 0 : index
    %420 = vector.load %arg18[%c0_123, %c0_124, %c0_125] : memref<1x64x128xf32, #tpu.memory_space<vmem>>, vector<1x64x128xf32>
    %421 = vector.shape_cast %420 : vector<1x64x128xf32> to vector<64x128xf32>
    %422 = vector.shape_cast %419 : vector<64x128xf32> to vector<1x64x128xf32>
    tpu.vector_store %arg18[%c0_123, %c0_124, %c0_125], %422 {strides = array<i32>} : memref<1x64x128xf32, #tpu.memory_space<vmem>>, vector<1x64x128xf32>,
    %c0_i32_126 = arith.constant 0 : i32
    %c4_i32 = arith.constant 4 : i32
    %423 = arith.addi %c0_i32_126, %c4_i32 : i32
    %c1_i32_127 = arith.constant 1 : i32
    scf.for %arg19 = %c0_i32_126 to %423 step %c1_i32_127  : i32 {
      %c1_i32_129 = arith.constant 1 : i32
      %424 = arith.muli %arg19, %c1_i32_129 : i32
      %c0_i32_130 = arith.constant 0 : i32
      %425 = arith.addi %c0_i32_130, %424 : i32
      %c0_131 = arith.constant 0 : index
      %c0_132 = arith.constant 0 : index
      %c0_133 = arith.constant 0 : index
      %426 = vector.load %arg18[%c0_131, %c0_132, %c0_133] : memref<1x64x128xf32, #tpu.memory_space<vmem>>, vector<1x64x128xf32>
      %427 = vector.shape_cast %426 : vector<1x64x128xf32> to vector<64x128xf32>
      %428 = vector.extract_strided_slice %427 {offsets = [0, 0], sizes = [16, 128], strides = [1, 1]} : vector<64x128xf32> to vector<16x128xf32>
      %429 = vector.extract_strided_slice %427 {offsets = [16, 0], sizes = [16, 128], strides = [1, 1]} : vector<64x128xf32> to vector<16x128xf32>
      %430 = vector.extract_strided_slice %427 {offsets = [32, 0], sizes = [16, 128], strides = [1, 1]} : vector<64x128xf32> to vector<16x128xf32>
      %431 = vector.extract_strided_slice %427 {offsets = [48, 0], sizes = [16, 128], strides = [1, 1]} : vector<64x128xf32> to vector<16x128xf32>
      %c4_i32_134 = arith.constant 4 : i32
      %432 = arith.muli %425, %c4_i32_134 : i32
      %c0_i32_135 = arith.constant 0 : i32
      %433 = arith.addi %432, %c0_i32_135 : i32
      %434 = arith.index_cast %433 : i32 to index
      %435 = memref.load %arg7[%434] : memref<16xf32, #tpu.memory_space<smem>>
      %c16_i32_136 = arith.constant 16 : i32
      %436 = arith.muli %425, %c16_i32_136 : i32
      %c0_i32_137 = arith.constant 0 : i32
      %437 = arith.addi %436, %c0_i32_137 : i32
      %c0_i32_138 = arith.constant 0 : i32
      %438 = arith.addi %437, %c0_i32_138 : i32
      %439 = arith.index_cast %438 : i32 to index
      %440 = memref.load %arg6[%439] : memref<64xf32, #tpu.memory_space<smem>>
      %441 = vector.broadcast %440 : f32 to vector<16x128xf32>
      %442 = arith.mulf %441, %428 : vector<16x128xf32>
      %c16_i32_139 = arith.constant 16 : i32
      %443 = arith.muli %425, %c16_i32_139 : i32
      %c0_i32_140 = arith.constant 0 : i32
      %444 = arith.addi %443, %c0_i32_140 : i32
      %c1_i32_141 = arith.constant 1 : i32
      %445 = arith.addi %444, %c1_i32_141 : i32
      %446 = arith.index_cast %445 : i32 to index
      %447 = memref.load %arg6[%446] : memref<64xf32, #tpu.memory_space<smem>>
      %448 = vector.broadcast %447 : f32 to vector<16x128xf32>
      %449 = arith.mulf %448, %429 : vector<16x128xf32>
      %450 = arith.addf %442, %449 : vector<16x128xf32>
      %c16_i32_142 = arith.constant 16 : i32
      %451 = arith.muli %425, %c16_i32_142 : i32
      %c0_i32_143 = arith.constant 0 : i32
      %452 = arith.addi %451, %c0_i32_143 : i32
      %c2_i32_144 = arith.constant 2 : i32
      %453 = arith.addi %452, %c2_i32_144 : i32
      %454 = arith.index_cast %453 : i32 to index
      %455 = memref.load %arg6[%454] : memref<64xf32, #tpu.memory_space<smem>>
      %456 = vector.broadcast %455 : f32 to vector<16x128xf32>
      %457 = arith.mulf %456, %430 : vector<16x128xf32>
      %458 = arith.addf %450, %457 : vector<16x128xf32>
      %c16_i32_145 = arith.constant 16 : i32
      %459 = arith.muli %425, %c16_i32_145 : i32
      %c0_i32_146 = arith.constant 0 : i32
      %460 = arith.addi %459, %c0_i32_146 : i32
      %c3_i32 = arith.constant 3 : i32
      %461 = arith.addi %460, %c3_i32 : i32
      %462 = arith.index_cast %461 : i32 to index
      %463 = memref.load %arg6[%462] : memref<64xf32, #tpu.memory_space<smem>>
      %464 = vector.broadcast %463 : f32 to vector<16x128xf32>
      %465 = arith.mulf %464, %431 : vector<16x128xf32>
      %466 = arith.addf %458, %465 : vector<16x128xf32>
      %467 = vector.broadcast %435 : f32 to vector<16x128xf32>
      %468 = arith.addf %466, %467 : vector<16x128xf32>
      %c4_i32_147 = arith.constant 4 : i32
      %469 = arith.muli %425, %c4_i32_147 : i32
      %c1_i32_148 = arith.constant 1 : i32
      %470 = arith.addi %469, %c1_i32_148 : i32
      %471 = arith.index_cast %470 : i32 to index
      %472 = memref.load %arg7[%471] : memref<16xf32, #tpu.memory_space<smem>>
      %c16_i32_149 = arith.constant 16 : i32
      %473 = arith.muli %425, %c16_i32_149 : i32
      %c4_i32_150 = arith.constant 4 : i32
      %474 = arith.addi %473, %c4_i32_150 : i32
      %c0_i32_151 = arith.constant 0 : i32
      %475 = arith.addi %474, %c0_i32_151 : i32
      %476 = arith.index_cast %475 : i32 to index
      %477 = memref.load %arg6[%476] : memref<64xf32, #tpu.memory_space<smem>>
      %478 = vector.broadcast %477 : f32 to vector<16x128xf32>
      %479 = arith.mulf %478, %428 : vector<16x128xf32>
      %c16_i32_152 = arith.constant 16 : i32
      %480 = arith.muli %425, %c16_i32_152 : i32
      %c4_i32_153 = arith.constant 4 : i32
      %481 = arith.addi %480, %c4_i32_153 : i32
      %c1_i32_154 = arith.constant 1 : i32
      %482 = arith.addi %481, %c1_i32_154 : i32
      %483 = arith.index_cast %482 : i32 to index
      %484 = memref.load %arg6[%483] : memref<64xf32, #tpu.memory_space<smem>>
      %485 = vector.broadcast %484 : f32 to vector<16x128xf32>
      %486 = arith.mulf %485, %429 : vector<16x128xf32>
      %487 = arith.addf %479, %486 : vector<16x128xf32>
      %c16_i32_155 = arith.constant 16 : i32
      %488 = arith.muli %425, %c16_i32_155 : i32
      %c4_i32_156 = arith.constant 4 : i32
      %489 = arith.addi %488, %c4_i32_156 : i32
      %c2_i32_157 = arith.constant 2 : i32
      %490 = arith.addi %489, %c2_i32_157 : i32
      %491 = arith.index_cast %490 : i32 to index
      %492 = memref.load %arg6[%491] : memref<64xf32, #tpu.memory_space<smem>>
      %493 = vector.broadcast %492 : f32 to vector<16x128xf32>
      %494 = arith.mulf %493, %430 : vector<16x128xf32>
      %495 = arith.addf %487, %494 : vector<16x128xf32>
      %c16_i32_158 = arith.constant 16 : i32
      %496 = arith.muli %425, %c16_i32_158 : i32
      %c4_i32_159 = arith.constant 4 : i32
      %497 = arith.addi %496, %c4_i32_159 : i32
      %c3_i32_160 = arith.constant 3 : i32
      %498 = arith.addi %497, %c3_i32_160 : i32
      %499 = arith.index_cast %498 : i32 to index
      %500 = memref.load %arg6[%499] : memref<64xf32, #tpu.memory_space<smem>>
      %501 = vector.broadcast %500 : f32 to vector<16x128xf32>
      %502 = arith.mulf %501, %431 : vector<16x128xf32>
      %503 = arith.addf %495, %502 : vector<16x128xf32>
      %504 = vector.broadcast %472 : f32 to vector<16x128xf32>
      %505 = arith.addf %503, %504 : vector<16x128xf32>
      %c2_i32_161 = arith.constant 2 : i32
      %506 = arith.muli %425, %c2_i32_161 : i32
      %c0_i32_162 = arith.constant 0 : i32
      %507 = arith.addi %506, %c0_i32_162 : i32
      %508 = arith.index_cast %507 : i32 to index
      %509 = memref.load %arg10[%508] : memref<8xf32, #tpu.memory_space<smem>>
      %c1_i32_163 = arith.constant 1 : i32
      %510 = tpu.dynamic_rotate %505 by %c1_i32_163 dim 1 : vector<16x128xf32>, i32 -> vector<16x128xf32>
      %cst_164 = arith.constant 0.000000e+00 : f32
      %511 = vector.broadcast %cst_164 : f32 to vector<16x128xf32>
      %512 = arith.select %71, %510, %511 : vector<16x128xi1>, vector<16x128xf32>
      %c127_i32_165 = arith.constant 127 : i32
      %513 = tpu.dynamic_rotate %505 by %c127_i32_165 dim 1 : vector<16x128xf32>, i32 -> vector<16x128xf32>
      %cst_166 = arith.constant 0.000000e+00 : f32
      %514 = vector.broadcast %cst_166 : f32 to vector<16x128xf32>
      %515 = arith.select %80, %513, %514 : vector<16x128xi1>, vector<16x128xf32>
      %c9_i32 = arith.constant 9 : i32
      %516 = arith.muli %425, %c9_i32 : i32
      %c0_i32_167 = arith.constant 0 : i32
      %517 = arith.addi %516, %c0_i32_167 : i32
      %c0_i32_168 = arith.constant 0 : i32
      %518 = arith.addi %517, %c0_i32_168 : i32
      %519 = arith.index_cast %518 : i32 to index
      %520 = memref.load %arg8[%519] : memref<36xf32, #tpu.memory_space<smem>>
      %521 = vector.broadcast %520 : f32 to vector<16x128xf32>
      %522 = arith.mulf %521, %512 : vector<16x128xf32>
      %c9_i32_169 = arith.constant 9 : i32
      %523 = arith.muli %425, %c9_i32_169 : i32
      %c0_i32_170 = arith.constant 0 : i32
      %524 = arith.addi %523, %c0_i32_170 : i32
      %c1_i32_171 = arith.constant 1 : i32
      %525 = arith.addi %524, %c1_i32_171 : i32
      %526 = arith.index_cast %525 : i32 to index
      %527 = memref.load %arg8[%526] : memref<36xf32, #tpu.memory_space<smem>>
      %528 = vector.broadcast %527 : f32 to vector<16x128xf32>
      %529 = arith.mulf %528, %505 : vector<16x128xf32>
      %530 = arith.addf %522, %529 : vector<16x128xf32>
      %c9_i32_172 = arith.constant 9 : i32
      %531 = arith.muli %425, %c9_i32_172 : i32
      %c0_i32_173 = arith.constant 0 : i32
      %532 = arith.addi %531, %c0_i32_173 : i32
      %c2_i32_174 = arith.constant 2 : i32
      %533 = arith.addi %532, %c2_i32_174 : i32
      %534 = arith.index_cast %533 : i32 to index
      %535 = memref.load %arg8[%534] : memref<36xf32, #tpu.memory_space<smem>>
      %536 = vector.broadcast %535 : f32 to vector<16x128xf32>
      %537 = arith.mulf %536, %515 : vector<16x128xf32>
      %538 = arith.addf %530, %537 : vector<16x128xf32>
      %c1_i32_175 = arith.constant 1 : i32
      %539 = tpu.dynamic_rotate %538 by %c1_i32_175 dim 0 : vector<16x128xf32>, i32 -> vector<16x128xf32>
      %cst_176 = arith.constant 0.000000e+00 : f32
      %540 = vector.broadcast %cst_176 : f32 to vector<16x128xf32>
      %541 = arith.select %35, %539, %540 : vector<16x128xi1>, vector<16x128xf32>
      %c9_i32_177 = arith.constant 9 : i32
      %542 = arith.muli %425, %c9_i32_177 : i32
      %c3_i32_178 = arith.constant 3 : i32
      %543 = arith.addi %542, %c3_i32_178 : i32
      %c0_i32_179 = arith.constant 0 : i32
      %544 = arith.addi %543, %c0_i32_179 : i32
      %545 = arith.index_cast %544 : i32 to index
      %546 = memref.load %arg8[%545] : memref<36xf32, #tpu.memory_space<smem>>
      %547 = vector.broadcast %546 : f32 to vector<16x128xf32>
      %548 = arith.mulf %547, %512 : vector<16x128xf32>
      %c9_i32_180 = arith.constant 9 : i32
      %549 = arith.muli %425, %c9_i32_180 : i32
      %c3_i32_181 = arith.constant 3 : i32
      %550 = arith.addi %549, %c3_i32_181 : i32
      %c1_i32_182 = arith.constant 1 : i32
      %551 = arith.addi %550, %c1_i32_182 : i32
      %552 = arith.index_cast %551 : i32 to index
      %553 = memref.load %arg8[%552] : memref<36xf32, #tpu.memory_space<smem>>
      %554 = vector.broadcast %553 : f32 to vector<16x128xf32>
      %555 = arith.mulf %554, %505 : vector<16x128xf32>
      %556 = arith.addf %548, %555 : vector<16x128xf32>
      %c9_i32_183 = arith.constant 9 : i32
      %557 = arith.muli %425, %c9_i32_183 : i32
      %c3_i32_184 = arith.constant 3 : i32
      %558 = arith.addi %557, %c3_i32_184 : i32
      %c2_i32_185 = arith.constant 2 : i32
      %559 = arith.addi %558, %c2_i32_185 : i32
      %560 = arith.index_cast %559 : i32 to index
      %561 = memref.load %arg8[%560] : memref<36xf32, #tpu.memory_space<smem>>
      %562 = vector.broadcast %561 : f32 to vector<16x128xf32>
      %563 = arith.mulf %562, %515 : vector<16x128xf32>
      %564 = arith.addf %556, %563 : vector<16x128xf32>
      %565 = arith.addf %541, %564 : vector<16x128xf32>
      %c9_i32_186 = arith.constant 9 : i32
      %566 = arith.muli %425, %c9_i32_186 : i32
      %c6_i32 = arith.constant 6 : i32
      %567 = arith.addi %566, %c6_i32 : i32
      %c0_i32_187 = arith.constant 0 : i32
      %568 = arith.addi %567, %c0_i32_187 : i32
      %569 = arith.index_cast %568 : i32 to index
      %570 = memref.load %arg8[%569] : memref<36xf32, #tpu.memory_space<smem>>
      %571 = vector.broadcast %570 : f32 to vector<16x128xf32>
      %572 = arith.mulf %571, %512 : vector<16x128xf32>
      %c9_i32_188 = arith.constant 9 : i32
      %573 = arith.muli %425, %c9_i32_188 : i32
      %c6_i32_189 = arith.constant 6 : i32
      %574 = arith.addi %573, %c6_i32_189 : i32
      %c1_i32_190 = arith.constant 1 : i32
      %575 = arith.addi %574, %c1_i32_190 : i32
      %576 = arith.index_cast %575 : i32 to index
      %577 = memref.load %arg8[%576] : memref<36xf32, #tpu.memory_space<smem>>
      %578 = vector.broadcast %577 : f32 to vector<16x128xf32>
      %579 = arith.mulf %578, %505 : vector<16x128xf32>
      %580 = arith.addf %572, %579 : vector<16x128xf32>
      %c9_i32_191 = arith.constant 9 : i32
      %581 = arith.muli %425, %c9_i32_191 : i32
      %c6_i32_192 = arith.constant 6 : i32
      %582 = arith.addi %581, %c6_i32_192 : i32
      %c2_i32_193 = arith.constant 2 : i32
      %583 = arith.addi %582, %c2_i32_193 : i32
      %584 = arith.index_cast %583 : i32 to index
      %585 = memref.load %arg8[%584] : memref<36xf32, #tpu.memory_space<smem>>
      %586 = vector.broadcast %585 : f32 to vector<16x128xf32>
      %587 = arith.mulf %586, %515 : vector<16x128xf32>
      %588 = arith.addf %580, %587 : vector<16x128xf32>
      %c15_i32_194 = arith.constant 15 : i32
      %589 = tpu.dynamic_rotate %588 by %c15_i32_194 dim 0 : vector<16x128xf32>, i32 -> vector<16x128xf32>
      %cst_195 = arith.constant 0.000000e+00 : f32
      %590 = vector.broadcast %cst_195 : f32 to vector<16x128xf32>
      %591 = arith.select %44, %589, %590 : vector<16x128xi1>, vector<16x128xf32>
      %592 = arith.addf %565, %591 : vector<16x128xf32>
      %593 = vector.broadcast %509 : f32 to vector<16x128xf32>
      %594 = arith.addf %592, %593 : vector<16x128xf32>
      %c4_i32_196 = arith.constant 4 : i32
      %595 = arith.muli %425, %c4_i32_196 : i32
      %c2_i32_197 = arith.constant 2 : i32
      %596 = arith.addi %595, %c2_i32_197 : i32
      %597 = arith.index_cast %596 : i32 to index
      %598 = memref.load %arg7[%597] : memref<16xf32, #tpu.memory_space<smem>>
      %c16_i32_198 = arith.constant 16 : i32
      %599 = arith.muli %425, %c16_i32_198 : i32
      %c8_i32 = arith.constant 8 : i32
      %600 = arith.addi %599, %c8_i32 : i32
      %c0_i32_199 = arith.constant 0 : i32
      %601 = arith.addi %600, %c0_i32_199 : i32
      %602 = arith.index_cast %601 : i32 to index
      %603 = memref.load %arg6[%602] : memref<64xf32, #tpu.memory_space<smem>>
      %604 = vector.broadcast %603 : f32 to vector<16x128xf32>
      %605 = arith.mulf %604, %428 : vector<16x128xf32>
      %c16_i32_200 = arith.constant 16 : i32
      %606 = arith.muli %425, %c16_i32_200 : i32
      %c8_i32_201 = arith.constant 8 : i32
      %607 = arith.addi %606, %c8_i32_201 : i32
      %c1_i32_202 = arith.constant 1 : i32
      %608 = arith.addi %607, %c1_i32_202 : i32
      %609 = arith.index_cast %608 : i32 to index
      %610 = memref.load %arg6[%609] : memref<64xf32, #tpu.memory_space<smem>>
      %611 = vector.broadcast %610 : f32 to vector<16x128xf32>
      %612 = arith.mulf %611, %429 : vector<16x128xf32>
      %613 = arith.addf %605, %612 : vector<16x128xf32>
      %c16_i32_203 = arith.constant 16 : i32
      %614 = arith.muli %425, %c16_i32_203 : i32
      %c8_i32_204 = arith.constant 8 : i32
      %615 = arith.addi %614, %c8_i32_204 : i32
      %c2_i32_205 = arith.constant 2 : i32
      %616 = arith.addi %615, %c2_i32_205 : i32
      %617 = arith.index_cast %616 : i32 to index
      %618 = memref.load %arg6[%617] : memref<64xf32, #tpu.memory_space<smem>>
      %619 = vector.broadcast %618 : f32 to vector<16x128xf32>
      %620 = arith.mulf %619, %430 : vector<16x128xf32>
      %621 = arith.addf %613, %620 : vector<16x128xf32>
      %c16_i32_206 = arith.constant 16 : i32
      %622 = arith.muli %425, %c16_i32_206 : i32
      %c8_i32_207 = arith.constant 8 : i32
      %623 = arith.addi %622, %c8_i32_207 : i32
      %c3_i32_208 = arith.constant 3 : i32
      %624 = arith.addi %623, %c3_i32_208 : i32
      %625 = arith.index_cast %624 : i32 to index
      %626 = memref.load %arg6[%625] : memref<64xf32, #tpu.memory_space<smem>>
      %627 = vector.broadcast %626 : f32 to vector<16x128xf32>
      %628 = arith.mulf %627, %431 : vector<16x128xf32>
      %629 = arith.addf %621, %628 : vector<16x128xf32>
      %630 = vector.broadcast %598 : f32 to vector<16x128xf32>
      %631 = arith.addf %629, %630 : vector<16x128xf32>
      %c2_i32_209 = arith.constant 2 : i32
      %632 = arith.muli %425, %c2_i32_209 : i32
      %c1_i32_210 = arith.constant 1 : i32
      %633 = arith.addi %632, %c1_i32_210 : i32
      %634 = arith.index_cast %633 : i32 to index
      %635 = memref.load %arg10[%634] : memref<8xf32, #tpu.memory_space<smem>>
      %c2_i32_211 = arith.constant 2 : i32
      %636 = tpu.dynamic_rotate %631 by %c2_i32_211 dim 1 : vector<16x128xf32>, i32 -> vector<16x128xf32>
      %cst_212 = arith.constant 0.000000e+00 : f32
      %637 = vector.broadcast %cst_212 : f32 to vector<16x128xf32>
      %638 = arith.select %62, %636, %637 : vector<16x128xi1>, vector<16x128xf32>
      %c1_i32_213 = arith.constant 1 : i32
      %639 = tpu.dynamic_rotate %631 by %c1_i32_213 dim 1 : vector<16x128xf32>, i32 -> vector<16x128xf32>
      %cst_214 = arith.constant 0.000000e+00 : f32
      %640 = vector.broadcast %cst_214 : f32 to vector<16x128xf32>
      %641 = arith.select %71, %639, %640 : vector<16x128xi1>, vector<16x128xf32>
      %c127_i32_215 = arith.constant 127 : i32
      %642 = tpu.dynamic_rotate %631 by %c127_i32_215 dim 1 : vector<16x128xf32>, i32 -> vector<16x128xf32>
      %cst_216 = arith.constant 0.000000e+00 : f32
      %643 = vector.broadcast %cst_216 : f32 to vector<16x128xf32>
      %644 = arith.select %80, %642, %643 : vector<16x128xi1>, vector<16x128xf32>
      %c126_i32_217 = arith.constant 126 : i32
      %645 = tpu.dynamic_rotate %631 by %c126_i32_217 dim 1 : vector<16x128xf32>, i32 -> vector<16x128xf32>
      %cst_218 = arith.constant 0.000000e+00 : f32
      %646 = vector.broadcast %cst_218 : f32 to vector<16x128xf32>
      %647 = arith.select %89, %645, %646 : vector<16x128xi1>, vector<16x128xf32>
      %c25_i32 = arith.constant 25 : i32
      %648 = arith.muli %425, %c25_i32 : i32
      %c0_i32_219 = arith.constant 0 : i32
      %649 = arith.addi %648, %c0_i32_219 : i32
      %c0_i32_220 = arith.constant 0 : i32
      %650 = arith.addi %649, %c0_i32_220 : i32
      %651 = arith.index_cast %650 : i32 to index
      %652 = memref.load %arg9[%651] : memref<100xf32, #tpu.memory_space<smem>>
      %653 = vector.broadcast %652 : f32 to vector<16x128xf32>
      %654 = arith.mulf %653, %638 : vector<16x128xf32>
      %c25_i32_221 = arith.constant 25 : i32
      %655 = arith.muli %425, %c25_i32_221 : i32
      %c0_i32_222 = arith.constant 0 : i32
      %656 = arith.addi %655, %c0_i32_222 : i32
      %c1_i32_223 = arith.constant 1 : i32
      %657 = arith.addi %656, %c1_i32_223 : i32
      %658 = arith.index_cast %657 : i32 to index
      %659 = memref.load %arg9[%658] : memref<100xf32, #tpu.memory_space<smem>>
      %660 = vector.broadcast %659 : f32 to vector<16x128xf32>
      %661 = arith.mulf %660, %641 : vector<16x128xf32>
      %662 = arith.addf %654, %661 : vector<16x128xf32>
      %c25_i32_224 = arith.constant 25 : i32
      %663 = arith.muli %425, %c25_i32_224 : i32
      %c0_i32_225 = arith.constant 0 : i32
      %664 = arith.addi %663, %c0_i32_225 : i32
      %c2_i32_226 = arith.constant 2 : i32
      %665 = arith.addi %664, %c2_i32_226 : i32
      %666 = arith.index_cast %665 : i32 to index
      %667 = memref.load %arg9[%666] : memref<100xf32, #tpu.memory_space<smem>>
      %668 = vector.broadcast %667 : f32 to vector<16x128xf32>
      %669 = arith.mulf %668, %631 : vector<16x128xf32>
      %670 = arith.addf %662, %669 : vector<16x128xf32>
      %c25_i32_227 = arith.constant 25 : i32
      %671 = arith.muli %425, %c25_i32_227 : i32
      %c0_i32_228 = arith.constant 0 : i32
      %672 = arith.addi %671, %c0_i32_228 : i32
      %c3_i32_229 = arith.constant 3 : i32
      %673 = arith.addi %672, %c3_i32_229 : i32
      %674 = arith.index_cast %673 : i32 to index
      %675 = memref.load %arg9[%674] : memref<100xf32, #tpu.memory_space<smem>>
      %676 = vector.broadcast %675 : f32 to vector<16x128xf32>
      %677 = arith.mulf %676, %644 : vector<16x128xf32>
      %678 = arith.addf %670, %677 : vector<16x128xf32>
      %c25_i32_230 = arith.constant 25 : i32
      %679 = arith.muli %425, %c25_i32_230 : i32
      %c0_i32_231 = arith.constant 0 : i32
      %680 = arith.addi %679, %c0_i32_231 : i32
      %c4_i32_232 = arith.constant 4 : i32
      %681 = arith.addi %680, %c4_i32_232 : i32
      %682 = arith.index_cast %681 : i32 to index
      %683 = memref.load %arg9[%682] : memref<100xf32, #tpu.memory_space<smem>>
      %684 = vector.broadcast %683 : f32 to vector<16x128xf32>
      %685 = arith.mulf %684, %647 : vector<16x128xf32>
      %686 = arith.addf %678, %685 : vector<16x128xf32>
      %c2_i32_233 = arith.constant 2 : i32
      %687 = tpu.dynamic_rotate %686 by %c2_i32_233 dim 0 : vector<16x128xf32>, i32 -> vector<16x128xf32>
      %cst_234 = arith.constant 0.000000e+00 : f32
      %688 = vector.broadcast %cst_234 : f32 to vector<16x128xf32>
      %689 = arith.select %26, %687, %688 : vector<16x128xi1>, vector<16x128xf32>
      %c25_i32_235 = arith.constant 25 : i32
      %690 = arith.muli %425, %c25_i32_235 : i32
      %c5_i32 = arith.constant 5 : i32
      %691 = arith.addi %690, %c5_i32 : i32
      %c0_i32_236 = arith.constant 0 : i32
      %692 = arith.addi %691, %c0_i32_236 : i32
      %693 = arith.index_cast %692 : i32 to index
      %694 = memref.load %arg9[%693] : memref<100xf32, #tpu.memory_space<smem>>
      %695 = vector.broadcast %694 : f32 to vector<16x128xf32>
      %696 = arith.mulf %695, %638 : vector<16x128xf32>
      %c25_i32_237 = arith.constant 25 : i32
      %697 = arith.muli %425, %c25_i32_237 : i32
      %c5_i32_238 = arith.constant 5 : i32
      %698 = arith.addi %697, %c5_i32_238 : i32
      %c1_i32_239 = arith.constant 1 : i32
      %699 = arith.addi %698, %c1_i32_239 : i32
      %700 = arith.index_cast %699 : i32 to index
      %701 = memref.load %arg9[%700] : memref<100xf32, #tpu.memory_space<smem>>
      %702 = vector.broadcast %701 : f32 to vector<16x128xf32>
      %703 = arith.mulf %702, %641 : vector<16x128xf32>
      %704 = arith.addf %696, %703 : vector<16x128xf32>
      %c25_i32_240 = arith.constant 25 : i32
      %705 = arith.muli %425, %c25_i32_240 : i32
      %c5_i32_241 = arith.constant 5 : i32
      %706 = arith.addi %705, %c5_i32_241 : i32
      %c2_i32_242 = arith.constant 2 : i32
      %707 = arith.addi %706, %c2_i32_242 : i32
      %708 = arith.index_cast %707 : i32 to index
      %709 = memref.load %arg9[%708] : memref<100xf32, #tpu.memory_space<smem>>
      %710 = vector.broadcast %709 : f32 to vector<16x128xf32>
      %711 = arith.mulf %710, %631 : vector<16x128xf32>
      %712 = arith.addf %704, %711 : vector<16x128xf32>
      %c25_i32_243 = arith.constant 25 : i32
      %713 = arith.muli %425, %c25_i32_243 : i32
      %c5_i32_244 = arith.constant 5 : i32
      %714 = arith.addi %713, %c5_i32_244 : i32
      %c3_i32_245 = arith.constant 3 : i32
      %715 = arith.addi %714, %c3_i32_245 : i32
      %716 = arith.index_cast %715 : i32 to index
      %717 = memref.load %arg9[%716] : memref<100xf32, #tpu.memory_space<smem>>
      %718 = vector.broadcast %717 : f32 to vector<16x128xf32>
      %719 = arith.mulf %718, %644 : vector<16x128xf32>
      %720 = arith.addf %712, %719 : vector<16x128xf32>
      %c25_i32_246 = arith.constant 25 : i32
      %721 = arith.muli %425, %c25_i32_246 : i32
      %c5_i32_247 = arith.constant 5 : i32
      %722 = arith.addi %721, %c5_i32_247 : i32
      %c4_i32_248 = arith.constant 4 : i32
      %723 = arith.addi %722, %c4_i32_248 : i32
      %724 = arith.index_cast %723 : i32 to index
      %725 = memref.load %arg9[%724] : memref<100xf32, #tpu.memory_space<smem>>
      %726 = vector.broadcast %725 : f32 to vector<16x128xf32>
      %727 = arith.mulf %726, %647 : vector<16x128xf32>
      %728 = arith.addf %720, %727 : vector<16x128xf32>
      %c1_i32_249 = arith.constant 1 : i32
      %729 = tpu.dynamic_rotate %728 by %c1_i32_249 dim 0 : vector<16x128xf32>, i32 -> vector<16x128xf32>
      %cst_250 = arith.constant 0.000000e+00 : f32
      %730 = vector.broadcast %cst_250 : f32 to vector<16x128xf32>
      %731 = arith.select %35, %729, %730 : vector<16x128xi1>, vector<16x128xf32>
      %732 = arith.addf %689, %731 : vector<16x128xf32>
      %c25_i32_251 = arith.constant 25 : i32
      %733 = arith.muli %425, %c25_i32_251 : i32
      %c10_i32 = arith.constant 10 : i32
      %734 = arith.addi %733, %c10_i32 : i32
      %c0_i32_252 = arith.constant 0 : i32
      %735 = arith.addi %734, %c0_i32_252 : i32
      %736 = arith.index_cast %735 : i32 to index
      %737 = memref.load %arg9[%736] : memref<100xf32, #tpu.memory_space<smem>>
      %738 = vector.broadcast %737 : f32 to vector<16x128xf32>
      %739 = arith.mulf %738, %638 : vector<16x128xf32>
      %c25_i32_253 = arith.constant 25 : i32
      %740 = arith.muli %425, %c25_i32_253 : i32
      %c10_i32_254 = arith.constant 10 : i32
      %741 = arith.addi %740, %c10_i32_254 : i32
      %c1_i32_255 = arith.constant 1 : i32
      %742 = arith.addi %741, %c1_i32_255 : i32
      %743 = arith.index_cast %742 : i32 to index
      %744 = memref.load %arg9[%743] : memref<100xf32, #tpu.memory_space<smem>>
      %745 = vector.broadcast %744 : f32 to vector<16x128xf32>
      %746 = arith.mulf %745, %641 : vector<16x128xf32>
      %747 = arith.addf %739, %746 : vector<16x128xf32>
      %c25_i32_256 = arith.constant 25 : i32
      %748 = arith.muli %425, %c25_i32_256 : i32
      %c10_i32_257 = arith.constant 10 : i32
      %749 = arith.addi %748, %c10_i32_257 : i32
      %c2_i32_258 = arith.constant 2 : i32
      %750 = arith.addi %749, %c2_i32_258 : i32
      %751 = arith.index_cast %750 : i32 to index
      %752 = memref.load %arg9[%751] : memref<100xf32, #tpu.memory_space<smem>>
      %753 = vector.broadcast %752 : f32 to vector<16x128xf32>
      %754 = arith.mulf %753, %631 : vector<16x128xf32>
      %755 = arith.addf %747, %754 : vector<16x128xf32>
      %c25_i32_259 = arith.constant 25 : i32
      %756 = arith.muli %425, %c25_i32_259 : i32
      %c10_i32_260 = arith.constant 10 : i32
      %757 = arith.addi %756, %c10_i32_260 : i32
      %c3_i32_261 = arith.constant 3 : i32
      %758 = arith.addi %757, %c3_i32_261 : i32
      %759 = arith.index_cast %758 : i32 to index
      %760 = memref.load %arg9[%759] : memref<100xf32, #tpu.memory_space<smem>>
      %761 = vector.broadcast %760 : f32 to vector<16x128xf32>
      %762 = arith.mulf %761, %644 : vector<16x128xf32>
      %763 = arith.addf %755, %762 : vector<16x128xf32>
      %c25_i32_262 = arith.constant 25 : i32
      %764 = arith.muli %425, %c25_i32_262 : i32
      %c10_i32_263 = arith.constant 10 : i32
      %765 = arith.addi %764, %c10_i32_263 : i32
      %c4_i32_264 = arith.constant 4 : i32
      %766 = arith.addi %765, %c4_i32_264 : i32
      %767 = arith.index_cast %766 : i32 to index
      %768 = memref.load %arg9[%767] : memref<100xf32, #tpu.memory_space<smem>>
      %769 = vector.broadcast %768 : f32 to vector<16x128xf32>
      %770 = arith.mulf %769, %647 : vector<16x128xf32>
      %771 = arith.addf %763, %770 : vector<16x128xf32>
      %772 = arith.addf %732, %771 : vector<16x128xf32>
      %c25_i32_265 = arith.constant 25 : i32
      %773 = arith.muli %425, %c25_i32_265 : i32
      %c15_i32_266 = arith.constant 15 : i32
      %774 = arith.addi %773, %c15_i32_266 : i32
      %c0_i32_267 = arith.constant 0 : i32
      %775 = arith.addi %774, %c0_i32_267 : i32
      %776 = arith.index_cast %775 : i32 to index
      %777 = memref.load %arg9[%776] : memref<100xf32, #tpu.memory_space<smem>>
      %778 = vector.broadcast %777 : f32 to vector<16x128xf32>
      %779 = arith.mulf %778, %638 : vector<16x128xf32>
      %c25_i32_268 = arith.constant 25 : i32
      %780 = arith.muli %425, %c25_i32_268 : i32
      %c15_i32_269 = arith.constant 15 : i32
      %781 = arith.addi %780, %c15_i32_269 : i32
      %c1_i32_270 = arith.constant 1 : i32
      %782 = arith.addi %781, %c1_i32_270 : i32
      %783 = arith.index_cast %782 : i32 to index
      %784 = memref.load %arg9[%783] : memref<100xf32, #tpu.memory_space<smem>>
      %785 = vector.broadcast %784 : f32 to vector<16x128xf32>
      %786 = arith.mulf %785, %641 : vector<16x128xf32>
      %787 = arith.addf %779, %786 : vector<16x128xf32>
      %c25_i32_271 = arith.constant 25 : i32
      %788 = arith.muli %425, %c25_i32_271 : i32
      %c15_i32_272 = arith.constant 15 : i32
      %789 = arith.addi %788, %c15_i32_272 : i32
      %c2_i32_273 = arith.constant 2 : i32
      %790 = arith.addi %789, %c2_i32_273 : i32
      %791 = arith.index_cast %790 : i32 to index
      %792 = memref.load %arg9[%791] : memref<100xf32, #tpu.memory_space<smem>>
      %793 = vector.broadcast %792 : f32 to vector<16x128xf32>
      %794 = arith.mulf %793, %631 : vector<16x128xf32>
      %795 = arith.addf %787, %794 : vector<16x128xf32>
      %c25_i32_274 = arith.constant 25 : i32
      %796 = arith.muli %425, %c25_i32_274 : i32
      %c15_i32_275 = arith.constant 15 : i32
      %797 = arith.addi %796, %c15_i32_275 : i32
      %c3_i32_276 = arith.constant 3 : i32
      %798 = arith.addi %797, %c3_i32_276 : i32
      %799 = arith.index_cast %798 : i32 to index
      %800 = memref.load %arg9[%799] : memref<100xf32, #tpu.memory_space<smem>>
      %801 = vector.broadcast %800 : f32 to vector<16x128xf32>
      %802 = arith.mulf %801, %644 : vector<16x128xf32>
      %803 = arith.addf %795, %802 : vector<16x128xf32>
      %c25_i32_277 = arith.constant 25 : i32
      %804 = arith.muli %425, %c25_i32_277 : i32
      %c15_i32_278 = arith.constant 15 : i32
      %805 = arith.addi %804, %c15_i32_278 : i32
      %c4_i32_279 = arith.constant 4 : i32
      %806 = arith.addi %805, %c4_i32_279 : i32
      %807 = arith.index_cast %806 : i32 to index
      %808 = memref.load %arg9[%807] : memref<100xf32, #tpu.memory_space<smem>>
      %809 = vector.broadcast %808 : f32 to vector<16x128xf32>
      %810 = arith.mulf %809, %647 : vector<16x128xf32>
      %811 = arith.addf %803, %810 : vector<16x128xf32>
      %c15_i32_280 = arith.constant 15 : i32
      %812 = tpu.dynamic_rotate %811 by %c15_i32_280 dim 0 : vector<16x128xf32>, i32 -> vector<16x128xf32>
      %cst_281 = arith.constant 0.000000e+00 : f32
      %813 = vector.broadcast %cst_281 : f32 to vector<16x128xf32>
      %814 = arith.select %44, %812, %813 : vector<16x128xi1>, vector<16x128xf32>
      %815 = arith.addf %772, %814 : vector<16x128xf32>
      %c25_i32_282 = arith.constant 25 : i32
      %816 = arith.muli %425, %c25_i32_282 : i32
      %c20_i32 = arith.constant 20 : i32
      %817 = arith.addi %816, %c20_i32 : i32
      %c0_i32_283 = arith.constant 0 : i32
      %818 = arith.addi %817, %c0_i32_283 : i32
      %819 = arith.index_cast %818 : i32 to index
      %820 = memref.load %arg9[%819] : memref<100xf32, #tpu.memory_space<smem>>
      %821 = vector.broadcast %820 : f32 to vector<16x128xf32>
      %822 = arith.mulf %821, %638 : vector<16x128xf32>
      %c25_i32_284 = arith.constant 25 : i32
      %823 = arith.muli %425, %c25_i32_284 : i32
      %c20_i32_285 = arith.constant 20 : i32
      %824 = arith.addi %823, %c20_i32_285 : i32
      %c1_i32_286 = arith.constant 1 : i32
      %825 = arith.addi %824, %c1_i32_286 : i32
      %826 = arith.index_cast %825 : i32 to index
      %827 = memref.load %arg9[%826] : memref<100xf32, #tpu.memory_space<smem>>
      %828 = vector.broadcast %827 : f32 to vector<16x128xf32>
      %829 = arith.mulf %828, %641 : vector<16x128xf32>
      %830 = arith.addf %822, %829 : vector<16x128xf32>
      %c25_i32_287 = arith.constant 25 : i32
      %831 = arith.muli %425, %c25_i32_287 : i32
      %c20_i32_288 = arith.constant 20 : i32
      %832 = arith.addi %831, %c20_i32_288 : i32
      %c2_i32_289 = arith.constant 2 : i32
      %833 = arith.addi %832, %c2_i32_289 : i32
      %834 = arith.index_cast %833 : i32 to index
      %835 = memref.load %arg9[%834] : memref<100xf32, #tpu.memory_space<smem>>
      %836 = vector.broadcast %835 : f32 to vector<16x128xf32>
      %837 = arith.mulf %836, %631 : vector<16x128xf32>
      %838 = arith.addf %830, %837 : vector<16x128xf32>
      %c25_i32_290 = arith.constant 25 : i32
      %839 = arith.muli %425, %c25_i32_290 : i32
      %c20_i32_291 = arith.constant 20 : i32
      %840 = arith.addi %839, %c20_i32_291 : i32
      %c3_i32_292 = arith.constant 3 : i32
      %841 = arith.addi %840, %c3_i32_292 : i32
      %842 = arith.index_cast %841 : i32 to index
      %843 = memref.load %arg9[%842] : memref<100xf32, #tpu.memory_space<smem>>
      %844 = vector.broadcast %843 : f32 to vector<16x128xf32>
      %845 = arith.mulf %844, %644 : vector<16x128xf32>
      %846 = arith.addf %838, %845 : vector<16x128xf32>
      %c25_i32_293 = arith.constant 25 : i32
      %847 = arith.muli %425, %c25_i32_293 : i32
      %c20_i32_294 = arith.constant 20 : i32
      %848 = arith.addi %847, %c20_i32_294 : i32
      %c4_i32_295 = arith.constant 4 : i32
      %849 = arith.addi %848, %c4_i32_295 : i32
      %850 = arith.index_cast %849 : i32 to index
      %851 = memref.load %arg9[%850] : memref<100xf32, #tpu.memory_space<smem>>
      %852 = vector.broadcast %851 : f32 to vector<16x128xf32>
      %853 = arith.mulf %852, %647 : vector<16x128xf32>
      %854 = arith.addf %846, %853 : vector<16x128xf32>
      %c14_i32_296 = arith.constant 14 : i32
      %855 = tpu.dynamic_rotate %854 by %c14_i32_296 dim 0 : vector<16x128xf32>, i32 -> vector<16x128xf32>
      %cst_297 = arith.constant 0.000000e+00 : f32
      %856 = vector.broadcast %cst_297 : f32 to vector<16x128xf32>
      %857 = arith.select %53, %855, %856 : vector<16x128xi1>, vector<16x128xf32>
      %858 = arith.addf %815, %857 : vector<16x128xf32>
      %859 = vector.broadcast %635 : f32 to vector<16x128xf32>
      %860 = arith.addf %858, %859 : vector<16x128xf32>
      %861 = tpu.concatenate %468, %594, %860, %427 in 0 : vector<16x128xf32>, vector<16x128xf32>, vector<16x128xf32>, vector<64x128xf32> -> vector<112x128xf32>
      %c1_i32_298 = arith.constant 1 : i32
      %862 = tpu.dynamic_rotate %861 by %c1_i32_298 dim 1 : vector<112x128xf32>, i32 -> vector<112x128xf32>
      %cst_299 = arith.constant 0xFF800000 : f32
      %863 = vector.broadcast %cst_299 : f32 to vector<112x128xf32>
      %864 = arith.select %188, %862, %863 : vector<112x128xi1>, vector<112x128xf32>
      %c127_i32_300 = arith.constant 127 : i32
      %865 = tpu.dynamic_rotate %861 by %c127_i32_300 dim 1 : vector<112x128xf32>, i32 -> vector<112x128xf32>
      %cst_301 = arith.constant 0xFF800000 : f32
      %866 = vector.broadcast %cst_301 : f32 to vector<112x128xf32>
      %867 = arith.select %197, %865, %866 : vector<112x128xi1>, vector<112x128xf32>
      %868 = arith.maximumf %864, %867 : vector<112x128xf32>
      %869 = arith.maximumf %861, %868 : vector<112x128xf32>
      %c1_i32_302 = arith.constant 1 : i32
      %870 = tpu.dynamic_rotate %869 by %c1_i32_302 dim 0 : vector<112x128xf32>, i32 -> vector<112x128xf32>
      %cst_303 = arith.constant 0xFF800000 : f32
      %871 = vector.broadcast %cst_303 : f32 to vector<112x128xf32>
      %872 = arith.select %170, %870, %871 : vector<112x128xi1>, vector<112x128xf32>
      %c111_i32 = arith.constant 111 : i32
      %873 = tpu.dynamic_rotate %869 by %c111_i32 dim 0 : vector<112x128xf32>, i32 -> vector<112x128xf32>
      %cst_304 = arith.constant 0xFF800000 : f32
      %874 = vector.broadcast %cst_304 : f32 to vector<112x128xf32>
      %875 = arith.select %179, %873, %874 : vector<112x128xi1>, vector<112x128xf32>
      %876 = arith.maximumf %872, %875 : vector<112x128xf32>
      %877 = arith.maximumf %869, %876 : vector<112x128xf32>
      %878 = vector.extract_strided_slice %877 {offsets = [48, 0], sizes = [16, 128], strides = [1, 1]} : vector<112x128xf32> to vector<16x128xf32>
      %879 = vector.extract_strided_slice %877 {offsets = [64, 0], sizes = [16, 128], strides = [1, 1]} : vector<112x128xf32> to vector<16x128xf32>
      %880 = vector.extract_strided_slice %877 {offsets = [80, 0], sizes = [16, 128], strides = [1, 1]} : vector<112x128xf32> to vector<16x128xf32>
      %881 = vector.extract_strided_slice %877 {offsets = [96, 0], sizes = [16, 128], strides = [1, 1]} : vector<112x128xf32> to vector<16x128xf32>
      %c4_i32_305 = arith.constant 4 : i32
      %882 = arith.muli %425, %c4_i32_305 : i32
      %c3_i32_306 = arith.constant 3 : i32
      %883 = arith.addi %882, %c3_i32_306 : i32
      %884 = arith.index_cast %883 : i32 to index
      %885 = memref.load %arg7[%884] : memref<16xf32, #tpu.memory_space<smem>>
      %c16_i32_307 = arith.constant 16 : i32
      %886 = arith.muli %425, %c16_i32_307 : i32
      %c12_i32 = arith.constant 12 : i32
      %887 = arith.addi %886, %c12_i32 : i32
      %c0_i32_308 = arith.constant 0 : i32
      %888 = arith.addi %887, %c0_i32_308 : i32
      %889 = arith.index_cast %888 : i32 to index
      %890 = memref.load %arg6[%889] : memref<64xf32, #tpu.memory_space<smem>>
      %891 = vector.broadcast %890 : f32 to vector<16x128xf32>
      %892 = arith.mulf %891, %878 : vector<16x128xf32>
      %c16_i32_309 = arith.constant 16 : i32
      %893 = arith.muli %425, %c16_i32_309 : i32
      %c12_i32_310 = arith.constant 12 : i32
      %894 = arith.addi %893, %c12_i32_310 : i32
      %c1_i32_311 = arith.constant 1 : i32
      %895 = arith.addi %894, %c1_i32_311 : i32
      %896 = arith.index_cast %895 : i32 to index
      %897 = memref.load %arg6[%896] : memref<64xf32, #tpu.memory_space<smem>>
      %898 = vector.broadcast %897 : f32 to vector<16x128xf32>
      %899 = arith.mulf %898, %879 : vector<16x128xf32>
      %900 = arith.addf %892, %899 : vector<16x128xf32>
      %c16_i32_312 = arith.constant 16 : i32
      %901 = arith.muli %425, %c16_i32_312 : i32
      %c12_i32_313 = arith.constant 12 : i32
      %902 = arith.addi %901, %c12_i32_313 : i32
      %c2_i32_314 = arith.constant 2 : i32
      %903 = arith.addi %902, %c2_i32_314 : i32
      %904 = arith.index_cast %903 : i32 to index
      %905 = memref.load %arg6[%904] : memref<64xf32, #tpu.memory_space<smem>>
      %906 = vector.broadcast %905 : f32 to vector<16x128xf32>
      %907 = arith.mulf %906, %880 : vector<16x128xf32>
      %908 = arith.addf %900, %907 : vector<16x128xf32>
      %c16_i32_315 = arith.constant 16 : i32
      %909 = arith.muli %425, %c16_i32_315 : i32
      %c12_i32_316 = arith.constant 12 : i32
      %910 = arith.addi %909, %c12_i32_316 : i32
      %c3_i32_317 = arith.constant 3 : i32
      %911 = arith.addi %910, %c3_i32_317 : i32
      %912 = arith.index_cast %911 : i32 to index
      %913 = memref.load %arg6[%912] : memref<64xf32, #tpu.memory_space<smem>>
      %914 = vector.broadcast %913 : f32 to vector<16x128xf32>
      %915 = arith.mulf %914, %881 : vector<16x128xf32>
      %916 = arith.addf %908, %915 : vector<16x128xf32>
      %917 = vector.broadcast %885 : f32 to vector<16x128xf32>
      %918 = arith.addf %916, %917 : vector<16x128xf32>
      %919 = vector.extract_strided_slice %877 {offsets = [0, 0], sizes = [48, 128], strides = [1, 1]} : vector<112x128xf32> to vector<48x128xf32>
      %920 = tpu.concatenate %919, %918 in 0 : vector<48x128xf32>, vector<16x128xf32> -> vector<64x128xf32>
      %921 = arith.index_cast %425 : i32 to index
      %922 = memref.load %arg12[%921] : memref<4xf32, #tpu.memory_space<smem>>
      %923 = arith.index_cast %425 : i32 to index
      %924 = memref.load %arg16[%923] : memref<4xf32, #tpu.memory_space<smem>>
      %925 = vector.extract_strided_slice %920 {offsets = [0, 0], sizes = [16, 128], strides = [1, 1]} : vector<64x128xf32> to vector<16x128xf32>
      %926 = vector.extract_strided_slice %920 {offsets = [16, 0], sizes = [16, 128], strides = [1, 1]} : vector<64x128xf32> to vector<16x128xf32>
      %927 = vector.extract_strided_slice %920 {offsets = [32, 0], sizes = [16, 128], strides = [1, 1]} : vector<64x128xf32> to vector<16x128xf32>
      %928 = vector.extract_strided_slice %920 {offsets = [48, 0], sizes = [16, 128], strides = [1, 1]} : vector<64x128xf32> to vector<16x128xf32>
      %cst_318 = arith.constant dense<0xFF800000> : vector<16xf32>
      %929 = vector.multi_reduction <maximumf>, %925, %cst_318 [1] : vector<16x128xf32> to vector<16xf32>
      %930 = vector.shape_cast %929 : vector<16xf32> to vector<16x1xf32>
      %cst_319 = arith.constant dense<0xFF800000> : vector<1xf32>
      %931 = vector.multi_reduction <maximumf>, %930, %cst_319 [0] : vector<16x1xf32> to vector<1xf32>
      %932 = vector.shape_cast %931 : vector<1xf32> to vector<1x1xf32>
      %cst_320 = arith.constant dense<0xFF800000> : vector<16xf32>
      %933 = vector.multi_reduction <maximumf>, %926, %cst_320 [1] : vector<16x128xf32> to vector<16xf32>
      %934 = vector.shape_cast %933 : vector<16xf32> to vector<16x1xf32>
      %cst_321 = arith.constant dense<0xFF800000> : vector<1xf32>
      %935 = vector.multi_reduction <maximumf>, %934, %cst_321 [0] : vector<16x1xf32> to vector<1xf32>
      %936 = vector.shape_cast %935 : vector<1xf32> to vector<1x1xf32>
      %cst_322 = arith.constant dense<0xFF800000> : vector<16xf32>
      %937 = vector.multi_reduction <maximumf>, %927, %cst_322 [1] : vector<16x128xf32> to vector<16xf32>
      %938 = vector.shape_cast %937 : vector<16xf32> to vector<16x1xf32>
      %cst_323 = arith.constant dense<0xFF800000> : vector<1xf32>
      %939 = vector.multi_reduction <maximumf>, %938, %cst_323 [0] : vector<16x1xf32> to vector<1xf32>
      %940 = vector.shape_cast %939 : vector<1xf32> to vector<1x1xf32>
      %cst_324 = arith.constant dense<0xFF800000> : vector<16xf32>
      %941 = vector.multi_reduction <maximumf>, %928, %cst_324 [1] : vector<16x128xf32> to vector<16xf32>
      %942 = vector.shape_cast %941 : vector<16xf32> to vector<16x1xf32>
      %cst_325 = arith.constant dense<0xFF800000> : vector<1xf32>
      %943 = vector.multi_reduction <maximumf>, %942, %cst_325 [0] : vector<16x1xf32> to vector<1xf32>
      %944 = vector.shape_cast %943 : vector<1xf32> to vector<1x1xf32>
      %cst_326 = arith.constant dense<0.000000e+00> : vector<16xf32>
      %945 = vector.multi_reduction <add>, %925, %cst_326 [1] : vector<16x128xf32> to vector<16xf32>
      %946 = vector.shape_cast %945 : vector<16xf32> to vector<16x1xf32>
      %cst_327 = arith.constant dense<0.000000e+00> : vector<1xf32>
      %947 = vector.multi_reduction <add>, %946, %cst_327 [0] : vector<16x1xf32> to vector<1xf32>
      %948 = vector.shape_cast %947 : vector<1xf32> to vector<1x1xf32>
      %cst_328 = arith.constant 4.8828125E-4 : f32
      %949 = vector.broadcast %cst_328 : f32 to vector<1x1xf32>
      %950 = arith.mulf %948, %949 : vector<1x1xf32>
      %cst_329 = arith.constant dense<0.000000e+00> : vector<16xf32>
      %951 = vector.multi_reduction <add>, %926, %cst_329 [1] : vector<16x128xf32> to vector<16xf32>
      %952 = vector.shape_cast %951 : vector<16xf32> to vector<16x1xf32>
      %cst_330 = arith.constant dense<0.000000e+00> : vector<1xf32>
      %953 = vector.multi_reduction <add>, %952, %cst_330 [0] : vector<16x1xf32> to vector<1xf32>
      %954 = vector.shape_cast %953 : vector<1xf32> to vector<1x1xf32>
      %cst_331 = arith.constant 4.8828125E-4 : f32
      %955 = vector.broadcast %cst_331 : f32 to vector<1x1xf32>
      %956 = arith.mulf %954, %955 : vector<1x1xf32>
      %cst_332 = arith.constant dense<0.000000e+00> : vector<16xf32>
      %957 = vector.multi_reduction <add>, %927, %cst_332 [1] : vector<16x128xf32> to vector<16xf32>
      %958 = vector.shape_cast %957 : vector<16xf32> to vector<16x1xf32>
      %cst_333 = arith.constant dense<0.000000e+00> : vector<1xf32>
      %959 = vector.multi_reduction <add>, %958, %cst_333 [0] : vector<16x1xf32> to vector<1xf32>
      %960 = vector.shape_cast %959 : vector<1xf32> to vector<1x1xf32>
      %cst_334 = arith.constant 4.8828125E-4 : f32
      %961 = vector.broadcast %cst_334 : f32 to vector<1x1xf32>
      %962 = arith.mulf %960, %961 : vector<1x1xf32>
      %cst_335 = arith.constant dense<0.000000e+00> : vector<16xf32>
      %963 = vector.multi_reduction <add>, %928, %cst_335 [1] : vector<16x128xf32> to vector<16xf32>
      %964 = vector.shape_cast %963 : vector<16xf32> to vector<16x1xf32>
      %cst_336 = arith.constant dense<0.000000e+00> : vector<1xf32>
      %965 = vector.multi_reduction <add>, %964, %cst_336 [0] : vector<16x1xf32> to vector<1xf32>
      %966 = vector.shape_cast %965 : vector<1xf32> to vector<1x1xf32>
      %cst_337 = arith.constant 4.8828125E-4 : f32
      %967 = vector.broadcast %cst_337 : f32 to vector<1x1xf32>
      %968 = arith.mulf %966, %967 : vector<1x1xf32>
      %c4_i32_338 = arith.constant 4 : i32
      %969 = arith.muli %425, %c4_i32_338 : i32
      %c0_i32_339 = arith.constant 0 : i32
      %970 = arith.addi %969, %c0_i32_339 : i32
      %971 = arith.index_cast %970 : i32 to index
      %972 = memref.load %arg11[%971] : memref<16xf32, #tpu.memory_space<smem>>
      %973 = vector.broadcast %972 : f32 to vector<1x1xf32>
      %974 = arith.mulf %932, %973 : vector<1x1xf32>
      %c4_i32_340 = arith.constant 4 : i32
      %975 = arith.muli %425, %c4_i32_340 : i32
      %c1_i32_341 = arith.constant 1 : i32
      %976 = arith.addi %975, %c1_i32_341 : i32
      %977 = arith.index_cast %976 : i32 to index
      %978 = memref.load %arg11[%977] : memref<16xf32, #tpu.memory_space<smem>>
      %979 = vector.broadcast %978 : f32 to vector<1x1xf32>
      %980 = arith.mulf %936, %979 : vector<1x1xf32>
      %981 = arith.addf %974, %980 : vector<1x1xf32>
      %c4_i32_342 = arith.constant 4 : i32
      %982 = arith.muli %425, %c4_i32_342 : i32
      %c2_i32_343 = arith.constant 2 : i32
      %983 = arith.addi %982, %c2_i32_343 : i32
      %984 = arith.index_cast %983 : i32 to index
      %985 = memref.load %arg11[%984] : memref<16xf32, #tpu.memory_space<smem>>
      %986 = vector.broadcast %985 : f32 to vector<1x1xf32>
      %987 = arith.mulf %940, %986 : vector<1x1xf32>
      %988 = arith.addf %981, %987 : vector<1x1xf32>
      %c4_i32_344 = arith.constant 4 : i32
      %989 = arith.muli %425, %c4_i32_344 : i32
      %c3_i32_345 = arith.constant 3 : i32
      %990 = arith.addi %989, %c3_i32_345 : i32
      %991 = arith.index_cast %990 : i32 to index
      %992 = memref.load %arg11[%991] : memref<16xf32, #tpu.memory_space<smem>>
      %993 = vector.broadcast %992 : f32 to vector<1x1xf32>
      %994 = arith.mulf %944, %993 : vector<1x1xf32>
      %995 = arith.addf %988, %994 : vector<1x1xf32>
      %996 = vector.broadcast %922 : f32 to vector<1x1xf32>
      %997 = arith.addf %995, %996 : vector<1x1xf32>
      %cst_346 = arith.constant 0.000000e+00 : f32
      %998 = vector.broadcast %cst_346 : f32 to vector<1x1xf32>
      %999 = arith.maximumf %997, %998 : vector<1x1xf32>
      %c4_i32_347 = arith.constant 4 : i32
      %1000 = arith.muli %425, %c4_i32_347 : i32
      %c0_i32_348 = arith.constant 0 : i32
      %1001 = arith.addi %1000, %c0_i32_348 : i32
      %1002 = arith.index_cast %1001 : i32 to index
      %1003 = memref.load %arg13[%1002] : memref<16xf32, #tpu.memory_space<smem>>
      %1004 = vector.broadcast %1003 : f32 to vector<1x1xf32>
      %1005 = arith.mulf %1004, %999 : vector<1x1xf32>
      %c4_i32_349 = arith.constant 4 : i32
      %1006 = arith.muli %425, %c4_i32_349 : i32
      %c0_i32_350 = arith.constant 0 : i32
      %1007 = arith.addi %1006, %c0_i32_350 : i32
      %1008 = arith.index_cast %1007 : i32 to index
      %1009 = memref.load %arg14[%1008] : memref<16xf32, #tpu.memory_space<smem>>
      %1010 = vector.broadcast %1009 : f32 to vector<1x1xf32>
      %1011 = arith.addf %1005, %1010 : vector<1x1xf32>
      %cst_351 = arith.constant 0.000000e+00 : f32
      %1012 = vector.broadcast %cst_351 : f32 to vector<1x1xf32>
      %1013 = arith.maximumf %1011, %1012 : vector<1x1xf32>
      %c4_i32_352 = arith.constant 4 : i32
      %1014 = arith.muli %425, %c4_i32_352 : i32
      %c1_i32_353 = arith.constant 1 : i32
      %1015 = arith.addi %1014, %c1_i32_353 : i32
      %1016 = arith.index_cast %1015 : i32 to index
      %1017 = memref.load %arg13[%1016] : memref<16xf32, #tpu.memory_space<smem>>
      %1018 = vector.broadcast %1017 : f32 to vector<1x1xf32>
      %1019 = arith.mulf %1018, %999 : vector<1x1xf32>
      %c4_i32_354 = arith.constant 4 : i32
      %1020 = arith.muli %425, %c4_i32_354 : i32
      %c1_i32_355 = arith.constant 1 : i32
      %1021 = arith.addi %1020, %c1_i32_355 : i32
      %1022 = arith.index_cast %1021 : i32 to index
      %1023 = memref.load %arg14[%1022] : memref<16xf32, #tpu.memory_space<smem>>
      %1024 = vector.broadcast %1023 : f32 to vector<1x1xf32>
      %1025 = arith.addf %1019, %1024 : vector<1x1xf32>
      %cst_356 = arith.constant 0.000000e+00 : f32
      %1026 = vector.broadcast %cst_356 : f32 to vector<1x1xf32>
      %1027 = arith.maximumf %1025, %1026 : vector<1x1xf32>
      %c4_i32_357 = arith.constant 4 : i32
      %1028 = arith.muli %425, %c4_i32_357 : i32
      %c2_i32_358 = arith.constant 2 : i32
      %1029 = arith.addi %1028, %c2_i32_358 : i32
      %1030 = arith.index_cast %1029 : i32 to index
      %1031 = memref.load %arg13[%1030] : memref<16xf32, #tpu.memory_space<smem>>
      %1032 = vector.broadcast %1031 : f32 to vector<1x1xf32>
      %1033 = arith.mulf %1032, %999 : vector<1x1xf32>
      %c4_i32_359 = arith.constant 4 : i32
      %1034 = arith.muli %425, %c4_i32_359 : i32
      %c2_i32_360 = arith.constant 2 : i32
      %1035 = arith.addi %1034, %c2_i32_360 : i32
      %1036 = arith.index_cast %1035 : i32 to index
      %1037 = memref.load %arg14[%1036] : memref<16xf32, #tpu.memory_space<smem>>
      %1038 = vector.broadcast %1037 : f32 to vector<1x1xf32>
      %1039 = arith.addf %1033, %1038 : vector<1x1xf32>
      %cst_361 = arith.constant 0.000000e+00 : f32
      %1040 = vector.broadcast %cst_361 : f32 to vector<1x1xf32>
      %1041 = arith.maximumf %1039, %1040 : vector<1x1xf32>
      %c4_i32_362 = arith.constant 4 : i32
      %1042 = arith.muli %425, %c4_i32_362 : i32
      %c3_i32_363 = arith.constant 3 : i32
      %1043 = arith.addi %1042, %c3_i32_363 : i32
      %1044 = arith.index_cast %1043 : i32 to index
      %1045 = memref.load %arg13[%1044] : memref<16xf32, #tpu.memory_space<smem>>
      %1046 = vector.broadcast %1045 : f32 to vector<1x1xf32>
      %1047 = arith.mulf %1046, %999 : vector<1x1xf32>
      %c4_i32_364 = arith.constant 4 : i32
      %1048 = arith.muli %425, %c4_i32_364 : i32
      %c3_i32_365 = arith.constant 3 : i32
      %1049 = arith.addi %1048, %c3_i32_365 : i32
      %1050 = arith.index_cast %1049 : i32 to index
      %1051 = memref.load %arg14[%1050] : memref<16xf32, #tpu.memory_space<smem>>
      %1052 = vector.broadcast %1051 : f32 to vector<1x1xf32>
      %1053 = arith.addf %1047, %1052 : vector<1x1xf32>
      %cst_366 = arith.constant 0.000000e+00 : f32
      %1054 = vector.broadcast %cst_366 : f32 to vector<1x1xf32>
      %1055 = arith.maximumf %1053, %1054 : vector<1x1xf32>
      %c4_i32_367 = arith.constant 4 : i32
      %1056 = arith.muli %425, %c4_i32_367 : i32
      %c0_i32_368 = arith.constant 0 : i32
      %1057 = arith.addi %1056, %c0_i32_368 : i32
      %1058 = arith.index_cast %1057 : i32 to index
      %1059 = memref.load %arg11[%1058] : memref<16xf32, #tpu.memory_space<smem>>
      %1060 = vector.broadcast %1059 : f32 to vector<1x1xf32>
      %1061 = arith.mulf %950, %1060 : vector<1x1xf32>
      %c4_i32_369 = arith.constant 4 : i32
      %1062 = arith.muli %425, %c4_i32_369 : i32
      %c1_i32_370 = arith.constant 1 : i32
      %1063 = arith.addi %1062, %c1_i32_370 : i32
      %1064 = arith.index_cast %1063 : i32 to index
      %1065 = memref.load %arg11[%1064] : memref<16xf32, #tpu.memory_space<smem>>
      %1066 = vector.broadcast %1065 : f32 to vector<1x1xf32>
      %1067 = arith.mulf %956, %1066 : vector<1x1xf32>
      %1068 = arith.addf %1061, %1067 : vector<1x1xf32>
      %c4_i32_371 = arith.constant 4 : i32
      %1069 = arith.muli %425, %c4_i32_371 : i32
      %c2_i32_372 = arith.constant 2 : i32
      %1070 = arith.addi %1069, %c2_i32_372 : i32
      %1071 = arith.index_cast %1070 : i32 to index
      %1072 = memref.load %arg11[%1071] : memref<16xf32, #tpu.memory_space<smem>>
      %1073 = vector.broadcast %1072 : f32 to vector<1x1xf32>
      %1074 = arith.mulf %962, %1073 : vector<1x1xf32>
      %1075 = arith.addf %1068, %1074 : vector<1x1xf32>
      %c4_i32_373 = arith.constant 4 : i32
      %1076 = arith.muli %425, %c4_i32_373 : i32
      %c3_i32_374 = arith.constant 3 : i32
      %1077 = arith.addi %1076, %c3_i32_374 : i32
      %1078 = arith.index_cast %1077 : i32 to index
      %1079 = memref.load %arg11[%1078] : memref<16xf32, #tpu.memory_space<smem>>
      %1080 = vector.broadcast %1079 : f32 to vector<1x1xf32>
      %1081 = arith.mulf %968, %1080 : vector<1x1xf32>
      %1082 = arith.addf %1075, %1081 : vector<1x1xf32>
      %1083 = vector.broadcast %922 : f32 to vector<1x1xf32>
      %1084 = arith.addf %1082, %1083 : vector<1x1xf32>
      %cst_375 = arith.constant 0.000000e+00 : f32
      %1085 = vector.broadcast %cst_375 : f32 to vector<1x1xf32>
      %1086 = arith.maximumf %1084, %1085 : vector<1x1xf32>
      %c4_i32_376 = arith.constant 4 : i32
      %1087 = arith.muli %425, %c4_i32_376 : i32
      %c0_i32_377 = arith.constant 0 : i32
      %1088 = arith.addi %1087, %c0_i32_377 : i32
      %1089 = arith.index_cast %1088 : i32 to index
      %1090 = memref.load %arg13[%1089] : memref<16xf32, #tpu.memory_space<smem>>
      %1091 = vector.broadcast %1090 : f32 to vector<1x1xf32>
      %1092 = arith.mulf %1091, %1086 : vector<1x1xf32>
      %c4_i32_378 = arith.constant 4 : i32
      %1093 = arith.muli %425, %c4_i32_378 : i32
      %c0_i32_379 = arith.constant 0 : i32
      %1094 = arith.addi %1093, %c0_i32_379 : i32
      %1095 = arith.index_cast %1094 : i32 to index
      %1096 = memref.load %arg14[%1095] : memref<16xf32, #tpu.memory_space<smem>>
      %1097 = vector.broadcast %1096 : f32 to vector<1x1xf32>
      %1098 = arith.addf %1092, %1097 : vector<1x1xf32>
      %cst_380 = arith.constant 0.000000e+00 : f32
      %1099 = vector.broadcast %cst_380 : f32 to vector<1x1xf32>
      %1100 = arith.maximumf %1098, %1099 : vector<1x1xf32>
      %c4_i32_381 = arith.constant 4 : i32
      %1101 = arith.muli %425, %c4_i32_381 : i32
      %c1_i32_382 = arith.constant 1 : i32
      %1102 = arith.addi %1101, %c1_i32_382 : i32
      %1103 = arith.index_cast %1102 : i32 to index
      %1104 = memref.load %arg13[%1103] : memref<16xf32, #tpu.memory_space<smem>>
      %1105 = vector.broadcast %1104 : f32 to vector<1x1xf32>
      %1106 = arith.mulf %1105, %1086 : vector<1x1xf32>
      %c4_i32_383 = arith.constant 4 : i32
      %1107 = arith.muli %425, %c4_i32_383 : i32
      %c1_i32_384 = arith.constant 1 : i32
      %1108 = arith.addi %1107, %c1_i32_384 : i32
      %1109 = arith.index_cast %1108 : i32 to index
      %1110 = memref.load %arg14[%1109] : memref<16xf32, #tpu.memory_space<smem>>
      %1111 = vector.broadcast %1110 : f32 to vector<1x1xf32>
      %1112 = arith.addf %1106, %1111 : vector<1x1xf32>
      %cst_385 = arith.constant 0.000000e+00 : f32
      %1113 = vector.broadcast %cst_385 : f32 to vector<1x1xf32>
      %1114 = arith.maximumf %1112, %1113 : vector<1x1xf32>
      %c4_i32_386 = arith.constant 4 : i32
      %1115 = arith.muli %425, %c4_i32_386 : i32
      %c2_i32_387 = arith.constant 2 : i32
      %1116 = arith.addi %1115, %c2_i32_387 : i32
      %1117 = arith.index_cast %1116 : i32 to index
      %1118 = memref.load %arg13[%1117] : memref<16xf32, #tpu.memory_space<smem>>
      %1119 = vector.broadcast %1118 : f32 to vector<1x1xf32>
      %1120 = arith.mulf %1119, %1086 : vector<1x1xf32>
      %c4_i32_388 = arith.constant 4 : i32
      %1121 = arith.muli %425, %c4_i32_388 : i32
      %c2_i32_389 = arith.constant 2 : i32
      %1122 = arith.addi %1121, %c2_i32_389 : i32
      %1123 = arith.index_cast %1122 : i32 to index
      %1124 = memref.load %arg14[%1123] : memref<16xf32, #tpu.memory_space<smem>>
      %1125 = vector.broadcast %1124 : f32 to vector<1x1xf32>
      %1126 = arith.addf %1120, %1125 : vector<1x1xf32>
      %cst_390 = arith.constant 0.000000e+00 : f32
      %1127 = vector.broadcast %cst_390 : f32 to vector<1x1xf32>
      %1128 = arith.maximumf %1126, %1127 : vector<1x1xf32>
      %c4_i32_391 = arith.constant 4 : i32
      %1129 = arith.muli %425, %c4_i32_391 : i32
      %c3_i32_392 = arith.constant 3 : i32
      %1130 = arith.addi %1129, %c3_i32_392 : i32
      %1131 = arith.index_cast %1130 : i32 to index
      %1132 = memref.load %arg13[%1131] : memref<16xf32, #tpu.memory_space<smem>>
      %1133 = vector.broadcast %1132 : f32 to vector<1x1xf32>
      %1134 = arith.mulf %1133, %1086 : vector<1x1xf32>
      %c4_i32_393 = arith.constant 4 : i32
      %1135 = arith.muli %425, %c4_i32_393 : i32
      %c3_i32_394 = arith.constant 3 : i32
      %1136 = arith.addi %1135, %c3_i32_394 : i32
      %1137 = arith.index_cast %1136 : i32 to index
      %1138 = memref.load %arg14[%1137] : memref<16xf32, #tpu.memory_space<smem>>
      %1139 = vector.broadcast %1138 : f32 to vector<1x1xf32>
      %1140 = arith.addf %1134, %1139 : vector<1x1xf32>
      %cst_395 = arith.constant 0.000000e+00 : f32
      %1141 = vector.broadcast %cst_395 : f32 to vector<1x1xf32>
      %1142 = arith.maximumf %1140, %1141 : vector<1x1xf32>
      %1143 = arith.addf %1013, %1100 : vector<1x1xf32>
      %cst_396 = arith.constant 0.000000e+00 : f32
      %1144 = vector.broadcast %cst_396 : f32 to vector<1x1xf32>
      %1145 = arith.maximumf %1143, %1144 : vector<1x1xf32>
      %1146 = vector.broadcast %1145 : vector<1x1xf32> to vector<16x128xf32>
      %1147 = arith.mulf %925, %1146 : vector<16x128xf32>
      %1148 = arith.addf %1027, %1114 : vector<1x1xf32>
      %cst_397 = arith.constant 0.000000e+00 : f32
      %1149 = vector.broadcast %cst_397 : f32 to vector<1x1xf32>
      %1150 = arith.maximumf %1148, %1149 : vector<1x1xf32>
      %1151 = vector.broadcast %1150 : vector<1x1xf32> to vector<16x128xf32>
      %1152 = arith.mulf %926, %1151 : vector<16x128xf32>
      %1153 = arith.addf %1041, %1128 : vector<1x1xf32>
      %cst_398 = arith.constant 0.000000e+00 : f32
      %1154 = vector.broadcast %cst_398 : f32 to vector<1x1xf32>
      %1155 = arith.maximumf %1153, %1154 : vector<1x1xf32>
      %1156 = vector.broadcast %1155 : vector<1x1xf32> to vector<16x128xf32>
      %1157 = arith.mulf %927, %1156 : vector<16x128xf32>
      %1158 = arith.addf %1055, %1142 : vector<1x1xf32>
      %cst_399 = arith.constant 0.000000e+00 : f32
      %1159 = vector.broadcast %cst_399 : f32 to vector<1x1xf32>
      %1160 = arith.maximumf %1158, %1159 : vector<1x1xf32>
      %1161 = vector.broadcast %1160 : vector<1x1xf32> to vector<16x128xf32>
      %1162 = arith.mulf %928, %1161 : vector<16x128xf32>
      %1163 = arith.maximumf %1147, %1152 : vector<16x128xf32>
      %1164 = arith.maximumf %1157, %1162 : vector<16x128xf32>
      %1165 = arith.maximumf %1163, %1164 : vector<16x128xf32>
      %1166 = arith.addf %1147, %1152 : vector<16x128xf32>
      %1167 = arith.addf %1157, %1162 : vector<16x128xf32>
      %1168 = arith.addf %1166, %1167 : vector<16x128xf32>
      %c2_i32_400 = arith.constant 2 : i32
      %1169 = arith.muli %425, %c2_i32_400 : i32
      %c0_i32_401 = arith.constant 0 : i32
      %1170 = arith.addi %1169, %c0_i32_401 : i32
      %1171 = arith.index_cast %1170 : i32 to index
      %1172 = memref.load %arg15[%1171] : memref<8xf32, #tpu.memory_space<smem>>
      %1173 = vector.broadcast %1172 : f32 to vector<16x128xf32>
      %1174 = arith.mulf %1173, %1165 : vector<16x128xf32>
      %c2_i32_402 = arith.constant 2 : i32
      %1175 = arith.muli %425, %c2_i32_402 : i32
      %c1_i32_403 = arith.constant 1 : i32
      %1176 = arith.addi %1175, %c1_i32_403 : i32
      %1177 = arith.index_cast %1176 : i32 to index
      %1178 = memref.load %arg15[%1177] : memref<8xf32, #tpu.memory_space<smem>>
      %cst_404 = arith.constant 2.500000e-01 : f32
      %1179 = vector.broadcast %cst_404 : f32 to vector<16x128xf32>
      %1180 = arith.mulf %1168, %1179 : vector<16x128xf32>
      %1181 = vector.broadcast %1178 : f32 to vector<16x128xf32>
      %1182 = arith.mulf %1181, %1180 : vector<16x128xf32>
      %1183 = arith.addf %1174, %1182 : vector<16x128xf32>
      %1184 = vector.broadcast %924 : f32 to vector<16x128xf32>
      %1185 = arith.addf %1183, %1184 : vector<16x128xf32>
      %cst_405 = arith.constant 0.000000e+00 : f32
      %1186 = vector.broadcast %cst_405 : f32 to vector<16x128xf32>
      %1187 = arith.maximumf %1185, %1186 : vector<16x128xf32>
      %1188 = arith.mulf %1147, %1187 : vector<16x128xf32>
      %1189 = arith.mulf %1152, %1187 : vector<16x128xf32>
      %1190 = arith.mulf %1157, %1187 : vector<16x128xf32>
      %1191 = arith.mulf %1162, %1187 : vector<16x128xf32>
      %1192 = tpu.concatenate %1188, %1189, %1190, %1191 in 0 : vector<16x128xf32>, vector<16x128xf32>, vector<16x128xf32>, vector<16x128xf32> -> vector<64x128xf32>
      %c0_406 = arith.constant 0 : index
      %c0_407 = arith.constant 0 : index
      %c0_408 = arith.constant 0 : index
      %1193 = vector.load %arg18[%c0_406, %c0_407, %c0_408] : memref<1x64x128xf32, #tpu.memory_space<vmem>>, vector<1x64x128xf32>
      %1194 = vector.shape_cast %1193 : vector<1x64x128xf32> to vector<64x128xf32>
      %1195 = vector.shape_cast %1192 : vector<64x128xf32> to vector<1x64x128xf32>
      tpu.vector_store %arg18[%c0_406, %c0_407, %c0_408], %1195 {strides = array<i32>} : memref<1x64x128xf32, #tpu.memory_space<vmem>>, vector<1x64x128xf32>,
    }
    %c4_i32_128 = arith.constant 4 : i32
    return
  }
  func.func @transform_0(%arg0: i32) -> i32 {
    %c0_i32 = arith.constant 0 : i32
    %c0_i32_0 = arith.constant 0 : i32
    return %c0_i32 : i32
  }
  func.func @transform_1(%arg0: i32) -> i32 {
    %c0_i32 = arith.constant 0 : i32
    %c0_i32_0 = arith.constant 0 : i32
    return %c0_i32 : i32
  }
  func.func @transform_2(%arg0: i32) -> i32 {
    %c0_i32 = arith.constant 0 : i32
    %c0_i32_0 = arith.constant 0 : i32
    return %c0_i32 : i32
  }
  func.func @transform_3(%arg0: i32) -> i32 {
    %c0_i32 = arith.constant 0 : i32
    %c0_i32_0 = arith.constant 0 : i32
    return %c0_i32 : i32
  }
  func.func @transform_4(%arg0: i32) -> i32 {
    %c0_i32 = arith.constant 0 : i32
    %c0_i32_0 = arith.constant 0 : i32
    return %c0_i32 : i32
  }
  func.func @transform_5(%arg0: i32) -> i32 {
    %c0_i32 = arith.constant 0 : i32
    %c0_i32_0 = arith.constant 0 : i32
    return %c0_i32 : i32
  }
  func.func @transform_6(%arg0: i32) -> i32 {
    %c0_i32 = arith.constant 0 : i32
    %c0_i32_0 = arith.constant 0 : i32
    return %c0_i32 : i32
  }
  func.func @transform_7(%arg0: i32) -> i32 {
    %c0_i32 = arith.constant 0 : i32
    %c0_i32_0 = arith.constant 0 : i32
    return %c0_i32 : i32
  }
  func.func @transform_8(%arg0: i32) -> i32 {
    %c0_i32 = arith.constant 0 : i32
    %c0_i32_0 = arith.constant 0 : i32
    return %c0_i32 : i32
  }
  func.func @transform_9(%arg0: i32) -> i32 {
    %c0_i32 = arith.constant 0 : i32
    %c0_i32_0 = arith.constant 0 : i32
    return %c0_i32 : i32
  }
  func.func @transform_10(%arg0: i32) -> i32 {
    %c0_i32 = arith.constant 0 : i32
    %c0_i32_0 = arith.constant 0 : i32
    return %c0_i32 : i32
  }
  func.func @transform_11(%arg0: i32) -> i32 {
    %c0_i32 = arith.constant 0 : i32
    %c0_i32_0 = arith.constant 0 : i32
    return %c0_i32 : i32
  }
  func.func @transform_12(%arg0: i32) -> i32 {
    %c0_i32 = arith.constant 0 : i32
    %c0_i32_0 = arith.constant 0 : i32
    return %c0_i32 : i32
  }
  func.func @transform_13(%arg0: i32) -> i32 {
    %c0_i32 = arith.constant 0 : i32
    %c0_i32_0 = arith.constant 0 : i32
    return %c0_i32 : i32
  }
  func.func @transform_14(%arg0: i32) -> i32 {
    %c0_i32 = arith.constant 0 : i32
    %c0_i32_0 = arith.constant 0 : i32
    return %c0_i32 : i32
  }
  func.func @transform_15(%arg0: i32) -> i32 {
    %c0_i32 = arith.constant 0 : i32
    %c0_i32_0 = arith.constant 0 : i32
    return %c0_i32 : i32
  }
  func.func @transform_16(%arg0: i32) -> (i32, i32, i32) {
    %c0_i32 = arith.constant 0 : i32
    %c0_i32_0 = arith.constant 0 : i32
    %c0_i32_1 = arith.constant 0 : i32
    return %arg0, %c0_i32, %c0_i32_0 : i32, i32, i32
  }
  func.func @transform_17(%arg0: i32) -> (i32, i32, i32) {
    %c0_i32 = arith.constant 0 : i32
    %c0_i32_0 = arith.constant 0 : i32
    %c0_i32_1 = arith.constant 0 : i32
    return %arg0, %c0_i32, %c0_i32_0 : i32, i32, i32
  }
}

</mosaic_0001>

<bundles_post_ra>
// kernel: forward.2
= control target key start
LH: loop header
LB: loop body
LE: loop exit
PB: predicated region body
PF: predicated region fallthrough
CT: control target
= control target key end

     0   :  { %s5430_s0 = inlined_call_operand.hbm [shape: f32[4], index: 0, kind: input, shape index: {}]   ;;  %s5431_s1 = inlined_call_operand.hbm [shape: f32[4], index: 1, kind: input, shape index: {}]   ;;  %s5432_s2 = inlined_call_operand.vmem [shape: f32[9], index: 2, kind: input, shape index: {}]   ;;  %s5433_s3 = inlined_call_operand.vmem [shape: f32[25], index: 3, kind: input, shape index: {}]   ;;  %s5434_s4 = inlined_call_operand.hbm [shape: f32[2], index: 4, kind: input, shape index: {}]   ;;  %s5435_s5 = inlined_call_operand.vmem [shape: f32[64], index: 5, kind: input, shape index: {}]   ;;  %s5436_s6 = inlined_call_operand.vmem [shape: f32[16], index: 6, kind: input, shape index: {}]   ;;  %s5437_s7 = inlined_call_operand.vmem [shape: f32[36], index: 7, kind: input, shape index: {}]   ;;  %s5438_s8 = inlined_call_operand.vmem [shape: f32[100], index: 8, kind: input, shape index: {}]   ;;  %s5439_s9 = inlined_call_operand.vmem [shape: f32[8], index: 9, kind: input, shape index: {}]   ;;  %s5440_s10 = inlined_call_operand.vmem [shape: f32[16], index: 10, kind: input, shape index: {}]   ;;  %s5441_s11 = inlined_call_operand.vmem [shape: f32[4], index: 11, kind: input, shape index: {}]   ;;  %s5442_s12 = inlined_call_operand.vmem [shape: f32[16], index: 12, kind: input, shape index: {}]   ;;  %s5443_s13 = inlined_call_operand.vmem [shape: f32[16], index: 13, kind: input, shape index: {}]   ;;  %s5444_s14 = inlined_call_operand.vmem [shape: f32[8], index: 14, kind: input, shape index: {}]   ;;  %s5445_s15 = inlined_call_operand.vmem [shape: f32[4], index: 15, kind: input, shape index: {}]   ;;  %s5446_s16 = inlined_call_operand.hbm [shape: f32[2,16,128], index: 16, kind: input, shape index: {}]   ;;  %s5447_s17 = inlined_call_operand.vmem [shape: f32[2,64,128], index: 17, kind: output, shape index: {}]  }
   0x1   :  { %5519 = sst [smem:[#allocation73_spill]] %s5430_s0 }
   0x2   :  { %5520 = sst [smem:[#allocation74_spill]] %s5431_s1 }
   0x3   :  { %5521 = sst [smem:[#allocation75_spill]] %s5432_s2 }
   0x4   :  { %5522 = sst [smem:[#allocation76_spill]] %s5433_s3 }
   0x5   :  { %5523 = sst [smem:[#allocation77_spill]] %s5434_s4 }
   0x6   :  { %5524 = sst [smem:[#allocation78_spill]] %s5435_s5 }
   0x7   :  { %5525 = sst [smem:[#allocation79_spill]] %s5436_s6 }
   0x8   :  { %5526 = sst [smem:[#allocation80_spill]] %s5437_s7 }
   0x9   :  { %5527 = sst [smem:[#allocation81_spill]] %s5438_s8 }
   0xa   :  { %5528 = sst [smem:[#allocation82_spill]] %s5439_s9 }
   0xb   :  { %5529 = sst [smem:[#allocation83_spill]] %s5440_s10 }
   0xc   :  { %5530 = sst [smem:[#allocation84_spill]] %s5441_s11 }
   0xd   :  { %5531 = sst [smem:[#allocation85_spill]] %s5442_s12 }
   0xe   :  { %5532 = sst [smem:[#allocation86_spill]] %s5443_s13 }
   0xf   :  { %5533 = sst [smem:[#allocation87_spill]] %s5444_s14 }
  0x10   :  { %5534 = sst [smem:[#allocation88_spill]] %s5445_s15 }
  0x11   :  { %5535 = sst [smem:[#allocation89_spill]] %s5446_s16 }
  0x12   :  { %5536 = sst [smem:[#allocation90_spill]] %s5447_s17 }
  0x13   :  { %22 = vsyncpa [#allocation4], 0 }
  0x14   :  { %23 = vsyncpa [#allocation7], 0 }
  0x15   :  { %24 = vsyncpa [#allocation5], 0 }
  0x16   :  { %25 = vsyncpa [#allocation10], 0 }
  0x17   :  { %26 = vsyncpa [#allocation14], 0 }
  0x18   :  { %27 = vsyncpa [#allocation17], 0 }
  0x19   :  { %28 = vsyncpa [#allocation20], 0 }
  0x1a   :  { %29 = vsyncpa [#allocation23], 0 }
  0x1b   :  { %30 = vsyncpa [#allocation26], 0 }
  0x1c   :  { %31 = vsyncpa [#allocation3], 0 }
  0x1d   :  { %33 = vsyncpa [#allocation3 + $0x1], 0  ;;  %s3444_s24 = smov 0   ;;  %s3446_s25 = smov 0  }
  0x1e   :  { %s3448_s26 = smov 0   ;;  %s3450_s27 = smov 0  }
  0x1f LB: > { %5537 = sst [smem:[#allocation41_spill]] %s3313_s25  ;;  %s3468_s30 = sadd.s32 4294967295, %s3321_s27   ;;  %s3321_s27 = sphi %s3450_s27, %s5742_s27   ;;  %s3317_s26 = sphi %s3448_s26, %s5745_s26   ;;  %s3313_s25 = sphi %s3446_s25, %s5744_s25   ;;  %s3309_s24 = sphi %s3444_s24, %s5743_s24  }
  0x20   : > { %5538 = sst [smem:[#allocation42_spill]] %s3317_s26  ;;  %p2678_p0 = scmp.ge.s32.totalorder %s3321_s27, 1 }
  0x21   : > { %s5539_s3 = sld [smem:[#allocation76_spill]]  ;;  %p5448_p1 = scmp.eq.s32.totalorder %s3468_s30, 0 }
  0x22   : > { %5540 = sst [smem:[#allocation43_spill]] %s3468_s30  ;;  %p432_p2 = scmp.lt.s32.totalorder %s3321_s27, 3 }
  0x23   : > { %s5542_s6 = sld [smem:[#allocation79_spill]] }
  0x24   : > { %p3473_p3 = pnand %p2678_p0, %p432_p2  ;;  %s5543_s8 = sld [smem:[#allocation81_spill]] }
  0x25   : > { %s5545_s10 = sld [smem:[#allocation83_spill]] }
  0x26   : > { %s5541_s18 = scalar_select %p3473_p3, 1, 0 }
  0x27   : > { %s474_s0 = sshll.u32 %s5539_s3, 4  ;;  %p2831_p4 = pneg %p3473_p3  ;;  %s475_s0 = int_to_ptr.vmem [resolvable:$true] %s474_s0 }
  0x28   : > { %s3327_s3 = smov [#allocation6]   ;;  %s5546_s22 = sld [smem:[#allocation74_spill]] }
  0x29   : > { %s505_s20 = sshll.u32 %s5542_s6, 4  ;;  %p3489_p5 = pnand %p2831_p4, %p5448_p1  ;;  %s3482_s20 = int_to_ptr.vmem [resolvable:$true] %s505_s20 }
  0x2a   : > { %s527_s23 = sshll.u32 %s5543_s8, 4  ;;  %s2994_s8 = scalar_lea.vmem %s475_s0, 16  ;;  %s3493_s23 = int_to_ptr.vmem [resolvable:$true] %s527_s23 }
  0x2b   : > { %s549_s1 = sshll.u32 %s5545_s10, 4  ;;  %p2995_p6 = scmp.ne.s32.totalorder %s475_s0, %s2994_s8  ;;  %s3498_s1 = int_to_ptr.vmem [resolvable:$true] %s549_s1 }
  0x2c   : > { %p3507_p7 = pneg %p3489_p5  ;;  %p3002_p10 = scmp.lt.s32.totalorder %s475_s0, %s475_s0 }
  0x2d   : > { %p3003_p11 = scmp.lt.s32.totalorder %s2994_s8, %s2994_s8 }
  0x2e   : > { %2837 = dma.hbm_to_smem (!%p3489_p5), %s5546_s22, 16, %s3327_s3, [#allocation7]  }
  0x2f   : > { %p2997_p8 = pnand %p3507_p7, %p2995_p6  ;;  %p3004_p12 = por %p3003_p11, %p3002_p10 }
  0x31   : > { %p2998_p9 = pneg %p2997_p8 }
  0x33   : > { %p3005_p13 = pnand %p3004_p12, %p2998_p9 }
  0x35   : > { %3008 = shalt.err (!%p3005_p13)
}
  0x36   : > { %s3328_s29 = smov [#allocation9]   ;;  %s3009_s3 = scalar_lea.vmem %s3482_s20, 16 }
  0x37   : > { %2843 = dma.vmem_to_smem (!%p3489_p5), %s475_s0, 16, %s3328_s29, [#allocation10]  }
  0x38   : > { %p3010_p0 = scmp.ne.s32.totalorder %s3482_s20, %s3009_s3  ;;  %p3017_p6 = scmp.lt.s32.totalorder %s3482_s20, %s3482_s20 }
  0x39   : > { %p3018_p8 = scmp.lt.s32.totalorder %s3009_s3, %s3009_s3 }
  0x3a   : > { %p3012_p2 = pnand %p3010_p0, %p3507_p7 }
  0x3b   : > { %p3019_p1 = por %p3018_p8, %p3017_p6 }
  0x3c   : > { %p3013_p4 = pneg %p3012_p2 }
  0x3e   : > { %p3020_p10 = pnand %p3019_p1, %p3013_p4 }
  0x40   : > { %3023 = shalt.err (!%p3020_p10)
}
  0x41   : > { %s3329_s6 = smov [#allocation13]   ;;  %s3024_s8 = scalar_lea.vmem %s3493_s23, 16 }
  0x42   : > { %2852 = dma.vmem_to_smem (!%p3489_p5), %s3482_s20, 16, %s3329_s6, [#allocation14]  }
  0x43   : > { %p3025_p9 = scmp.ne.s32.totalorder %s3493_s23, %s3024_s8  ;;  %p3032_p13 = scmp.lt.s32.totalorder %s3493_s23, %s3493_s23 }
  0x44   : > { %p3033_p0 = scmp.lt.s32.totalorder %s3024_s8, %s3024_s8 }
  0x45   : > { %p3027_p11 = pnand %p3025_p9, %p3507_p7 }
  0x46   : > { %p3034_p2 = por %p3033_p0, %p3032_p13 }
  0x47   : > { %p3028_p12 = pneg %p3027_p11 }
  0x49   : > { %p3035_p1 = pnand %p3034_p2, %p3028_p12 }
  0x4b   : > { %3038 = shalt.err (!%p3035_p1)
}
  0x4c   : > { %s3330_s0 = smov [#allocation16]   ;;  %s5548_s12 = sld [smem:[#allocation85_spill]] }
  0x4d   : > { %2858 = dma.vmem_to_smem (!%p3489_p5), %s3493_s23, 16, %s3330_s0, [#allocation17]  }
  0x4e   : > { %s3039_s22 = scalar_lea.vmem %s3498_s1, 16  ;;  %p3047_p10 = scmp.lt.s32.totalorder %s3498_s1, %s3498_s1 }
  0x4f   : > { %p3040_p4 = scmp.ne.s32.totalorder %s3498_s1, %s3039_s22  ;;  %p3048_p9 = scmp.lt.s32.totalorder %s3039_s22, %s3039_s22 }
  0x51   : > { %p3042_p6 = pnand %p3040_p4, %p3507_p7  ;;  %p3049_p11 = por %p3048_p9, %p3047_p10 }
  0x52   : > { %s571_s21 = sshll.u32 %s5548_s12, 4  ;;  %s572_s21 = int_to_ptr.vmem [resolvable:$true] %s571_s21 }
  0x53   : > { %p3043_p8 = pneg %p3042_p6 }
  0x55   : > { %p3050_p12 = pnand %p3049_p11, %p3043_p8 }
  0x57   : > { %3053 = shalt.err (!%p3050_p12)
}
  0x58   : > { %s3331_s29 = smov [#allocation19]   ;;  %s3054_s23 = scalar_lea.vmem %s572_s21, 16 }
  0x59   : > { %2864 = dma.vmem_to_smem (!%p3489_p5), %s3498_s1, 16, %s3331_s29, [#allocation20]  }
  0x5a   : > { %p3055_p13 = scmp.ne.s32.totalorder %s572_s21, %s3054_s23  ;;  %p3062_p1 = scmp.lt.s32.totalorder %s572_s21, %s572_s21 }
  0x5b   : > { %p3063_p4 = scmp.lt.s32.totalorder %s3054_s23, %s3054_s23 }
  0x5c   : > { %p3057_p0 = pnand %p3055_p13, %p3507_p7 }
  0x5d   : > { %p3064_p6 = por %p3063_p4, %p3062_p1 }
  0x5e   : > { %p3058_p2 = pneg %p3057_p0 }
  0x60   : > { %p3065_p3 = pnand %p3064_p6, %p3058_p2 }
  0x62   : > { %3068 = shalt.err (!%p3065_p3)
}
  0x63   : > { %s3332_s3 = smov [#allocation22]   ;;  %s5549_s14 = sld [smem:[#allocation87_spill]] }
  0x64   : > { %2870 = dma.vmem_to_smem (!%p3489_p5), %s572_s21, 16, %s3332_s3, [#allocation23]  }
  0x69   : > { %s593_s1 = sshll.u32 %s5549_s14, 4  ;;  %s594_s1 = int_to_ptr.vmem [resolvable:$true] %s593_s1 }
  0x6a   : > { %s3069_s0 = scalar_lea.vmem %s594_s1, 16  ;;  %p3077_p11 = scmp.lt.s32.totalorder %s594_s1, %s594_s1 }
  0x6b   : > { %p3070_p8 = scmp.ne.s32.totalorder %s594_s1, %s3069_s0  ;;  %p3078_p12 = scmp.lt.s32.totalorder %s3069_s0, %s3069_s0 }
  0x6d   : > { %p3072_p10 = pnand %p3070_p8, %p3507_p7  ;;  %p3079_p13 = por %p3078_p12, %p3077_p11 }
  0x6f   : > { %p3073_p9 = pneg %p3072_p10 }
  0x71   : > { %p3080_p0 = pnand %p3079_p13, %p3073_p9 }
  0x73   : > { %3083 = shalt.err (!%p3080_p0)
}
  0x74   : > { %s3333_s20 = smov [#allocation25]   ;;  %s3334_s19 = smov [#allocation2]  }
  0x75   : > { %2876 = dma.vmem_to_smem (!%p3489_p5), %s594_s1, 16, %s3333_s20, [#allocation26]  }
  0x76   : > { %s5550_s29 = sld [smem:[#allocation73_spill]] }
  0x77   : > { %s5551_s2 = sld [smem:[#allocation75_spill]] }
  0x7c   : > { %2834 = dma.hbm_to_smem (!%p3489_p5), %s5550_s29, 16, %s3334_s19, [#allocation4]  }
  0x7d   : > { %s463_s6 = sshll.u32 %s5551_s2, 4  ;;  %s464_s6 = int_to_ptr.vmem [resolvable:$true] %s463_s6 }
  0x7e   : > { %s3095_s8 = scalar_lea.vmem %s464_s6, 16  ;;  %p3103_p4 = scmp.lt.s32.totalorder %s464_s6, %s464_s6 }
  0x7f   : > { %p3096_p3 = scmp.ne.s32.totalorder %s464_s6, %s3095_s8  ;;  %p3104_p6 = scmp.lt.s32.totalorder %s3095_s8, %s3095_s8 }
  0x81   : > { %p3098_p2 = pnand %p3096_p3, %p3507_p7  ;;  %p3105_p8 = por %p3104_p6, %p3103_p4 }
  0x83   : > { %p3099_p1 = pneg %p3098_p2 }
  0x85   : > { %p3106_p10 = pnand %p3105_p8, %p3099_p1 }
  0x87   : > { %3109 = shalt.err (!%p3106_p10)
}
  0x88   : > { %s3335_s1 = smov [#allocation8]   ;;  %s3336_s0 = smov [#allocation11]  }
  0x89   : > { %2840 = dma.vmem_to_smem (!%p3489_p5), %s464_s6, 16, %s3335_s1, [#allocation5]  }
  0x8a   : > { %s5552_s4 = sld [smem:[#allocation77_spill]] }
  0x8b   : > { %s5553_s5 = sld [smem:[#allocation78_spill]] }
  0x8c   : > { %s5554_s7 = sld [smem:[#allocation80_spill]] }
  0x90   : > { %2846 = dma.hbm_to_smem (!%p3489_p5), %s5552_s4, 16, %s3336_s0, [#allocation7]  }
  0x91   : > { %s494_s29 = sshll.u32 %s5553_s5, 4  ;;  %s495_s29 = int_to_ptr.vmem [resolvable:$true] %s494_s29 }
  0x92   : > { %s516_s8 = sshll.u32 %s5554_s7, 4  ;;  %s3121_s2 = scalar_lea.vmem %s495_s29, 16  ;;  %s517_s8 = int_to_ptr.vmem [resolvable:$true] %s516_s8 }
  0x93   : > { %p3122_p9 = scmp.ne.s32.totalorder %s495_s29, %s3121_s2  ;;  %p3129_p13 = scmp.lt.s32.totalorder %s495_s29, %s495_s29 }
  0x94   : > { %p3130_p0 = scmp.lt.s32.totalorder %s3121_s2, %s3121_s2 }
  0x95   : > { %p3124_p11 = pnand %p3122_p9, %p3507_p7 }
  0x96   : > { %p3131_p3 = por %p3130_p0, %p3129_p13 }
  0x97   : > { %p3125_p12 = pneg %p3124_p11 }
  0x99   : > { %p3132_p2 = pnand %p3131_p3, %p3125_p12 }
  0x9b   : > { %3135 = shalt.err (!%p3132_p2)
}
  0x9c   : > { %s3337_s6 = smov [#allocation12]   ;;  %s3136_s1 = scalar_lea.vmem %s517_s8, 16 }
  0x9d   : > { %2849 = dma.vmem_to_smem (!%p3489_p5), %s495_s29, 16, %s3337_s6, [#allocation10]  }
  0x9e   : > { %p3137_p1 = scmp.ne.s32.totalorder %s517_s8, %s3136_s1  ;;  %p3144_p8 = scmp.lt.s32.totalorder %s517_s8, %s517_s8 }
  0x9f   : > { %p3145_p10 = scmp.lt.s32.totalorder %s3136_s1, %s3136_s1 }
  0xa0   : > { %p3139_p4 = pnand %p3137_p1, %p3507_p7 }
  0xa1   : > { %p3146_p9 = por %p3145_p10, %p3144_p8 }
  0xa2   : > { %p3140_p6 = pneg %p3139_p4 }
  0xa4   : > { %p3147_p11 = pnand %p3146_p9, %p3140_p6 }
  0xa6   : > { %3150 = shalt.err (!%p3147_p11)
}
  0xa7   : > { %s3338_s2 = smov [#allocation15]   ;;  %s5555_s9 = sld [smem:[#allocation82_spill]] }
  0xa8   : > { %2855 = dma.vmem_to_smem (!%p3489_p5), %s517_s8, 16, %s3338_s2, [#allocation14]  }
  0xa9   : > { %s5556_s11 = sld [smem:[#allocation84_spill]] }
  0xad   : > { %s538_s19 = sshll.u32 %s5555_s9, 4  ;;  %s539_s19 = int_to_ptr.vmem [resolvable:$true] %s538_s19 }
  0xae   : > { %s3151_s23 = scalar_lea.vmem %s539_s19, 16  ;;  %p3159_p3 = scmp.lt.s32.totalorder %s539_s19, %s539_s19 }
  0xaf   : > { %s560_s29 = sshll.u32 %s5556_s11, 4  ;;  %p3152_p12 = scmp.ne.s32.totalorder %s539_s19, %s3151_s23  ;;  %s561_s29 = int_to_ptr.vmem [resolvable:$true] %s560_s29 }
  0xb0   : > { %p3160_p2 = scmp.lt.s32.totalorder %s3151_s23, %s3151_s23 }
  0xb1   : > { %p3154_p13 = pnand %p3152_p12, %p3507_p7 }
  0xb2   : > { %p3161_p1 = por %p3160_p2, %p3159_p3 }
  0xb3   : > { %p3155_p0 = pneg %p3154_p13 }
  0xb5   : > { %p3162_p4 = pnand %p3161_p1, %p3155_p0 }
  0xb7   : > { %3165 = shalt.err (!%p3162_p4)
}
  0xb8   : > { %s3339_s3 = smov [#allocation18]   ;;  %s3166_s8 = scalar_lea.vmem %s561_s29, 16 }
  0xb9   : > { %2861 = dma.vmem_to_smem (!%p3489_p5), %s539_s19, 16, %s3339_s3, [#allocation17]  }
  0xba   : > { %p3167_p6 = scmp.ne.s32.totalorder %s561_s29, %s3166_s8  ;;  %p3174_p9 = scmp.lt.s32.totalorder %s561_s29, %s561_s29 }
  0xbb   : > { %p3175_p11 = scmp.lt.s32.totalorder %s3166_s8, %s3166_s8 }
  0xbc   : > { %p3169_p8 = pnand %p3167_p6, %p3507_p7 }
  0xbd   : > { %p3176_p12 = por %p3175_p11, %p3174_p9 }
  0xbe   : > { %p3170_p10 = pneg %p3169_p8 }
  0xc0   : > { %p3177_p13 = pnand %p3176_p12, %p3170_p10 }
  0xc2   : > { %3180 = shalt.err (!%p3177_p13)
}
  0xc3   : > { %s3340_s6 = smov [#allocation21]   ;;  %s5557_s13 = sld [smem:[#allocation86_spill]] }
  0xc4   : > { %2867 = dma.vmem_to_smem (!%p3489_p5), %s561_s29, 16, %s3340_s6, [#allocation20]  }
  0xc5   : > { %s5558_s15 = sld [smem:[#allocation88_spill]] }
  0xc9   : > { %s582_s0 = sshll.u32 %s5557_s13, 4  ;;  %s583_s0 = int_to_ptr.vmem [resolvable:$true] %s582_s0 }
  0xca   : > { %s3181_s22 = scalar_lea.vmem %s583_s0, 16  ;;  %p3189_p1 = scmp.lt.s32.totalorder %s583_s0, %s583_s0 }
  0xcb   : > { %s604_s21 = sshll.u32 %s5558_s15, 4  ;;  %p3182_p0 = scmp.ne.s32.totalorder %s583_s0, %s3181_s22  ;;  %s605_s21 = int_to_ptr.vmem [resolvable:$true] %s604_s21 }
  0xcc   : > { %p3190_p4 = scmp.lt.s32.totalorder %s3181_s22, %s3181_s22 }
  0xcd   : > { %p3184_p3 = pnand %p3182_p0, %p3507_p7 }
  0xce   : > { %p3191_p6 = por %p3190_p4, %p3189_p1 }
  0xcf   : > { %p3185_p2 = pneg %p3184_p3 }
  0xd1   : > { %p3192_p8 = pnand %p3191_p6, %p3185_p2 }
  0xd3   : > { %3195 = shalt.err (!%p3192_p8)
}
  0xd4   : > { %s3341_s29 = smov [#allocation24]   ;;  %s3196_s23 = scalar_lea.vmem %s605_s21, 16 }
  0xd5   : > { %2873 = dma.vmem_to_smem (!%p3489_p5), %s583_s0, 16, %s3341_s29, [#allocation23]  }
  0xd6   : > { %p3197_p10 = scmp.ne.s32.totalorder %s605_s21, %s3196_s23  ;;  %p3204_p12 = scmp.lt.s32.totalorder %s605_s21, %s605_s21 }
  0xd7   : > { %p3205_p13 = scmp.lt.s32.totalorder %s3196_s23, %s3196_s23 }
  0xd8   : > { %p3199_p9 = pnand %p3197_p10, %p3507_p7 }
  0xd9   : > { %p3206_p0 = por %p3205_p13, %p3204_p12 }
  0xda   : > { %p3200_p11 = pneg %p3199_p9 }
  0xdc   : > { %p3207_p3 = pnand %p3206_p0, %p3200_p11 }
  0xde   : > { %3210 = shalt.err (!%p3207_p3)
}
  0xdf   : > { %s3342_s3 = smov [#allocation27]   ;;  %s3616_s17 = sadd.s32 1, %s3321_s27  }
  0xe0   : > { %2879 = dma.vmem_to_smem (!%p3489_p5), %s605_s21, 16, %s3342_s3, [#allocation26]  }
  0xe1   : > { %5559 = sst [smem:[#allocation44_spill]] %s3616_s17  ;;  %s382_s8 = sadd.s32 1, %s3317_s26 }
  0xe2   : > { %s379_s6 = ssub.s32 %s3321_s27, %s3616_s17  ;;  %p389_p7 = scmp.ne.s32.totalorder %s3317_s26, %s3313_s25 }
  0xe3   : > { %p380_p2 = scmp.eq.s32.totalorder %s379_s6, 0  ;;  %p390_p1 = scmp.eq.s32.totalorder %s3321_s27, 0 }
  0xe4   : > { %p395_p4 = scmp.ne.s32.totalorder %s3313_s25, %s3309_s24  ;;  %p2900_p6 = scmp.lt.s32.totalorder %s3321_s27, 2 }
  0xe5   : > { %s3628_s28 = scalar_select %p380_p2, %s3317_s26, %s382_s8  }
  0xe6   : > { %p391_p8 = por %p390_p1, %p389_p7  ;;  %p5561_p10 = scmp.eq.s32.totalorder %s3468_s30, 0 }
  0xe7   : > { %5560 = sst [smem:[#allocation45_spill]] %s3628_s28  ;;  %s615_s2 = sand.u32 1, %s3317_s26  }
  0xe8   : > { %p3632_p9 = por %p5561_p10, %p395_p4  ;;  %s2763_s0 = sshll.u32 %s3321_s27, 8 }
  0xe9   : > { %s2696_s20 = sshll.u32 %s615_s2, 4  ;;  %s5563_s16 = sld [smem:[#allocation89_spill]] }
  0xea   : > { %s5562_s1 = scalar_select %p3632_p9, 1, 0 }
  0xeb   : > { %s619_s24 = scalar_lea.vmem [#allocation28], %s2696_s20  ;;  %p3643_p5 = pnand %p2900_p6, %p391_p8 }
  0xec   : > { %s626_s29 = sshll.u32 %s619_s24, 4  ;;  %s3649_s3 = scalar_lea.sflag [#allocation3], %s615_s2  ;;  %s3647_s29 = int_to_ptr.vmem [resolvable:$true] %s626_s29 }
  0xed   : > { %p3213_p12 = pneg %p3643_p5 }
  0xef   : > { %s3641_s22 = scalar_lea.hbm %s5563_s16, %s2763_s0  ;;  %s3216_s0 = scalar_lea.hbm %s5563_s16, 512 }
  0xf0   : > { %s3211_s27 = scalar_lea.hbm %s3641_s22, 256  ;;  %p3217_p3 = scmp.lt.s32.totalorder %s3641_s22, %s5563_s16 }
  0xf1   : > { %p3212_p11 = scmp.ne.s32.totalorder %s3641_s22, %s3211_s27  ;;  %p3218_p7 = scmp.lt.s32.totalorder %s3216_s0, %s3211_s27 }
  0xf3   : > { %p3214_p13 = pnand %p3213_p12, %p3212_p11  ;;  %p3219_p2 = por %p3218_p7, %p3217_p3 }
  0xf5   : > { %p3215_p0 = pneg %p3214_p13 }
  0xf7   : > { %p3220_p1 = pnand %p3219_p2, %p3215_p0 }
  0xf9   : > { %3223 = shalt.err (!%p3220_p1)
}
  0xfa   : > { %s3224_s2 = scalar_lea.vmem %s3647_s29, 256  ;;  %s3343_s21 = smov [#allocation28]  }
  0xfb   : > { %p3225_p4 = scmp.ne.s32.totalorder %s3647_s29, %s3224_s2  ;;  %s3229_s24 = sshll.u32 %s3343_s21, 4  ;;  %s3230_s24 = int_to_ptr.vmem [resolvable:$false] %s3229_s24 }
  0xfc   : > { %s3231_s8 = scalar_lea.vmem %s3230_s24, 512  ;;  %p3232_p10 = scmp.lt.s32.totalorder %s3647_s29, %s3230_s24 }
  0xfd   : > { %p3227_p6 = pnand %p3225_p4, %p3213_p12  ;;  %p3233_p11 = scmp.lt.s32.totalorder %s3231_s8, %s3224_s2 }
  0xff   : > { %p3228_p8 = pneg %p3227_p6  ;;  %p3234_p13 = por %p3233_p11, %p3232_p10 }
 0x101   : > { %p3235_p9 = pnand %p3234_p13, %p3228_p8 }
 0x103   : > { %3238 = shalt.err (!%p3235_p9)
}
 0x104   : > { %s3344_s27 = smov 128   ;;  %s3345_s6 = smov 8  }
 0x105   : > { %2883 = dma.hbm_to_vmem [thread:$0]  (!%p3643_p5), %s3641_s22, 256, %s3647_s29, %s3649_s3, %s3344_s27, %s3344_s27, %s3345_s6  }
 0x106   : > { %p5565_p12 = scmp.ne.s32.totalorder %s5541_s18, 0 }
 0x107   : > { %p5566_p0 = scmp.eq.s32.totalorder (!%p5565_p12), %s3468_s30, 0 }
 0x108   : > { %638 = sbr.rel (%p5565_p12) target bundleno = 1191 (0x4a7), region = 88 }
 0x10d   : > { %3260 = dma.done.wait (%p5566_p0), [#allocation4], 16   ;;  %p5567_p3 = pmov %p5566_p0 }
 0x10e   : > { %p5568_p7 = pmov %p5566_p0 }
 0x10f   : > { %3262 = vsyncadd (%p5567_p3), [#allocation4], 4294967280 }
 0x110   : > { %3264 = dma.done.wait (%p5568_p7), [#allocation7], 16   ;;  %p5569_p9 = pmov %p5566_p0 }
 0x111   : > { %p5570_p2 = pmov %p5566_p0 }
 0x112   : > { %3266 = vsyncadd (%p5569_p9), [#allocation7], 4294967280 }
 0x113   : > { %3268 = dma.done.wait (%p5570_p2), [#allocation5], 16   ;;  %p5571_p5 = pmov %p5566_p0 }
 0x114   : > { %p5572_p1 = pmov %p5566_p0 }
 0x115   : > { %3270 = vsyncadd (%p5571_p5), [#allocation5], 4294967280 }
 0x116   : > { %3272 = dma.done.wait (%p5572_p1), [#allocation10], 16   ;;  %p5573_p4 = pmov %p5566_p0 }
 0x117   : > { %p5574_p6 = pmov %p5566_p0 }
 0x118   : > { %3274 = vsyncadd (%p5573_p4), [#allocation10], 4294967280 }
 0x119   : > { %3276 = dma.done.wait (%p5574_p6), [#allocation7], 16   ;;  %p5575_p8 = pmov %p5566_p0 }
 0x11a   : > { %p5576_p10 = pmov %p5566_p0 }
 0x11b   : > { %3278 = vsyncadd (%p5575_p8), [#allocation7], 4294967280 }
 0x11c   : > { %3280 = dma.done.wait (%p5576_p10), [#allocation10], 16   ;;  %p5577_p11 = pmov %p5566_p0 }
 0x11d   : > { %p5578_p13 = pmov %p5566_p0 }
 0x11e   : > { %3282 = vsyncadd (%p5577_p11), [#allocation10], 4294967280 }
 0x11f   : > { %3284 = dma.done.wait (%p5578_p13), [#allocation14], 32   ;;  %p5579_p12 = pmov %p5566_p0 }
 0x121   : > { %3286 = vsyncadd (%p5579_p12), [#allocation14], 4294967264 }
 0x122   : > { %3288 = dma.done.wait (%p5566_p0), [#allocation17], 32   ;;  %p5580_p3 = pmov %p5566_p0 }
 0x123   : > { %p5581_p7 = pmov %p5566_p0 }
 0x124   : > { %3290 = vsyncadd (%p5580_p3), [#allocation17], 4294967264 }
 0x125   : > { %3292 = dma.done.wait (%p5581_p7), [#allocation20], 32   ;;  %p5582_p9 = pmov %p5566_p0 }
 0x126   : > { %p5583_p2 = pmov %p5566_p0 }
 0x127   : > { %3294 = vsyncadd (%p5582_p9), [#allocation20], 4294967264 }
 0x128   : > { %3296 = dma.done.wait (%p5583_p2), [#allocation23], 32   ;;  %p5584_p5 = pmov %p5566_p0 }
 0x129   : > { %p5585_p1 = pmov %p5566_p0 }
 0x12a   : > { %3298 = vsyncadd (%p5584_p5), [#allocation23], 4294967264 }
 0x12b   : > { %3300 = dma.done.wait (%p5585_p1), [#allocation26], 32   ;;  %p5586_p4 = pmov %p5566_p0 }
 0x12c   : > { %s704_s18 = sand.u32 1, %s3313_s25   ;;  %p5587_p6 = scmp.ne.s32.totalorder %s5562_s1, 0 }
 0x12d   : > { %3302 = vsyncadd (%p5586_p4), [#allocation26], 4294967264  ;;  %s2716_s22 = sshll.u32 %s704_s18, 4  ;;  %s705_s29 = scalar_lea.sflag [#allocation3], %s704_s18 }
 0x12e   : > { %s708_s23 = scalar_lea.vmem [#allocation28], %s2716_s22 }
 0x12f   : > { %3304 = dma.done.wait (%p5587_p6), %s705_s29, 256  }
 0x130   : > { %3306 = vsyncadd (%p5587_p6), %s705_s29, 4294967040 }
 0x131   : > { %713 = sfence }
 0x132   : > { %s3721_s3 = sld [smem:[#allocation6 + $0x2]]  ;;  %v765_v0 = vlaneseq  ;;  %v3729_v5 = vld [vmem:[%s708_s23] sm:$0xff]  ;;  %v3731_v6 = vld [vmem:[%s708_s23 + $0x8] sm:$0xff]  ;;  %s5453_s20 = smov 1  }
 0x133   : > { %s2730_s0 = sld [smem:[#allocation2 + $0x2]]  ;;  %s3347_s19 = smov 2  }
 0x134   : > { %v3724_v1 = vshrl.u32 %v765_v0, 7  ;;  %s2720_s1 = sld [smem:[#allocation2 + $0x1]]  ;;  %s5451_s24 = smov 127   ;;  %v793_v40 = vand.u32 127, %v765_v0 }
 0x135   : > { %s2719_s2 = sld [smem:[#allocation6 + $0x1]]  ;;  %s3349_s27 = smov 126  }
 0x136   : > { %v968_v2 = vadd.s32 64, %v3724_v1  ;;  %v969_v3 = vadd.s32 72, %v3724_v1  ;;  %v970_v4 = vadd.s32 80, %v3724_v1  ;;  %v971_v7 = vadd.s32 88, %v3724_v1  ;;  %s1097_s21 = sld [smem:[#allocation2]] }
 0x137   : > { %v972_v8 = vadd.s32 96, %v3724_v1  ;;  %v973_v9 = vadd.s32 104, %v3724_v1  ;;  %s1096_s8 = sld [smem:[#allocation6]]  ;;  %v767_v41 = vadd.s32 8, %v3724_v1  ;;  %v3864_v43 = vadd.s32 4294967295, %v793_v40 }
 0x138   : > { %v1199_v10 = vstv %s3721_s3  ;;  %v978_v11 = vand.u32 15, %v968_v2  ;;  %v985_v12 = vand.u32 15, %v969_v3  ;;  %v992_v14 = vand.u32 15, %v970_v4  ;;  %s3809_s6 = sld [smem:[#allocation9 + $0x1]] }
 0x139   : > { %v1196_v13 = vstv %s2730_s0  ;;  %v999_v15 = vand.u32 15, %v971_v7  ;;  %v1006_v16 = vand.u32 15, %v972_v8  ;;  %v1013_v19 = vand.u32 15, %v973_v9  ;;  %s3811_s18 = sld [smem:[#allocation9 + $0x6]] }
 0x13a   : > { %v1197_v17 = vmul.f32 %v1196_v13, %v3729_v5  ;;  %v1198_v18 = vmul.f32 %v1196_v13, %v3731_v6  ;;  %v3739_v20 = vadd.s32 4294967295, %v978_v11  ;;  %v3741_v21 = vadd.s32 4294967295, %v992_v14  ;;  %s3813_s22 = sld [smem:[#allocation9 + $0xb]] }
 0x13b   : > { %v3743_v22 = vadd.s32 4294967295, %v1006_v16  ;;  %v3745_v23 = vadd.s32 1, %v985_v12  ;;  %v3757_v26 = vadd.s32 1, %v999_v15  ;;  %v3759_v27 = vadd.s32 1, %v1013_v19  ;;  %s3815_s29 = sld [smem:[#allocation9 + $0x10]] }
 0x13c   : > { %5588 = vst [vmem:[#allocation46_spill] sm:$0xff] %v3739_v20  ;;  %5589 = vst [vmem:[#allocation47_spill] sm:$0xff] %v3741_v21  ;;  %v3747_v24 = vadd.f32 %v1199_v10, %v1197_v17  ;;  %v3754_v25 = vadd.f32 %v1199_v10, %v1198_v18  ;;  %v1106_v28 = vstv %s2720_s1  ;;  %v1109_v31 = vstv %s2719_s2  ;;  %s3817_s23 = sld [smem:[#allocation9 + $0x15]] }
 0x13d   : > { %5590 = vst [vmem:[#allocation48_spill] sm:$0xff] %v3743_v22  ;;  %5591 = vst [vmem:[#allocation49_spill] sm:$0xff] %v3745_v23  ;;  %v1108_v29 = vmul.f32 %v1106_v28, %v3731_v6  ;;  %v1107_v30 = vmul.f32 %v1106_v28, %v3729_v5  ;;  %v1098_v34 = vstv %s1097_s21  ;;  %v1101_v36 = vstv %s1096_s8  ;;  %s3819_s3 = sld [smem:[#allocation9]] }
 0x13e   : > { %1209 = vrot.lane.b32.xlu1 %v3747_v24, %s5453_s20  ;;  %1203 = vrot.lane.b32.xlu0 %v3747_v24, %s3347_s19  ;;  %5592 = vst [vmem:[#allocation50_spill] sm:$0xff] %v3757_v26  ;;  %5593 = vst [vmem:[#allocation51_spill] sm:$0xff] %v3759_v27  ;;  %v1099_v35 = vmul.f32 %v1098_v34, %v3729_v5  ;;  %v1100_v38 = vmul.f32 %v1098_v34, %v3731_v6  ;;  %s3821_s0 = sld [smem:[#allocation9 + $0x5]]  ;;  %v1232_v42 = vstv %s3809_s6 }
 0x13f   : > { %v3775_v32 = vadd.f32 %v1109_v31, %v1108_v29  ;;  %v3777_v33 = vadd.f32 %v1109_v31, %v1107_v30  ;;  %s3823_s1 = sld [smem:[#allocation9 + $0xa]]  ;;  %v3866_v44 = vadd.s32 4294967294, %v793_v40  ;;  %v1267_v45 = vstv %s3811_s18 }
 0x140   : > { %v3788_v37 = vadd.f32 %v1101_v36, %v1099_v35  ;;  %v3803_v39 = vadd.f32 %v1101_v36, %v1100_v38  ;;  %s3827_s2 = sld [smem:[#allocation9 + $0x14]]  ;;  %v1303_v46 = vstv %s3813_s22  ;;  %v3878_v51 = vadd.s32 1, %v793_v40 }
 0x141   : > { %s3829_s21 = sld [smem:[#allocation9 + $0x2]]  ;;  %5594 = vst [vmem:[#allocation52_spill] sm:$0xff] %v3866_v44  ;;  %v1333_v47 = vstv %s3815_s29  ;;  %v772_v52 = vand.u32 15, %v3724_v1  ;;  %v3885_v55 = vadd.s32 2, %v793_v40  ;;  %v779_v56 = vand.u32 15, %v767_v41 }
 0x142   : > { %1211 = vrot.lane.b32.xlu1 %v3754_v25, %s5453_s20  ;;  %1205 = vrot.lane.b32.xlu0 %v3754_v25, %s3347_s19  ;;  %s3825_s19 = sld [smem:[#allocation9 + $0xf]]  ;;  %v1369_v48 = vstv %s3817_s23  ;;  %vm831_vm6 = vcmp.ge.s32.totalorder %v3864_v43, 0  ;;  %vm827_vm7 = vcmp.ge.s32.totalorder %v3866_v44, 0  ;;  %vm836_vm8 = vcmp.lt.s32.totalorder %v3878_v51, 128 }
 0x143   : > { %s3831_s8 = sld [smem:[#allocation9 + $0x3]]  ;;  %v1228_v49 = vstv %s3819_s3  ;;  %v3916_v7 = vadd.s32 4294967295, %v772_v52  ;;  %v3924_v10 = vadd.s32 1, %v779_v56  ;;  %v3926_v11 = vadd.s32 2, %v779_v56 }
 0x144   : > { %s3839_s4 = sld [smem:[#allocation9 + $0xd]]  ;;  %v5463_v53 = vstv %s3821_s0  ;;  %v3943_v19 = vadd.s32 4294967294, %v772_v52  ;;  %vm840_vm9 = vcmp.lt.s32.totalorder %v3885_v55, 128  ;;  %vm1257_vm10 = vcmp.lt.s32.totalorder %v3724_v1, 2 }
 0x145   : > { %s3841_s5 = sld [smem:[#allocation9 + $0x11]]  ;;  %v5461_v57 = vstv %s3823_s1  ;;  %vm1143_vm11 = vcmp.lt.s32.totalorder %v3724_v1, 1  ;;  %vm804_vm12 = vcmp.ge.s32.totalorder %v3916_v7, 0  ;;  %vm1184_vm13 = vcmp.lt.s32.totalorder %v3724_v1, 7 }
 0x146   : > { %1217 = vrot.lane.b32.xlu1 %v3754_v25, %s5451_s24  ;;  %1215 = vrot.lane.b32.xlu0 %v3747_v24, %s5451_s24  ;;  %s3843_s7 = sld [smem:[#allocation9 + $0x12]]  ;;  %v5464_v59 = vstv %s3827_s2  ;;  %vm815_vm14 = vcmp.lt.s32.totalorder %v3924_v10, 16  ;;  %vm1394_vm15 = vcmp.lt.s32.totalorder %v3724_v1, 6  ;;  %vm823_vm2 = vcmp.lt.s32.totalorder %v3926_v11, 16 }
 0x147   : > { %s3845_s9 = sld [smem:[#allocation9 + $0x16]]  ;;  %v1238_v50 = vstv %s3829_s21  ;;  %vm5517_vm1 = vcmp.ge.s32.totalorder %v3943_v19, 0 }
 0x148   : > { %s3847_s10 = sld [smem:[#allocation9 + $0x17]]  ;;  %v5462_v58 = vstv %s3825_s19  ;;  %v3895_v60 = vmul.f32 %v1238_v50, %v3754_v25  ;;  %v3905_v0 = vmul.f32 %v1238_v50, %v3747_v24 }
 0x149   : > { %s3849_s11 = sld [smem:[#allocation9 + $0x4]] }
 0x14a   : > { %1223 = vrot.lane.b32.xlu1 %v3754_v25, %s3349_s27  ;;  %1221 = vrot.lane.b32.xlu0 %v3747_v24, %s3349_s27  ;;  %s3833_s27 = sld [smem:[#allocation9 + $0x7]] }
 0x14b   : > { %s3851_s12 = sld [smem:[#allocation9 + $0x9]]  ;;  %v1339_v3 = vstv %s3841_s5 }
 0x14c   : > { %s3854_s13 = sld [smem:[#allocation9 + $0xe]]  ;;  %v3930_v13 = vmul.f32 %v1339_v3, %v3754_v25  ;;  %v3940_v17 = vmul.f32 %v1339_v3, %v3747_v24 }
 0x14d   : > { %s3856_s14 = sld [smem:[#allocation9 + $0x13]]  ;;  %v1375_v9 = vstv %s3845_s9  ;;  %s5634_s9 = smov 1  }
 0x14e   : > { %1115 = vrot.lane.b32.xlu1 %v3775_v32, %s5453_s20  ;;  %1113 = vrot.lane.b32.xlu0 %v3777_v33, %s5453_s20  ;;  %s3858_s15 = sld [smem:[#allocation9 + $0x18]]  ;;  %v3937_v16 = vmul.f32 %v1375_v9, %v3754_v25  ;;  %v3947_v29 = vmul.f32 %v1375_v9, %v3747_v24 }
 0x14f   : > { %s3860_s16 = sld [smem:[#allocation8]] }
 0x150   : > { %s3868_s28 = sld [smem:[#allocation8 + $0x1]]  ;;  %v1273_v54 = vstv %s3833_s27 }
 0x151   : > { %s3874_s26 = sld [smem:[#allocation8 + $0x3]]  ;;  %v3901_v62 = vmul.f32 %v1273_v54, %v3754_v25  ;;  %v3912_v4 = vmul.f32 %v1273_v54, %v3747_v24 }
 0x152   : > { %1121 = vrot.lane.b32.xlu1 %v3775_v32, %s5451_s24  ;;  %1119 = vrot.lane.b32.xlu0 %v3777_v33, %s5451_s24  ;;  %s3880_s25 = sld [smem:[#allocation8 + $0x4]] }
 0x153   : > { %s3887_s17 = sld [smem:[#allocation8 + $0x7]] }
 0x154   : > { %s3897_s21 = sld [smem:[#allocation8 + $0x6]] }
 0x155   : > { %s3907_s27 = sld [smem:[#allocation8 + $0x2]] }
 0x156   : > { %1404 = vrot.lane.b32.xlu0 %v3788_v37, %s5453_s20  ;;  %1418 = vrot.lane.b32.xlu1 %v3731_v6, %s5453_s20  ;;  %s3914_s30 = sld [smem:[#allocation8 + $0x5]]  ;;  %v1130_v18 = vstv %s3868_s28 }
 0x157   : > { %s3951_s5 = sld [smem:[#allocation11]]  ;;  %v3961_v41 = vmul.f32 %v1130_v18, %v3775_v32  ;;  %v3969_v54 = vmul.f32 %v1130_v18, %v3777_v33  ;;  %v3982_v18 = vadd.s32 56, %v3724_v1 }
 0x158   : > { %v1153_v31 = vstv %s3880_s25 }
 0x159   : > { %v1171_v36 = vstv %s3887_s17  ;;  %v3965_v50 = vmul.f32 %v1153_v31, %v3775_v32  ;;  %v3972_v56 = vmul.f32 %v1153_v31, %v3777_v33 }
 0x15a   : > { %1416 = vrot.lane.b32.xlu0 %v3729_v5, %s5453_s20  ;;  %1442 = vrot.lane.b32.xlu1 %v3731_v6, %s5451_s24  ;;  %v3975_v9 = vmul.f32 %v1171_v36, %v3775_v32 }
 0x15e   : > { %1428 = vrot.lane.b32.xlu0 %v3788_v37, %s5451_s24 }
 0x162   : > { %1440 = vrot.lane.b32.xlu0 %v3729_v5, %s5451_s24 }
 0x166   : > { %1406 = vrot.lane.b32.xlu0 %v3803_v39, %s5453_s20  ;;  %s3837_s20 = sld [smem:[#allocation9 + $0xc]] }
 0x16a   : > { %1430 = vrot.lane.b32.xlu0 %v3803_v39, %s5451_s24  ;;  %s3835_s24 = sld [smem:[#allocation9 + $0x8]] }
 0x16c   : > { %v1309_v63 = vstv %s3837_s20  ;;  %s3922_s20 = sld [smem:[#allocation8 + $0x8]] }
 0x16d   : > { %v3919_v8 = vmul.f32 %v1309_v63, %v3754_v25  ;;  %v3934_v15 = vmul.f32 %v1309_v63, %v3747_v24  ;;  %v3978_v24 = vmul.f32 %v1171_v36, %v3777_v33 }
 0x170   : > { %v5600_v21 = vstv %s3835_s24 }
 0x1b0   : > { %v1210_v63 = vpop.permute.xlu1 %1209  ;;  %v1204_v3 = vpop.permute.xlu0 %1203 }
 0x1b1   : > { %v1213_v31 = vsel %vm831_vm6, %v1210_v63, 0.0  ;;  %v1207_v40 = vsel %vm827_vm7, %v1204_v3, 0.0 }
 0x1b2   : > { %v1233_v32 = vmul.f32 %v1232_v42, %v1213_v31  ;;  %v1268_v35 = vmul.f32 %v1267_v45, %v1213_v31  ;;  %v1304_v33 = vmul.f32 %v1303_v46, %v1213_v31  ;;  %v1334_v36 = vmul.f32 %v1333_v47, %v1213_v31 }
 0x1b3   : > { %v1370_v52 = vmul.f32 %v1369_v48, %v1213_v31  ;;  %v1229_v34 = vmul.f32 %v1228_v49, %v1207_v40  ;;  %v1264_v63 = vmul.f32 %v5463_v53, %v1207_v40  ;;  %v1300_v3 = vmul.f32 %v5461_v57, %v1207_v40 }
 0x1b4   : > { %v1330_v25 = vmul.f32 %v5462_v58, %v1207_v40  ;;  %v1366_v38 = vmul.f32 %v5464_v59, %v1207_v40  ;;  %v1212_v30 = vpop.permute.xlu1 %1211  ;;  %v1206_v28 = vpop.permute.xlu0 %1205 }
 0x1b5   : > { %v1235_v12 = vadd.f32 %v1233_v32, %v1229_v34  ;;  %v1270_v2 = vadd.f32 %v1268_v35, %v1264_v63  ;;  %v1306_v61 = vadd.f32 %v1304_v33, %v1300_v3  ;;  %v1214_v57 = vsel %vm831_vm6, %v1212_v30, 0.0 }
 0x1b6   : > { %v1336_v58 = vadd.f32 %v1334_v36, %v1330_v25  ;;  %v1372_v53 = vadd.f32 %v1370_v52, %v1366_v38  ;;  %v1234_v40 = vmul.f32 %v1232_v42, %v1214_v57  ;;  %v1269_v59 = vmul.f32 %v1267_v45, %v1214_v57 }
 0x1b7   : > { %v1305_v14 = vmul.f32 %v1303_v46, %v1214_v57  ;;  %v1335_v31 = vmul.f32 %v1333_v47, %v1214_v57  ;;  %v1371_v34 = vmul.f32 %v1369_v48, %v1214_v57  ;;  %v1208_v35 = vsel %vm827_vm7, %v1206_v28, 0.0 }
 0x1b8   : > { %v1230_v30 = vmul.f32 %v1228_v49, %v1208_v35  ;;  %v5595_v25 = vstv %s3821_s0  ;;  %v5596_v42 = vstv %s3823_s1  ;;  %v5597_v52 = vstv %s3825_s19  ;;  %v1218_v33 = vpop.permute.xlu1 %1217  ;;  %v1216_v46 = vpop.permute.xlu0 %1215 }
 0x1b9   : > { %v1265_v38 = vmul.f32 %v5595_v25, %v1208_v35  ;;  %v1301_v45 = vmul.f32 %v5596_v42, %v1208_v35  ;;  %v1331_v32 = vmul.f32 %v5597_v52, %v1208_v35  ;;  %v5598_v36 = vstv %s3827_s2 }
 0x1ba   : > { %v1367_v47 = vmul.f32 %v5598_v36, %v1208_v35  ;;  %v1220_v48 = vsel %vm836_vm8, %v1218_v33, 0.0  ;;  %v1219_v57 = vsel %vm836_vm8, %v1216_v46, 0.0  ;;  %v1241_v49 = vadd.f32 %v3905_v0, %v1235_v12 }
 0x1bb   : > { %v1236_v28 = vadd.f32 %v1234_v40, %v1230_v30  ;;  %v1271_v63 = vadd.f32 %v1269_v59, %v1265_v38  ;;  %v1307_v3 = vadd.f32 %v1305_v14, %v1301_v45  ;;  %v1337_v25 = vadd.f32 %v1335_v31, %v1331_v32 }
 0x1bc   : > { %v1373_v42 = vadd.f32 %v1371_v34, %v1367_v47  ;;  %v5599_v52 = vstv %s3831_s8  ;;  %v1281_v35 = vmul.f32 %v5600_v21, %v1220_v48  ;;  %v5601_v36 = vstv %s3839_s4  ;;  %v1224_v59 = vpop.permute.xlu1 %1223  ;;  %v1222_v14 = vpop.permute.xlu0 %1221  ;;  %s4198_s4 = sld [smem:[#allocation11 + $0x1]] }
 0x1bd   : > { %v1246_v22 = vmul.f32 %v5599_v52, %v1220_v48  ;;  %v1317_v20 = vmul.f32 %v5601_v36, %v1220_v48  ;;  %v1242_v33 = vadd.f32 %v3895_v60, %v1236_v28  ;;  %v1277_v46 = vadd.f32 %v3901_v62, %v1271_v63 }
 0x1be   : > { %v1313_v0 = vadd.f32 %v3919_v8, %v1307_v3  ;;  %v1343_v12 = vadd.f32 %v3930_v13, %v1337_v25  ;;  %v5602_v31 = vstv %s3843_s7  ;;  %v1379_v34 = vadd.f32 %v3937_v16, %v1373_v42  ;;  %s5631_s7 = sld [smem:[#allocation43_spill]] }
 0x1bf   : > { %v1347_v40 = vmul.f32 %v5602_v31, %v1220_v48  ;;  %v5603_v21 = vstv %s3847_s10  ;;  %v5604_v38 = vmov %v5599_v52  ;;  %v1248_v60 = vadd.f32 %v1246_v22, %v1242_v33  ;;  %s4244_s10 = sld [smem:[#allocation2 + $0x3]] }
 0x1c0   : > { %v1383_v30 = vmul.f32 %v5603_v21, %v1220_v48  ;;  %v1245_v45 = vmul.f32 %v5604_v38, %v1219_v57  ;;  %v1283_v62 = vadd.f32 %v1281_v35, %v1277_v46  ;;  %v1319_v32 = vadd.f32 %v1317_v20, %v1313_v0  ;;  %v1114_v20 = vpop.permute.xlu0 %1113 }
 0x1c1   : > { %v1276_v8 = vadd.f32 %v3912_v4, %v1270_v2  ;;  %v1349_v47 = vadd.f32 %v1347_v40, %v1343_v12  ;;  %v5605_v63 = vstv %s3835_s24  ;;  %v1312_v25 = vadd.f32 %v3934_v15, %v1306_v61  ;;  %v1116_v15 = vpop.permute.xlu1 %1115 }
 0x1c2   : > { %v1385_v13 = vadd.f32 %v1383_v30, %v1379_v34  ;;  %v1247_v28 = vadd.f32 %v1245_v45, %v1241_v49  ;;  %v1280_v3 = vmul.f32 %v5605_v63, %v1219_v57  ;;  %v5606_v16 = vmov %v5601_v36 }
 0x1c3   : > { %v1316_v42 = vmul.f32 %v5606_v16, %v1219_v57  ;;  %v1342_v48 = vadd.f32 %v3940_v17, %v1336_v58  ;;  %v5607_v22 = vmov %v5602_v31  ;;  %v1378_v4 = vadd.f32 %v3947_v29, %v1372_v53 }
 0x1c4   : > { %v1346_v52 = vmul.f32 %v5607_v22, %v1219_v57  ;;  %v1282_v2 = vadd.f32 %v1280_v3, %v1276_v8  ;;  %v5608_v49 = vmov %v5603_v21  ;;  %v1226_v61 = vsel %vm840_vm9, %v1224_v59, 0.0  ;;  %v1120_v45 = vpop.permute.xlu0 %1119  ;;  %p760_p8 = scmp.lt.s32.totalorder %s5631_s7, 1 }
 0x1c5   : > { %v1382_v35 = vmul.f32 %v5608_v49, %v1219_v57  ;;  %v1318_v36 = vadd.f32 %v1316_v42, %v1312_v25  ;;  %v5609_v46 = vstv %s3849_s11  ;;  %v5610_v17 = vstv %s3851_s12  ;;  %s5637_s11 = smov 127   ;;  %s4258_s12 = sld [smem:[#allocation6 + $0x3]] }
 0x1c6   : > { %v1348_v33 = vadd.f32 %v1346_v52, %v1342_v48  ;;  %v1252_v58 = vmul.f32 %v5609_v46, %v1226_v61  ;;  %v1287_v0 = vmul.f32 %v5610_v17, %v1226_v61  ;;  %v5611_v31 = vstv %s3854_s13  ;;  %s5747_s7 = smov (!%p760_p8, %s5631_s7), 1 }
 0x1c7   : > { %v1384_v12 = vadd.f32 %v1382_v35, %v1378_v4  ;;  %v1323_v40 = vmul.f32 %v5611_v31, %v1226_v61  ;;  %v5612_v53 = vstv %s3856_s14  ;;  %v5613_v57 = vstv %s3858_s15  ;;  %s2764_s13 = sshll.u32 %s5747_s7, 6 }
 0x1c8   : > { %v1353_v29 = vmul.f32 %v5612_v53, %v1226_v61  ;;  %v1389_v34 = vmul.f32 %v5613_v57, %v1226_v61  ;;  %v1254_v59 = vadd.f32 %v1252_v58, %v1248_v60  ;;  %v1289_v21 = vadd.f32 %v1287_v0, %v1283_v62 }
 0x1c9   : > { %v1225_v30 = vsel %vm840_vm9, %v1222_v14, 0.0  ;;  %v1118_v38 = vsel %vm831_vm6, %v1116_v15, 0.0  ;;  %v4089_v8 = vadd.f32 %v1323_v40, %v1319_v32  ;;  %v5614_v25 = vmov %v5609_v46 }
 0x1ca   : > { %v4091_v63 = vadd.f32 %v1353_v29, %v1349_v47  ;;  %v4093_v3 = vadd.f32 %v1389_v34, %v1385_v13  ;;  %v1251_v16 = vmul.f32 %v5614_v25, %v1225_v30  ;;  %v1256_v60 = vrot.slane %v1254_v59, 6  ;;  %v1122_v59 = vpop.permute.xlu1 %1121 }
 0x1cb   : > { %v1291_v62 = vrot.slane %v1289_v21, 7  ;;  %v5615_v42 = vmov %v5610_v17  ;;  %v5616_v48 = vmov %v5611_v31  ;;  %v5617_v4 = vmov %v5612_v53  ;;  %v4115_v17 = vpop.permute.xlu0 %1404 }
 0x1cc   : > { %v1286_v14 = vmul.f32 %v5615_v42, %v1225_v30  ;;  %v1322_v22 = vmul.f32 %v5616_v48, %v1225_v30  ;;  %v1357_v32 = vrot.slane %v4091_v63, 1  ;;  %v1393_v47 = vrot.slane %v4093_v3, 2 }
 0x1cd   : > { %v1253_v52 = vadd.f32 %v1251_v16, %v1247_v28  ;;  %v1352_v13 = vmul.f32 %v5617_v4, %v1225_v30  ;;  %v5618_v61 = vmov %v5613_v57  ;;  %v5619_v46 = vstv %s3860_s16  ;;  %s5638_s16 = sld [smem:[#allocation90_spill]] }
 0x1ce   : > { %v1288_v49 = vadd.f32 %v1286_v14, %v1282_v2  ;;  %v4107_v35 = vadd.f32 %v1322_v22, %v1318_v36  ;;  %v1388_v15 = vmul.f32 %v5618_v61, %v1225_v30  ;;  %v1128_v58 = vmul.f32 %v5619_v46, %v1118_v38 }
 0x1cf   : > { %v1255_v0 = vrot.slane %v1253_v52, 6  ;;  %v1354_v28 = vadd.f32 %v1352_v13, %v1348_v33  ;;  %v5620_v31 = vstv %s3874_s26  ;;  %v5621_v53 = vstv %s3897_s21  ;;  %v1417_v48 = vpop.permute.xlu0 %1416  ;;  %s4416_s26 = smov 0  }
 0x1d0   : > { %v1151_v40 = vmul.f32 %v5620_v31, %v1118_v38  ;;  %v1169_v2 = vmul.f32 %v5621_v53, %v1118_v38  ;;  %v1290_v36 = vrot.slane %v1288_v49, 7  ;;  %v4123_v29 = vadd.f32 %v1388_v15, %v1384_v12 }
 0x1d1   : > { %v1134_v57 = vadd.f32 %v3961_v41, %v1128_v58  ;;  %v1117_v34 = vsel %vm831_vm6, %v1114_v20, 0.0  ;;  %v1259_v33 = vsel %vm1257_vm10, %v1256_v60, %v1255_v0  ;;  %v1356_v21 = vrot.slane %v1354_v28, 1 }
 0x1d2   : > { %v1157_v30 = vadd.f32 %v3965_v50, %v1151_v40  ;;  %v1175_v38 = vadd.f32 %v3975_v9, %v1169_v2  ;;  %v1392_v12 = vrot.slane %v4123_v29, 2  ;;  %v5622_v25 = vmov %v5619_v46 }
 0x1d3   : > { %v1127_v41 = vmul.f32 %v5622_v25, %v1117_v34  ;;  %v5623_v16 = vmov %v5620_v31  ;;  %v5624_v42 = vmov %v5621_v53  ;;  %v1124_v22 = vsel %vm836_vm8, %v1122_v59, 0.0  ;;  %s4293_s25 = scalar_lea.vmem %s5638_s16, %s2764_s13 }
 0x1d4   : > { %v1150_v20 = vmul.f32 %v5623_v16, %v1117_v34  ;;  %v1168_v14 = vmul.f32 %v5624_v42, %v1117_v34  ;;  %v1123_v50 = vsel %vm836_vm8, %v1120_v45, 0.0  ;;  %v1293_v9 = vsel %vm1143_vm11, %v1291_v62, %v1290_v36  ;;  %5639 = sst [smem:[#allocation43_spill]] %s4293_s25 }
 0x1d5   : > { %v1258_v52 = vsel %vm1257_vm10, %v1255_v0, %v1256_v60  ;;  %v1133_v4 = vadd.f32 %v3969_v54, %v1127_v41  ;;  %v5625_v61 = vstv %s3907_s27  ;;  %v5626_v46 = vstv %s3914_s30 }
 0x1d6   : > { %v1156_v13 = vadd.f32 %v3972_v56, %v1150_v20  ;;  %v1174_v49 = vadd.f32 %v3978_v24, %v1168_v14  ;;  %v1138_v15 = vmul.f32 %v5625_v61, %v1124_v22  ;;  %v1161_v58 = vmul.f32 %v5626_v46, %v1124_v22  ;;  %v1429_v24 = vpop.permute.xlu0 %1428 }
 0x1d7   : > { %v5627_v28 = vstv %s3922_s20  ;;  %v5628_v40 = vmov %v5625_v61  ;;  %v5629_v53 = vmov %v5626_v46  ;;  %v1294_v54 = vsel %vm804_vm12, %v1293_v9, 0.0 }
 0x1d8   : > { %v1179_v31 = vmul.f32 %v5627_v28, %v1124_v22  ;;  %v1137_v45 = vmul.f32 %v5628_v40, %v1123_v50  ;;  %v1160_v2 = vmul.f32 %v5629_v53, %v1123_v50  ;;  %v1140_v29 = vadd.f32 %v1138_v15, %v1134_v57 }
 0x1d9   : > { %v5630_v34 = vmov %v5627_v28  ;;  %v1292_v56 = vsel %vm1143_vm11, %v1290_v36, %v1291_v62  ;;  %v1163_v60 = vadd.f32 %v1161_v58, %v1157_v30  ;;  %v1359_v57 = vsel %vm1184_vm13, %v1357_v32, %v1356_v21  ;;  %v1419_v36 = vpop.permute.xlu1 %1418 }
 0x1da   : > { %v1178_v59 = vmul.f32 %v5630_v34, %v1123_v50  ;;  %v1181_v0 = vadd.f32 %v1179_v31, %v1175_v38  ;;  %v1139_v25 = vadd.f32 %v1137_v45, %v1133_v4  ;;  %v1162_v41 = vadd.f32 %v1160_v2, %v1156_v13  ;;  %v1441_v4 = vpop.permute.xlu0 %1440 }
 0x1db   : > { %v1142_v16 = vrot.slane %v1140_v29, 7  ;;  %v1297_v42 = vadd.f32 %v1292_v56, %v1258_v52  ;;  %v1361_v50 = vsel %vm815_vm14, %v1359_v57, 0.0  ;;  %v1396_v62 = vsel %vm1394_vm15, %v1393_v47, %v1392_v12 }
 0x1dc   : > { %v1180_v20 = vadd.f32 %v1178_v59, %v1174_v49  ;;  %v1183_v14 = vrot.slane %v1181_v0, 1  ;;  %v1141_v22 = vrot.slane %v1139_v25, 7  ;;  %v1398_v9 = vsel %vm823_vm2, %v1396_v62, 0.0 }
 0x1dd   : > { %v1327_v38 = vadd.f32 %v4089_v8, %v1297_v42  ;;  %v1260_v52 = vsel %vm5517_vm1, %v1259_v33, 0.0  ;;  %v1358_v15 = vsel %vm1184_vm13, %v1356_v21, %v1357_v32  ;;  %v1395_v21 = vsel %vm1394_vm15, %v1392_v12, %v1393_v47 }
 0x1de   : > { %v1182_v30 = vrot.slane %v1180_v20, 1  ;;  %v1145_v13 = vsel %vm1143_vm11, %v1142_v16, %v1141_v22  ;;  %v1144_v49 = vsel %vm1143_vm11, %v1141_v22, %v1142_v16  ;;  %v1296_v61 = vadd.f32 %v1294_v54, %v1260_v52  ;;  %v1407_v2 = vpop.permute.xlu0 %1406  ;;  %v1443_v54 = vpop.permute.xlu1 %1442 }
 0x1df   : > { %v1146_v8 = vsel %vm804_vm12, %v1145_v13, 0.0  ;;  %v1165_v46 = vadd.f32 %v1163_v60, %v1144_v49  ;;  %v1363_v40 = vadd.f32 %v1361_v50, %v1327_v38  ;;  %v1420_v45 = vsel %vm831_vm6, %v4115_v17, -inf }
 0x1e0   : > { %v1186_v33 = vsel %vm1184_vm13, %v1183_v14, %v1182_v30  ;;  %v1185_v58 = vsel %vm1184_vm13, %v1182_v30, %v1183_v14  ;;  %v1164_v28 = vadd.f32 %v1162_v41, %v1146_v8  ;;  %v1326_v63 = vadd.f32 %v4107_v35, %v1296_v61 }
 0x1e1   : > { %v1188_v31 = vsel %vm815_vm14, %v1186_v33, 0.0  ;;  %v1426_v53 = vsel %vm831_vm6, %v1417_v48, -inf  ;;  %v1400_v35 = vadd.f32 %v1398_v9, %v1363_v40  ;;  %v1444_v59 = vsel %vm836_vm8, %v1429_v24, -inf }
 0x1e2   : > { %v1190_v32 = vadd.f32 %v1188_v31, %v1165_v46  ;;  %v1189_v29 = vadd.f32 %v1185_v58, %v1164_v28  ;;  %v1362_v34 = vadd.f32 %v1358_v15, %v1326_v63  ;;  %v5632_v3 = vstv %s3951_s5  ;;  %v1431_v20 = vpop.permute.xlu0 %1430 }
 0x1e3   : > { %v1452_v47 = vmax.f32 %v1420_v45, %v1444_v59  ;;  %v1450_v12 = vsel %vm836_vm8, %v1441_v4, -inf  ;;  %v1427_v17 = vsel %vm831_vm6, %v1419_v36, -inf  ;;  %v5633_v60 = vmov %v5632_v3 }
 0x1e4   : > { %v4213_v56 = vadd.f32 %v5632_v3, %v1190_v32  ;;  %v4221_v48 = vadd.f32 %v5633_v60, %v1189_v29  ;;  %v1399_v0 = vadd.f32 %v1395_v21, %v1362_v34  ;;  %v1458_v25 = vmax.f32 %v1426_v53, %v1450_v12 }
 0x1e5   : > { %v4227_v24 = vmax.f32 %v3788_v37, %v1452_v47  ;;  %v1421_v41 = vsel %vm831_vm6, %v1407_v2, -inf  ;;  %v1451_v16 = vsel %vm836_vm8, %v1443_v54, -inf  ;;  %v5635_v57 = vand.u32 15, %v3982_v18 }
 0x1e6   : > { %1410 = vrot.lane.b32.xlu0 %v4213_v56, %s5634_s9  ;;  %1408 = vrot.lane.b32.xlu1 %v4221_v48, %s5634_s9  ;;  %v4236_v42 = vmax.f32 %v3729_v5, %v1458_v25  ;;  %v1459_v37 = vmax.f32 %v1427_v17, %v1451_v16  ;;  %v1445_v22 = vsel %vm836_vm8, %v1431_v20, -inf  ;;  %v1401_v18 = vstv %s4198_s4 }
 0x1e7   : > { %v4240_v14 = vadd.s32 1, %v5635_v57  ;;  %v1453_v50 = vmax.f32 %v1421_v41, %v1445_v22  ;;  %v1468_v62 = vrot.slane %v4227_v24, 7  ;;  %v1492_v36 = vrot.slane %v4227_v24, 1 }
 0x1e8   : > { %v1474_v30 = vrot.slane %v4236_v42, 7  ;;  %v4253_v5 = vmax.f32 %v3731_v6, %v1459_v37  ;;  %v4269_v4 = vadd.f32 %v1401_v18, %v1400_v35  ;;  %v1534_v58 = vstv %s4244_s10 }
 0x1e9   : > { %5636 = vst [vmem:[#allocation53_spill] sm:$0xff] %v4240_v14  ;;  %v4261_v38 = vmax.f32 %v3803_v39, %v1453_v50  ;;  %vm5518_vm0 = vcmp.lt.s32.totalorder %v4240_v14, 16  ;;  %v1537_v40 = vstv %s4258_s12  ;;  %v4303_v32 = vadd.f32 %v1401_v18, %v1399_v0 }
 0x1ea   : > { %1434 = vrot.lane.b32.xlu0 %v4213_v56, %s5637_s11  ;;  %1432 = vrot.lane.b32.xlu1 %v4221_v48, %s5637_s11  ;;  %v1475_v9 = vrot.slane %v4253_v5, 7  ;;  %v1499_v6 = vrot.slane %v4253_v5, 1  ;;  %v842_v45 = vadd.s32 16, %v3724_v1  ;;  %v846_v0 = vadd.s32 48, %v3724_v1 }
 0x1eb   : > { %v1493_v52 = vrot.slane %v4261_v38, 1  ;;  %v1469_v25 = vrot.slane %v4261_v38, 7 }
 0x1ec   : > { %v1476_v39 = vsel %vm1143_vm11, %v1474_v30, %v1475_v9  ;;  %v1483_v13 = vsel %vm1143_vm11, %v1475_v9, %v1468_v62  ;;  %v1507_v49 = vsel %vm1184_vm13, %v1499_v6, %v1492_v36  ;;  %v852_v29 = vand.u32 15, %v842_v45 }
 0x1ed   : > { %v1484_v61 = vsel %vm804_vm12, %v1483_v13, -inf  ;;  %v1515_v15 = vsel %vm5518_vm0, %v1507_v49, -inf  ;;  %v1506_v8 = vsel %vm1184_vm13, %v1492_v36, %v1493_v52  ;;  %v880_v22 = vand.u32 15, %v846_v0 }
 0x1ee   : > { %1414 = vrot.lane.b32.xlu1 %v4269_v4, %s5634_s9  ;;  %v1523_v46 = vmax.f32 %v1476_v39, %v1515_v15  ;;  %v1516_v33 = vmax.f32 %v1484_v61, %v1506_v8  ;;  %v4321_v17 = vadd.s32 4294967295, %v852_v29  ;;  %v1482_v50 = vsel %vm1143_vm11, %v1468_v62, %v1469_v25 }
 0x1ef   : > { %v845_v36 = vadd.s32 40, %v3724_v1  ;;  %v844_v39 = vadd.s32 32, %v3724_v1 }
 0x1f0   : > { %v1531_v28 = vmax.f32 %v4253_v5, %v1523_v46  ;;  %v1524_v31 = vmax.f32 %v4227_v24, %v1516_v33  ;;  %5640 = vst [vmem:[#allocation54_spill] sm:$0xff] %v4321_v17  ;;  %vm5468_vm5 = vcmp.ge.s32.totalorder %v4321_v17, 0  ;;  %v1498_v33 = vrot.slane %v4236_v42, 1 }
 0x1f2   : > { %1438 = vrot.lane.b32.xlu1 %v4269_v4, %s5637_s11  ;;  %v1536_v63 = vmul.f32 %v1534_v58, %v1531_v28  ;;  %1540 = vst [vmem:[%s4293_s25] sm:$0xff] %v1524_v31  ;;  %v843_v28 = vadd.s32 24, %v3724_v1 }
 0x1f4   : > { %v1539_v21 = vadd.f32 %v1537_v40, %v1536_v63 }
 0x1f6   : > { %1412 = vrot.lane.b32.xlu1 %v4303_v32, %s5634_s9  ;;  %1547 = vst [vmem:[%s4293_s25 + $0x38] sm:$0xff] %v1539_v21  ;;  %v873_v21 = vand.u32 15, %v845_v36 }
 0x1fa   : > { %1436 = vrot.lane.b32.xlu1 %v4303_v32, %s5637_s11 }
 0x258   : > { %v1411_v53 = vpop.permute.xlu0 %1410  ;;  %v1409_v2 = vpop.permute.xlu1 %1408 }
 0x259   : > { %v1423_v34 = vsel %vm831_vm6, %v1411_v53, -inf  ;;  %v1422_v3 = vsel %vm831_vm6, %v1409_v2, -inf  ;;  %v866_v2 = vand.u32 15, %v844_v39 }
 0x25b   : > { %v4377_v5 = vadd.s32 4294967295, %v866_v2 }
 0x25c   : > { %v1435_v35 = vpop.permute.xlu0 %1434  ;;  %v1433_v54 = vpop.permute.xlu1 %1432 }
 0x25d   : > { %v1447_v59 = vsel %vm836_vm8, %v1435_v35, -inf  ;;  %v1446_v12 = vsel %vm836_vm8, %v1433_v54, -inf  ;;  %v859_v35 = vand.u32 15, %v843_v28  ;;  %5643 = vst [vmem:[#allocation57_spill] sm:$0xff] %v4377_v5 }
 0x25e   : > { %v1455_v47 = vmax.f32 %v1423_v34, %v1447_v59  ;;  %v1454_v60 = vmax.f32 %v1422_v3, %v1446_v12  ;;  %v1500_v34 = vsel %vm1184_vm13, %v1498_v33, %v1499_v6  ;;  %v4367_v59 = vadd.s32 1, %v873_v21 }
 0x25f   : > { %v4381_v0 = vadd.s32 1, %v859_v35 }
 0x260   : > { %v4326_v24 = vmax.f32 %v4213_v56, %v1455_v47  ;;  %v4329_v41 = vmax.f32 %v4221_v48, %v1454_v60  ;;  %v1415_v16 = vpop.permute.xlu1 %1414  ;;  %5642 = vst [vmem:[#allocation56_spill] sm:$0xff] %v4367_v59  ;;  %vm959_vm4 = vcmp.lt.s32.totalorder %v4367_v59, 16 }
 0x261   : > { %v1425_v49 = vsel %vm831_vm6, %v1415_v16, -inf  ;;  %5644 = vst [vmem:[#allocation58_spill] sm:$0xff] %v4381_v0  ;;  %vm957_vm3 = vcmp.lt.s32.totalorder %v4381_v0, 16 }
 0x262   : > { %v1495_v20 = vrot.slane %v4326_v24, 1  ;;  %v1470_v57 = vrot.slane %v4329_v41, 7  ;;  %v1494_v37 = vrot.slane %v4329_v41, 1  ;;  %v1471_v16 = vrot.slane %v4326_v24, 7 }
 0x264   : > { %v1481_v56 = vsel %vm1143_vm11, %v1469_v25, %v1470_v57  ;;  %v1504_v48 = vsel %vm1184_vm13, %v1494_v37, %v1495_v20  ;;  %v1505_v18 = vsel %vm1184_vm13, %v1493_v52, %v1494_v37  ;;  %v1439_v9 = vpop.permute.xlu1 %1438  ;;  %v4353_v52 = vadd.s32 4294967295, %v880_v22 }
 0x265   : > { %v1486_v13 = vsel %vm5468_vm5, %v1481_v56, -inf  ;;  %v1509_v62 = vsel %vm815_vm14, %v1505_v18, -inf  ;;  %v1449_v61 = vsel %vm836_vm8, %v1439_v9, -inf }
 0x266   : > { %v1517_v15 = vmax.f32 %v1482_v50, %v1509_v62  ;;  %v1518_v8 = vmax.f32 %v1486_v13, %v1504_v48  ;;  %5641 = vst [vmem:[#allocation55_spill] sm:$0xff] %v4353_v52  ;;  %v1457_v46 = vmax.f32 %v1425_v49, %v1449_v61  ;;  %vm5469_vm5 = vcmp.ge.s32.totalorder %v4353_v52, 0 }
 0x268   : > { %v1525_v31 = vmax.f32 %v4261_v38, %v1517_v15  ;;  %v1526_v63 = vmax.f32 %v4329_v41, %v1518_v8  ;;  %v1465_v45 = vmax.f32 %v4269_v4, %v1457_v46  ;;  %v1413_v53 = vpop.permute.xlu1 %1412 }
 0x269   : > { %v1424_v47 = vsel %vm831_vm6, %v1413_v53, -inf }
 0x26a   : > { %1541 = vst [vmem:[%s4293_s25 + $0x8] sm:$0xff] %v1525_v31  ;;  %1542 = vst [vmem:[%s4293_s25 + $0x10] sm:$0xff] %v1526_v63  ;;  %v1473_v29 = vrot.slane %v1465_v45, 7  ;;  %v1497_v4 = vrot.slane %v1465_v45, 1 }
 0x26c   : > { %v1477_v38 = vsel %vm1143_vm11, %v1473_v29, %v1474_v30  ;;  %v1437_v54 = vpop.permute.xlu1 %1436  ;;  %v1501_v30 = vsel %vm1184_vm13, %v1497_v4, %v1498_v33 }
 0x26d   : > { %v1490_v3 = vsel %vm5469_vm5, %v1477_v38, -inf  ;;  %v1448_v6 = vsel %vm836_vm8, %v1437_v54, -inf  ;;  %vm928_vm5 = vcmp.ge.s32.totalorder %v4377_v5, 0  ;;  %v1513_v36 = vsel %vm959_vm4, %v1501_v30, -inf }
 0x26e   : > { %v1522_v12 = vmax.f32 %v1490_v3, %v1500_v34  ;;  %v1456_v60 = vmax.f32 %v1424_v47, %v1448_v6 }
 0x270   : > { %v1530_v25 = vmax.f32 %v4236_v42, %v1522_v12  ;;  %v1464_v41 = vmax.f32 %v4303_v32, %v1456_v60 }
 0x272   : > { %v1535_v37 = vmul.f32 %v1534_v58, %v1530_v25  ;;  %v1472_v22 = vrot.slane %v1464_v41, 7  ;;  %v1496_v50 = vrot.slane %v1464_v41, 1 }
 0x274   : > { %v1538_v56 = vadd.f32 %v1537_v40, %v1535_v37  ;;  %v1478_v42 = vsel %vm1143_vm11, %v1472_v22, %v1473_v29  ;;  %v1479_v32 = vsel %vm1143_vm11, %v1471_v16, %v1472_v22  ;;  %v1502_v58 = vsel %vm1184_vm13, %v1496_v50, %v1497_v4 }
 0x275   : > { %v1488_v48 = vsel %vm928_vm5, %v1479_v32, -inf  ;;  %v1503_v18 = vsel %vm1184_vm13, %v1495_v20, %v1496_v50  ;;  %v1521_v9 = vmax.f32 %v1478_v42, %v1513_v36  ;;  %v1480_v40 = vsel %vm1143_vm11, %v1470_v57, %v1471_v16 }
 0x276   : > { %1546 = vst [vmem:[%s4293_s25 + $0x30] sm:$0xff] %v1538_v56  ;;  %v1511_v39 = vsel %vm957_vm3, %v1503_v18, -inf  ;;  %v1520_v13 = vmax.f32 %v1488_v48, %v1502_v58 }
 0x277   : > { %v1519_v62 = vmax.f32 %v1480_v40, %v1511_v39  ;;  %v1529_v49 = vmax.f32 %v1465_v45, %v1521_v9 }
 0x278   : > { %v1528_v61 = vmax.f32 %v1464_v41, %v1520_v13 }
 0x279   : > { %v1527_v15 = vmax.f32 %v4326_v24, %v1519_v62  ;;  %1545 = vst [vmem:[%s4293_s25 + $0x28] sm:$0xff] %v1529_v49 }
 0x27a   : > { %1544 = vst [vmem:[%s4293_s25 + $0x20] sm:$0xff] %v1528_v61 }
 0x27b   : > { %1543 = vst [vmem:[%s4293_s25 + $0x18] sm:$0xff] %v1527_v15 }
 0x27c LB: >> { %s5646_s25 = sld [smem:[#allocation43_spill]]  ;;  %s4422_s30 = sshll.u32 %s3325_s26, 4  ;;  %vm5703_vm1 = vcmp.ge.s32.totalorder %v3943_v19, 0  ;;  %s3325_s26 = sphi %s4416_s26, %s1553_s26  }
 0x27d   : >> { %5647 = sst [smem:[#allocation59_spill]] %s3325_s26  ;;  %s1716_s17 = sadd.s32 8, %s4422_s30 }
 0x27e   : >> { %5648 = sst [smem:[#allocation60_spill]] %s4422_s30  ;;  %s4426_s28 = sshll.u32 %s3325_s26, 2 }
 0x27f   : >> { %5649 = sst [smem:[#allocation61_spill]] %s4426_s28  ;;  %s1721_s24 = sadd.s32 9, %s4422_s30 }
 0x280   : >> { %s1717_s6 = sld [smem:[#allocation12 + %s1716_s17]]  ;;  %s1728_s18 = sadd.s32 10, %s4422_s30 }
 0x281   : >> { %s1722_s22 = sld [smem:[#allocation12 + %s1721_s24]]  ;;  %s1735_s29 = sadd.s32 11, %s4422_s30 }
 0x282   : >> { %s4432_s23 = sadd.s32 2, %s4426_s28  ;;  %s1729_s3 = sld [smem:[#allocation12 + %s1728_s18]]  ;;  %v4435_v24 = vld [vmem:[%s5646_s25] sm:$0xff]  ;;  %v4438_v20 = vld [vmem:[%s5646_s25 + $0x8] sm:$0xff]  ;;  %v4441_v57 = vld [vmem:[%s5646_s25 + $0x10] sm:$0xff] }
 0x283   : >> { %5650 = sst [smem:[#allocation62_spill]] %s4432_s23  ;;  %v4447_v8 = vld [vmem:[%s5646_s25 + $0x18] sm:$0xff]  ;;  %s1595_s19 = sadd.s32 4, %s4422_s30  ;;  %v4451_v46 = vld [vmem:[%s5646_s25 + $0x20] sm:$0xff]  ;;  %v4454_v28 = vld [vmem:[%s5646_s25 + $0x28] sm:$0xff] }
 0x284   : >> { %s1736_s0 = sld [smem:[#allocation12 + %s1735_s29]]  ;;  %s1600_s8 = sadd.s32 5, %s4422_s30  ;;  %v4458_v31 = vld [vmem:[%s5646_s25 + $0x30] sm:$0xff]  ;;  %v4462_v45 = vld [vmem:[%s5646_s25 + $0x38] sm:$0xff] }
 0x285   : >> { %s4444_s1 = sld [smem:[#allocation13 + %s4432_s23]]  ;;  %5651 = vst [vmem:[#allocation63_spill] sm:$0xff] %v4462_v45  ;;  %s1607_s27 = sadd.s32 6, %s4422_s30 }
 0x286   : >> { %v1718_v33 = vstv %s1717_s6  ;;  %s1596_s2 = sld [smem:[#allocation12 + %s1595_s19]]  ;;  %s1614_s5 = sadd.s32 7, %s4422_s30 }
 0x287   : >> { %v1719_v63 = vmul.f32 %v1718_v33, %v4435_v24  ;;  %v1723_v21 = vstv %s1722_s22  ;;  %v1720_v53 = vmul.f32 %v1718_v33, %v4438_v20  ;;  %s1601_s21 = sld [smem:[#allocation12 + %s1600_s8]]  ;;  %s4483_s7 = sadd.s32 1, %s4426_s28 }
 0x288   : >> { %v1724_v2 = vmul.f32 %v1723_v21, %v4441_v57  ;;  %v1730_v29 = vstv %s1729_s3  ;;  %v1725_v35 = vmul.f32 %v1723_v21, %v4447_v8  ;;  %s1608_s20 = sld [smem:[#allocation12 + %s1607_s27]]  ;;  %s5472_s9 = smov 1  }
 0x289   : >> { %v1731_v34 = vmul.f32 %v1730_v29, %v4451_v46  ;;  %v1732_v4 = vmul.f32 %v1730_v29, %v4454_v28  ;;  %s4473_s4 = sld [smem:[#allocation12 + %s1614_s5]]  ;;  %s3351_s10 = smov 2  }
 0x28a   : >> { %v1737_v38 = vstv %s1736_s0  ;;  %v1726_v54 = vadd.f32 %v1724_v2, %v1719_v63  ;;  %v1727_v47 = vadd.f32 %v1725_v35, %v1720_v53  ;;  %5652 = sst [smem:[#allocation64_spill]] %s4483_s7  ;;  %s5470_s12 = smov 127  }
 0x28b   : >> { %v1738_v3 = vmul.f32 %v1737_v38, %v4458_v31  ;;  %v1739_v6 = vmul.f32 %v1737_v38, %v4462_v45  ;;  %v1742_v25 = vstv %s4444_s1  ;;  %s1594_s11 = sld [smem:[#allocation13 + %s4483_s7]]  ;;  %s3353_s13 = smov 126  }
 0x28c   : >> { %v1733_v12 = vadd.f32 %v1731_v34, %v1726_v54  ;;  %v1734_v60 = vadd.f32 %v1732_v4, %v1727_v47  ;;  %v1597_v30 = vstv %s1596_s2  ;;  %s1569_s14 = sadd.s32 1, %s4422_s30  ;;  %s1565_s15 = sld [smem:[#allocation12 + %s4422_s30]] }
 0x28d   : >> { %v1599_v41 = vmul.f32 %v1597_v30, %v4438_v20  ;;  %v1602_v16 = vstv %s1601_s21  ;;  %v1598_v37 = vmul.f32 %v1597_v30, %v4435_v24  ;;  %s1570_s16 = sld [smem:[#allocation12 + %s1569_s14]]  ;;  %s1576_s17 = sadd.s32 2, %s4422_s30 }
 0x28e   : >> { %v1740_v22 = vadd.f32 %v1738_v3, %v1733_v12  ;;  %v1741_v50 = vadd.f32 %v1739_v6, %v1734_v60  ;;  %v1604_v36 = vmul.f32 %v1602_v16, %v4447_v8  ;;  %v1609_v56 = vstv %s1608_s20  ;;  %s1577_s24 = sld [smem:[#allocation12 + %s1576_s17]]  ;;  %s1583_s6 = sadd.s32 3, %s4422_s30 }
 0x28f   : >> { %v1603_v42 = vmul.f32 %v1602_v16, %v4441_v57  ;;  %v1611_v58 = vmul.f32 %v1609_v56, %v4454_v28  ;;  %v1610_v48 = vmul.f32 %v1609_v56, %v4451_v46  ;;  %v1616_v40 = vstv %s4473_s4  ;;  %s1584_s18 = sld [smem:[#allocation12 + %s1583_s6]]  ;;  %s4573_s29 = smul.u32 25, %s3325_s26 }
 0x290   : >> { %v4480_v32 = vadd.f32 %v1742_v25, %v1740_v22  ;;  %v4490_v18 = vadd.f32 %v1742_v25, %v1741_v50  ;;  %v1606_v9 = vadd.f32 %v1604_v36, %v1599_v41  ;;  %v1618_v13 = vmul.f32 %v1616_v40, %v4462_v45  ;;  %s1563_s22 = sld [smem:[#allocation13 + %s4426_s28]] }
 0x291   : >> { %v1605_v39 = vadd.f32 %v1603_v42, %v1598_v37  ;;  %v1617_v61 = vmul.f32 %v1616_v40, %v4458_v31  ;;  %v1621_v63 = vstv %s1594_s11  ;;  %s1776_s3 = sadd.s32 1, %s4573_s29  ;;  %s1815_s0 = sadd.s32 6, %s4573_s29 }
 0x292   : >> { %1753 = vrot.lane.b32.xlu1 %v4480_v32, %s5472_s9  ;;  %1747 = vrot.lane.b32.xlu0 %v4480_v32, %s3351_s10  ;;  %v1613_v62 = vadd.f32 %v1611_v58, %v1606_v9  ;;  %v1566_v2 = vstv %s1565_s15  ;;  %s1856_s1 = sadd.s32 11, %s4573_s29  ;;  %s4578_s19 = sld [smem:[#allocation16 + %s1776_s3]] }
 0x293   : >> { %v1612_v49 = vadd.f32 %v1610_v48, %v1605_v39  ;;  %v1571_v29 = vstv %s1570_s16  ;;  %v1567_v35 = vmul.f32 %v1566_v2, %v4435_v24  ;;  %v1568_v12 = vmul.f32 %v1566_v2, %v4438_v20  ;;  %s1891_s2 = sadd.s32 16, %s4573_s29  ;;  %s4581_s8 = sld [smem:[#allocation16 + %s1815_s0]] }
 0x294   : >> { %v1620_v15 = vadd.f32 %v1618_v13, %v1613_v62  ;;  %v1572_v34 = vmul.f32 %v1571_v29, %v4441_v57  ;;  %v1578_v38 = vstv %s1577_s24  ;;  %v1573_v60 = vmul.f32 %v1571_v29, %v4447_v8  ;;  %s1932_s21 = sadd.s32 21, %s4573_s29  ;;  %s4584_s27 = sld [smem:[#allocation16 + %s1856_s1]] }
 0x295   : >> { %v1619_v33 = vadd.f32 %v1617_v61, %v1612_v49  ;;  %v1579_v54 = vmul.f32 %v1578_v38, %v4451_v46  ;;  %v1585_v3 = vstv %s1584_s18  ;;  %v1580_v41 = vmul.f32 %v1578_v38, %v4454_v28  ;;  %s1810_s20 = sadd.s32 5, %s4573_s29  ;;  %s4587_s5 = sld [smem:[#allocation16 + %s1891_s2]] }
 0x296   : >> { %1755 = vrot.lane.b32.xlu1 %v4490_v18, %s5472_s9  ;;  %1749 = vrot.lane.b32.xlu0 %v4490_v18, %s3351_s10  ;;  %v4505_v21 = vadd.f32 %v1621_v63, %v1620_v15  ;;  %v1574_v4 = vadd.f32 %v1572_v34, %v1567_v35  ;;  %v1586_v47 = vmul.f32 %v1585_v3, %v4458_v31  ;;  %v1590_v16 = vstv %s1563_s22  ;;  %s1851_s4 = sadd.s32 10, %s4573_s29  ;;  %s4590_s10 = sld [smem:[#allocation16 + %s1932_s21]] }
 0x297   : >> { %v4507_v53 = vadd.f32 %v1621_v63, %v1619_v33  ;;  %v1575_v25 = vadd.f32 %v1573_v60, %v1568_v12  ;;  %v1587_v50 = vmul.f32 %v1585_v3, %v4462_v45  ;;  %s1886_s11 = sadd.s32 15, %s4573_s29  ;;  %s1927_s14 = sadd.s32 20, %s4573_s29 }
 0x298   : >> { %v1581_v6 = vadd.f32 %v1579_v54, %v1574_v4  ;;  %s4597_s15 = sld [smem:[#allocation16 + %s1810_s20]]  ;;  %s1783_s16 = sadd.s32 2, %s4573_s29  ;;  %v5496_v42 = vstv %s4578_s19 }
 0x299   : >> { %v1582_v22 = vadd.f32 %v1580_v41, %v1575_v25  ;;  %s4600_s17 = sld [smem:[#allocation16 + %s1851_s4]]  ;;  %s1790_s24 = sadd.s32 3, %s4573_s29  ;;  %v5497_v58 = vstv %s4581_s8  ;;  %v5670_v17 = vstv %s4581_s8 }
 0x29a   : >> { %1761 = vrot.lane.b32.xlu1 %v4490_v18, %s5470_s12  ;;  %1759 = vrot.lane.b32.xlu0 %v4480_v32, %s5470_s12  ;;  %v1588_v30 = vadd.f32 %v1586_v47, %v1581_v6  ;;  %s4603_s6 = sld [smem:[#allocation16 + %s1886_s11]]  ;;  %s1822_s18 = sadd.s32 7, %s4573_s29  ;;  %v5498_v48 = vstv %s4584_s27  ;;  %v5671_v27 = vstv %s4584_s27 }
 0x29b   : >> { %v1589_v36 = vadd.f32 %v1587_v50, %v1582_v22  ;;  %5654 = sst [smem:[#allocation66_spill]] %s4587_s5  ;;  %s1829_s3 = sadd.s32 8, %s4573_s29  ;;  %v5504_v9 = vstv %s4587_s5 }
 0x29c   : >> { %v4553_v37 = vadd.f32 %v1590_v16, %v1588_v30  ;;  %5655 = sst [smem:[#allocation67_spill]] %s4590_s10  ;;  %s1863_s1 = sadd.s32 12, %s4573_s29  ;;  %v5506_v40 = vstv %s4590_s10 }
 0x29d   : >> { %v4564_v56 = vadd.f32 %v1590_v16, %v1589_v36  ;;  %s4606_s22 = sld [smem:[#allocation16 + %s1927_s14]]  ;;  %s1870_s21 = sadd.s32 13, %s4573_s29 }
 0x29e   : >> { %1767 = vrot.lane.b32.xlu1 %v4490_v18, %s3353_s13  ;;  %1765 = vrot.lane.b32.xlu0 %v4480_v32, %s3353_s13  ;;  %5653 = vst [vmem:[#allocation65_spill] sm:$0xff] %v4553_v37  ;;  %s4594_s13 = sld [smem:[#allocation16 + %s4573_s29]]  ;;  %s1898_s4 = sadd.s32 17, %s4573_s29  ;;  %v5500_v13 = vstv %s4597_s15 }
 0x29f   : >> { %s4609_s0 = sld [smem:[#allocation16 + %s1783_s16]]  ;;  %s1946_s16 = sadd.s32 23, %s4573_s29  ;;  %v5502_v49 = vstv %s4600_s17 }
 0x2a0   : >> { %s4612_s2 = sld [smem:[#allocation16 + %s1790_s24]]  ;;  %s1797_s24 = sadd.s32 4, %s4573_s29  ;;  %v1888_v61 = vstv %s4603_s6 }
 0x2a1   : >> { %s4615_s20 = sld [smem:[#allocation16 + %s1822_s18]]  ;;  %s1836_s28 = sadd.s32 9, %s4573_s29 }
 0x2a2   : >> { %1628 = vrot.lane.b32.xlu1 %v4505_v21, %s5472_s9  ;;  %1626 = vrot.lane.b32.xlu0 %v4507_v53, %s5472_s9  ;;  %s4618_s11 = sld [smem:[#allocation16 + %s1829_s3]]  ;;  %s1877_s30 = sadd.s32 14, %s4573_s29 }
 0x2a3   : >> { %s4621_s14 = sld [smem:[#allocation16 + %s1863_s1]]  ;;  %s4639_s3 = smul.u32 9, %s3325_s26 }
 0x2a4   : >> { %s4624_s25 = sld [smem:[#allocation16 + %s1870_s21]]  ;;  %v5499_v39 = vstv %s4594_s13 }
 0x2a5   : >> { %s4627_s23 = sld [smem:[#allocation16 + %s1898_s4]]  ;;  %s1643_s26 = sadd.s32 1, %s4639_s3  ;;  %v1785_v62 = vstv %s4609_s0 }
 0x2a6   : >> { %1634 = vrot.lane.b32.xlu1 %v4505_v21, %s5470_s12  ;;  %1632 = vrot.lane.b32.xlu0 %v4507_v53, %s5470_s12  ;;  %5656 = sst [smem:[#allocation68_spill]] %s4612_s2  ;;  %v4687_v2 = vmul.f32 %v1785_v62, %v4490_v18  ;;  %s1696_s0 = sadd.s32 8, %s4639_s3  ;;  %v4698_v54 = vmul.f32 %v1785_v62, %v4480_v32 }
 0x2a7   : >> { %s4636_s2 = sld [smem:[#allocation16 + %s1946_s16]]  ;;  %v1824_v15 = vstv %s4615_s20 }
 0x2a8   : >> { %s4641_s1 = sld [smem:[#allocation16 + %s1797_s24]]  ;;  %s1668_s24 = sadd.s32 4, %s4639_s3  ;;  %v4693_v34 = vmul.f32 %v1824_v15, %v4490_v18  ;;  %v4707_v6 = vmul.f32 %v1824_v15, %v4480_v32 }
 0x2a9   : >> { %s4644_s21 = sld [smem:[#allocation16 + %s1836_s28]]  ;;  %v1865_v33 = vstv %s4621_s14 }
 0x2aa   : >> { %1983 = vrot.lane.b32.xlu1 %v4435_v24, %s5472_s9  ;;  %1985 = vrot.lane.b32.xlu0 %v4438_v20, %s5472_s9  ;;  %s4647_s4 = sld [smem:[#allocation16 + %s1877_s30]]  ;;  %s1663_s30 = sadd.s32 3, %s4639_s3  ;;  %v4703_v3 = vmul.f32 %v1865_v33, %v4490_v18  ;;  %v4710_v12 = vmul.f32 %v1865_v33, %v4480_v32 }
 0x2ab   : >> { %s4659_s28 = sld [smem:[#allocation15 + %s1643_s26]]  ;;  %v1900_v35 = vstv %s4627_s23 }
 0x2ac   : >> { %s4675_s26 = sld [smem:[#allocation15 + %s1663_s30]]  ;;  %v4715_v60 = vmul.f32 %v1900_v35, %v4490_v18  ;;  %v4722_v41 = vmul.f32 %v1900_v35, %v4480_v32 }
 0x2ad   : >> { %5658 = sst [smem:[#allocation70_spill]] %s4636_s2 }
 0x2ae   : >> { %1987 = vrot.lane.b32.xlu1 %v4441_v57, %s5472_s9  ;;  %1989 = vrot.lane.b32.xlu0 %v4447_v8, %s5472_s9  ;;  %5659 = sst [smem:[#allocation71_spill]] %s4641_s1 }
 0x2af   : >> { %s4656_s1 = sld [smem:[#allocation15 + %s4639_s3]] }
 0x2b0   : >> { %s5663_s30 = sld [smem:[#allocation70_spill]] }
 0x2b1   : >> { %s5664_s20 = sld [smem:[#allocation71_spill]]  ;;  %v1645_v50 = vstv %s4659_s28 }
 0x2b2   : >> { %1991 = vrot.lane.b32.xlu1 %v4451_v46, %s5472_s9  ;;  %2027 = vrot.lane.b32.xlu0 %v4438_v20, %s5470_s12  ;;  %s5666_s28 = sld [smem:[#allocation66_spill]] }
 0x2b5   : >> { %5660 = sst [smem:[#allocation72_spill]] %s4656_s1 }
 0x2b6   : >> { %2025 = vrot.lane.b32.xlu1 %v4435_v24, %s5470_s12  ;;  %2031 = vrot.lane.b32.xlu0 %v4447_v8, %s5470_s12 }
 0x2b8   : >> { %v5672_v26 = vstv %s5666_s28 }
 0x2ba   : >> { %2029 = vrot.lane.b32.xlu1 %v4441_v57, %s5470_s12  ;;  %1993 = vrot.lane.b32.xlu0 %v4454_v28, %s5472_s9 }
 0x2be   : >> { %2033 = vrot.lane.b32.xlu1 %v4451_v46, %s5470_s12  ;;  %2035 = vrot.lane.b32.xlu0 %v4454_v28, %s5470_s12 }
 0x2c2   : >> { %1995 = vrot.lane.b32.xlu1 %v4458_v31, %s5472_s9  ;;  %1971 = vrot.lane.b32.xlu0 %v4553_v37, %s5472_s9 }
 0x2c6   : >> { %2037 = vrot.lane.b32.xlu1 %v4458_v31, %s5470_s12  ;;  %2013 = vrot.lane.b32.xlu0 %v4553_v37, %s5470_s12 }
 0x2ca   : >> { %1997 = vrot.lane.b32.xlu1 %v4462_v45, %s5472_s9  ;;  %1973 = vrot.lane.b32.xlu0 %v4564_v56, %s5472_s9  ;;  %s1939_s9 = sadd.s32 22, %s4573_s29 }
 0x2cb   : >> { %s4633_s18 = sld [smem:[#allocation16 + %s1939_s9]]  ;;  %s1953_s9 = sadd.s32 24, %s4573_s29 }
 0x2cc   : >> { %s4652_s2 = sld [smem:[#allocation16 + %s1953_s9]] }
 0x2cd   : >> { %s5661_s9 = sld [smem:[#allocation68_spill]] }
 0x2ce   : >> { %2039 = vrot.lane.b32.xlu1 %v4462_v45, %s5470_s12  ;;  %s1905_s12 = sadd.s32 18, %s4573_s29  ;;  %v5679_v45 = vstv %s4618_s11 }
 0x2cf   : >> { %s4630_s7 = sld [smem:[#allocation16 + %s1905_s12]]  ;;  %s1912_s12 = sadd.s32 19, %s4573_s29 }
 0x2d0   : >> { %s4649_s16 = sld [smem:[#allocation16 + %s1912_s12]]  ;;  %s1684_s12 = sadd.s32 6, %s4639_s3 }
 0x2d1   : >> { %s4662_s29 = sld [smem:[#allocation15 + %s1668_s24]]  ;;  %s1650_s24 = sadd.s32 2, %s4639_s3  ;;  %v1941_v4 = vstv %s4633_s18 }
 0x2d2   : >> { %s4682_s5 = sld [smem:[#allocation15 + %s1684_s12]]  ;;  %v4719_v25 = vmul.f32 %v1941_v4, %v4490_v18  ;;  %v4728_v22 = vmul.f32 %v1941_v4, %v4480_v32  ;;  %v4742_v4 = vmul.f32 %v1645_v50, %v4505_v21  ;;  %v4748_v18 = vmul.f32 %v1645_v50, %v4507_v53 }
 0x2d3   : >> { %s4700_s14 = sld [smem:[#allocation15 + %s1650_s24]] }
 0x2d4   : >> { %s5665_s18 = sld [smem:[#allocation72_spill]] }
 0x2d5   : >> { %5657 = sst [smem:[#allocation69_spill]] %s4630_s7  ;;  %s1689_s7 = sadd.s32 7, %s4639_s3 }
 0x2d6   : >> { %s4669_s1 = sld [smem:[#allocation15 + %s1689_s7]]  ;;  %s1675_s7 = sadd.s32 5, %s4639_s3 }
 0x2d7   : >> { %s5662_s10 = sld [smem:[#allocation69_spill]]  ;;  %v1670_v36 = vstv %s4662_s29 }
 0x2d8   : >> { %s4712_s23 = sld [smem:[#allocation15 + %s1675_s7]]  ;;  %v4745_v33 = vmul.f32 %v1670_v36, %v4505_v21  ;;  %v4758_v47 = vmul.f32 %v1670_v36, %v4507_v53 }
 0x2d9   : >> { %s4724_s3 = sld [smem:[#allocation15 + %s1696_s0]] }
 0x2da   : >> { %s5667_s29 = sld [smem:[#allocation67_spill]] }
 0x2db   : >> { %s5740_s24 = sld [smem:[#allocation62_spill]] }
 0x2dc   : >> { %v1691_v30 = vstv %s4669_s1 }
 0x2dd   : >> { %v4755_v32 = vmul.f32 %v1691_v30, %v4505_v21 }
 0x2e0   : >> { %v5673_v23 = vstv %s5667_s29 }
 0x304   : >> { %v1754_v29 = vpop.permute.xlu1 %1753  ;;  %v1748_v16 = vpop.permute.xlu0 %1747 }
 0x305   : >> { %v1757_v38 = vsel %vm831_vm6, %v1754_v29, 0.0  ;;  %v1751_v35 = vsel %vm827_vm7, %v1748_v16, 0.0  ;;  %v4767_v29 = vmul.f32 %v1691_v30, %v4507_v53 }
 0x306   : >> { %v1779_v15 = vmul.f32 %v5496_v42, %v1757_v38  ;;  %v1818_v50 = vmul.f32 %v5497_v58, %v1757_v38  ;;  %v1859_v62 = vmul.f32 %v5498_v48, %v1757_v38  ;;  %v1774_v16 = vmul.f32 %v5499_v39, %v1751_v35 }
 0x307   : >> { %v1813_v21 = vmul.f32 %v5500_v13, %v1751_v35  ;;  %v1854_v36 = vmul.f32 %v5502_v49, %v1751_v35  ;;  %v1894_v42 = vmul.f32 %v5504_v9, %v1757_v38  ;;  %v1935_v58 = vmul.f32 %v5506_v40, %v1757_v38 }
 0x308   : >> { %v1756_v48 = vpop.permute.xlu1 %1755  ;;  %v1750_v53 = vpop.permute.xlu0 %1749  ;;  %v1781_v13 = vadd.f32 %v1779_v15, %v1774_v16  ;;  %v1889_v0 = vmul.f32 %v1888_v61, %v1751_v35  ;;  %v5668_v49 = vstv %s4606_s22  ;;  %v5669_v38 = vstv %s4578_s19 }
 0x309   : >> { %v1930_v59 = vmul.f32 %v5668_v49, %v1751_v35  ;;  %v1758_v63 = vsel %vm831_vm6, %v1756_v48, 0.0  ;;  %v1820_v9 = vadd.f32 %v1818_v50, %v1813_v21  ;;  %v1861_v5 = vadd.f32 %v1859_v62, %v1854_v36 }
 0x30a   : >> { %v1780_v40 = vmul.f32 %v5669_v38, %v1758_v63  ;;  %v1819_v52 = vmul.f32 %v5670_v17, %v1758_v63  ;;  %v1860_v30 = vmul.f32 %v5671_v27, %v1758_v63  ;;  %v1895_v39 = vmul.f32 %v5672_v26, %v1758_v63 }
 0x30b   : >> { %v1936_v15 = vmul.f32 %v5673_v23, %v1758_v63  ;;  %v1752_v16 = vsel %vm827_vm7, %v1750_v53, 0.0  ;;  %v5674_v49 = vstv %s4594_s13  ;;  %v5675_v48 = vstv %s4597_s15  ;;  %s5713_s13 = smov 127   ;;  %s5714_s15 = sld [smem:[#allocation60_spill]] }
 0x30c   : >> { %v1775_v35 = vmul.f32 %v5674_v49, %v1752_v16  ;;  %v1814_v50 = vmul.f32 %v5675_v48, %v1752_v16  ;;  %v5676_v62 = vstv %s4600_s17  ;;  %v1890_v17 = vmul.f32 %v1888_v61, %v1752_v16  ;;  %v1762_v36 = vpop.permute.xlu1 %1761  ;;  %v1760_v27 = vpop.permute.xlu0 %1759 }
 0x30d   : >> { %v1855_v21 = vmul.f32 %v5676_v62, %v1752_v16  ;;  %v1896_v38 = vadd.f32 %v1894_v42, %v1889_v0  ;;  %v5677_v26 = vstv %s4606_s22  ;;  %v1764_v23 = vsel %vm836_vm8, %v1762_v36, 0.0 }
 0x30e   : >> { %v1931_v14 = vmul.f32 %v5677_v26, %v1752_v16  ;;  %v1763_v63 = vsel %vm836_vm8, %v1760_v27, 0.0  ;;  %v1782_v53 = vadd.f32 %v1780_v40, %v1775_v35  ;;  %v1821_v49 = vadd.f32 %v1819_v52, %v1814_v50 }
 0x30f   : >> { %v1862_v48 = vadd.f32 %v1860_v30, %v1855_v21  ;;  %v1897_v62 = vadd.f32 %v1895_v39, %v1890_v17  ;;  %v5678_v61 = vstv %s5661_s9  ;;  %v1833_v0 = vmul.f32 %v5679_v45, %v1764_v23 }
 0x310   : >> { %v1938_v44 = vadd.f32 %v1936_v15, %v1931_v14  ;;  %v1794_v37 = vmul.f32 %v5678_v61, %v1764_v23  ;;  %v5680_v42 = vstv %s4624_s25  ;;  %v1789_v26 = vadd.f32 %v4687_v2, %v1782_v53  ;;  %v1768_v52 = vpop.permute.xlu1 %1767  ;;  %s5701_s25 = sld [smem:[#allocation59_spill]] }
 0x311   : >> { %v1874_v16 = vmul.f32 %v5680_v42, %v1764_v23  ;;  %v1828_v36 = vadd.f32 %v4693_v34, %v1821_v49  ;;  %v1869_v27 = vadd.f32 %v4703_v3, %v1862_v48  ;;  %v1904_v40 = vadd.f32 %v4715_v60, %v1897_v62  ;;  %s2197_s17 = sadd.s32 12, %s5714_s15  ;;  %s2202_s6 = sadd.s32 13, %s5714_s15 }
 0x312   : >> { %v5681_v30 = vstv %s5662_s10  ;;  %v1945_v39 = vadd.f32 %v4719_v25, %v1938_v44  ;;  %v5682_v15 = vstv %s5663_s30  ;;  %v5683_v35 = vmov %v5678_v61  ;;  %s5712_s10 = smov 1   ;;  %s5079_s22 = sld [smem:[#allocation12 + %s2197_s17]] }
 0x313   : >> { %v1909_v14 = vmul.f32 %v5681_v30, %v1764_v23  ;;  %v1950_v45 = vmul.f32 %v5682_v15, %v1764_v23  ;;  %v1793_v50 = vmul.f32 %v5683_v35, %v1763_v63  ;;  %v1937_v2 = vadd.f32 %v1935_v58, %v1930_v59  ;;  %v1766_v58 = vpop.permute.xlu0 %1765  ;;  %s5343_s30 = sld [smem:[#allocation19 + %s5740_s24]] }
 0x314   : >> { %v1796_v21 = vadd.f32 %v1794_v37, %v1789_v26  ;;  %v1835_v17 = vadd.f32 %v1833_v0, %v1828_v36  ;;  %v1788_v34 = vadd.f32 %v4698_v54, %v1781_v13  ;;  %v1876_v3 = vadd.f32 %v1874_v16, %v1869_v27 }
 0x315   : >> { %v1911_v60 = vadd.f32 %v1909_v14, %v1904_v40  ;;  %v1827_v53 = vadd.f32 %v4707_v6, %v1820_v9  ;;  %v5684_v49 = vstv %s4618_s11  ;;  %v1952_v44 = vadd.f32 %v1950_v45, %v1945_v39  ;;  %v1629_v40 = vpop.permute.xlu1 %1628  ;;  %s2209_s11 = sadd.s32 14, %s5714_s15 }
 0x316   : >> { %v1832_v48 = vmul.f32 %v5684_v49, %v1763_v63  ;;  %v1795_v25 = vadd.f32 %v1793_v50, %v1788_v34  ;;  %v5685_v23 = vmov %v5680_v42  ;;  %v5686_v59 = vmov %v5681_v30  ;;  %s4898_s19 = sshll.u32 %s5701_s25, 1  ;;  %s5112_s1 = sld [smem:[#allocation12 + %s2209_s11]] }
 0x317   : >> { %v1873_v62 = vmul.f32 %v5685_v23, %v1763_v63  ;;  %v1908_v37 = vmul.f32 %v5686_v59, %v1763_v63  ;;  %v1868_v13 = vadd.f32 %v4710_v12, %v1861_v5  ;;  %v1903_v54 = vadd.f32 %v4722_v41, %v1896_v38  ;;  %s4908_s8 = sld [smem:[#allocation18 + %s4898_s19]]  ;;  %s1745_s27 = sadd.s32 1, %s4898_s19 }
 0x318   : >> { %v5687_v61 = vmov %v5682_v15  ;;  %v1770_v9 = vsel %vm840_vm9, %v1768_v52, 0.0  ;;  %v1834_v6 = vadd.f32 %v1832_v48, %v1827_v53  ;;  %v1944_v42 = vadd.f32 %v4728_v22, %v1937_v2 }
 0x319   : >> { %v1949_v0 = vmul.f32 %v5687_v61, %v1763_v63  ;;  %v5688_v16 = vstv %s5664_s20  ;;  %v5689_v36 = vstv %s4644_s21  ;;  %v1875_v30 = vadd.f32 %v1873_v62, %v1868_v13  ;;  %v1627_v62 = vpop.permute.xlu0 %1626  ;;  %s2216_s21 = sadd.s32 15, %s5714_s15  ;;  %s5393_s15 = sld [smem:[#allocation25 + %s1745_s27]] }
 0x31a   : >> { %v1801_v26 = vmul.f32 %v5688_v16, %v1770_v9  ;;  %v1840_v27 = vmul.f32 %v5689_v36, %v1770_v9  ;;  %v5690_v5 = vstv %s4647_s4  ;;  %v5691_v41 = vstv %s4649_s16  ;;  %s5723_s4 = sld [smem:[#allocation61_spill]] }
 0x31b   : >> { %v1881_v12 = vmul.f32 %v5690_v5, %v1770_v9  ;;  %v1916_v38 = vmul.f32 %v5691_v41, %v1770_v9  ;;  %v5692_v63 = vstv %s4652_s2  ;;  %v1910_v52 = vadd.f32 %v1908_v37, %v1903_v54  ;;  %s5088_s2 = sld [smem:[#allocation12 + %s2202_s6]] }
 0x31c   : >> { %v1957_v14 = vmul.f32 %v5692_v63, %v1770_v9  ;;  %v1803_v39 = vadd.f32 %v1801_v26, %v1796_v21  ;;  %v1842_v15 = vadd.f32 %v1840_v27, %v1835_v17  ;;  %v1769_v22 = vsel %vm840_vm9, %v1766_v58, 0.0  ;;  %s5127_s16 = sld [smem:[#allocation12 + %s2216_s21]] }
 0x31d   : >> { %v1951_v45 = vadd.f32 %v1949_v0, %v1944_v42  ;;  %v4858_v35 = vadd.f32 %v1916_v38, %v1911_v60  ;;  %v5693_v50 = vmov %v5688_v16  ;;  %v1631_v34 = vsel %vm831_vm6, %v1629_v40, 0.0 }
 0x31e   : >> { %v1800_v2 = vmul.f32 %v5693_v50, %v1769_v22  ;;  %v1883_v53 = vadd.f32 %v1881_v12, %v1876_v3  ;;  %v4864_v49 = vadd.f32 %v1957_v14, %v1952_v44  ;;  %v5694_v48 = vmov %v5689_v36 }
 0x31f   : >> { %v1839_v21 = vmul.f32 %v5694_v48, %v1769_v22  ;;  %v5695_v17 = vmov %v5690_v5  ;;  %v1805_v59 = vrot.slane %v1803_v39, 6  ;;  %v5696_v58 = vmov %v5691_v41  ;;  %v1635_v41 = vpop.permute.xlu1 %1634 }
 0x320   : >> { %v1880_v23 = vmul.f32 %v5695_v17, %v1769_v22  ;;  %v1802_v37 = vadd.f32 %v1800_v2, %v1795_v25  ;;  %v1915_v13 = vmul.f32 %v5696_v58, %v1769_v22  ;;  %v5697_v60 = vmov %v5692_v63  ;;  %s5148_s12 = sadd.s32 3, %s5723_s4  ;;  %s5337_s7 = sld [smem:[#allocation19 + %s5723_s4]] }
 0x321   : >> { %v1956_v54 = vmul.f32 %v5697_v60, %v1769_v22  ;;  %v1844_v61 = vrot.slane %v1842_v15, 7  ;;  %v1841_v0 = vadd.f32 %v1839_v21, %v1834_v6  ;;  %v5698_v9 = vstv %s5665_s18  ;;  %s5176_s9 = sld [smem:[#allocation13 + %s5148_s12]] }
 0x322   : >> { %v1642_v42 = vmul.f32 %v5698_v9, %v1631_v34  ;;  %v5699_v16 = vstv %s4675_s26  ;;  %v1920_v44 = vrot.slane %v4858_v35, 1  ;;  %v1804_v26 = vrot.slane %v1802_v37, 6  ;;  %v1633_v35 = vpop.permute.xlu0 %1632  ;;  %s5739_s26 = sld [smem:[#allocation64_spill]] }
 0x323   : >> { %v1667_v3 = vmul.f32 %v5699_v16, %v1631_v34  ;;  %v1917_v36 = vadd.f32 %v1915_v13, %v1910_v52  ;;  %v5700_v27 = vstv %s4682_s5  ;;  %v1843_v5 = vrot.slane %v1841_v0, 7  ;;  %s4939_s5 = sld [smem:[#allocation18 + %s1745_s27]] }
 0x324   : >> { %v1688_v40 = vmul.f32 %v5700_v27, %v1631_v34  ;;  %v1882_v25 = vadd.f32 %v1880_v23, %v1875_v30  ;;  %v4881_v12 = vadd.f32 %v1956_v54, %v1951_v45  ;;  %v1630_v6 = vsel %vm831_vm6, %v1627_v62, 0.0  ;;  %s5346_s20 = sld [smem:[#allocation19 + %s5148_s12]] }
 0x325   : >> { %v1806_v38 = vsel %vm1257_vm10, %v1804_v26, %v1805_v59  ;;  %v1807_v63 = vsel %vm1257_vm10, %v1805_v59, %v1804_v26  ;;  %v1649_v14 = vadd.f32 %v4742_v4, %v1642_v42  ;;  %v1674_v30 = vadd.f32 %v4745_v33, %v1667_v3  ;;  %s5357_s18 = sld [smem:[#allocation21 + %s5701_s25]] }
 0x326   : >> { %v1845_v52 = vsel %vm1143_vm11, %v1843_v5, %v1844_v61  ;;  %v1846_v39 = vsel %vm1143_vm11, %v1844_v61, %v1843_v5  ;;  %v1919_v15 = vrot.slane %v1917_v36, 1  ;;  %v5702_v22 = vmov %v5698_v9  ;;  %s5363_s28 = sld [smem:[#allocation24 + %s5148_s12]] }
 0x327   : >> { %v1641_v45 = vmul.f32 %v5702_v22, %v1630_v6  ;;  %v1808_v4 = vsel %vm5703_vm1, %v1807_v63, 0.0  ;;  %v1695_v33 = vadd.f32 %v4755_v32, %v1688_v40  ;;  %v5704_v50 = vmov %v5700_v27  ;;  %s5367_s29 = sld [smem:[#allocation22 + %s5723_s4]] }
 0x328   : >> { %v1687_v2 = vmul.f32 %v5704_v50, %v1630_v6  ;;  %v1637_v34 = vsel %vm836_vm8, %v1635_v41, 0.0  ;;  %v1847_v48 = vsel %vm804_vm12, %v1846_v39, 0.0  ;;  %v5705_v21 = vmov %v5699_v16  ;;  %s5340_s0 = sld [smem:[#allocation19 + %s5739_s26]] }
 0x329   : >> { %v1666_v17 = vmul.f32 %v5705_v21, %v1630_v6  ;;  %v5706_v23 = vstv %s4700_s14  ;;  %v5707_v59 = vstv %s4724_s3  ;;  %v1648_v32 = vadd.f32 %v4748_v18, %v1641_v45  ;;  %s5349_s14 = sld [smem:[#allocation22 + %s5739_s26]] }
 0x32a   : >> { %v1654_v62 = vmul.f32 %v5706_v23, %v1637_v34  ;;  %v1700_v37 = vmul.f32 %v5707_v59, %v1637_v34  ;;  %v5708_v58 = vstv %s4712_s23  ;;  %v1636_v60 = vsel %vm836_vm8, %v1633_v35, 0.0  ;;  %s5353_s23 = sld [smem:[#allocation24 + %s5739_s26]]  ;;  %s1553_s26 = sadd.s32 1, %s5701_s25  }
 0x32b   : >> { %v1679_v13 = vmul.f32 %v5708_v58, %v1637_v34  ;;  %v1850_v54 = vadd.f32 %v1845_v52, %v1806_v38  ;;  %v1694_v61 = vadd.f32 %v4767_v29, %v1687_v2  ;;  %v5709_v42 = vmov %v5706_v23  ;;  %s5360_s3 = sld [smem:[#allocation22 + %s5148_s12]]  ;;  %p1550_p10 = scmp.ge.s32.totalorder %s1553_s26, 4  }
 0x32c   : >> { %v1656_v0 = vadd.f32 %v1654_v62, %v1649_v14  ;;  %v1702_v9 = vadd.f32 %v1700_v37, %v1695_v33  ;;  %v1653_v16 = vmul.f32 %v5709_v42, %v1636_v60  ;;  %v5710_v3 = vmov %v5708_v58  ;;  %s5741_s27 = sld [smem:[#allocation43_spill]] }
 0x32d   : >> { %v1678_v26 = vmul.f32 %v5710_v3, %v1636_v60  ;;  %v5711_v36 = vmov %v5707_v59  ;;  %v1885_v40 = vadd.f32 %v1883_v53, %v1850_v54  ;;  %v1922_v18 = vsel %vm1184_vm13, %v1920_v44, %v1919_v15 }
 0x32e   : >> { %v1699_v27 = vmul.f32 %v5711_v36, %v1636_v60  ;;  %v1673_v5 = vadd.f32 %v4758_v47, %v1666_v17  ;;  %v1658_v6 = vrot.slane %v1656_v0, 7  ;;  %v1655_v41 = vadd.f32 %v1653_v16, %v1648_v32  ;;  %v1984_v0 = vpop.permute.xlu1 %1983  ;;  %v1986_v16 = vpop.permute.xlu0 %1985 }
 0x32f   : >> { %v1924_v29 = vsel %vm815_vm14, %v1922_v18, 0.0  ;;  %v1704_v38 = vrot.slane %v1702_v9, 1  ;;  %v1960_v52 = vrot.slane %v4881_v12, 2  ;;  %v1961_v53 = vrot.slane %v4864_v49, 2 }
 0x330   : >> { %v1701_v63 = vadd.f32 %v1699_v27, %v1694_v61  ;;  %v1926_v14 = vadd.f32 %v1924_v29, %v1885_v40  ;;  %v1657_v39 = vrot.slane %v1655_v41, 7  ;;  %v1849_v22 = vadd.f32 %v1847_v48, %v1808_v4 }
 0x331   : >> { %v1921_v47 = vsel %vm1184_vm13, %v1919_v15, %v1920_v44  ;;  %v1681_v45 = vadd.f32 %v1679_v13, %v1674_v30  ;;  %v1680_v35 = vadd.f32 %v1678_v26, %v1673_v5  ;;  %v1711_v50 = vstv %s4908_s8  ;;  %s5371_s8 = sld [smem:[#allocation22 + %s5740_s24]] }
 0x332   : >> { %v1703_v33 = vrot.slane %v1701_v63, 1  ;;  %v1659_v2 = vsel %vm1143_vm11, %v1657_v39, %v1658_v6  ;;  %v1660_v12 = vsel %vm1143_vm11, %v1658_v6, %v1657_v39  ;;  %v1963_v34 = vsel %vm1394_vm15, %v1961_v53, %v1960_v52  ;;  %v1988_v9 = vpop.permute.xlu1 %1987  ;;  %v1990_v26 = vpop.permute.xlu0 %1989 }
 0x333   : >> { %v1884_v21 = vadd.f32 %v1882_v25, %v1849_v22  ;;  %v1661_v49 = vsel %vm804_vm12, %v1660_v12, 0.0  ;;  %v1683_v4 = vadd.f32 %v1681_v45, %v1659_v2  ;;  %v1965_v17 = vsel %vm823_vm2, %v1963_v34, 0.0 }
 0x334   : >> { %v1706_v44 = vsel %vm1184_vm13, %v1704_v38, %v1703_v33  ;;  %v1705_v30 = vsel %vm1184_vm13, %v1703_v33, %v1704_v38  ;;  %v1682_v15 = vadd.f32 %v1680_v35, %v1661_v49  ;;  %v1967_v62 = vadd.f32 %v1965_v17, %v1926_v14 }
 0x335   : >> { %v1708_v48 = vsel %vm815_vm14, %v1706_v44, 0.0  ;;  %v1925_v23 = vadd.f32 %v1921_v47, %v1884_v21  ;;  %v1962_v59 = vsel %vm1394_vm15, %v1960_v52, %v1961_v53  ;;  %v1968_v60 = vstv %s4939_s5  ;;  %s5374_s5 = sld [smem:[#allocation24 + %s5723_s4]] }
 0x336   : >> { %v1710_v25 = vadd.f32 %v1708_v48, %v1683_v4  ;;  %v1709_v37 = vadd.f32 %v1705_v30, %v1682_v15  ;;  %v4972_v54 = vadd.f32 %v1968_v60, %v1967_v62  ;;  %v1992_v42 = vpop.permute.xlu1 %1991  ;;  %v2028_v27 = vpop.permute.xlu0 %2027  ;;  %v2005_v38 = vsel %vm831_vm6, %v1984_v0, -inf }
 0x337   : >> { %v1966_v32 = vadd.f32 %v1962_v59, %v1925_v23  ;;  %v2007_v63 = vsel %vm831_vm6, %v1988_v9, -inf  ;;  %v2009_v14 = vsel %vm831_vm6, %v1992_v42, -inf  ;;  %v2006_v52 = vsel %vm831_vm6, %v1986_v16, -inf }
 0x338   : >> { %v4963_v58 = vadd.f32 %v1711_v50, %v1710_v25  ;;  %v4965_v13 = vadd.f32 %v1711_v50, %v1709_v37  ;;  %v2048_v53 = vsel %vm836_vm8, %v2028_v27, -inf  ;;  %v2008_v47 = vsel %vm831_vm6, %v1990_v26, -inf }
 0x339   : >> { %v4978_v61 = vadd.f32 %v1968_v60, %v1966_v32  ;;  %v2062_v12 = vmax.f32 %v2006_v52, %v2048_v53 }
 0x33a   : >> { %1977 = vrot.lane.b32.xlu0 %v4963_v58, %s5712_s10  ;;  %1975 = vrot.lane.b32.xlu1 %v4965_v13, %s5712_s10  ;;  %v2026_v3 = vpop.permute.xlu1 %2025  ;;  %v2032_v18 = vpop.permute.xlu0 %2031 }
 0x33b   : >> { %v2047_v22 = vsel %vm836_vm8, %v2026_v3, -inf  ;;  %v2050_v35 = vsel %vm836_vm8, %v2032_v18, -inf  ;;  %v5022_v17 = vmax.f32 %v4438_v20, %v2062_v12 }
 0x33c   : >> { %v2061_v34 = vmax.f32 %v2005_v38, %v2047_v22  ;;  %v2064_v49 = vmax.f32 %v2008_v47, %v2050_v35  ;;  %v5715_v38 = vld [vmem:[#allocation63_spill] sm:$0xff]  ;;  %v5717_v22 = vld [vmem:[#allocation53_spill] sm:$0xff] }
 0x33d   : >> { %v2132_v9 = vrot.slane %v5022_v17, 1  ;;  %vm5718_vm0 = vcmp.lt.s32.totalorder %v5717_v22, 16  ;;  %v5719_v35 = vld [vmem:[#allocation49_spill] sm:$0xff] }
 0x33e   : >> { %1981 = vrot.lane.b32.xlu0 %v4972_v54, %s5712_s10  ;;  %2017 = vrot.lane.b32.xlu1 %v4965_v13, %s5713_s13  ;;  %v2030_v36 = vpop.permute.xlu1 %2029  ;;  %v1994_v6 = vpop.permute.xlu0 %1993  ;;  %v5028_v59 = vmax.f32 %v4447_v8, %v2064_v49  ;;  %v5031_v60 = vmax.f32 %v4435_v24, %v2061_v34  ;;  %vm5720_vm1 = vcmp.lt.s32.totalorder %v5719_v35, 16 }
 0x33f   : >> { %v2049_v39 = vsel %vm836_vm8, %v2030_v36, -inf  ;;  %v2010_v44 = vsel %vm831_vm6, %v1994_v6, -inf }
 0x340   : >> { %v2063_v2 = vmax.f32 %v2007_v63, %v2049_v39  ;;  %v2134_v42 = vrot.slane %v5028_v59, 1  ;;  %v2089_v27 = vrot.slane %v5031_v60, 7 }
 0x342   : >> { %2023 = vrot.lane.b32.xlu0 %v4972_v54, %s5713_s13  ;;  %1979 = vrot.lane.b32.xlu1 %v4978_v61, %s5712_s10  ;;  %v2034_v40 = vpop.permute.xlu1 %2033  ;;  %v2036_v29 = vpop.permute.xlu0 %2035  ;;  %v5019_v48 = vmax.f32 %v4441_v57, %v2063_v2  ;;  %s5377_s10 = sld [smem:[#allocation24 + %s5740_s24]] }
 0x343   : >> { %v2051_v45 = vsel %vm836_vm8, %v2034_v40, -inf  ;;  %v2052_v15 = vsel %vm836_vm8, %v2036_v29, -inf  ;;  %v2090_v40 = vrot.slane %v5022_v17, 7 }
 0x344   : >> { %v2065_v21 = vmax.f32 %v2009_v14, %v2051_v45  ;;  %v2066_v32 = vmax.f32 %v2010_v44, %v2052_v15  ;;  %v2091_v18 = vrot.slane %v5019_v48, 7  ;;  %v5716_v14 = vld [vmem:[#allocation65_spill] sm:$0xff] }
 0x345   : >> { %v2103_v39 = vsel %vm1143_vm11, %v2089_v27, %v2090_v40 }
 0x346   : >> { %2015 = vrot.lane.b32.xlu0 %v4564_v56, %s5713_s13  ;;  %2021 = vrot.lane.b32.xlu1 %v4978_v61, %s5713_s13  ;;  %v1996_v5 = vpop.permute.xlu1 %1995  ;;  %v1972_v50 = vpop.permute.xlu0 %1971  ;;  %v5025_v62 = vmax.f32 %v4451_v46, %v2065_v21  ;;  %v2133_v46 = vrot.slane %v5019_v48, 1  ;;  %v5049_v3 = vmax.f32 %v4454_v28, %v2066_v32  ;;  %v2102_v22 = vsel %vm1143_vm11, %v2090_v40, %v2091_v18 }
 0x347   : >> { %v2011_v4 = vsel %vm831_vm6, %v1996_v5, -inf  ;;  %v1999_v20 = vsel %vm831_vm6, %v1972_v50, -inf  ;;  %v2092_v5 = vrot.slane %v5028_v59, 7 }
 0x348   : >> { %v2135_v24 = vrot.slane %v5025_v62, 1  ;;  %v2093_v53 = vrot.slane %v5025_v62, 7  ;;  %v2094_v50 = vrot.slane %v5049_v3, 7 }
 0x349   : >> { %v2101_v45 = vsel %vm1143_vm11, %v2091_v18, %v2092_v5 }
 0x34a   : >> { %2019 = vrot.lane.b32.xlu0 %v4963_v58, %s5713_s13  ;;  %v2038_v41 = vpop.permute.xlu1 %2037  ;;  %v2014_v25 = vpop.permute.xlu0 %2013  ;;  %v2142_v28 = vsel %vm1184_vm13, %v2134_v42, %v2135_v24  ;;  %v2099_v44 = vsel %vm1143_vm11, %v2093_v53, %v2094_v50  ;;  %s5389_s13 = sld [smem:[#allocation25 + %s4898_s19]] }
 0x34b   : >> { %v2053_v30 = vsel %vm836_vm8, %v2038_v41, -inf  ;;  %v2041_v8 = vsel %vm836_vm8, %v2014_v25, -inf  ;;  %v2136_v41 = vrot.slane %v5049_v3, 1  ;;  %s2227_s19 = sld [smem:[#allocation27 + %s5701_s25]] }
 0x34c   : >> { %v2067_v37 = vmax.f32 %v2011_v4, %v2053_v30  ;;  %v2055_v36 = vmax.f32 %v1999_v20, %v2041_v8  ;;  %v5721_v30 = vld [vmem:[#allocation50_spill] sm:$0xff] }
 0x34e   : >> { %v1998_v33 = vpop.permute.xlu1 %1997  ;;  %v5046_v16 = vmax.f32 %v4458_v31, %v2067_v37  ;;  %v2144_v31 = vsel %vm1184_vm13, %v2132_v9, %v2133_v46  ;;  %v5071_v29 = vpop.permute.xlu0 %1973  ;;  %v5077_v52 = vmax.f32 %v5716_v14, %v2055_v36  ;;  %v2204_v36 = vstv %s5088_s2  ;;  %v5724_v14 = vld [vmem:[#allocation51_spill] sm:$0xff] }
 0x34f   : >> { %v2012_v57 = vsel %vm831_vm6, %v1998_v33, -inf  ;;  %v2160_v47 = vsel %vm5718_vm0, %v2144_v31, -inf  ;;  %v2162_v33 = vsel %vm5720_vm1, %v2142_v28, -inf  ;;  %vm5722_vm1 = vcmp.lt.s32.totalorder %v5721_v30, 16 }
 0x350   : >> { %v2137_v6 = vrot.slane %v5046_v16, 1  ;;  %v2125_v34 = vrot.slane %v5077_v52, 1  ;;  %v2174_v21 = vmax.f32 %v2103_v39, %v2160_v47  ;;  %v2176_v49 = vmax.f32 %v2101_v45, %v2162_v33 }
 0x351   : >> { %v2095_v25 = vrot.slane %v5046_v16, 7  ;;  %v2131_v28 = vrot.slane %v5031_v60, 1  ;;  %v2100_v47 = vsel %vm1143_vm11, %v2092_v5, %v2093_v53  ;;  %v2211_v53 = vstv %s5112_s1 }
 0x352   : >> { %v2040_v23 = vpop.permute.xlu1 %2039  ;;  %v2140_v2 = vsel %vm1184_vm13, %v2136_v41, %v2137_v6  ;;  %v2190_v20 = vmax.f32 %v5028_v59, %v2176_v49  ;;  %v2000_v59 = vsel %vm831_vm6, %v5071_v29, -inf  ;;  %v2141_v29 = vsel %vm1184_vm13, %v2135_v24, %v2136_v41  ;;  %v5730_v24 = vld [vmem:[#allocation55_spill] sm:$0xff] }
 0x353   : >> { %v2054_v0 = vsel %vm836_vm8, %v2040_v23, -inf  ;;  %v2164_v15 = vsel %vm5722_vm1, %v2140_v2, -inf  ;;  %vm5725_vm1 = vcmp.lt.s32.totalorder %v5724_v14, 16 }
 0x354   : >> { %v2068_v26 = vmax.f32 %v2012_v57, %v2054_v0  ;;  %v2188_v57 = vmax.f32 %v5022_v17, %v2174_v21  ;;  %v2178_v0 = vmax.f32 %v2099_v44, %v2164_v15  ;;  %v2206_v35 = vmul.f32 %v2204_v36, %v2190_v20  ;;  %v5728_v20 = vld [vmem:[#allocation47_spill] sm:$0xff] }
 0x355   : >> { %v2145_v44 = vsel %vm1184_vm13, %v2131_v28, %v2132_v9  ;;  %vm5729_vm0 = vcmp.ge.s32.totalorder %v5728_v20, 0  ;;  %v2143_v17 = vsel %vm1184_vm13, %v2133_v46, %v2134_v42 }
 0x356   : >> { %v5074_v63 = vmax.f32 %v5715_v38, %v2068_v26  ;;  %v2199_v26 = vstv %s5079_s22  ;;  %v2192_v33 = vmax.f32 %v5049_v3, %v2178_v0  ;;  %v5167_v0 = vsel %vm5729_vm0, %v2100_v47, -inf }
 0x357   : >> { %v2201_v45 = vmul.f32 %v2199_v26, %v2188_v57  ;;  %vm5731_vm0 = vcmp.ge.s32.totalorder %v5730_v24, 0 }
 0x358   : >> { %v2138_v12 = vrot.slane %v5074_v63, 1  ;;  %v2096_v37 = vrot.slane %v5074_v63, 7  ;;  %v2213_v14 = vmul.f32 %v2211_v53, %v2192_v33 }
 0x35a   : >> { %v2152_v32 = vsel %vm1184_vm13, %v2138_v12, %v2125_v34  ;;  %v2097_v38 = vsel %vm1143_vm11, %v2095_v25, %v2096_v37 }
 0x35b   : >> { %v2166_v39 = vsel %vm5725_vm1, %v2152_v32, -inf  ;;  %v5726_v32 = vld [vmem:[#allocation46_spill] sm:$0xff] }
 0x35c   : >> { %v2180_v49 = vmax.f32 %v2097_v38, %v2166_v39  ;;  %vm5727_vm1 = vcmp.ge.s32.totalorder %v5726_v32, 0  ;;  %v2208_v38 = vadd.f32 %v2206_v35, %v2201_v45 }
 0x35d   : >> { %v2119_v57 = vsel %vm5727_vm1, %v2102_v22, -inf  ;;  %v2218_v22 = vstv %s5127_s16 }
 0x35e   : >> { %v2194_v42 = vmax.f32 %v5074_v63, %v2180_v49  ;;  %v2175_v33 = vmax.f32 %v2119_v57, %v2143_v17 }
 0x3ac   : >> { %v5104_v4 = vpop.permute.xlu0 %1977  ;;  %v1976_v23 = vpop.permute.xlu1 %1975 }
 0x3ad   : >> { %v2001_v30 = vsel %vm831_vm6, %v1976_v23, -inf  ;;  %v2083_v23 = vrot.slane %v5077_v52, 7 }
 0x3b0   : >> { %v1982_v8 = vpop.permute.xlu0 %1981  ;;  %v2018_v31 = vpop.permute.xlu1 %2017 }
 0x3b1   : >> { %v2043_v2 = vsel %vm836_vm8, %v2018_v31, -inf  ;;  %v2004_v40 = vsel %vm831_vm6, %v1982_v8, -inf }
 0x3b2   : >> { %v2057_v9 = vmax.f32 %v2001_v30, %v2043_v2  ;;  %v2215_v30 = vadd.f32 %v2213_v14, %v2208_v38 }
 0x3b4   : >> { %v2024_v21 = vpop.permute.xlu0 %2023  ;;  %v1980_v5 = vpop.permute.xlu1 %1979  ;;  %v5203_v2 = vmax.f32 %v4965_v13, %v2057_v9  ;;  %v2002_v13 = vsel %vm831_vm6, %v5104_v4, -inf  ;;  %v2098_v4 = vsel %vm1143_vm11, %v2094_v50, %v2095_v25  ;;  %v2223_v9 = vstv %s5176_s9 }
 0x3b5   : >> { %v2046_v18 = vsel %vm836_vm8, %v2024_v21, -inf }
 0x3b6   : >> { %v2060_v15 = vmax.f32 %v2004_v40, %v2046_v18  ;;  %v2085_v50 = vrot.slane %v5203_v2, 7 }
 0x3b8   : >> { %v5180_v8 = vmax.f32 %v4972_v54, %v2060_v15  ;;  %v2016_v31 = vpop.permute.xlu0 %2015  ;;  %v2022_v46 = vpop.permute.xlu1 %2021  ;;  %v2003_v54 = vsel %vm831_vm6, %v1980_v5, -inf  ;;  %v2110_v5 = vsel %vm1143_vm11, %v2096_v37, %v2083_v23  ;;  %v2127_v37 = vrot.slane %v5203_v2, 1 }
 0x3b9   : >> { %v2042_v39 = vsel %vm836_vm8, %v2016_v31, -inf  ;;  %v2045_v35 = vsel %vm836_vm8, %v2022_v46, -inf  ;;  %v2111_v38 = vsel %vm804_vm12, %v2110_v5, -inf }
 0x3ba   : >> { %v2088_v47 = vrot.slane %v5180_v8, 7  ;;  %v2056_v45 = vmax.f32 %v2000_v59, %v2042_v39  ;;  %v2059_v21 = vmax.f32 %v2003_v54, %v2045_v35  ;;  %v2189_v35 = vmax.f32 %v5019_v48, %v2175_v33 }
 0x3bb   : >> { %v2139_v48 = vsel %vm1184_vm13, %v2137_v6, %v2138_v12 }
 0x3bc   : >> { %v2104_v49 = vsel %vm1143_vm11, %v2088_v47, %v2089_v27  ;;  %v2070_v40 = vmax.f32 %v4564_v56, %v2056_v45  ;;  %v2020_v18 = vpop.permute.xlu0 %2019  ;;  %v2220_v27 = vmul.f32 %v2218_v22, %v2194_v42  ;;  %v2073_v56 = vmax.f32 %v4978_v61, %v2059_v21  ;;  %v5732_v21 = vld [vmem:[#allocation48_spill] sm:$0xff] }
 0x3bd   : >> { %v2117_v41 = vsel %vm5731_vm0, %v2104_v49, -inf  ;;  %v2044_v15 = vsel %vm836_vm8, %v2020_v18, -inf  ;;  %vm5733_vm1 = vcmp.ge.s32.totalorder %v5732_v21, 0  ;;  %v2177_v18 = vmax.f32 %v5167_v0, %v2141_v29 }
 0x3be   : >> { %v2084_v32 = vrot.slane %v2070_v40, 7  ;;  %v2126_v57 = vrot.slane %v2070_v40, 1  ;;  %v2058_v20 = vmax.f32 %v2002_v13, %v2044_v15  ;;  %v2173_v17 = vmax.f32 %v2117_v41, %v2145_v44 }
 0x3bf   : >> { %v2222_v14 = vadd.f32 %v2220_v27, %v2215_v30  ;;  %v2123_v49 = vsel %vm5733_vm1, %v2098_v4, -inf  ;;  %v2129_v33 = vrot.slane %v2073_v56, 1  ;;  %v5734_v30 = vld [vmem:[#allocation54_spill] sm:$0xff]  ;;  %v2130_v29 = vrot.slane %v5180_v8, 1 }
 0x3c0   : >> { %v5233_v31 = vmax.f32 %v4963_v58, %v2058_v20  ;;  %v2151_v61 = vsel %vm1184_vm13, %v2125_v34, %v2126_v57  ;;  %v2109_v3 = vsel %vm1143_vm11, %v2083_v23, %v2084_v32  ;;  %v2150_v44 = vsel %vm1184_vm13, %v2126_v57, %v2127_v37 }
 0x3c1   : >> { %v2167_v25 = vmax.f32 %v2111_v38, %v2151_v61  ;;  %v2087_v58 = vrot.slane %v2073_v56, 7  ;;  %v2154_v46 = vsel %vm815_vm14, %v2150_v44, -inf  ;;  %v2187_v34 = vmax.f32 %v5031_v60, %v2173_v17 }
 0x3c2   : >> { %v2086_v59 = vrot.slane %v5233_v31, 7  ;;  %v2128_v39 = vrot.slane %v5233_v31, 1  ;;  %v2168_v23 = vmax.f32 %v2109_v3, %v2154_v46  ;;  %v2108_v54 = vsel %vm1143_vm11, %v2084_v32, %v2085_v50 }
 0x3c3   : >> { %v5252_v42 = vmax.f32 %v5077_v52, %v2167_v25  ;;  %v5272_v5 = vadd.f32 %v2223_v9, %v2222_v14  ;;  %vm5735_vm0 = vcmp.ge.s32.totalorder %v5734_v30, 0  ;;  %v2200_v41 = vmul.f32 %v2199_v26, %v2187_v34 }
 0x3c4   : >> { %v2149_v45 = vsel %vm1184_vm13, %v2127_v37, %v2128_v39  ;;  %v2106_v52 = vsel %vm1143_vm11, %v2086_v59, %v2087_v58  ;;  %v2113_v0 = vsel %vm5735_vm0, %v2108_v54, -inf  ;;  %v5277_v13 = vmax.f32 %v2070_v40, %v2168_v23 }
 0x3c5   : >> { %2228 = vmax.xlane.f32.xlu1 %v5252_v42  ;;  %2272 = vadd.xlane.f32.xlu0 %v5252_v42  ;;  %v2169_v24 = vmax.f32 %v2113_v0, %v2149_v45  ;;  %v2115_v63 = vsel %vm928_vm5, %v2106_v52, -inf  ;;  %v2179_v27 = vmax.f32 %v2123_v49, %v2139_v48  ;;  %v2191_v6 = vmax.f32 %v5025_v62, %v2177_v18 }
 0x3c6   : >> { %v2205_v12 = vmul.f32 %v2204_v36, %v2189_v35  ;;  %v2147_v40 = vsel %vm1184_vm13, %v2129_v33, %v2130_v29  ;;  %v2146_v57 = vsel %vm1184_vm13, %v2130_v29, %v2131_v28  ;;  %v2105_v62 = vsel %vm1143_vm11, %v2087_v58, %v2088_v47 }
 0x3c7   : >> { %v5291_v32 = vmax.f32 %v5203_v2, %v2169_v24  ;;  %v2171_v26 = vmax.f32 %v2115_v63, %v2147_v40  ;;  %v2193_v36 = vmax.f32 %v5046_v16, %v2179_v27  ;;  %v2212_v2 = vmul.f32 %v2211_v53, %v2191_v6 }
 0x3c8   : >> { %v2207_v20 = vadd.f32 %v2205_v12, %v2200_v41  ;;  %v2158_v60 = vsel %vm959_vm4, %v2146_v57, -inf  ;;  %v2148_v38 = vsel %vm1184_vm13, %v2128_v39, %v2129_v33  ;;  %v2107_v61 = vsel %vm1143_vm11, %v2085_v50, %v2086_v59 }
 0x3c9   : >> { %2310 = vadd.xlane.f32.xlu0 %v5272_v5  ;;  %2274 = vadd.xlane.f32.xlu1 %v5277_v13  ;;  %v5308_v37 = vmax.f32 %v2073_v56, %v2171_v26  ;;  %v2172_v28 = vmax.f32 %v2105_v62, %v2158_v60  ;;  %v2219_v47 = vmul.f32 %v2218_v22, %v2193_v36  ;;  %v2156_v3 = vsel %vm957_vm3, %v2148_v38, -inf }
 0x3ca   : >> { %v2214_v17 = vadd.f32 %v2212_v2, %v2207_v20  ;;  %v2170_v22 = vmax.f32 %v2107_v61, %v2156_v3 }
 0x3cb   : >> { %v5317_v16 = vmax.f32 %v5180_v8, %v2172_v28 }
 0x3cc   : >> { %v2221_v53 = vadd.f32 %v2219_v47, %v2214_v17  ;;  %v5330_v8 = vmax.f32 %v5233_v31, %v2170_v22 }
 0x3cd   : >> { %2239 = vmax.xlane.f32.xlu1 %v5291_v32  ;;  %2284 = vadd.xlane.f32.xlu0 %v5291_v32 }
 0x3ce   : >> { %v5325_v25 = vadd.f32 %v2223_v9, %v2221_v53 }
 0x3d1   : >> { %2230 = vmax.xlane.f32.xlu0 %v5277_v13  ;;  %2296 = vadd.xlane.f32.xlu1 %v5308_v37 }
 0x3d5   : >> { %2298 = vadd.xlane.f32.xlu0 %v5317_v16  ;;  %2250 = vmax.xlane.f32.xlu1 %v5308_v37 }
 0x3d9   : >> { %2252 = vmax.xlane.f32.xlu0 %v5317_v16  ;;  %2308 = vadd.xlane.f32.xlu1 %v5325_v25 }
 0x3dd   : >> { %2286 = vadd.xlane.f32.xlu0 %v5330_v8  ;;  %2261 = vmax.xlane.f32.xlu1 %v5325_v25 }
 0x3e1   : >> { %2241 = vmax.xlane.f32.xlu0 %v5330_v8 }
 0x3e5   : >> { %2263 = vmax.xlane.f32.xlu0 %v5272_v5 }
 0x44e   : >> { %v2229_v50 = vpop.xlane.xlu1 %2228  ;;  %v2273_v14 = vpop.xlane.xlu0 %2272 }
 0x452   : >> { %v2275_v9 = vpop.xlane.xlu1 %2274  ;;  %v2311_v44 = vpop.xlane.xlu0 %2310 }
 0x453   : >> { %v2276_v58 = vadd.f32 %v2275_v9, %v2273_v14 }
 0x455   : >> { %v2277_v46 = vrot.slane %v2276_v58, 4 }
 0x456   : >> { %v2240_v59 = vpop.xlane.xlu1 %2239  ;;  %v2285_v39 = vpop.xlane.xlu0 %2284 }
 0x457   : >> { %v2278_v54 = vadd.f32 %v2277_v46, %v2276_v58 }
 0x459   : >> { %v2279_v52 = vrot.slane %v2278_v54, 2 }
 0x45a   : >> { %v2297_v34 = vpop.xlane.xlu1 %2296  ;;  %v2231_v23 = vpop.xlane.xlu0 %2230 }
 0x45b   : >> { %v2232_v31 = vmax.f32 %v2229_v50, %v2231_v23  ;;  %v2280_v63 = vadd.f32 %v2279_v52, %v2278_v54  ;;  %v2324_v52 = vstv %s5340_s0 }
 0x45d   : >> { %v2233_v49 = vrot.slane %v2232_v31, 4  ;;  %v2281_v2 = vrot.slane %v2280_v63, 1 }
 0x45e   : >> { %v2251_v45 = vpop.xlane.xlu1 %2250  ;;  %v2299_v35 = vpop.xlane.xlu0 %2298 }
 0x45f   : >> { %v2300_v21 = vadd.f32 %v2299_v35, %v2297_v34  ;;  %v2234_v24 = vmax.f32 %v2232_v31, %v2233_v49  ;;  %v2282_v3 = vadd.f32 %v2281_v2, %v2280_v63  ;;  %v2321_v31 = vstv %s5337_s7 }
 0x461   : >> { %v2301_v18 = vrot.slane %v2300_v21, 4  ;;  %v2235_v57 = vrot.slane %v2234_v24, 2  ;;  %v2283_v54 = vmul.f32 0.00048828125, %v2282_v3  ;;  %v2360_v3 = vstv %s5360_s3 }
 0x462   : >> { %v2309_v48 = vpop.xlane.xlu1 %2308  ;;  %v2253_v33 = vpop.xlane.xlu0 %2252 }
 0x463   : >> { %v2302_v30 = vadd.f32 %v2301_v18, %v2300_v21  ;;  %v2312_v0 = vadd.f32 %v2311_v44, %v2309_v48  ;;  %v2254_v29 = vmax.f32 %v2251_v45, %v2253_v33  ;;  %v2236_v38 = vmax.f32 %v2234_v24, %v2235_v57 }
 0x464   : >> { %v2366_v24 = vmul.f32 %v2321_v31, %v2283_v54 }
 0x465   : >> { %v2303_v41 = vrot.slane %v2302_v30, 2  ;;  %v2313_v15 = vrot.slane %v2312_v0, 4  ;;  %v2255_v27 = vrot.slane %v2254_v29, 4 }
 0x466   : >> { %v2287_v6 = vpop.xlane.xlu0 %2286  ;;  %v2262_v9 = vpop.xlane.xlu1 %2261 }
 0x467   : >> { %v2314_v12 = vadd.f32 %v2313_v15, %v2312_v0  ;;  %v2288_v40 = vadd.f32 %v2287_v6, %v2285_v39  ;;  %v2256_v26 = vmax.f32 %v2254_v29, %v2255_v27  ;;  %v2304_v20 = vadd.f32 %v2303_v41, %v2302_v30 }
 0x468   : >> { %v2237_v39 = vrot.slane %v2236_v38, 1  ;;  %v2328_v41 = vstv %s5343_s30 }
 0x469   : >> { %v2315_v62 = vrot.slane %v2314_v12, 2  ;;  %v2289_v36 = vrot.slane %v2288_v40, 4  ;;  %v2257_v28 = vrot.slane %v2256_v26, 2  ;;  %v2305_v53 = vrot.slane %v2304_v20, 1 }
 0x46a   : >> { %v2242_v4 = vpop.xlane.xlu0 %2241  ;;  %v2238_v33 = vmax.f32 %v2236_v38, %v2237_v39  ;;  %v2342_v39 = vstv %s5374_s5 }
 0x46b   : >> { %v2316_v60 = vadd.f32 %v2315_v62, %v2314_v12  ;;  %v2290_v17 = vadd.f32 %v2289_v36, %v2288_v40  ;;  %v2243_v47 = vmax.f32 %v2240_v59, %v2242_v4  ;;  %v2258_v14 = vmax.f32 %v2256_v26, %v2257_v28 }
 0x46c   : >> { %v2306_v46 = vadd.f32 %v2305_v53, %v2304_v20  ;;  %v2332_v40 = vstv %s5346_s20  ;;  %v2322_v57 = vmul.f32 %v2321_v31, %v2238_v33 }
 0x46d   : >> { %v2291_v61 = vrot.slane %v2290_v17, 2  ;;  %v2244_v56 = vrot.slane %v2243_v47, 4  ;;  %v2317_v50 = vrot.slane %v2316_v60, 1  ;;  %v2259_v21 = vrot.slane %v2258_v14, 1 }
 0x46e   : >> { %v2264_v22 = vpop.xlane.xlu0 %2263  ;;  %v2307_v30 = vmul.f32 0.00048828125, %v2306_v46  ;;  %v2349_v46 = vstv %s5353_s23 }
 0x46f   : >> { %v2292_v44 = vadd.f32 %v2291_v61, %v2290_v17  ;;  %v2245_v58 = vmax.f32 %v2243_v47, %v2244_v56  ;;  %v2265_v59 = vmax.f32 %v2262_v9, %v2264_v22  ;;  %v2318_v35 = vadd.f32 %v2317_v50, %v2316_v60 }
 0x470   : >> { %v2260_v27 = vmax.f32 %v2258_v14, %v2259_v21  ;;  %v2369_v20 = vmul.f32 %v2328_v41, %v2307_v30  ;;  %v2335_v47 = vstv %s5357_s18  ;;  %v2339_v50 = vstv %s5367_s29 }
 0x471   : >> { %v2293_v34 = vrot.slane %v2292_v44, 1  ;;  %v2246_v23 = vrot.slane %v2245_v58, 2  ;;  %v2266_v45 = vrot.slane %v2265_v59, 4  ;;  %v2319_v63 = vmul.f32 0.00048828125, %v2318_v35 }
 0x472   : >> { %v2329_v60 = vmul.f32 %v2328_v41, %v2260_v27  ;;  %v2346_v14 = vstv %s5349_s14  ;;  %v2353_v9 = vstv %s5371_s8 }
 0x473   : >> { %v2294_v49 = vadd.f32 %v2293_v34, %v2292_v44  ;;  %v2247_v18 = vmax.f32 %v2245_v58, %v2246_v23  ;;  %v2267_v48 = vmax.f32 %v2265_v59, %v2266_v45  ;;  %v2371_v4 = vmul.f32 %v2332_v40, %v2319_v63 }
 0x474   : >> { %v2363_v58 = vstv %s5363_s28  ;;  %v2356_v34 = vstv %s5377_s10 }
 0x475   : >> { %v2295_v0 = vmul.f32 0.00048828125, %v2294_v49  ;;  %v2248_v29 = vrot.slane %v2247_v18, 1  ;;  %v2268_v15 = vrot.slane %v2267_v48, 2 }
 0x477   : >> { %v2367_v6 = vmul.f32 %v2324_v52, %v2295_v0  ;;  %v2249_v12 = vmax.f32 %v2247_v18, %v2248_v29  ;;  %v2269_v26 = vmax.f32 %v2267_v48, %v2268_v15 }
 0x479   : >> { %v2368_v62 = vadd.f32 %v2367_v6, %v2366_v24  ;;  %v2325_v36 = vmul.f32 %v2324_v52, %v2249_v12  ;;  %v2270_v2 = vrot.slane %v2269_v26, 1 }
 0x47b   : >> { %v2370_v28 = vadd.f32 %v2369_v20, %v2368_v62  ;;  %v2326_v17 = vadd.f32 %v2325_v36, %v2322_v57  ;;  %v2271_v38 = vmax.f32 %v2269_v26, %v2270_v2 }
 0x47d   : >> { %v2372_v53 = vadd.f32 %v2371_v4, %v2370_v28  ;;  %v2330_v61 = vadd.f32 %v2329_v60, %v2326_v17  ;;  %v2333_v56 = vmul.f32 %v2332_v40, %v2271_v38 }
 0x47f   : >> { %v2373_v22 = vadd.f32 %v2372_v53, %v2335_v47  ;;  %v2334_v44 = vadd.f32 %v2333_v56, %v2330_v61 }
 0x481   : >> { %v2374_v59 = vmax.f32 %v2373_v22, 0.0  ;;  %v2336_v23 = vadd.f32 %v2335_v47, %v2334_v44 }
 0x483   : >> { %v2375_v31 = vmul.f32 %v2374_v59, %v2339_v50  ;;  %v2378_v54 = vmul.f32 %v2374_v59, %v2346_v14  ;;  %v2381_v45 = vmul.f32 %v2374_v59, %v2353_v9  ;;  %v2384_v35 = vmul.f32 %v2374_v59, %v2360_v3 }
 0x484   : >> { %v2337_v21 = vmax.f32 %v2336_v23, 0.0 }
 0x485   : >> { %v2376_v49 = vadd.f32 %v2375_v31, %v2342_v39  ;;  %v2379_v18 = vadd.f32 %v2378_v54, %v2349_v46  ;;  %v2382_v52 = vadd.f32 %v2381_v45, %v2356_v34  ;;  %v2385_v48 = vadd.f32 %v2384_v35, %v2363_v58 }
 0x486   : >> { %v2340_v33 = vmul.f32 %v2339_v50, %v2337_v21  ;;  %v2347_v30 = vmul.f32 %v2346_v14, %v2337_v21  ;;  %v2354_v0 = vmul.f32 %v2353_v9, %v2337_v21  ;;  %v2361_v29 = vmul.f32 %v2360_v3, %v2337_v21 }
 0x487   : >> { %v2377_v27 = vmax.f32 %v2376_v49, 0.0  ;;  %v2380_v6 = vmax.f32 %v2379_v18, 0.0  ;;  %v2383_v12 = vmax.f32 %v2382_v52, 0.0  ;;  %v2386_v40 = vmax.f32 %v2385_v48, 0.0 }
 0x488   : >> { %v2343_v24 = vadd.f32 %v2342_v39, %v2340_v33  ;;  %v2350_v41 = vadd.f32 %v2349_v46, %v2347_v30  ;;  %v2357_v15 = vadd.f32 %v2356_v34, %v2354_v0  ;;  %v2364_v63 = vadd.f32 %v2363_v58, %v2361_v29 }
 0x489   : >> { %v2422_v31 = vstv %s5393_s15  ;;  %v2427_v49 = vstv %s2227_s19 }
 0x48a   : >> { %v2344_v26 = vmax.f32 %v2343_v24, 0.0  ;;  %v2351_v57 = vmax.f32 %v2350_v41, 0.0  ;;  %v2358_v20 = vmax.f32 %v2357_v15, 0.0  ;;  %v2365_v62 = vmax.f32 %v2364_v63, 0.0 }
 0x48c   : >> { %v2387_v36 = vadd.f32 %v2377_v27, %v2344_v26  ;;  %v2391_v2 = vadd.f32 %v2380_v6, %v2351_v57  ;;  %v2395_v4 = vadd.f32 %v2383_v12, %v2358_v20  ;;  %v2399_v60 = vadd.f32 %v2386_v40, %v2365_v62 }
 0x48e   : >> { %v2388_v28 = vmax.f32 %v2387_v36, 0.0  ;;  %v2392_v17 = vmax.f32 %v2391_v2, 0.0  ;;  %v2396_v47 = vmax.f32 %v2395_v4, 0.0  ;;  %v2400_v38 = vmax.f32 %v2399_v60, 0.0 }
 0x490   : >> { %v2389_v53 = vmul.f32 %v2388_v28, %v5252_v42  ;;  %v2390_v61 = vmul.f32 %v2388_v28, %v5277_v13  ;;  %v2393_v56 = vmul.f32 %v2392_v17, %v5291_v32  ;;  %v2394_v3 = vmul.f32 %v2392_v17, %v5330_v8 }
 0x491   : >> { %v2397_v22 = vmul.f32 %v2396_v47, %v5308_v37  ;;  %v2398_v50 = vmul.f32 %v2396_v47, %v5317_v16  ;;  %v2401_v14 = vmul.f32 %v2400_v38, %v5325_v25  ;;  %v2402_v9 = vmul.f32 %v2400_v38, %v5272_v5 }
 0x492   : >> { %v2403_v44 = vmax.f32 %v2389_v53, %v2393_v56  ;;  %v2404_v58 = vmax.f32 %v2390_v61, %v2394_v3  ;;  %v2409_v42 = vadd.f32 %v2393_v56, %v2389_v53  ;;  %v2410_v59 = vadd.f32 %v2394_v3, %v2390_v61 }
 0x493   : >> { %v2405_v13 = vmax.f32 %v2397_v22, %v2401_v14  ;;  %v2406_v39 = vmax.f32 %v2398_v50, %v2402_v9  ;;  %v2411_v32 = vadd.f32 %v2401_v14, %v2397_v22  ;;  %v2412_v46 = vadd.f32 %v2402_v9, %v2398_v50 }
 0x494   : >> { %v2416_v16 = vstv %s5389_s13 }
 0x495   : >> { %v2407_v8 = vmax.f32 %v2403_v44, %v2405_v13  ;;  %v2408_v34 = vmax.f32 %v2404_v58, %v2406_v39  ;;  %v2413_v37 = vadd.f32 %v2411_v32, %v2409_v42  ;;  %v2414_v23 = vadd.f32 %v2412_v46, %v2410_v59 }
 0x497   : >> { %v2420_v54 = vmul.f32 0.25, %v2413_v37  ;;  %v2421_v25 = vmul.f32 0.25, %v2414_v23  ;;  %v2417_v45 = vmul.f32 %v2416_v16, %v2407_v8  ;;  %v2418_v35 = vmul.f32 %v2416_v16, %v2408_v34 }
 0x499   : >> { %v2423_v5 = vmul.f32 %v2422_v31, %v2420_v54  ;;  %v2424_v21 = vmul.f32 %v2422_v31, %v2421_v25 }
 0x49b   : >> { %v2425_v18 = vadd.f32 %v2423_v5, %v2417_v45  ;;  %v2426_v52 = vadd.f32 %v2424_v21, %v2418_v35 }
 0x49d   : >> { %v2428_v48 = vadd.f32 %v2427_v49, %v2425_v18  ;;  %v2429_v33 = vadd.f32 %v2427_v49, %v2426_v52 }
 0x49f   : >> { %v2430_v30 = vmax.f32 %v2428_v48, 0.0  ;;  %v2431_v0 = vmax.f32 %v2429_v33, 0.0 }
 0x4a1   : >> { %v2432_v29 = vmul.f32 %v2430_v30, %v2389_v53  ;;  %v2433_v24 = vmul.f32 %v2431_v0, %v2390_v61  ;;  %v2434_v41 = vmul.f32 %v2430_v30, %v2393_v56  ;;  %v2435_v15 = vmul.f32 %v2431_v0, %v2394_v3 }
 0x4a2   : >> { %v2436_v63 = vmul.f32 %v2430_v30, %v2397_v22  ;;  %v2437_v27 = vmul.f32 %v2431_v0, %v2398_v50  ;;  %v2438_v6 = vmul.f32 %v2430_v30, %v2401_v14  ;;  %v2439_v12 = vmul.f32 %v2431_v0, %v2402_v9  ;;  %1552 = sbr.rel (!%p1550_p10) target bundleno = 636 (0x27c), region = 201 }
 0x4a3   : >> { %2440 = vst [vmem:[%s5741_s27] sm:$0xff] %v2432_v29  ;;  %2441 = vst [vmem:[%s5741_s27 + $0x8] sm:$0xff] %v2433_v24 }
 0x4a4   : >> { %2442 = vst [vmem:[%s5741_s27 + $0x10] sm:$0xff] %v2434_v41  ;;  %2443 = vst [vmem:[%s5741_s27 + $0x18] sm:$0xff] %v2435_v15 }
 0x4a5   : >> { %2444 = vst [vmem:[%s5741_s27 + $0x20] sm:$0xff] %v2436_v63  ;;  %2445 = vst [vmem:[%s5741_s27 + $0x28] sm:$0xff] %v2437_v27 }
 0x4a6   : >> { %2446 = vst [vmem:[%s5741_s27 + $0x30] sm:$0xff] %v2438_v6  ;;  %2447 = vst [vmem:[%s5741_s27 + $0x38] sm:$0xff] %v2439_v12 }
 0x4a7 PF: > { %s5742_s27 = sld [smem:[#allocation44_spill]] }
 0x4a8   : > { %s5743_s24 = sld [smem:[#allocation41_spill]] }
 0x4a9   : > { %s5744_s25 = sld [smem:[#allocation42_spill]] }
 0x4aa   : > { %s5745_s26 = sld [smem:[#allocation45_spill]] }
 0x4ad   : > { %p36_p11 = scmp.ge.s32.totalorder %s5742_s27, 4  }
 0x4af   :  { %38 = sbr.rel (!%p36_p11) target bundleno = 31 (0x1f), region = 212 }
 0x4b4   :  { %2469 = vsyncpa [#allocation3], 1 }
 0x4b5   :  { %2471 = vsyncpa [#allocation3 + $0x1], 1 }
 0x4b6   :  { %2472 = vsyncpa [#allocation4], 1 }
 0x4b7   :  { %2474 = vsyncpa [#allocation4 + $0x1], 1 }
 0x4b8   :  { %2475 = vsyncpa [#allocation7], 1 }
 0x4b9   :  { %2476 = vsyncpa [#allocation5], 1 }
 0x4ba   :  { %2478 = vsyncpa [#allocation5 + $0x1], 1 }
 0x4bb   :  { %2479 = vsyncpa [#allocation10], 1 }
 0x4bc   :  { %2480 = vsyncpa [#allocation14], 1 }
 0x4bd   :  { %2481 = vsyncpa [#allocation17], 1 }
 0x4be   :  { %2482 = vsyncpa [#allocation20], 1 }
 0x4bf   :  { %2483 = vsyncpa [#allocation23], 1 }
 0x4c0   :  { %2484 = vsyncpa [#allocation26], 1 }

// kernel: forward.3
= control target key start
LH: loop header
LB: loop body
LE: loop exit
PB: predicated region body
PF: predicated region fallthrough
CT: control target
= control target key end

     0   :  { %12 = vsyncpa [#allocation4], 0  ;;  %s5331_s0 = inlined_call_operand.vmem [shape: f32[2,8192], index: 0, kind: input, shape index: {}]   ;;  %s5332_s1 = inlined_call_operand.hbm [shape: f32[8192,1024], index: 1, kind: input, shape index: {}]   ;;  %s5333_s2 = inlined_call_operand.hbm [shape: f32[1,1024], index: 2, kind: input, shape index: {}]   ;;  %s5334_s3 = inlined_call_operand.hbm [shape: f32[1024,256], index: 3, kind: input, shape index: {}]   ;;  %s5335_s4 = inlined_call_operand.hbm [shape: f32[1,256], index: 4, kind: input, shape index: {}]   ;;  %s5336_s5 = inlined_call_operand.hbm [shape: f32[256,128], index: 5, kind: input, shape index: {}]   ;;  %s5337_s6 = inlined_call_operand.hbm [shape: f32[1,128], index: 6, kind: input, shape index: {}]   ;;  %s5338_s7 = inlined_call_operand.hbm [shape: f32[2,128], index: 7, kind: output, shape index: {}]  }
   0x1   :  { %14 = vsyncpa [#allocation4 + $0x1], 0 }
   0x2   :  { %15 = vsyncpa [#allocation7], 0 }
   0x3   :  { %16 = vsyncpa [#allocation10], 0 }
   0x4   :  { %17 = vsyncpa [#allocation13], 0 }
   0x5   :  { %18 = vsyncpa [#allocation5], 0  ;;  %s4024_s24 = smov 0   ;;  %s4026_s25 = smov 0  }
   0x6   :  { %s4028_s26 = smov 0   ;;  %s4030_s27 = smov 0  }
   0x7 LB: > { %s3969_s28 = smov [#allocation6]   ;;  %s4045_s30 = sadd.s32 4294967295, %s3967_s27   ;;  %s3967_s27 = sphi %s4030_s27, %s5360_s27   ;;  %s3963_s26 = sphi %s4028_s26, %s5359_s26   ;;  %s3959_s25 = sphi %s4026_s25, %s5358_s25   ;;  %s3955_s24 = sphi %s4024_s24, %s5357_s24  }
   0x8   : > { %s220_s29 = sshll.u32 %s3969_s28, 4  ;;  %p3562_p0 = scmp.ge.s32.totalorder %s3967_s27, 1  ;;  %s221_s29 = int_to_ptr.vmem [resolvable:$true] %s220_s29 }
   0x9   : > { %p5339_p1 = scmp.eq.s32.totalorder %s4045_s30, 0  ;;  %p207_p2 = scmp.lt.s32.totalorder %s3967_s27, 9 }
   0xa   : > { %s3970_s9 = smov [#allocation9]   ;;  %s3971_s11 = smov [#allocation8]  }
   0xb   : > { %p4051_p4 = pnand %p3562_p0, %p207_p2  ;;  %s244_s10 = sshll.u32 %s3970_s9, 4  ;;  %s245_s10 = int_to_ptr.vmem [resolvable:$true] %s244_s10 }
   0xc   : > { %s230_s12 = sshll.u32 %s3971_s11, 4  ;;  %s3746_s15 = scalar_lea.vmem %s221_s29, 128  ;;  %s4063_s12 = int_to_ptr.vmem [resolvable:$true] %s230_s12 }
   0xd   : > { %s5342_s8 = scalar_select %p4051_p4, 1, 0 }
   0xe   : > { %p3652_p5 = pneg %p4051_p4  ;;  %p3747_p8 = scmp.ne.s32.totalorder %s221_s29, %s3746_s15 }
   0xf   : > { %p3754_p11 = scmp.lt.s32.totalorder %s221_s29, %s221_s29  ;;  %p3755_p12 = scmp.lt.s32.totalorder %s3746_s15, %s3746_s15 }
  0x10   : > { %p4059_p6 = pnand %p3652_p5, %p5339_p1 }
  0x11   : > { %p3756_p13 = por %p3755_p12, %p3754_p11 }
  0x12   : > { %p4067_p7 = pneg %p4059_p6 }
  0x14   : > { %p3749_p9 = pnand %p3747_p8, %p4067_p7 }
  0x16   : > { %p3750_p10 = pneg %p3749_p9 }
  0x18   : > { %p3757_p0 = pnand %p3756_p13, %p3750_p10 }
  0x1a   : > { %3760 = shalt.err (!%p3757_p0)
}
  0x1b   : > { %3655 = dma.hbm_to_vmem [thread:$0]  (!%p4059_p6), %s5333_s2, 128, %s221_s29, [#allocation7]  }
  0x1c   : > { %s3772_s18 = scalar_lea.vmem %s245_s10, 32  ;;  %p3780_p1 = scmp.lt.s32.totalorder %s245_s10, %s245_s10 }
  0x1d   : > { %p3773_p2 = scmp.ne.s32.totalorder %s245_s10, %s3772_s18  ;;  %p3781_p8 = scmp.lt.s32.totalorder %s3772_s18, %s3772_s18 }
  0x1f   : > { %p3775_p5 = pnand %p3773_p2, %p4067_p7  ;;  %p3782_p9 = por %p3781_p8, %p3780_p1 }
  0x21   : > { %p3776_p3 = pneg %p3775_p5 }
  0x23   : > { %p3783_p4 = pnand %p3782_p9, %p3776_p3 }
  0x25   : > { %3786 = shalt.err (!%p3783_p4)
}
  0x26   : > { %3661 = dma.hbm_to_vmem [thread:$0]  (!%p4059_p6), %s5335_s4, 32, %s245_s10, [#allocation10]  }
  0x27   : > { %s3798_s21 = scalar_lea.vmem %s4063_s12, 32768  ;;  %p3806_p13 = scmp.lt.s32.totalorder %s4063_s12, %s4063_s12 }
  0x28   : > { %p3799_p10 = scmp.ne.s32.totalorder %s4063_s12, %s3798_s21  ;;  %p3807_p1 = scmp.lt.s32.totalorder %s3798_s21, %s3798_s21 }
  0x2a   : > { %p3801_p11 = pnand %p3799_p10, %p4067_p7  ;;  %p3808_p3 = por %p3807_p1, %p3806_p13 }
  0x2c   : > { %p3802_p12 = pneg %p3801_p11 }
  0x2e   : > { %p3809_p4 = pnand %p3808_p3, %p3802_p12 }
  0x30   : > { %3812 = shalt.err (!%p3809_p4)
}
  0x31   : > { %s3972_s22 = smov 256   ;;  %s3973_s23 = smov 16  }
  0x32   : > { %3658 = dma.hbm_to_vmem [thread:$0]  (!%p4059_p6), %s5334_s3, 32768, %s4063_s12, [#allocation7], %s3972_s22, %s3972_s22, %s3973_s23  }
  0x33   : > { %s3974_s9 = smov [#allocation11]  }
  0x34   : > { %s254_s10 = sshll.u32 %s3974_s9, 4  ;;  %s255_s10 = int_to_ptr.vmem [resolvable:$true] %s254_s10 }
  0x35   : > { %s3824_s11 = scalar_lea.vmem %s255_s10, 4096  ;;  %p3832_p8 = scmp.lt.s32.totalorder %s255_s10, %s255_s10 }
  0x36   : > { %p3825_p0 = scmp.ne.s32.totalorder %s255_s10, %s3824_s11  ;;  %p3833_p9 = scmp.lt.s32.totalorder %s3824_s11, %s3824_s11 }
  0x38   : > { %p3827_p2 = pnand %p3825_p0, %p4067_p7  ;;  %p3834_p10 = por %p3833_p9, %p3832_p8 }
  0x3a   : > { %p3828_p5 = pneg %p3827_p2 }
  0x3c   : > { %p3835_p11 = pnand %p3834_p10, %p3828_p5 }
  0x3e   : > { %3838 = shalt.err (!%p3835_p11)
}
  0x3f   : > { %s3975_s15 = smov 128   ;;  %s3976_s16 = smov 8  }
  0x40   : > { %3664 = dma.hbm_to_vmem [thread:$0]  (!%p4059_p6), %s5336_s5, 4096, %s255_s10, [#allocation10], %s3975_s15, %s3975_s15, %s3976_s16  }
  0x41   : > { %s3977_s18 = smov [#allocation12]  }
  0x42   : > { %s268_s19 = sshll.u32 %s3977_s18, 4  ;;  %s269_s19 = int_to_ptr.vmem [resolvable:$true] %s268_s19 }
  0x43   : > { %s3850_s20 = scalar_lea.vmem %s269_s19, 16  ;;  %s3857_s21 = scalar_lea.vmem %s269_s19, 32 }
  0x44   : > { %p3851_p12 = scmp.ne.s32.totalorder %s269_s19, %s3850_s20  ;;  %p3858_p3 = scmp.lt.s32.totalorder %s269_s19, %s269_s19 }
  0x45   : > { %p3859_p4 = scmp.lt.s32.totalorder %s3857_s21, %s3850_s20 }
  0x46   : > { %p3853_p13 = pnand %p3851_p12, %p4067_p7 }
  0x47   : > { %p3860_p0 = por %p3859_p4, %p3858_p3 }
  0x48   : > { %p3854_p1 = pneg %p3853_p13 }
  0x4a   : > { %p3861_p2 = pnand %p3860_p0, %p3854_p1 }
  0x4c   : > { %3864 = shalt.err (!%p3861_p2)
}
  0x4d   : > { %3667 = dma.hbm_to_vmem [thread:$0]  (!%p4059_p6), %s5337_s6, 16, %s269_s19, [#allocation13]  }
  0x4e   : > { %s4112_s14 = sadd.s32 1, %s3967_s27   ;;  %s57_s28 = sadd.s32 1, %s3963_s26 }
  0x4f   : > { %s54_s13 = ssub.s32 %s3967_s27, %s4112_s14  ;;  %p64_p5 = scmp.ne.s32.totalorder %s3963_s26, %s3959_s25 }
  0x50   : > { %p55_p7 = scmp.eq.s32.totalorder %s54_s13, 0  ;;  %p65_p8 = scmp.eq.s32.totalorder %s3967_s27, 0 }
  0x51   : > { %p70_p9 = scmp.ne.s32.totalorder %s3959_s25, %s3955_s24  ;;  %p5345_p11 = scmp.eq.s32.totalorder %s4045_s30, 0 }
  0x52   : > { %s4123_s29 = scalar_select %p55_p7, %s3963_s26, %s57_s28  }
  0x53   : > { %p66_p10 = por %p65_p8, %p64_p5  ;;  %p4127_p12 = por %p5345_p11, %p70_p9 }
  0x54   : > { %p3677_p13 = scmp.lt.s32.totalorder %s3967_s27, 8  ;;  %s288_s10 = sand.u32 1, %s3963_s26  }
  0x55   : > { %s5346_s9 = scalar_select %p4127_p12, 1, 0 }
  0x56   : > { %s3569_s11 = sshll.u32 %s288_s10, 13  ;;  %s3590_s15 = sshll.u32 %s3967_s27, 17 }
  0x57   : > { %s4137_s12 = scalar_lea.hbm %s5332_s1, %s3590_s15  ;;  %s292_s24 = scalar_lea.vmem [#allocation3], %s3569_s11 }
  0x58   : > { %s300_s18 = sshll.u32 %s292_s24, 4  ;;  %p4141_p6 = pnand %p3677_p13, %p66_p10  ;;  %s4139_s18 = int_to_ptr.vmem [resolvable:$true] %s300_s18 }
  0x59   : > { %s4145_s20 = scalar_lea.sflag [#allocation4], %s288_s10  ;;  %s3865_s27 = scalar_lea.hbm %s4137_s12, 131072 }
  0x5a   : > { %p3866_p1 = scmp.ne.s32.totalorder %s4137_s12, %s3865_s27  ;;  %p3867_p3 = pneg %p4141_p6 }
  0x5b   : > { %s3870_s23 = scalar_lea.hbm %s5332_s1, 1048576  ;;  %p3871_p2 = scmp.lt.s32.totalorder %s4137_s12, %s5332_s1 }
  0x5c   : > { %p3868_p4 = pnand %p3867_p3, %p3866_p1  ;;  %p3872_p7 = scmp.lt.s32.totalorder %s3870_s23, %s3865_s27 }
  0x5e   : > { %p3869_p0 = pneg %p3868_p4  ;;  %p3873_p5 = por %p3872_p7, %p3871_p2 }
  0x60   : > { %p3874_p8 = pnand %p3873_p5, %p3869_p0 }
  0x62   : > { %3877 = shalt.err (!%p3874_p8)
}
  0x63   : > { %s3878_s10 = scalar_lea.vmem %s4139_s18, 131072  ;;  %s3978_s11 = smov [#allocation3]  }
  0x64   : > { %p3879_p9 = scmp.ne.s32.totalorder %s4139_s18, %s3878_s10  ;;  %s3883_s15 = sshll.u32 %s3978_s11, 4  ;;  %s3884_s15 = int_to_ptr.vmem [resolvable:$false] %s3883_s15 }
  0x65   : > { %s3885_s16 = scalar_lea.vmem %s3884_s15, 262144  ;;  %p3886_p13 = scmp.lt.s32.totalorder %s4139_s18, %s3884_s15 }
  0x66   : > { %p3881_p10 = pnand %p3879_p9, %p3867_p3  ;;  %p3887_p1 = scmp.lt.s32.totalorder %s3885_s16, %s3878_s10 }
  0x68   : > { %p3882_p11 = pneg %p3881_p10  ;;  %p3888_p4 = por %p3887_p1, %p3886_p13 }
  0x6a   : > { %p3889_p12 = pnand %p3888_p4, %p3882_p11 }
  0x6c   : > { %3892 = shalt.err (!%p3889_p12)
}
  0x6d   : > { %s3979_s17 = smov 1024   ;;  %s3980_s24 = smov 64  }
  0x6e   : > { %3671 = dma.hbm_to_vmem [thread:$0]  (!%p4141_p6), %s4137_s12, 131072, %s4139_s18, %s4145_s20, %s3979_s17, %s3979_s17, %s3980_s24  }
  0x6f   : > { %p5348_p3 = scmp.ne.s32.totalorder %s5342_s8, 0 }
  0x70   : > { %s314_s27 = sand.u32 (!%p5348_p3), 1, %s3959_s25   ;;  %p5349_p0 = scmp.ne.s32.totalorder (!%p5348_p3), %s5346_s9, 0 }
  0x71   : > { %312 = sbr.rel (%p5348_p3) target bundleno = 1437 (0x59d), region = 48  ;;  %s3574_s21 = sshll.u32 (!%p5348_p3), %s314_s27, 13 }
  0x72   : > { %s315_s22 = scalar_lea.sflag (!%p5348_p3), [#allocation4], %s314_s27  ;;  %s4169_s23 = scalar_lea.vmem (!%p5348_p3), [#allocation3], %s3574_s21 }
  0x76   : > { %3934 = dma.done.wait (%p5349_p0), %s315_s22, 131072  }
  0x77   : > { %3936 = vsyncadd (%p5349_p0), %s315_s22, 4294836224  ;;  %p5350_p12 = scmp.eq.s32.totalorder %s4045_s30, 0 }
  0x79   : > { %3938 = dma.done.wait (%p5350_p12), [#allocation7], 32896   ;;  %p5351_p6 = pmov %p5350_p12 }
  0x7b   : > { %3940 = vsyncadd (%p5351_p6), [#allocation7], 4294934400  ;;  %p5352_p2 = pmov %p5351_p6 }
  0x7d   : > { %3942 = dma.done.wait (%p5352_p2), [#allocation10], 4128   ;;  %p5353_p7 = pmov %p5352_p2 }
  0x7e   : > { %p5354_p5 = pmov %p5352_p2 }
  0x7f   : > { %3944 = vsyncadd (%p5353_p7), [#allocation10], 4294963168 }
  0x80   : > { %3946 = dma.done.wait (%p5354_p5), [#allocation13], 16   ;;  %p5355_p8 = pmov %p5352_p2 }
  0x81   : > { %s3580_s8 = sshll.u32 %s4045_s30, 3  ;;  %p5356_p10 = scmp.ne.s32.totalorder %s4045_s30, 0 }
  0x82   : > { %3948 = vsyncadd (%p5355_p8), [#allocation13], 4294967280  ;;  %p370_p9 = scmp.lt.s32.totalorder %s3580_s8, 63 }
  0x83   : > { %379 = sbr.rel (%p5356_p10) target bundleno = 154 (0x9a), region = 76 }
  0x84   : > { %s5362_s8 = smov (!%p370_p9, %s3580_s8), 63 }
  0x85   : > { %s3581_s9 = sshll.u32 %s5362_s8, 1 }
  0x86   : > { %s4191_s19 = scalar_lea.vmem %s5331_s0, %s3581_s9 }
  0x88   : > { %v382_v0 = vlaneseq  ;;  %v3981_v1 = vmov 1983009808   ;;  %v380_v4 = vld [vmem:[#allocation6] sm:$0xff] }
  0x89   : > { %v441_v2 = vunpack.c.l.s4 %v3981_v1 }
  0x8a   : > { %v383_v3 = vshrl.u32 %v382_v0, 7 }
  0x8b   : > { %v442_v5 = vunpack.c.0.s8 %v441_v2 }
  0x8c   : > { %v384_v6 = vsub.s32 0, %v383_v3  ;;  %v388_v7 = vsub.s32 1, %v383_v3  ;;  %v392_v8 = vsub.s32 2, %v383_v3  ;;  %v396_v9 = vsub.s32 3, %v383_v3 }
  0x8d   : > { %v445_v10 = vsub.s32 %v442_v5, %v383_v3  ;;  %v400_v11 = vsub.s32 4, %v383_v3  ;;  %v404_v12 = vsub.s32 5, %v383_v3  ;;  %v408_v13 = vsub.s32 6, %v383_v3 }
  0x8e   : > { %v385_v14 = vrot.slane %v380_v4, %v384_v6  ;;  %v389_v15 = vrot.slane %v380_v4, %v388_v7  ;;  %v393_v16 = vrot.slane %v380_v4, %v392_v8  ;;  %v397_v17 = vrot.slane %v380_v4, %v396_v9 }
  0x8f   : > { %v401_v18 = vrot.slane %v380_v4, %v400_v11  ;;  %v405_v19 = vrot.slane %v380_v4, %v404_v12  ;;  %v409_v20 = vrot.slane %v380_v4, %v408_v13  ;;  %v412_v21 = vsub.s32 7, %v383_v3 }
  0x90   : > { %v438_v22 = vcombine.low %v385_v14, %v389_v15  ;;  %v439_v23 = vcombine.low %v393_v16, %v397_v17 }
  0x91   : > { %v413_v24 = vrot.slane %v380_v4, %v412_v21  ;;  %v455_v25 = vcombine.low %v401_v18, %v405_v19 }
  0x92   : > { %v446_v26 = vrot.slane %v438_v22, %v445_v10  ;;  %v453_v27 = vrot.slane %v439_v23, %v445_v10 }
  0x93   : > { %v456_v28 = vcombine.low %v409_v20, %v413_v24  ;;  %v463_v29 = vrot.slane %v455_v25, %v445_v10 }
  0x94   : > { %v454_v30 = vcombine.low %v446_v26, %v453_v27 }
  0x95   : > { %v470_v31 = vrot.slane %v456_v28, %v445_v10 }
  0x96   : > { %474 = vst [vmem:[#allocation2] sm:$0xff] %v454_v30 }
  0x97   : > { %v471_v32 = vcombine.low %v463_v29, %v470_v31 }
  0x99   : > { %475 = vst [vmem:[#allocation2 + $0x8] sm:$0xff] %v471_v32 }
  0x9a PF: > { %v601_v33 = vld [vmem:[%s4169_s23 + $0x3c8] sm:$0xff]  ;;  %v600_v35 = vld [vmem:[%s4169_s23 + $0x3c0] sm:$0xff]  ;;  %p3583_p11 = scmp.ne.s32.totalorder %s4045_s30, 7 }
  0x9b   : > { %v857_v34 = vld [vmem:[%s4169_s23 + $0xbc8] sm:$0xff]  ;;  %1548 = vmatprep.subr.mxu0 %v601_v33  ;;  %v856_v36 = vld [vmem:[%s4169_s23 + $0xbc0] sm:$0xff] }
  0x9c   : > { %1619 = vmatprep.subr.mxu1 %v857_v34  ;;  %v593_v37 = vld [vmem:[%s4169_s23 + $0x388] sm:$0xff]  ;;  %1549 = vmatpush1.msra.mxu0 %v600_v35  ;;  %v592_v39 = vld [vmem:[%s4169_s23 + $0x380] sm:$0xff] }
  0x9d   : > { %v849_v38 = vld [vmem:[%s4169_s23 + $0xb88] sm:$0xff]  ;;  %1620 = vmatpush1.msra.mxu1 %v856_v36  ;;  %v848_v40 = vld [vmem:[%s4169_s23 + $0xb80] sm:$0xff]  ;;  %1550 = vmatprep.subr.mxu0 %v593_v37 }
  0x9e   : > { %v585_v41 = vld [vmem:[%s4169_s23 + $0x348] sm:$0xff]  ;;  %1621 = vmatprep.subr.mxu1 %v849_v38  ;;  %v584_v43 = vld [vmem:[%s4169_s23 + $0x340] sm:$0xff]  ;;  %1551 = vmatpush1.msra.mxu0 %v592_v39 }
  0x9f   : > { %v841_v42 = vld [vmem:[%s4169_s23 + $0xb48] sm:$0xff]  ;;  %v840_v44 = vld [vmem:[%s4169_s23 + $0xb40] sm:$0xff]  ;;  %1622 = vmatpush1.msra.mxu1 %v848_v40  ;;  %1552 = vmatprep.subr.mxu0 %v585_v41 }
  0xa0   : > { %v577_v45 = vld [vmem:[%s4169_s23 + $0x308] sm:$0xff]  ;;  %1623 = vmatprep.subr.mxu1 %v841_v42  ;;  %v576_v47 = vld [vmem:[%s4169_s23 + $0x300] sm:$0xff]  ;;  %1553 = vmatpush1.msra.mxu0 %v584_v43 }
  0xa1   : > { %v833_v46 = vld [vmem:[%s4169_s23 + $0xb08] sm:$0xff]  ;;  %v832_v48 = vld [vmem:[%s4169_s23 + $0xb00] sm:$0xff]  ;;  %1624 = vmatpush1.msra.mxu1 %v840_v44  ;;  %1554 = vmatprep.subr.mxu0 %v577_v45 }
  0xa2   : > { %v569_v49 = vld [vmem:[%s4169_s23 + $0x2c8] sm:$0xff]  ;;  %1625 = vmatprep.subr.mxu1 %v833_v46  ;;  %v568_v51 = vld [vmem:[%s4169_s23 + $0x2c0] sm:$0xff]  ;;  %1555 = vmatpush1.msra.mxu0 %v576_v47 }
  0xa3   : > { %v825_v50 = vld [vmem:[%s4169_s23 + $0xac8] sm:$0xff]  ;;  %v824_v52 = vld [vmem:[%s4169_s23 + $0xac0] sm:$0xff]  ;;  %1626 = vmatpush1.msra.mxu1 %v832_v48  ;;  %1556 = vmatprep.subr.mxu0 %v569_v49 }
  0xa4   : > { %v561_v53 = vld [vmem:[%s4169_s23 + $0x288] sm:$0xff]  ;;  %1627 = vmatprep.subr.mxu1 %v825_v50  ;;  %v560_v55 = vld [vmem:[%s4169_s23 + $0x280] sm:$0xff]  ;;  %1557 = vmatpush1.msra.mxu0 %v568_v51 }
  0xa5   : > { %v817_v54 = vld [vmem:[%s4169_s23 + $0xa88] sm:$0xff]  ;;  %v816_v56 = vld [vmem:[%s4169_s23 + $0xa80] sm:$0xff]  ;;  %1628 = vmatpush1.msra.mxu1 %v824_v52  ;;  %1558 = vmatprep.subr.mxu0 %v561_v53 }
  0xa6   : > { %v553_v57 = vld [vmem:[%s4169_s23 + $0x248] sm:$0xff]  ;;  %1629 = vmatprep.subr.mxu1 %v817_v54  ;;  %v552_v59 = vld [vmem:[%s4169_s23 + $0x240] sm:$0xff]  ;;  %1559 = vmatpush1.msra.mxu0 %v560_v55 }
  0xa7   : > { %v809_v58 = vld [vmem:[%s4169_s23 + $0xa48] sm:$0xff]  ;;  %v808_v60 = vld [vmem:[%s4169_s23 + $0xa40] sm:$0xff]  ;;  %1630 = vmatpush1.msra.mxu1 %v816_v56  ;;  %1560 = vmatprep.subr.mxu0 %v553_v57 }
  0xa8   : > { %v545_v61 = vld [vmem:[%s4169_s23 + $0x208] sm:$0xff]  ;;  %1631 = vmatprep.subr.mxu1 %v809_v58  ;;  %v544_v63 = vld [vmem:[%s4169_s23 + $0x200] sm:$0xff]  ;;  %1561 = vmatpush1.msra.mxu0 %v552_v59 }
  0xa9   : > { %v801_v62 = vld [vmem:[%s4169_s23 + $0xa08] sm:$0xff]  ;;  %v800_v0 = vld [vmem:[%s4169_s23 + $0xa00] sm:$0xff]  ;;  %1632 = vmatpush1.msra.mxu1 %v808_v60  ;;  %1562 = vmatprep.subr.mxu0 %v545_v61 }
  0xaa   : > { %v537_v1 = vld [vmem:[%s4169_s23 + $0x1c8] sm:$0xff]  ;;  %1633 = vmatprep.subr.mxu1 %v801_v62  ;;  %v536_v3 = vld [vmem:[%s4169_s23 + $0x1c0] sm:$0xff]  ;;  %1563 = vmatpush1.msra.mxu0 %v544_v63  ;;  %v3982_v63 = vmov 1983009808  }
  0xab   : > { %v793_v2 = vld [vmem:[%s4169_s23 + $0x9c8] sm:$0xff]  ;;  %v792_v4 = vld [vmem:[%s4169_s23 + $0x9c0] sm:$0xff]  ;;  %1634 = vmatpush1.msra.mxu1 %v800_v0  ;;  %1564 = vmatprep.subr.mxu0 %v537_v1  ;;  %v1508_v0 = vunpack.c.l.s4 %v3982_v63  ;;  %v1510_v1 = vlaneseq }
  0xac   : > { %v529_v5 = vld [vmem:[%s4169_s23 + $0x188] sm:$0xff]  ;;  %1635 = vmatprep.subr.mxu1 %v793_v2  ;;  %v528_v7 = vld [vmem:[%s4169_s23 + $0x180] sm:$0xff]  ;;  %1565 = vmatpush1.msra.mxu0 %v536_v3 }
  0xad   : > { %v785_v6 = vld [vmem:[%s4169_s23 + $0x988] sm:$0xff]  ;;  %v784_v8 = vld [vmem:[%s4169_s23 + $0x980] sm:$0xff]  ;;  %1636 = vmatpush1.msra.mxu1 %v792_v4  ;;  %1566 = vmatprep.subr.mxu0 %v529_v5 }
  0xae   : > { %v521_v9 = vld [vmem:[%s4169_s23 + $0x148] sm:$0xff]  ;;  %1637 = vmatprep.subr.mxu1 %v785_v6  ;;  %v520_v11 = vld [vmem:[%s4169_s23 + $0x140] sm:$0xff]  ;;  %1567 = vmatpush1.msra.mxu0 %v528_v7 }
  0xaf   : > { %v777_v10 = vld [vmem:[%s4169_s23 + $0x948] sm:$0xff]  ;;  %v776_v12 = vld [vmem:[%s4169_s23 + $0x940] sm:$0xff]  ;;  %1638 = vmatpush1.msra.mxu1 %v784_v8  ;;  %1568 = vmatprep.subr.mxu0 %v521_v9 }
  0xb0   : > { %v513_v13 = vld [vmem:[%s4169_s23 + $0x108] sm:$0xff]  ;;  %1639 = vmatprep.subr.mxu1 %v777_v10  ;;  %v512_v15 = vld [vmem:[%s4169_s23 + $0x100] sm:$0xff]  ;;  %1569 = vmatpush1.msra.mxu0 %v520_v11  ;;  %v1509_v10 = vunpack.c.0.s8 %v1508_v0  ;;  %v4297_v11 = vshrl.u32 %v1510_v1, 7 }
  0xb1   : > { %v769_v14 = vld [vmem:[%s4169_s23 + $0x908] sm:$0xff]  ;;  %v768_v16 = vld [vmem:[%s4169_s23 + $0x900] sm:$0xff]  ;;  %1640 = vmatpush1.msra.mxu1 %v776_v12  ;;  %1570 = vmatprep.subr.mxu0 %v513_v13 }
  0xb2   : > { %v505_v17 = vld [vmem:[%s4169_s23 + $0xc8] sm:$0xff]  ;;  %1641 = vmatprep.subr.mxu1 %v769_v14  ;;  %v504_v19 = vld [vmem:[%s4169_s23 + $0xc0] sm:$0xff]  ;;  %1571 = vmatpush1.msra.mxu0 %v512_v15 }
  0xb3   : > { %v761_v18 = vld [vmem:[%s4169_s23 + $0x8c8] sm:$0xff]  ;;  %v760_v20 = vld [vmem:[%s4169_s23 + $0x8c0] sm:$0xff]  ;;  %1642 = vmatpush1.msra.mxu1 %v768_v16  ;;  %1572 = vmatprep.subr.mxu0 %v505_v17  ;;  %v478_v16 = vld [vmem:[%s4191_s19] sm:$0xff] }
  0xb4   : > { %v497_v21 = vld [vmem:[%s4169_s23 + $0x88] sm:$0xff]  ;;  %1643 = vmatprep.subr.mxu1 %v761_v18  ;;  %v496_v23 = vld [vmem:[%s4169_s23 + $0x80] sm:$0xff]  ;;  %1573 = vmatpush1.msra.mxu0 %v504_v19 }
  0xb5   : > { %v753_v22 = vld [vmem:[%s4169_s23 + $0x888] sm:$0xff]  ;;  %v752_v24 = vld [vmem:[%s4169_s23 + $0x880] sm:$0xff]  ;;  %1644 = vmatpush1.msra.mxu1 %v760_v20  ;;  %1574 = vmatprep.subr.mxu0 %v497_v21  ;;  %v4309_v21 = vsub.s32 %v1509_v10, %v4297_v11 }
  0xb6   : > { %v489_v25 = vld [vmem:[%s4169_s23 + $0x48] sm:$0xff]  ;;  %1645 = vmatprep.subr.mxu1 %v753_v22  ;;  %v488_v27 = vld [vmem:[%s4169_s23 + $0x40] sm:$0xff]  ;;  %1575 = vmatpush1.msra.mxu0 %v496_v23 }
  0xb7   : > { %v745_v26 = vld [vmem:[%s4169_s23 + $0x848] sm:$0xff]  ;;  %v744_v28 = vld [vmem:[%s4169_s23 + $0x840] sm:$0xff]  ;;  %1646 = vmatpush1.msra.mxu1 %v752_v24  ;;  %1576 = vmatprep.subr.mxu0 %v489_v25  ;;  %v1506_v24 = vcombine.high %v478_v16, %v478_v16 }
  0xb8   : > { %v481_v29 = vld [vmem:[%s4169_s23 + $0x8] sm:$0xff]  ;;  %1647 = vmatprep.subr.mxu1 %v745_v26  ;;  %v480_v31 = vld [vmem:[%s4169_s23] sm:$0xff]  ;;  %1577 = vmatpush1.msra.mxu0 %v488_v27 }
  0xb9   : > { %v737_v30 = vld [vmem:[%s4169_s23 + $0x808] sm:$0xff]  ;;  %v736_v32 = vld [vmem:[%s4169_s23 + $0x800] sm:$0xff]  ;;  %1648 = vmatpush1.msra.mxu1 %v744_v28  ;;  %1578 = vmatprep.subr.mxu0 %v481_v29 }
  0xba   : > { %v729_v33 = vld [vmem:[%s4169_s23 + $0x7c8] sm:$0xff]  ;;  %1649 = vmatprep.subr.mxu1 %v737_v30  ;;  %v728_v35 = vld [vmem:[%s4169_s23 + $0x7c0] sm:$0xff]  ;;  %1579 = vmatpush1.msra.mxu0 %v480_v31  ;;  %v4320_v31 = vrot.slane %v478_v16, %v4309_v21 }
  0xbb   : > { %v985_v34 = vld [vmem:[%s4169_s23 + $0xfc8] sm:$0xff]  ;;  %v984_v36 = vld [vmem:[%s4169_s23 + $0xfc0] sm:$0xff]  ;;  %1650 = vmatpush1.msra.mxu1 %v736_v32  ;;  %1580 = vmatprep.subr.mxu0 %v729_v33 }
  0xbc   : > { %v721_v37 = vld [vmem:[%s4169_s23 + $0x788] sm:$0xff]  ;;  %1651 = vmatprep.subr.mxu1 %v985_v34  ;;  %v720_v39 = vld [vmem:[%s4169_s23 + $0x780] sm:$0xff]  ;;  %1581 = vmatpush2.msra.mxu0 %v728_v35  ;;  %v4325_v34 = vrot.slane %v1506_v24, %v4309_v21 }
  0xbd   : > { %v977_v38 = vld [vmem:[%s4169_s23 + $0xf88] sm:$0xff]  ;;  %v976_v40 = vld [vmem:[%s4169_s23 + $0xf80] sm:$0xff]  ;;  %1652 = vmatpush2.msra.mxu1 %v984_v36  ;;  %1582 = vmatprep.subr.mxu0 %v721_v37 }
  0xbe   : > { %v713_v41 = vld [vmem:[%s4169_s23 + $0x748] sm:$0xff]  ;;  %1653 = vmatprep.subr.mxu1 %v977_v38  ;;  %v712_v43 = vld [vmem:[%s4169_s23 + $0x740] sm:$0xff]  ;;  %1583 = vmatpush2.msra.mxu0 %v720_v39 }
  0xbf   : > { %v969_v42 = vld [vmem:[%s4169_s23 + $0xf48] sm:$0xff]  ;;  %v968_v44 = vld [vmem:[%s4169_s23 + $0xf40] sm:$0xff]  ;;  %1654 = vmatpush2.msra.mxu1 %v976_v40  ;;  %1584 = vmatprep.subr.mxu0 %v713_v41  ;;  %v4335_v41 = vcombine.high %v4320_v31, %v4320_v31 }
  0xc0   : > { %v705_v45 = vld [vmem:[%s4169_s23 + $0x708] sm:$0xff]  ;;  %1655 = vmatprep.subr.mxu1 %v969_v42  ;;  %v704_v47 = vld [vmem:[%s4169_s23 + $0x700] sm:$0xff]  ;;  %1585 = vmatpush2.msra.mxu0 %v712_v43  ;;  %v4340_v43 = vcombine.high %v4325_v34, %v4325_v34 }
  0xc1   : > { %v961_v46 = vld [vmem:[%s4169_s23 + $0xf08] sm:$0xff]  ;;  %v960_v48 = vld [vmem:[%s4169_s23 + $0xf00] sm:$0xff]  ;;  %1656 = vmatpush2.msra.mxu1 %v968_v44  ;;  %1586 = vmatprep.subr.mxu0 %v705_v45 }
  0xc2   : > { %v697_v49 = vld [vmem:[%s4169_s23 + $0x6c8] sm:$0xff]  ;;  %1657 = vmatprep.subr.mxu1 %v961_v46  ;;  %v696_v51 = vld [vmem:[%s4169_s23 + $0x6c0] sm:$0xff]  ;;  %1587 = vmatpush2.msra.mxu0 %v704_v47 }
  0xc3   : > { %v953_v50 = vld [vmem:[%s4169_s23 + $0xec8] sm:$0xff]  ;;  %v952_v52 = vld [vmem:[%s4169_s23 + $0xec0] sm:$0xff]  ;;  %1658 = vmatpush2.msra.mxu1 %v960_v48  ;;  %1588 = vmatprep.subr.mxu0 %v697_v49 }
  0xc4   : > { %v689_v53 = vld [vmem:[%s4169_s23 + $0x688] sm:$0xff]  ;;  %1659 = vmatprep.subr.mxu1 %v953_v50  ;;  %v688_v55 = vld [vmem:[%s4169_s23 + $0x680] sm:$0xff]  ;;  %1589 = vmatpush2.msra.mxu0 %v696_v51 }
  0xc5   : > { %v945_v54 = vld [vmem:[%s4169_s23 + $0xe88] sm:$0xff]  ;;  %v944_v56 = vld [vmem:[%s4169_s23 + $0xe80] sm:$0xff]  ;;  %1660 = vmatpush2.msra.mxu1 %v952_v52  ;;  %1590 = vmatprep.subr.mxu0 %v689_v53 }
  0xc6   : > { %v681_v57 = vld [vmem:[%s4169_s23 + $0x648] sm:$0xff]  ;;  %1661 = vmatprep.subr.mxu1 %v945_v54  ;;  %v680_v59 = vld [vmem:[%s4169_s23 + $0x640] sm:$0xff]  ;;  %1591 = vmatpush2.msra.mxu0 %v688_v55 }
  0xc7   : > { %v937_v58 = vld [vmem:[%s4169_s23 + $0xe48] sm:$0xff]  ;;  %v936_v60 = vld [vmem:[%s4169_s23 + $0xe40] sm:$0xff]  ;;  %1662 = vmatpush2.msra.mxu1 %v944_v56  ;;  %1592 = vmatprep.subr.mxu0 %v681_v57 }
  0xc8   : > { %v673_v61 = vld [vmem:[%s4169_s23 + $0x608] sm:$0xff]  ;;  %1663 = vmatprep.subr.mxu1 %v937_v58  ;;  %v672_v2 = vld [vmem:[%s4169_s23 + $0x600] sm:$0xff]  ;;  %1593 = vmatpush2.msra.mxu0 %v680_v59 }
  0xc9   : > { %v929_v62 = vld [vmem:[%s4169_s23 + $0xe08] sm:$0xff]  ;;  %v928_v3 = vld [vmem:[%s4169_s23 + $0xe00] sm:$0xff]  ;;  %1664 = vmatpush2.msra.mxu1 %v936_v60  ;;  %1594 = vmatprep.subr.mxu0 %v673_v61 }
  0xca   : > { %v665_v4 = vld [vmem:[%s4169_s23 + $0x5c8] sm:$0xff]  ;;  %1665 = vmatprep.subr.mxu1 %v929_v62  ;;  %v664_v6 = vld [vmem:[%s4169_s23 + $0x5c0] sm:$0xff]  ;;  %1595 = vmatpush2.msra.mxu0 %v672_v2 }
  0xcb   : > { %v921_v5 = vld [vmem:[%s4169_s23 + $0xdc8] sm:$0xff]  ;;  %v920_v7 = vld [vmem:[%s4169_s23 + $0xdc0] sm:$0xff]  ;;  %1666 = vmatpush2.msra.mxu1 %v928_v3  ;;  %1596 = vmatprep.subr.mxu0 %v665_v4 }
  0xcc   : > { %v657_v8 = vld [vmem:[%s4169_s23 + $0x588] sm:$0xff]  ;;  %1667 = vmatprep.subr.mxu1 %v921_v5  ;;  %v656_v12 = vld [vmem:[%s4169_s23 + $0x580] sm:$0xff]  ;;  %1597 = vmatpush2.msra.mxu0 %v664_v6 }
  0xcd   : > { %v913_v9 = vld [vmem:[%s4169_s23 + $0xd88] sm:$0xff]  ;;  %v912_v13 = vld [vmem:[%s4169_s23 + $0xd80] sm:$0xff]  ;;  %1668 = vmatpush2.msra.mxu1 %v920_v7  ;;  %1598 = vmatprep.subr.mxu0 %v657_v8 }
  0xce   : > { %v649_v14 = vld [vmem:[%s4169_s23 + $0x548] sm:$0xff]  ;;  %1669 = vmatprep.subr.mxu1 %v913_v9  ;;  %v648_v17 = vld [vmem:[%s4169_s23 + $0x540] sm:$0xff]  ;;  %1599 = vmatpush2.msra.mxu0 %v656_v12 }
  0xcf   : > { %v905_v15 = vld [vmem:[%s4169_s23 + $0xd48] sm:$0xff]  ;;  %v904_v18 = vld [vmem:[%s4169_s23 + $0xd40] sm:$0xff]  ;;  %1670 = vmatpush2.msra.mxu1 %v912_v13  ;;  %1600 = vmatprep.subr.mxu0 %v649_v14 }
  0xd0   : > { %v641_v19 = vld [vmem:[%s4169_s23 + $0x508] sm:$0xff]  ;;  %1671 = vmatprep.subr.mxu1 %v905_v15  ;;  %v640_v22 = vld [vmem:[%s4169_s23 + $0x500] sm:$0xff]  ;;  %1601 = vmatpush2.msra.mxu0 %v648_v17 }
  0xd1   : > { %v897_v20 = vld [vmem:[%s4169_s23 + $0xd08] sm:$0xff]  ;;  %v896_v23 = vld [vmem:[%s4169_s23 + $0xd00] sm:$0xff]  ;;  %1672 = vmatpush2.msra.mxu1 %v904_v18  ;;  %1602 = vmatprep.subr.mxu0 %v641_v19 }
  0xd2   : > { %v633_v25 = vld [vmem:[%s4169_s23 + $0x4c8] sm:$0xff]  ;;  %1673 = vmatprep.subr.mxu1 %v897_v20  ;;  %v632_v27 = vld [vmem:[%s4169_s23 + $0x4c0] sm:$0xff]  ;;  %1603 = vmatpush2.msra.mxu0 %v640_v22 }
  0xd3   : > { %v889_v26 = vld [vmem:[%s4169_s23 + $0xcc8] sm:$0xff]  ;;  %v888_v28 = vld [vmem:[%s4169_s23 + $0xcc0] sm:$0xff]  ;;  %1674 = vmatpush2.msra.mxu1 %v896_v23  ;;  %1604 = vmatprep.subr.mxu0 %v633_v25 }
  0xd4   : > { %v625_v29 = vld [vmem:[%s4169_s23 + $0x488] sm:$0xff]  ;;  %1675 = vmatprep.subr.mxu1 %v889_v26  ;;  %v624_v32 = vld [vmem:[%s4169_s23 + $0x480] sm:$0xff]  ;;  %1605 = vmatpush2.msra.mxu0 %v632_v27 }
  0xd5   : > { %v881_v30 = vld [vmem:[%s4169_s23 + $0xc88] sm:$0xff]  ;;  %v880_v33 = vld [vmem:[%s4169_s23 + $0xc80] sm:$0xff]  ;;  %1676 = vmatpush2.msra.mxu1 %v888_v28  ;;  %1606 = vmatprep.subr.mxu0 %v625_v29 }
  0xd6   : > { %v617_v35 = vld [vmem:[%s4169_s23 + $0x448] sm:$0xff]  ;;  %1677 = vmatprep.subr.mxu1 %v881_v30  ;;  %v616_v37 = vld [vmem:[%s4169_s23 + $0x440] sm:$0xff]  ;;  %1607 = vmatpush2.msra.mxu0 %v624_v32 }
  0xd7   : > { %v873_v36 = vld [vmem:[%s4169_s23 + $0xc48] sm:$0xff]  ;;  %v872_v38 = vld [vmem:[%s4169_s23 + $0xc40] sm:$0xff]  ;;  %1678 = vmatpush2.msra.mxu1 %v880_v33  ;;  %1608 = vmatprep.subr.mxu0 %v617_v35 }
  0xd8   : > { %v609_v39 = vld [vmem:[%s4169_s23 + $0x408] sm:$0xff]  ;;  %1679 = vmatprep.subr.mxu1 %v873_v36  ;;  %v608_v42 = vld [vmem:[%s4169_s23 + $0x400] sm:$0xff]  ;;  %1609 = vmatpush2.msra.mxu0 %v616_v37 }
  0xd9   : > { %v865_v40 = vld [vmem:[%s4169_s23 + $0xc08] sm:$0xff]  ;;  %1680 = vmatpush2.msra.mxu1 %v872_v38  ;;  %v864_v44 = vld [vmem:[%s4169_s23 + $0xc00] sm:$0xff]  ;;  %1610 = vmatprep.subr.mxu0 %v609_v39 }
  0xda   : > { %1681 = vmatprep.subr.mxu1 %v865_v40  ;;  %1611 = vmatpush2.msra.mxu0 %v608_v42  ;;  %v1113_v45 = vld [vmem:[%s4169_s23 + $0x13c8] sm:$0xff]  ;;  %v1112_v47 = vld [vmem:[%s4169_s23 + $0x13c0] sm:$0xff] }
  0xdb   : > { %1612 = vmatprep.mubr.f32.mxu0 %v4335_v41  ;;  %v1369_v46 = vld [vmem:[%s4169_s23 + $0x1bc8] sm:$0xff]  ;;  %1682 = vmatpush2.msra.mxu1 %v864_v44  ;;  %v1368_v48 = vld [vmem:[%s4169_s23 + $0x1bc0] sm:$0xff] }
  0xdc   : > { %1683 = vmatprep.mubr.f32.mxu1 %v4340_v43  ;;  %1613 = vmatmul.mubr.f32.vlgmr.msra.gmra.mxu0 %v4320_v31  ;;  %v1105_v49 = vld [vmem:[%s4169_s23 + $0x1388] sm:$0xff]  ;;  %v1104_v51 = vld [vmem:[%s4169_s23 + $0x1380] sm:$0xff] }
  0xdd   : > { %1684 = vmatmul.mubr.f32.vlgmr.msra.gmra.mxu1 %v4325_v34  ;;  %v1361_v50 = vld [vmem:[%s4169_s23 + $0x1b88] sm:$0xff]  ;;  %1690 = vmatprep.subr.mxu0 %v1113_v45  ;;  %v1360_v52 = vld [vmem:[%s4169_s23 + $0x1b80] sm:$0xff] }
  0xde   : > { %1761 = vmatprep.subr.mxu1 %v1369_v46  ;;  %1691 = vmatpush1.msra.mxu0 %v1112_v47  ;;  %v1097_v53 = vld [vmem:[%s4169_s23 + $0x1348] sm:$0xff]  ;;  %v1096_v55 = vld [vmem:[%s4169_s23 + $0x1340] sm:$0xff] }
  0xdf   : > { %1762 = vmatpush1.msra.mxu1 %v1368_v48  ;;  %v1353_v54 = vld [vmem:[%s4169_s23 + $0x1b48] sm:$0xff]  ;;  %1692 = vmatprep.subr.mxu0 %v1105_v49  ;;  %v1352_v56 = vld [vmem:[%s4169_s23 + $0x1b40] sm:$0xff] }
  0xe0   : > { %1763 = vmatprep.subr.mxu1 %v1361_v50  ;;  %1693 = vmatpush1.msra.mxu0 %v1104_v51  ;;  %v1089_v57 = vld [vmem:[%s4169_s23 + $0x1308] sm:$0xff]  ;;  %v1088_v59 = vld [vmem:[%s4169_s23 + $0x1300] sm:$0xff] }
  0xe1   : > { %1764 = vmatpush1.msra.mxu1 %v1360_v52  ;;  %v1345_v58 = vld [vmem:[%s4169_s23 + $0x1b08] sm:$0xff]  ;;  %1694 = vmatprep.subr.mxu0 %v1097_v53  ;;  %v1344_v60 = vld [vmem:[%s4169_s23 + $0x1b00] sm:$0xff] }
  0xe2   : > { %1765 = vmatprep.subr.mxu1 %v1353_v54  ;;  %1695 = vmatpush1.msra.mxu0 %v1096_v55  ;;  %v1081_v61 = vld [vmem:[%s4169_s23 + $0x12c8] sm:$0xff]  ;;  %v1080_v63 = vld [vmem:[%s4169_s23 + $0x12c0] sm:$0xff] }
  0xe3   : > { %1766 = vmatpush1.msra.mxu1 %v1352_v56  ;;  %v1337_v62 = vld [vmem:[%s4169_s23 + $0x1ac8] sm:$0xff]  ;;  %1696 = vmatprep.subr.mxu0 %v1089_v57  ;;  %v1336_v0 = vld [vmem:[%s4169_s23 + $0x1ac0] sm:$0xff] }
  0xe4   : > { %1767 = vmatprep.subr.mxu1 %v1345_v58  ;;  %1697 = vmatpush1.msra.mxu0 %v1088_v59  ;;  %v1073_v1 = vld [vmem:[%s4169_s23 + $0x1288] sm:$0xff]  ;;  %v1072_v3 = vld [vmem:[%s4169_s23 + $0x1280] sm:$0xff] }
  0xe5   : > { %1768 = vmatpush1.msra.mxu1 %v1344_v60  ;;  %v1329_v2 = vld [vmem:[%s4169_s23 + $0x1a88] sm:$0xff]  ;;  %1698 = vmatprep.subr.mxu0 %v1081_v61  ;;  %v1328_v4 = vld [vmem:[%s4169_s23 + $0x1a80] sm:$0xff] }
  0xe6   : > { %1769 = vmatprep.subr.mxu1 %v1337_v62  ;;  %1699 = vmatpush1.msra.mxu0 %v1080_v63  ;;  %v1065_v5 = vld [vmem:[%s4169_s23 + $0x1248] sm:$0xff]  ;;  %v1064_v7 = vld [vmem:[%s4169_s23 + $0x1240] sm:$0xff] }
  0xe7   : > { %1770 = vmatpush1.msra.mxu1 %v1336_v0  ;;  %v1321_v6 = vld [vmem:[%s4169_s23 + $0x1a48] sm:$0xff]  ;;  %1700 = vmatprep.subr.mxu0 %v1073_v1  ;;  %v1320_v8 = vld [vmem:[%s4169_s23 + $0x1a40] sm:$0xff] }
  0xe8   : > { %1771 = vmatprep.subr.mxu1 %v1329_v2  ;;  %1701 = vmatpush1.msra.mxu0 %v1072_v3  ;;  %v1057_v9 = vld [vmem:[%s4169_s23 + $0x1208] sm:$0xff]  ;;  %v1056_v12 = vld [vmem:[%s4169_s23 + $0x1200] sm:$0xff] }
  0xe9   : > { %1772 = vmatpush1.msra.mxu1 %v1328_v4  ;;  %v1313_v10 = vld [vmem:[%s4169_s23 + $0x1a08] sm:$0xff]  ;;  %1702 = vmatprep.subr.mxu0 %v1065_v5  ;;  %v1312_v13 = vld [vmem:[%s4169_s23 + $0x1a00] sm:$0xff] }
  0xea   : > { %1773 = vmatprep.subr.mxu1 %v1321_v6  ;;  %1703 = vmatpush1.msra.mxu0 %v1064_v7  ;;  %v1049_v14 = vld [vmem:[%s4169_s23 + $0x11c8] sm:$0xff]  ;;  %v1048_v16 = vld [vmem:[%s4169_s23 + $0x11c0] sm:$0xff] }
  0xeb   : > { %1774 = vmatpush1.msra.mxu1 %v1320_v8  ;;  %v1305_v15 = vld [vmem:[%s4169_s23 + $0x19c8] sm:$0xff]  ;;  %1704 = vmatprep.subr.mxu0 %v1057_v9  ;;  %v1304_v17 = vld [vmem:[%s4169_s23 + $0x19c0] sm:$0xff] }
  0xec   : > { %1775 = vmatprep.subr.mxu1 %v1313_v10  ;;  %1705 = vmatpush1.msra.mxu0 %v1056_v12  ;;  %v1041_v18 = vld [vmem:[%s4169_s23 + $0x1188] sm:$0xff]  ;;  %v1040_v20 = vld [vmem:[%s4169_s23 + $0x1180] sm:$0xff] }
  0xed   : > { %1776 = vmatpush1.msra.mxu1 %v1312_v13  ;;  %v1297_v19 = vld [vmem:[%s4169_s23 + $0x1988] sm:$0xff]  ;;  %1706 = vmatprep.subr.mxu0 %v1049_v14  ;;  %v1296_v22 = vld [vmem:[%s4169_s23 + $0x1980] sm:$0xff] }
  0xee   : > { %1777 = vmatprep.subr.mxu1 %v1305_v15  ;;  %1707 = vmatpush1.msra.mxu0 %v1048_v16  ;;  %v1033_v23 = vld [vmem:[%s4169_s23 + $0x1148] sm:$0xff]  ;;  %v1032_v25 = vld [vmem:[%s4169_s23 + $0x1140] sm:$0xff] }
  0xef   : > { %1778 = vmatpush1.msra.mxu1 %v1304_v17  ;;  %v1289_v24 = vld [vmem:[%s4169_s23 + $0x1948] sm:$0xff]  ;;  %1708 = vmatprep.subr.mxu0 %v1041_v18  ;;  %v1288_v26 = vld [vmem:[%s4169_s23 + $0x1940] sm:$0xff] }
  0xf0   : > { %1779 = vmatprep.subr.mxu1 %v1297_v19  ;;  %1709 = vmatpush1.msra.mxu0 %v1040_v20  ;;  %v1025_v27 = vld [vmem:[%s4169_s23 + $0x1108] sm:$0xff]  ;;  %v1024_v29 = vld [vmem:[%s4169_s23 + $0x1100] sm:$0xff] }
  0xf1   : > { %1780 = vmatpush1.msra.mxu1 %v1296_v22  ;;  %v1281_v28 = vld [vmem:[%s4169_s23 + $0x1908] sm:$0xff]  ;;  %1710 = vmatprep.subr.mxu0 %v1033_v23  ;;  %v1280_v30 = vld [vmem:[%s4169_s23 + $0x1900] sm:$0xff] }
  0xf2   : > { %1781 = vmatprep.subr.mxu1 %v1289_v24  ;;  %1711 = vmatpush1.msra.mxu0 %v1032_v25  ;;  %v1017_v32 = vld [vmem:[%s4169_s23 + $0x10c8] sm:$0xff]  ;;  %v1016_v35 = vld [vmem:[%s4169_s23 + $0x10c0] sm:$0xff] }
  0xf3   : > { %1782 = vmatpush1.msra.mxu1 %v1288_v26  ;;  %v1273_v33 = vld [vmem:[%s4169_s23 + $0x18c8] sm:$0xff]  ;;  %1712 = vmatprep.subr.mxu0 %v1025_v27  ;;  %v1272_v36 = vld [vmem:[%s4169_s23 + $0x18c0] sm:$0xff] }
  0xf4   : > { %1783 = vmatprep.subr.mxu1 %v1281_v28  ;;  %1713 = vmatpush1.msra.mxu0 %v1024_v29  ;;  %v1009_v37 = vld [vmem:[%s4169_s23 + $0x1088] sm:$0xff]  ;;  %v1008_v39 = vld [vmem:[%s4169_s23 + $0x1080] sm:$0xff] }
  0xf5   : > { %1784 = vmatpush1.msra.mxu1 %v1280_v30  ;;  %v1265_v38 = vld [vmem:[%s4169_s23 + $0x1888] sm:$0xff]  ;;  %1714 = vmatprep.subr.mxu0 %v1017_v32  ;;  %v1264_v40 = vld [vmem:[%s4169_s23 + $0x1880] sm:$0xff] }
  0xf6   : > { %1785 = vmatprep.subr.mxu1 %v1273_v33  ;;  %1715 = vmatpush1.msra.mxu0 %v1016_v35  ;;  %v1001_v42 = vld [vmem:[%s4169_s23 + $0x1048] sm:$0xff]  ;;  %v1000_v45 = vld [vmem:[%s4169_s23 + $0x1040] sm:$0xff]  ;;  %v479_v35 = vld [vmem:[%s4191_s19 + $0x8] sm:$0xff] }
  0xf7   : > { %1786 = vmatpush1.msra.mxu1 %v1272_v36  ;;  %v1257_v44 = vld [vmem:[%s4169_s23 + $0x1848] sm:$0xff]  ;;  %1716 = vmatprep.subr.mxu0 %v1009_v37  ;;  %v1256_v46 = vld [vmem:[%s4169_s23 + $0x1840] sm:$0xff] }
  0xf8   : > { %1787 = vmatprep.subr.mxu1 %v1265_v38  ;;  %1717 = vmatpush1.msra.mxu0 %v1008_v39  ;;  %v993_v47 = vld [vmem:[%s4169_s23 + $0x1008] sm:$0xff]  ;;  %v992_v49 = vld [vmem:[%s4169_s23 + $0x1000] sm:$0xff] }
  0xf9   : > { %1788 = vmatpush1.msra.mxu1 %v1264_v40  ;;  %v1249_v48 = vld [vmem:[%s4169_s23 + $0x1808] sm:$0xff]  ;;  %1718 = vmatprep.subr.mxu0 %v1001_v42  ;;  %v1248_v50 = vld [vmem:[%s4169_s23 + $0x1800] sm:$0xff] }
  0xfa   : > { %1789 = vmatprep.subr.mxu1 %v1257_v44  ;;  %1719 = vmatpush1.msra.mxu0 %v1000_v45  ;;  %v1241_v51 = vld [vmem:[%s4169_s23 + $0x17c8] sm:$0xff]  ;;  %v1240_v53 = vld [vmem:[%s4169_s23 + $0x17c0] sm:$0xff]  ;;  %v1523_v44 = vcombine.high %v479_v35, %v479_v35 }
  0xfb   : > { %1790 = vmatpush1.msra.mxu1 %v1256_v46  ;;  %v1497_v52 = vld [vmem:[%s4169_s23 + $0x1fc8] sm:$0xff]  ;;  %1720 = vmatprep.subr.mxu0 %v993_v47  ;;  %v1496_v54 = vld [vmem:[%s4169_s23 + $0x1fc0] sm:$0xff] }
  0xfc   : > { %1791 = vmatprep.subr.mxu1 %v1249_v48  ;;  %1721 = vmatpush1.msra.mxu0 %v992_v49  ;;  %v1233_v55 = vld [vmem:[%s4169_s23 + $0x1788] sm:$0xff]  ;;  %v1232_v57 = vld [vmem:[%s4169_s23 + $0x1780] sm:$0xff]  ;;  %v4467_v49 = vrot.slane %v479_v35, %v4309_v21  ;;  %v539_v35 = vld [vmem:[%s4169_s23 + $0x1d8] sm:$0xff] }
  0xfd   : > { %1792 = vmatpush1.msra.mxu1 %v1248_v50  ;;  %v1489_v56 = vld [vmem:[%s4169_s23 + $0x1f88] sm:$0xff]  ;;  %1722 = vmatprep.subr.mxu0 %v1241_v51  ;;  %v1488_v58 = vld [vmem:[%s4169_s23 + $0x1f80] sm:$0xff] }
  0xfe   : > { %1793 = vmatprep.subr.mxu1 %v1497_v52  ;;  %1723 = vmatpush2.msra.mxu0 %v1240_v53  ;;  %v1225_v59 = vld [vmem:[%s4169_s23 + $0x1748] sm:$0xff]  ;;  %v1224_v61 = vld [vmem:[%s4169_s23 + $0x1740] sm:$0xff] }
  0xff   : > { %1794 = vmatpush2.msra.mxu1 %v1496_v54  ;;  %v1481_v60 = vld [vmem:[%s4169_s23 + $0x1f48] sm:$0xff]  ;;  %1724 = vmatprep.subr.mxu0 %v1233_v55  ;;  %v1480_v62 = vld [vmem:[%s4169_s23 + $0x1f40] sm:$0xff]  ;;  %v4474_v54 = vrot.slane %v1523_v44, %v4309_v21  ;;  %v786_v44 = vld [vmem:[%s4169_s23 + $0x990] sm:$0xff] }
 0x100   : > { %1795 = vmatprep.subr.mxu1 %v1489_v56  ;;  %1725 = vmatpush2.msra.mxu0 %v1232_v57  ;;  %v1217_v63 = vld [vmem:[%s4169_s23 + $0x1708] sm:$0xff]  ;;  %v1216_v1 = vld [vmem:[%s4169_s23 + $0x1700] sm:$0xff] }
 0x101   : > { %1796 = vmatpush2.msra.mxu1 %v1488_v58  ;;  %v1473_v0 = vld [vmem:[%s4169_s23 + $0x1f08] sm:$0xff]  ;;  %1726 = vmatprep.subr.mxu0 %v1225_v59  ;;  %v1472_v2 = vld [vmem:[%s4169_s23 + $0x1f00] sm:$0xff]  ;;  %v4482_v59 = vcombine.high %v4467_v49, %v4467_v49 }
 0x102   : > { %1797 = vmatprep.subr.mxu1 %v1481_v60  ;;  %1727 = vmatpush2.msra.mxu0 %v1224_v61  ;;  %v1209_v3 = vld [vmem:[%s4169_s23 + $0x16c8] sm:$0xff]  ;;  %v1208_v5 = vld [vmem:[%s4169_s23 + $0x16c0] sm:$0xff] }
 0x103   : > { %1798 = vmatpush2.msra.mxu1 %v1480_v62  ;;  %v1465_v4 = vld [vmem:[%s4169_s23 + $0x1ec8] sm:$0xff]  ;;  %1728 = vmatprep.subr.mxu0 %v1217_v63  ;;  %v1464_v6 = vld [vmem:[%s4169_s23 + $0x1ec0] sm:$0xff]  ;;  %v4488_v62 = vcombine.high %v4474_v54, %v4474_v54  ;;  %v603_v63 = vld [vmem:[%s4169_s23 + $0x3d8] sm:$0xff] }
 0x104   : > { %1799 = vmatprep.subr.mxu1 %v1473_v0  ;;  %1729 = vmatpush2.msra.mxu0 %v1216_v1  ;;  %v1201_v7 = vld [vmem:[%s4169_s23 + $0x1688] sm:$0xff]  ;;  %v1200_v9 = vld [vmem:[%s4169_s23 + $0x1680] sm:$0xff]  ;;  %v859_v0 = vld [vmem:[%s4169_s23 + $0xbd8] sm:$0xff] }
 0x105   : > { %1800 = vmatpush2.msra.mxu1 %v1472_v2  ;;  %v1457_v8 = vld [vmem:[%s4169_s23 + $0x1e88] sm:$0xff]  ;;  %1730 = vmatprep.subr.mxu0 %v1209_v3  ;;  %v1456_v10 = vld [vmem:[%s4169_s23 + $0x1e80] sm:$0xff]  ;;  %v602_v1 = vld [vmem:[%s4169_s23 + $0x3d0] sm:$0xff] }
 0x106   : > { %1801 = vmatprep.subr.mxu1 %v1465_v4  ;;  %1731 = vmatpush2.msra.mxu0 %v1208_v5  ;;  %v1193_v12 = vld [vmem:[%s4169_s23 + $0x1648] sm:$0xff]  ;;  %v1192_v14 = vld [vmem:[%s4169_s23 + $0x1640] sm:$0xff]  ;;  %v858_v2 = vld [vmem:[%s4169_s23 + $0xbd0] sm:$0xff] }
 0x107   : > { %1802 = vmatpush2.msra.mxu1 %v1464_v6  ;;  %v1449_v13 = vld [vmem:[%s4169_s23 + $0x1e48] sm:$0xff]  ;;  %1732 = vmatprep.subr.mxu0 %v1201_v7  ;;  %v1448_v15 = vld [vmem:[%s4169_s23 + $0x1e40] sm:$0xff]  ;;  %v595_v3 = vld [vmem:[%s4169_s23 + $0x398] sm:$0xff] }
 0x108   : > { %1803 = vmatprep.subr.mxu1 %v1457_v8  ;;  %1733 = vmatpush2.msra.mxu0 %v1200_v9  ;;  %v1185_v16 = vld [vmem:[%s4169_s23 + $0x1608] sm:$0xff]  ;;  %v1184_v18 = vld [vmem:[%s4169_s23 + $0x1600] sm:$0xff]  ;;  %v851_v4 = vld [vmem:[%s4169_s23 + $0xb98] sm:$0xff] }
 0x109   : > { %1804 = vmatpush2.msra.mxu1 %v1456_v10  ;;  %v1441_v17 = vld [vmem:[%s4169_s23 + $0x1e08] sm:$0xff]  ;;  %1734 = vmatprep.subr.mxu0 %v1193_v12  ;;  %v1440_v19 = vld [vmem:[%s4169_s23 + $0x1e00] sm:$0xff]  ;;  %v594_v5 = vld [vmem:[%s4169_s23 + $0x390] sm:$0xff] }
 0x10a   : > { %1805 = vmatprep.subr.mxu1 %v1449_v13  ;;  %1735 = vmatpush2.msra.mxu0 %v1192_v14  ;;  %v1177_v20 = vld [vmem:[%s4169_s23 + $0x15c8] sm:$0xff]  ;;  %v1176_v23 = vld [vmem:[%s4169_s23 + $0x15c0] sm:$0xff]  ;;  %v850_v6 = vld [vmem:[%s4169_s23 + $0xb90] sm:$0xff] }
 0x10b   : > { %1806 = vmatpush2.msra.mxu1 %v1448_v15  ;;  %v1433_v22 = vld [vmem:[%s4169_s23 + $0x1dc8] sm:$0xff]  ;;  %1736 = vmatprep.subr.mxu0 %v1185_v16  ;;  %v1432_v24 = vld [vmem:[%s4169_s23 + $0x1dc0] sm:$0xff]  ;;  %v587_v7 = vld [vmem:[%s4169_s23 + $0x358] sm:$0xff] }
 0x10c   : > { %1807 = vmatprep.subr.mxu1 %v1441_v17  ;;  %1737 = vmatpush2.msra.mxu0 %v1184_v18  ;;  %v1169_v25 = vld [vmem:[%s4169_s23 + $0x1588] sm:$0xff]  ;;  %v1168_v27 = vld [vmem:[%s4169_s23 + $0x1580] sm:$0xff]  ;;  %v843_v8 = vld [vmem:[%s4169_s23 + $0xb58] sm:$0xff] }
 0x10d   : > { %1808 = vmatpush2.msra.mxu1 %v1440_v19  ;;  %v1425_v26 = vld [vmem:[%s4169_s23 + $0x1d88] sm:$0xff]  ;;  %1738 = vmatprep.subr.mxu0 %v1177_v20  ;;  %v1424_v28 = vld [vmem:[%s4169_s23 + $0x1d80] sm:$0xff]  ;;  %v586_v9 = vld [vmem:[%s4169_s23 + $0x350] sm:$0xff] }
 0x10e   : > { %1809 = vmatprep.subr.mxu1 %v1433_v22  ;;  %1739 = vmatpush2.msra.mxu0 %v1176_v23  ;;  %v1161_v29 = vld [vmem:[%s4169_s23 + $0x1548] sm:$0xff]  ;;  %v1160_v32 = vld [vmem:[%s4169_s23 + $0x1540] sm:$0xff]  ;;  %v842_v10 = vld [vmem:[%s4169_s23 + $0xb50] sm:$0xff] }
 0x10f   : > { %1810 = vmatpush2.msra.mxu1 %v1432_v24  ;;  %v1417_v30 = vld [vmem:[%s4169_s23 + $0x1d48] sm:$0xff]  ;;  %1740 = vmatprep.subr.mxu0 %v1169_v25  ;;  %v1416_v33 = vld [vmem:[%s4169_s23 + $0x1d40] sm:$0xff]  ;;  %v579_v12 = vld [vmem:[%s4169_s23 + $0x318] sm:$0xff] }
 0x110   : > { %1811 = vmatprep.subr.mxu1 %v1425_v26  ;;  %1741 = vmatpush2.msra.mxu0 %v1168_v27  ;;  %v1153_v36 = vld [vmem:[%s4169_s23 + $0x1508] sm:$0xff]  ;;  %v1152_v38 = vld [vmem:[%s4169_s23 + $0x1500] sm:$0xff]  ;;  %v835_v13 = vld [vmem:[%s4169_s23 + $0xb18] sm:$0xff] }
 0x111   : > { %1812 = vmatpush2.msra.mxu1 %v1424_v28  ;;  %v1409_v37 = vld [vmem:[%s4169_s23 + $0x1d08] sm:$0xff]  ;;  %1742 = vmatprep.subr.mxu0 %v1161_v29  ;;  %v1408_v39 = vld [vmem:[%s4169_s23 + $0x1d00] sm:$0xff]  ;;  %v578_v14 = vld [vmem:[%s4169_s23 + $0x310] sm:$0xff] }
 0x112   : > { %1813 = vmatprep.subr.mxu1 %v1417_v30  ;;  %1743 = vmatpush2.msra.mxu0 %v1160_v32  ;;  %v1145_v40 = vld [vmem:[%s4169_s23 + $0x14c8] sm:$0xff]  ;;  %v1144_v45 = vld [vmem:[%s4169_s23 + $0x14c0] sm:$0xff]  ;;  %v834_v15 = vld [vmem:[%s4169_s23 + $0xb10] sm:$0xff] }
 0x113   : > { %1814 = vmatpush2.msra.mxu1 %v1416_v33  ;;  %v1401_v42 = vld [vmem:[%s4169_s23 + $0x1cc8] sm:$0xff]  ;;  %1744 = vmatprep.subr.mxu0 %v1153_v36  ;;  %v1400_v46 = vld [vmem:[%s4169_s23 + $0x1cc0] sm:$0xff]  ;;  %v571_v16 = vld [vmem:[%s4169_s23 + $0x2d8] sm:$0xff] }
 0x114   : > { %1815 = vmatprep.subr.mxu1 %v1409_v37  ;;  %1745 = vmatpush2.msra.mxu0 %v1152_v38  ;;  %v1137_v47 = vld [vmem:[%s4169_s23 + $0x1488] sm:$0xff]  ;;  %v1136_v50 = vld [vmem:[%s4169_s23 + $0x1480] sm:$0xff]  ;;  %v827_v17 = vld [vmem:[%s4169_s23 + $0xad8] sm:$0xff] }
 0x115   : > { %1816 = vmatpush2.msra.mxu1 %v1408_v39  ;;  %v1393_v48 = vld [vmem:[%s4169_s23 + $0x1c88] sm:$0xff]  ;;  %1746 = vmatprep.subr.mxu0 %v1145_v40  ;;  %v1392_v51 = vld [vmem:[%s4169_s23 + $0x1c80] sm:$0xff]  ;;  %v570_v18 = vld [vmem:[%s4169_s23 + $0x2d0] sm:$0xff] }
 0x116   : > { %1817 = vmatprep.subr.mxu1 %v1401_v42  ;;  %1747 = vmatpush2.msra.mxu0 %v1144_v45  ;;  %v1129_v52 = vld [vmem:[%s4169_s23 + $0x1448] sm:$0xff]  ;;  %v1128_v55 = vld [vmem:[%s4169_s23 + $0x1440] sm:$0xff]  ;;  %v826_v19 = vld [vmem:[%s4169_s23 + $0xad0] sm:$0xff] }
 0x117   : > { %1818 = vmatpush2.msra.mxu1 %v1400_v46  ;;  %v1385_v53 = vld [vmem:[%s4169_s23 + $0x1c48] sm:$0xff]  ;;  %1748 = vmatprep.subr.mxu0 %v1137_v47  ;;  %v1384_v56 = vld [vmem:[%s4169_s23 + $0x1c40] sm:$0xff]  ;;  %v563_v20 = vld [vmem:[%s4169_s23 + $0x298] sm:$0xff] }
 0x118   : > { %1819 = vmatprep.subr.mxu1 %v1393_v48  ;;  %1749 = vmatpush2.msra.mxu0 %v1136_v50  ;;  %v1121_v57 = vld [vmem:[%s4169_s23 + $0x1408] sm:$0xff]  ;;  %v1120_v60 = vld [vmem:[%s4169_s23 + $0x1400] sm:$0xff]  ;;  %v819_v22 = vld [vmem:[%s4169_s23 + $0xa98] sm:$0xff] }
 0x119   : > { %1820 = vmatpush2.msra.mxu1 %v1392_v51  ;;  %v1377_v58 = vld [vmem:[%s4169_s23 + $0x1c08] sm:$0xff]  ;;  %1750 = vmatprep.subr.mxu0 %v1129_v52  ;;  %v1376_v61 = vld [vmem:[%s4169_s23 + $0x1c00] sm:$0xff]  ;;  %v562_v23 = vld [vmem:[%s4169_s23 + $0x290] sm:$0xff] }
 0x11a   : > { %1821 = vmatprep.subr.mxu1 %v1385_v53  ;;  %1751 = vmatpush2.msra.mxu0 %v1128_v55  ;;  %v818_v24 = vld [vmem:[%s4169_s23 + $0xa90] sm:$0xff]  ;;  %v555_v25 = vld [vmem:[%s4169_s23 + $0x258] sm:$0xff] }
 0x11b   : > { %1822 = vmatpush2.msra.mxu1 %v1384_v56  ;;  %1752 = vmatprep.subr.mxu0 %v1121_v57  ;;  %v811_v26 = vld [vmem:[%s4169_s23 + $0xa58] sm:$0xff]  ;;  %v554_v27 = vld [vmem:[%s4169_s23 + $0x250] sm:$0xff] }
 0x11c   : > { %1823 = vmatprep.subr.mxu1 %v1377_v58  ;;  %1753 = vmatpush2.msra.mxu0 %v1120_v60  ;;  %v810_v28 = vld [vmem:[%s4169_s23 + $0xa50] sm:$0xff]  ;;  %v547_v29 = vld [vmem:[%s4169_s23 + $0x218] sm:$0xff] }
 0x11d   : > { %1754 = vmatprep.mubr.f32.mxu0 %v4482_v59  ;;  %1824 = vmatpush2.msra.mxu1 %v1376_v61  ;;  %v803_v30 = vld [vmem:[%s4169_s23 + $0xa18] sm:$0xff]  ;;  %v546_v32 = vld [vmem:[%s4169_s23 + $0x210] sm:$0xff] }
 0x11e   : > { %1755 = vmatmul.mubr.f32.vlgmr.msra.gmra.mxu0 %v4467_v49  ;;  %1825 = vmatprep.mubr.f32.mxu1 %v4488_v62  ;;  %v802_v33 = vld [vmem:[%s4169_s23 + $0xa10] sm:$0xff]  ;;  %v795_v36 = vld [vmem:[%s4169_s23 + $0x9d8] sm:$0xff] }
 0x11f   : > { %1832 = vmatprep.subr.mxu0 %v603_v63  ;;  %1903 = vmatprep.subr.mxu1 %v859_v0  ;;  %v538_v37 = vld [vmem:[%s4169_s23 + $0x1d0] sm:$0xff]  ;;  %v531_v39 = vld [vmem:[%s4169_s23 + $0x198] sm:$0xff] }
 0x120   : > { %1826 = vmatmul.mubr.f32.vlgmr.msra.gmra.mxu1 %v4474_v54  ;;  %1833 = vmatpush1.msra.mxu0 %v602_v1  ;;  %v794_v38 = vld [vmem:[%s4169_s23 + $0x9d0] sm:$0xff]  ;;  %v787_v40 = vld [vmem:[%s4169_s23 + $0x998] sm:$0xff] }
 0x121   : > { %1904 = vmatpush1.msra.mxu1 %v858_v2  ;;  %1834 = vmatprep.subr.mxu0 %v595_v3  ;;  %v530_v42 = vld [vmem:[%s4169_s23 + $0x190] sm:$0xff]  ;;  %v523_v45 = vld [vmem:[%s4169_s23 + $0x158] sm:$0xff] }
 0x122   : > { %1905 = vmatprep.subr.mxu1 %v851_v4  ;;  %1835 = vmatpush1.msra.mxu0 %v594_v5  ;;  %v779_v46 = vld [vmem:[%s4169_s23 + $0x958] sm:$0xff]  ;;  %v522_v47 = vld [vmem:[%s4169_s23 + $0x150] sm:$0xff] }
 0x123   : > { %1906 = vmatpush1.msra.mxu1 %v850_v6  ;;  %1836 = vmatprep.subr.mxu0 %v587_v7  ;;  %v778_v48 = vld [vmem:[%s4169_s23 + $0x950] sm:$0xff]  ;;  %v515_v50 = vld [vmem:[%s4169_s23 + $0x118] sm:$0xff] }
 0x124   : > { %1907 = vmatprep.subr.mxu1 %v843_v8  ;;  %1837 = vmatpush1.msra.mxu0 %v586_v9  ;;  %v771_v51 = vld [vmem:[%s4169_s23 + $0x918] sm:$0xff]  ;;  %v514_v52 = vld [vmem:[%s4169_s23 + $0x110] sm:$0xff] }
 0x125   : > { %1908 = vmatpush1.msra.mxu1 %v842_v10  ;;  %1838 = vmatprep.subr.mxu0 %v579_v12  ;;  %v770_v53 = vld [vmem:[%s4169_s23 + $0x910] sm:$0xff]  ;;  %v507_v55 = vld [vmem:[%s4169_s23 + $0xd8] sm:$0xff] }
 0x126   : > { %1909 = vmatprep.subr.mxu1 %v835_v13  ;;  %1839 = vmatpush1.msra.mxu0 %v578_v14  ;;  %v763_v56 = vld [vmem:[%s4169_s23 + $0x8d8] sm:$0xff]  ;;  %v506_v57 = vld [vmem:[%s4169_s23 + $0xd0] sm:$0xff] }
 0x127   : > { %1910 = vmatpush1.msra.mxu1 %v834_v15  ;;  %1840 = vmatprep.subr.mxu0 %v571_v16  ;;  %v762_v58 = vld [vmem:[%s4169_s23 + $0x8d0] sm:$0xff]  ;;  %v499_v60 = vld [vmem:[%s4169_s23 + $0x98] sm:$0xff] }
 0x128   : > { %1911 = vmatprep.subr.mxu1 %v827_v17  ;;  %1841 = vmatpush1.msra.mxu0 %v570_v18  ;;  %v755_v61 = vld [vmem:[%s4169_s23 + $0x898] sm:$0xff]  ;;  %v498_v63 = vld [vmem:[%s4169_s23 + $0x90] sm:$0xff] }
 0x129   : > { %1912 = vmatpush1.msra.mxu1 %v826_v19  ;;  %1842 = vmatprep.subr.mxu0 %v563_v20  ;;  %v754_v0 = vld [vmem:[%s4169_s23 + $0x890] sm:$0xff]  ;;  %v491_v1 = vld [vmem:[%s4169_s23 + $0x58] sm:$0xff] }
 0x12a   : > { %1913 = vmatprep.subr.mxu1 %v819_v22  ;;  %1843 = vmatpush1.msra.mxu0 %v562_v23  ;;  %v747_v2 = vld [vmem:[%s4169_s23 + $0x858] sm:$0xff]  ;;  %v490_v3 = vld [vmem:[%s4169_s23 + $0x50] sm:$0xff] }
 0x12b   : > { %1914 = vmatpush1.msra.mxu1 %v818_v24  ;;  %1844 = vmatprep.subr.mxu0 %v555_v25  ;;  %v746_v4 = vld [vmem:[%s4169_s23 + $0x850] sm:$0xff]  ;;  %v483_v5 = vld [vmem:[%s4169_s23 + $0x18] sm:$0xff] }
 0x12c   : > { %1915 = vmatprep.subr.mxu1 %v811_v26  ;;  %1845 = vmatpush1.msra.mxu0 %v554_v27  ;;  %v739_v6 = vld [vmem:[%s4169_s23 + $0x818] sm:$0xff]  ;;  %v482_v7 = vld [vmem:[%s4169_s23 + $0x10] sm:$0xff] }
 0x12d   : > { %1916 = vmatpush1.msra.mxu1 %v810_v28  ;;  %1846 = vmatprep.subr.mxu0 %v547_v29  ;;  %v738_v8 = vld [vmem:[%s4169_s23 + $0x810] sm:$0xff]  ;;  %v731_v9 = vld [vmem:[%s4169_s23 + $0x7d8] sm:$0xff] }
 0x12e   : > { %1917 = vmatprep.subr.mxu1 %v803_v30  ;;  %1847 = vmatpush1.msra.mxu0 %v546_v32  ;;  %v987_v10 = vld [vmem:[%s4169_s23 + $0xfd8] sm:$0xff]  ;;  %v730_v12 = vld [vmem:[%s4169_s23 + $0x7d0] sm:$0xff] }
 0x12f   : > { %1918 = vmatpush1.msra.mxu1 %v802_v33  ;;  %1848 = vmatprep.subr.mxu0 %v539_v35  ;;  %v986_v13 = vld [vmem:[%s4169_s23 + $0xfd0] sm:$0xff]  ;;  %v723_v14 = vld [vmem:[%s4169_s23 + $0x798] sm:$0xff] }
 0x130   : > { %1919 = vmatprep.subr.mxu1 %v795_v36  ;;  %1849 = vmatpush1.msra.mxu0 %v538_v37  ;;  %v979_v15 = vld [vmem:[%s4169_s23 + $0xf98] sm:$0xff]  ;;  %v722_v16 = vld [vmem:[%s4169_s23 + $0x790] sm:$0xff] }
 0x131   : > { %1920 = vmatpush1.msra.mxu1 %v794_v38  ;;  %1850 = vmatprep.subr.mxu0 %v531_v39  ;;  %v978_v17 = vld [vmem:[%s4169_s23 + $0xf90] sm:$0xff]  ;;  %v715_v18 = vld [vmem:[%s4169_s23 + $0x758] sm:$0xff] }
 0x132   : > { %1921 = vmatprep.subr.mxu1 %v787_v40  ;;  %1851 = vmatpush1.msra.mxu0 %v530_v42  ;;  %v971_v19 = vld [vmem:[%s4169_s23 + $0xf58] sm:$0xff]  ;;  %v714_v20 = vld [vmem:[%s4169_s23 + $0x750] sm:$0xff] }
 0x133   : > { %1922 = vmatpush1.msra.mxu1 %v786_v44  ;;  %1852 = vmatprep.subr.mxu0 %v523_v45  ;;  %v970_v22 = vld [vmem:[%s4169_s23 + $0xf50] sm:$0xff]  ;;  %v707_v23 = vld [vmem:[%s4169_s23 + $0x718] sm:$0xff] }
 0x134   : > { %1923 = vmatprep.subr.mxu1 %v779_v46  ;;  %1853 = vmatpush1.msra.mxu0 %v522_v47  ;;  %v963_v24 = vld [vmem:[%s4169_s23 + $0xf18] sm:$0xff]  ;;  %v706_v25 = vld [vmem:[%s4169_s23 + $0x710] sm:$0xff] }
 0x135   : > { %1924 = vmatpush1.msra.mxu1 %v778_v48  ;;  %1854 = vmatprep.subr.mxu0 %v515_v50  ;;  %v962_v26 = vld [vmem:[%s4169_s23 + $0xf10] sm:$0xff]  ;;  %v699_v27 = vld [vmem:[%s4169_s23 + $0x6d8] sm:$0xff] }
 0x136   : > { %1925 = vmatprep.subr.mxu1 %v771_v51  ;;  %1855 = vmatpush1.msra.mxu0 %v514_v52  ;;  %v955_v28 = vld [vmem:[%s4169_s23 + $0xed8] sm:$0xff]  ;;  %v698_v29 = vld [vmem:[%s4169_s23 + $0x6d0] sm:$0xff] }
 0x137   : > { %1926 = vmatpush1.msra.mxu1 %v770_v53  ;;  %1856 = vmatprep.subr.mxu0 %v507_v55  ;;  %v954_v30 = vld [vmem:[%s4169_s23 + $0xed0] sm:$0xff]  ;;  %v691_v32 = vld [vmem:[%s4169_s23 + $0x698] sm:$0xff] }
 0x138   : > { %1927 = vmatprep.subr.mxu1 %v763_v56  ;;  %1857 = vmatpush1.msra.mxu0 %v506_v57  ;;  %v947_v33 = vld [vmem:[%s4169_s23 + $0xe98] sm:$0xff]  ;;  %v690_v35 = vld [vmem:[%s4169_s23 + $0x690] sm:$0xff] }
 0x139   : > { %1928 = vmatpush1.msra.mxu1 %v762_v58  ;;  %1858 = vmatprep.subr.mxu0 %v499_v60  ;;  %v946_v36 = vld [vmem:[%s4169_s23 + $0xe90] sm:$0xff]  ;;  %v683_v37 = vld [vmem:[%s4169_s23 + $0x658] sm:$0xff] }
 0x13a   : > { %1929 = vmatprep.subr.mxu1 %v755_v61  ;;  %1859 = vmatpush1.msra.mxu0 %v498_v63  ;;  %v939_v38 = vld [vmem:[%s4169_s23 + $0xe58] sm:$0xff]  ;;  %v682_v39 = vld [vmem:[%s4169_s23 + $0x650] sm:$0xff] }
 0x13b   : > { %1930 = vmatpush1.msra.mxu1 %v754_v0  ;;  %1860 = vmatprep.subr.mxu0 %v491_v1  ;;  %v938_v40 = vld [vmem:[%s4169_s23 + $0xe50] sm:$0xff]  ;;  %v675_v42 = vld [vmem:[%s4169_s23 + $0x618] sm:$0xff] }
 0x13c   : > { %1931 = vmatprep.subr.mxu1 %v747_v2  ;;  %1861 = vmatpush1.msra.mxu0 %v490_v3  ;;  %v931_v44 = vld [vmem:[%s4169_s23 + $0xe18] sm:$0xff]  ;;  %v674_v45 = vld [vmem:[%s4169_s23 + $0x610] sm:$0xff] }
 0x13d   : > { %1932 = vmatpush1.msra.mxu1 %v746_v4  ;;  %1862 = vmatprep.subr.mxu0 %v483_v5  ;;  %v930_v46 = vld [vmem:[%s4169_s23 + $0xe10] sm:$0xff]  ;;  %v667_v47 = vld [vmem:[%s4169_s23 + $0x5d8] sm:$0xff] }
 0x13e   : > { %1933 = vmatprep.subr.mxu1 %v739_v6  ;;  %1863 = vmatpush1.msra.mxu0 %v482_v7  ;;  %v923_v48 = vld [vmem:[%s4169_s23 + $0xdd8] sm:$0xff]  ;;  %v666_v50 = vld [vmem:[%s4169_s23 + $0x5d0] sm:$0xff] }
 0x13f   : > { %1934 = vmatpush1.msra.mxu1 %v738_v8  ;;  %1864 = vmatprep.subr.mxu0 %v731_v9  ;;  %v922_v51 = vld [vmem:[%s4169_s23 + $0xdd0] sm:$0xff]  ;;  %v659_v52 = vld [vmem:[%s4169_s23 + $0x598] sm:$0xff] }
 0x140   : > { %1935 = vmatprep.subr.mxu1 %v987_v10  ;;  %1865 = vmatpush2.msra.mxu0 %v730_v12  ;;  %v915_v53 = vld [vmem:[%s4169_s23 + $0xd98] sm:$0xff]  ;;  %v658_v55 = vld [vmem:[%s4169_s23 + $0x590] sm:$0xff] }
 0x141   : > { %1936 = vmatpush2.msra.mxu1 %v986_v13  ;;  %1866 = vmatprep.subr.mxu0 %v723_v14  ;;  %v914_v56 = vld [vmem:[%s4169_s23 + $0xd90] sm:$0xff]  ;;  %v651_v57 = vld [vmem:[%s4169_s23 + $0x558] sm:$0xff] }
 0x142   : > { %1937 = vmatprep.subr.mxu1 %v979_v15  ;;  %1867 = vmatpush2.msra.mxu0 %v722_v16  ;;  %v907_v58 = vld [vmem:[%s4169_s23 + $0xd58] sm:$0xff]  ;;  %v650_v60 = vld [vmem:[%s4169_s23 + $0x550] sm:$0xff] }
 0x143   : > { %1938 = vmatpush2.msra.mxu1 %v978_v17  ;;  %1868 = vmatprep.subr.mxu0 %v715_v18  ;;  %v906_v61 = vld [vmem:[%s4169_s23 + $0xd50] sm:$0xff]  ;;  %v643_v63 = vld [vmem:[%s4169_s23 + $0x518] sm:$0xff] }
 0x144   : > { %1939 = vmatprep.subr.mxu1 %v971_v19  ;;  %1869 = vmatpush2.msra.mxu0 %v714_v20  ;;  %v899_v0 = vld [vmem:[%s4169_s23 + $0xd18] sm:$0xff]  ;;  %v642_v1 = vld [vmem:[%s4169_s23 + $0x510] sm:$0xff] }
 0x145   : > { %1940 = vmatpush2.msra.mxu1 %v970_v22  ;;  %1870 = vmatprep.subr.mxu0 %v707_v23  ;;  %v898_v2 = vld [vmem:[%s4169_s23 + $0xd10] sm:$0xff]  ;;  %v635_v3 = vld [vmem:[%s4169_s23 + $0x4d8] sm:$0xff] }
 0x146   : > { %1941 = vmatprep.subr.mxu1 %v963_v24  ;;  %1871 = vmatpush2.msra.mxu0 %v706_v25  ;;  %v891_v4 = vld [vmem:[%s4169_s23 + $0xcd8] sm:$0xff]  ;;  %v634_v5 = vld [vmem:[%s4169_s23 + $0x4d0] sm:$0xff] }
 0x147   : > { %1942 = vmatpush2.msra.mxu1 %v962_v26  ;;  %1872 = vmatprep.subr.mxu0 %v699_v27  ;;  %v890_v6 = vld [vmem:[%s4169_s23 + $0xcd0] sm:$0xff]  ;;  %v627_v7 = vld [vmem:[%s4169_s23 + $0x498] sm:$0xff] }
 0x148   : > { %1943 = vmatprep.subr.mxu1 %v955_v28  ;;  %1873 = vmatpush2.msra.mxu0 %v698_v29  ;;  %v883_v8 = vld [vmem:[%s4169_s23 + $0xc98] sm:$0xff]  ;;  %v626_v9 = vld [vmem:[%s4169_s23 + $0x490] sm:$0xff] }
 0x149   : > { %1944 = vmatpush2.msra.mxu1 %v954_v30  ;;  %1874 = vmatprep.subr.mxu0 %v691_v32  ;;  %v882_v10 = vld [vmem:[%s4169_s23 + $0xc90] sm:$0xff]  ;;  %v619_v12 = vld [vmem:[%s4169_s23 + $0x458] sm:$0xff] }
 0x14a   : > { %1945 = vmatprep.subr.mxu1 %v947_v33  ;;  %1875 = vmatpush2.msra.mxu0 %v690_v35  ;;  %v875_v13 = vld [vmem:[%s4169_s23 + $0xc58] sm:$0xff]  ;;  %v618_v14 = vld [vmem:[%s4169_s23 + $0x450] sm:$0xff] }
 0x14b   : > { %1946 = vmatpush2.msra.mxu1 %v946_v36  ;;  %1876 = vmatprep.subr.mxu0 %v683_v37  ;;  %v874_v15 = vld [vmem:[%s4169_s23 + $0xc50] sm:$0xff]  ;;  %v611_v16 = vld [vmem:[%s4169_s23 + $0x418] sm:$0xff] }
 0x14c   : > { %1947 = vmatprep.subr.mxu1 %v939_v38  ;;  %1877 = vmatpush2.msra.mxu0 %v682_v39  ;;  %v867_v17 = vld [vmem:[%s4169_s23 + $0xc18] sm:$0xff]  ;;  %v610_v18 = vld [vmem:[%s4169_s23 + $0x410] sm:$0xff] }
 0x14d   : > { %1948 = vmatpush2.msra.mxu1 %v938_v40  ;;  %1878 = vmatprep.subr.mxu0 %v675_v42  ;;  %v866_v19 = vld [vmem:[%s4169_s23 + $0xc10] sm:$0xff]  ;;  %v1115_v20 = vld [vmem:[%s4169_s23 + $0x13d8] sm:$0xff] }
 0x14e   : > { %1949 = vmatprep.subr.mxu1 %v931_v44  ;;  %1879 = vmatpush2.msra.mxu0 %v674_v45  ;;  %v1371_v22 = vld [vmem:[%s4169_s23 + $0x1bd8] sm:$0xff]  ;;  %v1114_v23 = vld [vmem:[%s4169_s23 + $0x13d0] sm:$0xff] }
 0x14f   : > { %1950 = vmatpush2.msra.mxu1 %v930_v46  ;;  %1880 = vmatprep.subr.mxu0 %v667_v47  ;;  %v1370_v24 = vld [vmem:[%s4169_s23 + $0x1bd0] sm:$0xff]  ;;  %v1107_v25 = vld [vmem:[%s4169_s23 + $0x1398] sm:$0xff] }
 0x150   : > { %1951 = vmatprep.subr.mxu1 %v923_v48  ;;  %1881 = vmatpush2.msra.mxu0 %v666_v50  ;;  %v1363_v26 = vld [vmem:[%s4169_s23 + $0x1b98] sm:$0xff]  ;;  %v1106_v27 = vld [vmem:[%s4169_s23 + $0x1390] sm:$0xff] }
 0x151   : > { %1952 = vmatpush2.msra.mxu1 %v922_v51  ;;  %1882 = vmatprep.subr.mxu0 %v659_v52  ;;  %v1362_v28 = vld [vmem:[%s4169_s23 + $0x1b90] sm:$0xff]  ;;  %v1099_v29 = vld [vmem:[%s4169_s23 + $0x1358] sm:$0xff] }
 0x152   : > { %1953 = vmatprep.subr.mxu1 %v915_v53  ;;  %1883 = vmatpush2.msra.mxu0 %v658_v55  ;;  %v1355_v30 = vld [vmem:[%s4169_s23 + $0x1b58] sm:$0xff]  ;;  %v1098_v32 = vld [vmem:[%s4169_s23 + $0x1350] sm:$0xff] }
 0x153   : > { %1954 = vmatpush2.msra.mxu1 %v914_v56  ;;  %1884 = vmatprep.subr.mxu0 %v651_v57  ;;  %v1354_v33 = vld [vmem:[%s4169_s23 + $0x1b50] sm:$0xff]  ;;  %v1091_v35 = vld [vmem:[%s4169_s23 + $0x1318] sm:$0xff] }
 0x154   : > { %1955 = vmatprep.subr.mxu1 %v907_v58  ;;  %1885 = vmatpush2.msra.mxu0 %v650_v60  ;;  %v1347_v36 = vld [vmem:[%s4169_s23 + $0x1b18] sm:$0xff]  ;;  %v1090_v37 = vld [vmem:[%s4169_s23 + $0x1310] sm:$0xff] }
 0x155   : > { %1956 = vmatpush2.msra.mxu1 %v906_v61  ;;  %1886 = vmatprep.subr.mxu0 %v643_v63  ;;  %v1346_v38 = vld [vmem:[%s4169_s23 + $0x1b10] sm:$0xff]  ;;  %v1083_v39 = vld [vmem:[%s4169_s23 + $0x12d8] sm:$0xff] }
 0x156   : > { %1957 = vmatprep.subr.mxu1 %v899_v0  ;;  %1887 = vmatpush2.msra.mxu0 %v642_v1  ;;  %v1339_v40 = vld [vmem:[%s4169_s23 + $0x1ad8] sm:$0xff]  ;;  %v1082_v42 = vld [vmem:[%s4169_s23 + $0x12d0] sm:$0xff] }
 0x157   : > { %1958 = vmatpush2.msra.mxu1 %v898_v2  ;;  %1888 = vmatprep.subr.mxu0 %v635_v3  ;;  %v1338_v44 = vld [vmem:[%s4169_s23 + $0x1ad0] sm:$0xff]  ;;  %v1075_v45 = vld [vmem:[%s4169_s23 + $0x1298] sm:$0xff] }
 0x158   : > { %1959 = vmatprep.subr.mxu1 %v891_v4  ;;  %1889 = vmatpush2.msra.mxu0 %v634_v5  ;;  %v1331_v46 = vld [vmem:[%s4169_s23 + $0x1a98] sm:$0xff]  ;;  %v1074_v47 = vld [vmem:[%s4169_s23 + $0x1290] sm:$0xff] }
 0x159   : > { %1960 = vmatpush2.msra.mxu1 %v890_v6  ;;  %1890 = vmatprep.subr.mxu0 %v627_v7  ;;  %v1330_v48 = vld [vmem:[%s4169_s23 + $0x1a90] sm:$0xff]  ;;  %v1067_v50 = vld [vmem:[%s4169_s23 + $0x1258] sm:$0xff] }
 0x15a   : > { %1961 = vmatprep.subr.mxu1 %v883_v8  ;;  %1891 = vmatpush2.msra.mxu0 %v626_v9  ;;  %v1323_v51 = vld [vmem:[%s4169_s23 + $0x1a58] sm:$0xff]  ;;  %v1066_v52 = vld [vmem:[%s4169_s23 + $0x1250] sm:$0xff] }
 0x15b   : > { %1962 = vmatpush2.msra.mxu1 %v882_v10  ;;  %1892 = vmatprep.subr.mxu0 %v619_v12  ;;  %v1322_v53 = vld [vmem:[%s4169_s23 + $0x1a50] sm:$0xff]  ;;  %v1059_v55 = vld [vmem:[%s4169_s23 + $0x1218] sm:$0xff] }
 0x15c   : > { %1963 = vmatprep.subr.mxu1 %v875_v13  ;;  %1893 = vmatpush2.msra.mxu0 %v618_v14  ;;  %v1315_v56 = vld [vmem:[%s4169_s23 + $0x1a18] sm:$0xff]  ;;  %v1058_v57 = vld [vmem:[%s4169_s23 + $0x1210] sm:$0xff] }
 0x15d   : > { %1964 = vmatpush2.msra.mxu1 %v874_v15  ;;  %1894 = vmatprep.subr.mxu0 %v611_v16  ;;  %v1314_v58 = vld [vmem:[%s4169_s23 + $0x1a10] sm:$0xff]  ;;  %v1051_v60 = vld [vmem:[%s4169_s23 + $0x11d8] sm:$0xff] }
 0x15e   : > { %1965 = vmatprep.subr.mxu1 %v867_v17  ;;  %1895 = vmatpush2.msra.mxu0 %v610_v18  ;;  %v1307_v61 = vld [vmem:[%s4169_s23 + $0x19d8] sm:$0xff]  ;;  %v1050_v63 = vld [vmem:[%s4169_s23 + $0x11d0] sm:$0xff] }
 0x15f   : > { %1896 = vmatprep.mubr.f32.mxu0 %v4335_v41  ;;  %1966 = vmatpush2.msra.mxu1 %v866_v19  ;;  %v1306_v0 = vld [vmem:[%s4169_s23 + $0x19d0] sm:$0xff]  ;;  %v1043_v1 = vld [vmem:[%s4169_s23 + $0x1198] sm:$0xff] }
 0x160   : > { %1967 = vmatprep.mubr.f32.mxu1 %v4340_v43  ;;  %1897 = vmatmul.mubr.f32.vlgmr.msra.gmra.mxu0 %v4320_v31  ;;  %v1299_v2 = vld [vmem:[%s4169_s23 + $0x1998] sm:$0xff]  ;;  %v1042_v3 = vld [vmem:[%s4169_s23 + $0x1190] sm:$0xff] }
 0x161   : > { %1968 = vmatmul.mubr.f32.vlgmr.msra.gmra.mxu1 %v4325_v34  ;;  %1974 = vmatprep.subr.mxu0 %v1115_v20  ;;  %v1298_v4 = vld [vmem:[%s4169_s23 + $0x1990] sm:$0xff]  ;;  %v1035_v5 = vld [vmem:[%s4169_s23 + $0x1158] sm:$0xff] }
 0x162   : > { %2045 = vmatprep.subr.mxu1 %v1371_v22  ;;  %1975 = vmatpush1.msra.mxu0 %v1114_v23  ;;  %v1291_v6 = vld [vmem:[%s4169_s23 + $0x1958] sm:$0xff]  ;;  %v1034_v7 = vld [vmem:[%s4169_s23 + $0x1150] sm:$0xff] }
 0x163   : > { %2046 = vmatpush1.msra.mxu1 %v1370_v24  ;;  %1976 = vmatprep.subr.mxu0 %v1107_v25  ;;  %v1290_v8 = vld [vmem:[%s4169_s23 + $0x1950] sm:$0xff]  ;;  %v1027_v9 = vld [vmem:[%s4169_s23 + $0x1118] sm:$0xff] }
 0x164   : > { %2047 = vmatprep.subr.mxu1 %v1363_v26  ;;  %1977 = vmatpush1.msra.mxu0 %v1106_v27  ;;  %v1283_v10 = vld [vmem:[%s4169_s23 + $0x1918] sm:$0xff]  ;;  %v1026_v12 = vld [vmem:[%s4169_s23 + $0x1110] sm:$0xff] }
 0x165   : > { %2048 = vmatpush1.msra.mxu1 %v1362_v28  ;;  %1978 = vmatprep.subr.mxu0 %v1099_v29  ;;  %v1282_v13 = vld [vmem:[%s4169_s23 + $0x1910] sm:$0xff]  ;;  %v1019_v14 = vld [vmem:[%s4169_s23 + $0x10d8] sm:$0xff] }
 0x166   : > { %2049 = vmatprep.subr.mxu1 %v1355_v30  ;;  %1979 = vmatpush1.msra.mxu0 %v1098_v32  ;;  %v1275_v15 = vld [vmem:[%s4169_s23 + $0x18d8] sm:$0xff]  ;;  %v1018_v16 = vld [vmem:[%s4169_s23 + $0x10d0] sm:$0xff] }
 0x167   : > { %2050 = vmatpush1.msra.mxu1 %v1354_v33  ;;  %1980 = vmatprep.subr.mxu0 %v1091_v35  ;;  %v1274_v17 = vld [vmem:[%s4169_s23 + $0x18d0] sm:$0xff]  ;;  %v1011_v18 = vld [vmem:[%s4169_s23 + $0x1098] sm:$0xff] }
 0x168   : > { %2051 = vmatprep.subr.mxu1 %v1347_v36  ;;  %1981 = vmatpush1.msra.mxu0 %v1090_v37  ;;  %v1267_v19 = vld [vmem:[%s4169_s23 + $0x1898] sm:$0xff]  ;;  %v1010_v20 = vld [vmem:[%s4169_s23 + $0x1090] sm:$0xff] }
 0x169   : > { %2052 = vmatpush1.msra.mxu1 %v1346_v38  ;;  %1982 = vmatprep.subr.mxu0 %v1083_v39  ;;  %v1266_v22 = vld [vmem:[%s4169_s23 + $0x1890] sm:$0xff]  ;;  %v1003_v23 = vld [vmem:[%s4169_s23 + $0x1058] sm:$0xff] }
 0x16a   : > { %2053 = vmatprep.subr.mxu1 %v1339_v40  ;;  %1983 = vmatpush1.msra.mxu0 %v1082_v42  ;;  %v1259_v24 = vld [vmem:[%s4169_s23 + $0x1858] sm:$0xff]  ;;  %v1002_v25 = vld [vmem:[%s4169_s23 + $0x1050] sm:$0xff] }
 0x16b   : > { %2054 = vmatpush1.msra.mxu1 %v1338_v44  ;;  %1984 = vmatprep.subr.mxu0 %v1075_v45  ;;  %v1258_v26 = vld [vmem:[%s4169_s23 + $0x1850] sm:$0xff]  ;;  %v995_v27 = vld [vmem:[%s4169_s23 + $0x1018] sm:$0xff] }
 0x16c   : > { %2055 = vmatprep.subr.mxu1 %v1331_v46  ;;  %1985 = vmatpush1.msra.mxu0 %v1074_v47  ;;  %v1251_v28 = vld [vmem:[%s4169_s23 + $0x1818] sm:$0xff]  ;;  %v994_v29 = vld [vmem:[%s4169_s23 + $0x1010] sm:$0xff] }
 0x16d   : > { %2056 = vmatpush1.msra.mxu1 %v1330_v48  ;;  %1986 = vmatprep.subr.mxu0 %v1067_v50  ;;  %v1250_v30 = vld [vmem:[%s4169_s23 + $0x1810] sm:$0xff]  ;;  %v1243_v32 = vld [vmem:[%s4169_s23 + $0x17d8] sm:$0xff] }
 0x16e   : > { %2057 = vmatprep.subr.mxu1 %v1323_v51  ;;  %1987 = vmatpush1.msra.mxu0 %v1066_v52  ;;  %v1499_v33 = vld [vmem:[%s4169_s23 + $0x1fd8] sm:$0xff]  ;;  %v1242_v35 = vld [vmem:[%s4169_s23 + $0x17d0] sm:$0xff] }
 0x16f   : > { %2058 = vmatpush1.msra.mxu1 %v1322_v53  ;;  %1988 = vmatprep.subr.mxu0 %v1059_v55  ;;  %v1498_v36 = vld [vmem:[%s4169_s23 + $0x1fd0] sm:$0xff]  ;;  %v1235_v37 = vld [vmem:[%s4169_s23 + $0x1798] sm:$0xff] }
 0x170   : > { %2059 = vmatprep.subr.mxu1 %v1315_v56  ;;  %1989 = vmatpush1.msra.mxu0 %v1058_v57  ;;  %v1491_v38 = vld [vmem:[%s4169_s23 + $0x1f98] sm:$0xff]  ;;  %v1234_v39 = vld [vmem:[%s4169_s23 + $0x1790] sm:$0xff] }
 0x171   : > { %2060 = vmatpush1.msra.mxu1 %v1314_v58  ;;  %1990 = vmatprep.subr.mxu0 %v1051_v60  ;;  %v1490_v40 = vld [vmem:[%s4169_s23 + $0x1f90] sm:$0xff]  ;;  %v1227_v42 = vld [vmem:[%s4169_s23 + $0x1758] sm:$0xff] }
 0x172   : > { %2061 = vmatprep.subr.mxu1 %v1307_v61  ;;  %1991 = vmatpush1.msra.mxu0 %v1050_v63  ;;  %v1483_v44 = vld [vmem:[%s4169_s23 + $0x1f58] sm:$0xff]  ;;  %v1226_v45 = vld [vmem:[%s4169_s23 + $0x1750] sm:$0xff] }
 0x173   : > { %2062 = vmatpush1.msra.mxu1 %v1306_v0  ;;  %1992 = vmatprep.subr.mxu0 %v1043_v1  ;;  %v1482_v46 = vld [vmem:[%s4169_s23 + $0x1f50] sm:$0xff]  ;;  %v1219_v47 = vld [vmem:[%s4169_s23 + $0x1718] sm:$0xff] }
 0x174   : > { %2063 = vmatprep.subr.mxu1 %v1299_v2  ;;  %1993 = vmatpush1.msra.mxu0 %v1042_v3  ;;  %v1475_v48 = vld [vmem:[%s4169_s23 + $0x1f18] sm:$0xff]  ;;  %v1218_v50 = vld [vmem:[%s4169_s23 + $0x1710] sm:$0xff] }
 0x175   : > { %2064 = vmatpush1.msra.mxu1 %v1298_v4  ;;  %1994 = vmatprep.subr.mxu0 %v1035_v5  ;;  %v1474_v51 = vld [vmem:[%s4169_s23 + $0x1f10] sm:$0xff]  ;;  %v1211_v52 = vld [vmem:[%s4169_s23 + $0x16d8] sm:$0xff] }
 0x176   : > { %2065 = vmatprep.subr.mxu1 %v1291_v6  ;;  %1995 = vmatpush1.msra.mxu0 %v1034_v7  ;;  %v1467_v53 = vld [vmem:[%s4169_s23 + $0x1ed8] sm:$0xff]  ;;  %v1210_v55 = vld [vmem:[%s4169_s23 + $0x16d0] sm:$0xff] }
 0x177   : > { %2066 = vmatpush1.msra.mxu1 %v1290_v8  ;;  %1996 = vmatprep.subr.mxu0 %v1027_v9  ;;  %v1466_v56 = vld [vmem:[%s4169_s23 + $0x1ed0] sm:$0xff]  ;;  %v1203_v57 = vld [vmem:[%s4169_s23 + $0x1698] sm:$0xff] }
 0x178   : > { %2067 = vmatprep.subr.mxu1 %v1283_v10  ;;  %1997 = vmatpush1.msra.mxu0 %v1026_v12  ;;  %v1459_v58 = vld [vmem:[%s4169_s23 + $0x1e98] sm:$0xff]  ;;  %v1202_v60 = vld [vmem:[%s4169_s23 + $0x1690] sm:$0xff] }
 0x179   : > { %2068 = vmatpush1.msra.mxu1 %v1282_v13  ;;  %1998 = vmatprep.subr.mxu0 %v1019_v14  ;;  %v1458_v61 = vld [vmem:[%s4169_s23 + $0x1e90] sm:$0xff]  ;;  %v1195_v63 = vld [vmem:[%s4169_s23 + $0x1658] sm:$0xff] }
 0x17a   : > { %2069 = vmatprep.subr.mxu1 %v1275_v15  ;;  %1999 = vmatpush1.msra.mxu0 %v1018_v16  ;;  %v1451_v0 = vld [vmem:[%s4169_s23 + $0x1e58] sm:$0xff]  ;;  %v1194_v1 = vld [vmem:[%s4169_s23 + $0x1650] sm:$0xff] }
 0x17b   : > { %2070 = vmatpush1.msra.mxu1 %v1274_v17  ;;  %2000 = vmatprep.subr.mxu0 %v1011_v18  ;;  %v1450_v2 = vld [vmem:[%s4169_s23 + $0x1e50] sm:$0xff]  ;;  %v1187_v3 = vld [vmem:[%s4169_s23 + $0x1618] sm:$0xff] }
 0x17c   : > { %2071 = vmatprep.subr.mxu1 %v1267_v19  ;;  %2001 = vmatpush1.msra.mxu0 %v1010_v20  ;;  %v1443_v4 = vld [vmem:[%s4169_s23 + $0x1e18] sm:$0xff]  ;;  %v1186_v5 = vld [vmem:[%s4169_s23 + $0x1610] sm:$0xff] }
 0x17d   : > { %2072 = vmatpush1.msra.mxu1 %v1266_v22  ;;  %2002 = vmatprep.subr.mxu0 %v1003_v23  ;;  %v1442_v6 = vld [vmem:[%s4169_s23 + $0x1e10] sm:$0xff]  ;;  %v1179_v7 = vld [vmem:[%s4169_s23 + $0x15d8] sm:$0xff] }
 0x17e   : > { %2073 = vmatprep.subr.mxu1 %v1259_v24  ;;  %2003 = vmatpush1.msra.mxu0 %v1002_v25  ;;  %v1435_v8 = vld [vmem:[%s4169_s23 + $0x1dd8] sm:$0xff]  ;;  %v1178_v9 = vld [vmem:[%s4169_s23 + $0x15d0] sm:$0xff] }
 0x17f   : > { %2074 = vmatpush1.msra.mxu1 %v1258_v26  ;;  %2004 = vmatprep.subr.mxu0 %v995_v27  ;;  %v1434_v10 = vld [vmem:[%s4169_s23 + $0x1dd0] sm:$0xff]  ;;  %v1171_v12 = vld [vmem:[%s4169_s23 + $0x1598] sm:$0xff] }
 0x180   : > { %2075 = vmatprep.subr.mxu1 %v1251_v28  ;;  %2005 = vmatpush1.msra.mxu0 %v994_v29  ;;  %v1427_v13 = vld [vmem:[%s4169_s23 + $0x1d98] sm:$0xff]  ;;  %v1170_v14 = vld [vmem:[%s4169_s23 + $0x1590] sm:$0xff] }
 0x181   : > { %2076 = vmatpush1.msra.mxu1 %v1250_v30  ;;  %2006 = vmatprep.subr.mxu0 %v1243_v32  ;;  %v1426_v15 = vld [vmem:[%s4169_s23 + $0x1d90] sm:$0xff]  ;;  %v1163_v16 = vld [vmem:[%s4169_s23 + $0x1558] sm:$0xff] }
 0x182   : > { %2077 = vmatprep.subr.mxu1 %v1499_v33  ;;  %2007 = vmatpush2.msra.mxu0 %v1242_v35  ;;  %v1419_v17 = vld [vmem:[%s4169_s23 + $0x1d58] sm:$0xff]  ;;  %v1162_v18 = vld [vmem:[%s4169_s23 + $0x1550] sm:$0xff] }
 0x183   : > { %2078 = vmatpush2.msra.mxu1 %v1498_v36  ;;  %2008 = vmatprep.subr.mxu0 %v1235_v37  ;;  %v1418_v19 = vld [vmem:[%s4169_s23 + $0x1d50] sm:$0xff]  ;;  %v1155_v20 = vld [vmem:[%s4169_s23 + $0x1518] sm:$0xff] }
 0x184   : > { %2079 = vmatprep.subr.mxu1 %v1491_v38  ;;  %2009 = vmatpush2.msra.mxu0 %v1234_v39  ;;  %v1411_v22 = vld [vmem:[%s4169_s23 + $0x1d18] sm:$0xff]  ;;  %v1154_v23 = vld [vmem:[%s4169_s23 + $0x1510] sm:$0xff] }
 0x185   : > { %2080 = vmatpush2.msra.mxu1 %v1490_v40  ;;  %2010 = vmatprep.subr.mxu0 %v1227_v42  ;;  %v1410_v24 = vld [vmem:[%s4169_s23 + $0x1d10] sm:$0xff]  ;;  %v1147_v25 = vld [vmem:[%s4169_s23 + $0x14d8] sm:$0xff] }
 0x186   : > { %2081 = vmatprep.subr.mxu1 %v1483_v44  ;;  %2011 = vmatpush2.msra.mxu0 %v1226_v45  ;;  %v1403_v26 = vld [vmem:[%s4169_s23 + $0x1cd8] sm:$0xff]  ;;  %v1146_v27 = vld [vmem:[%s4169_s23 + $0x14d0] sm:$0xff]  ;;  %v605_v45 = vld [vmem:[%s4169_s23 + $0x3e8] sm:$0xff] }
 0x187   : > { %2082 = vmatpush2.msra.mxu1 %v1482_v46  ;;  %2012 = vmatprep.subr.mxu0 %v1219_v47  ;;  %v1402_v28 = vld [vmem:[%s4169_s23 + $0x1cd0] sm:$0xff]  ;;  %v1139_v29 = vld [vmem:[%s4169_s23 + $0x1498] sm:$0xff]  ;;  %v861_v46 = vld [vmem:[%s4169_s23 + $0xbe8] sm:$0xff] }
 0x188   : > { %2083 = vmatprep.subr.mxu1 %v1475_v48  ;;  %2013 = vmatpush2.msra.mxu0 %v1218_v50  ;;  %v1395_v30 = vld [vmem:[%s4169_s23 + $0x1c98] sm:$0xff]  ;;  %v1138_v32 = vld [vmem:[%s4169_s23 + $0x1490] sm:$0xff]  ;;  %v604_v47 = vld [vmem:[%s4169_s23 + $0x3e0] sm:$0xff] }
 0x189   : > { %2084 = vmatpush2.msra.mxu1 %v1474_v51  ;;  %2014 = vmatprep.subr.mxu0 %v1211_v52  ;;  %v1394_v33 = vld [vmem:[%s4169_s23 + $0x1c90] sm:$0xff]  ;;  %v1131_v35 = vld [vmem:[%s4169_s23 + $0x1458] sm:$0xff]  ;;  %v860_v48 = vld [vmem:[%s4169_s23 + $0xbe0] sm:$0xff] }
 0x18a   : > { %2085 = vmatprep.subr.mxu1 %v1467_v53  ;;  %2015 = vmatpush2.msra.mxu0 %v1210_v55  ;;  %v1387_v36 = vld [vmem:[%s4169_s23 + $0x1c58] sm:$0xff]  ;;  %v1130_v37 = vld [vmem:[%s4169_s23 + $0x1450] sm:$0xff]  ;;  %v597_v50 = vld [vmem:[%s4169_s23 + $0x3a8] sm:$0xff] }
 0x18b   : > { %2086 = vmatpush2.msra.mxu1 %v1466_v56  ;;  %2016 = vmatprep.subr.mxu0 %v1203_v57  ;;  %v1386_v38 = vld [vmem:[%s4169_s23 + $0x1c50] sm:$0xff]  ;;  %v1123_v39 = vld [vmem:[%s4169_s23 + $0x1418] sm:$0xff]  ;;  %v853_v51 = vld [vmem:[%s4169_s23 + $0xba8] sm:$0xff] }
 0x18c   : > { %2087 = vmatprep.subr.mxu1 %v1459_v58  ;;  %2017 = vmatpush2.msra.mxu0 %v1202_v60  ;;  %v1379_v40 = vld [vmem:[%s4169_s23 + $0x1c18] sm:$0xff]  ;;  %v1122_v42 = vld [vmem:[%s4169_s23 + $0x1410] sm:$0xff]  ;;  %v596_v52 = vld [vmem:[%s4169_s23 + $0x3a0] sm:$0xff] }
 0x18d   : > { %2088 = vmatpush2.msra.mxu1 %v1458_v61  ;;  %2018 = vmatprep.subr.mxu0 %v1195_v63  ;;  %v1378_v44 = vld [vmem:[%s4169_s23 + $0x1c10] sm:$0xff]  ;;  %v852_v53 = vld [vmem:[%s4169_s23 + $0xba0] sm:$0xff]  ;;  %v589_v55 = vld [vmem:[%s4169_s23 + $0x368] sm:$0xff] }
 0x18e   : > { %2089 = vmatprep.subr.mxu1 %v1451_v0  ;;  %2019 = vmatpush2.msra.mxu0 %v1194_v1  ;;  %v845_v56 = vld [vmem:[%s4169_s23 + $0xb68] sm:$0xff]  ;;  %v588_v57 = vld [vmem:[%s4169_s23 + $0x360] sm:$0xff] }
 0x18f   : > { %2090 = vmatpush2.msra.mxu1 %v1450_v2  ;;  %2020 = vmatprep.subr.mxu0 %v1187_v3  ;;  %v844_v58 = vld [vmem:[%s4169_s23 + $0xb60] sm:$0xff]  ;;  %v581_v60 = vld [vmem:[%s4169_s23 + $0x328] sm:$0xff] }
 0x190   : > { %2091 = vmatprep.subr.mxu1 %v1443_v4  ;;  %2021 = vmatpush2.msra.mxu0 %v1186_v5  ;;  %v837_v61 = vld [vmem:[%s4169_s23 + $0xb28] sm:$0xff]  ;;  %v580_v63 = vld [vmem:[%s4169_s23 + $0x320] sm:$0xff] }
 0x191   : > { %2092 = vmatpush2.msra.mxu1 %v1442_v6  ;;  %2022 = vmatprep.subr.mxu0 %v1179_v7  ;;  %v836_v0 = vld [vmem:[%s4169_s23 + $0xb20] sm:$0xff]  ;;  %v573_v1 = vld [vmem:[%s4169_s23 + $0x2e8] sm:$0xff] }
 0x192   : > { %2093 = vmatprep.subr.mxu1 %v1435_v8  ;;  %2023 = vmatpush2.msra.mxu0 %v1178_v9  ;;  %v829_v2 = vld [vmem:[%s4169_s23 + $0xae8] sm:$0xff]  ;;  %v572_v3 = vld [vmem:[%s4169_s23 + $0x2e0] sm:$0xff] }
 0x193   : > { %2094 = vmatpush2.msra.mxu1 %v1434_v10  ;;  %2024 = vmatprep.subr.mxu0 %v1171_v12  ;;  %v828_v4 = vld [vmem:[%s4169_s23 + $0xae0] sm:$0xff]  ;;  %v565_v5 = vld [vmem:[%s4169_s23 + $0x2a8] sm:$0xff] }
 0x194   : > { %2095 = vmatprep.subr.mxu1 %v1427_v13  ;;  %2025 = vmatpush2.msra.mxu0 %v1170_v14  ;;  %v821_v6 = vld [vmem:[%s4169_s23 + $0xaa8] sm:$0xff]  ;;  %v564_v7 = vld [vmem:[%s4169_s23 + $0x2a0] sm:$0xff] }
 0x195   : > { %2096 = vmatpush2.msra.mxu1 %v1426_v15  ;;  %2026 = vmatprep.subr.mxu0 %v1163_v16  ;;  %v820_v8 = vld [vmem:[%s4169_s23 + $0xaa0] sm:$0xff]  ;;  %v557_v9 = vld [vmem:[%s4169_s23 + $0x268] sm:$0xff] }
 0x196   : > { %2097 = vmatprep.subr.mxu1 %v1419_v17  ;;  %2027 = vmatpush2.msra.mxu0 %v1162_v18  ;;  %v813_v10 = vld [vmem:[%s4169_s23 + $0xa68] sm:$0xff]  ;;  %v556_v12 = vld [vmem:[%s4169_s23 + $0x260] sm:$0xff] }
 0x197   : > { %2098 = vmatpush2.msra.mxu1 %v1418_v19  ;;  %2028 = vmatprep.subr.mxu0 %v1155_v20  ;;  %v812_v13 = vld [vmem:[%s4169_s23 + $0xa60] sm:$0xff]  ;;  %v549_v14 = vld [vmem:[%s4169_s23 + $0x228] sm:$0xff] }
 0x198   : > { %2099 = vmatprep.subr.mxu1 %v1411_v22  ;;  %2029 = vmatpush2.msra.mxu0 %v1154_v23  ;;  %v805_v15 = vld [vmem:[%s4169_s23 + $0xa28] sm:$0xff]  ;;  %v548_v16 = vld [vmem:[%s4169_s23 + $0x220] sm:$0xff] }
 0x199   : > { %2100 = vmatpush2.msra.mxu1 %v1410_v24  ;;  %2030 = vmatprep.subr.mxu0 %v1147_v25  ;;  %v804_v17 = vld [vmem:[%s4169_s23 + $0xa20] sm:$0xff]  ;;  %v541_v18 = vld [vmem:[%s4169_s23 + $0x1e8] sm:$0xff] }
 0x19a   : > { %2101 = vmatprep.subr.mxu1 %v1403_v26  ;;  %2031 = vmatpush2.msra.mxu0 %v1146_v27  ;;  %v797_v19 = vld [vmem:[%s4169_s23 + $0x9e8] sm:$0xff]  ;;  %v540_v20 = vld [vmem:[%s4169_s23 + $0x1e0] sm:$0xff] }
 0x19b   : > { %2102 = vmatpush2.msra.mxu1 %v1402_v28  ;;  %2032 = vmatprep.subr.mxu0 %v1139_v29  ;;  %v796_v22 = vld [vmem:[%s4169_s23 + $0x9e0] sm:$0xff]  ;;  %v533_v23 = vld [vmem:[%s4169_s23 + $0x1a8] sm:$0xff] }
 0x19c   : > { %2103 = vmatprep.subr.mxu1 %v1395_v30  ;;  %2033 = vmatpush2.msra.mxu0 %v1138_v32  ;;  %v789_v24 = vld [vmem:[%s4169_s23 + $0x9a8] sm:$0xff]  ;;  %v532_v25 = vld [vmem:[%s4169_s23 + $0x1a0] sm:$0xff] }
 0x19d   : > { %2104 = vmatpush2.msra.mxu1 %v1394_v33  ;;  %2034 = vmatprep.subr.mxu0 %v1131_v35  ;;  %v788_v26 = vld [vmem:[%s4169_s23 + $0x9a0] sm:$0xff]  ;;  %v525_v27 = vld [vmem:[%s4169_s23 + $0x168] sm:$0xff] }
 0x19e   : > { %2105 = vmatprep.subr.mxu1 %v1387_v36  ;;  %2035 = vmatpush2.msra.mxu0 %v1130_v37  ;;  %v781_v28 = vld [vmem:[%s4169_s23 + $0x968] sm:$0xff]  ;;  %v524_v29 = vld [vmem:[%s4169_s23 + $0x160] sm:$0xff] }
 0x19f   : > { %2106 = vmatpush2.msra.mxu1 %v1386_v38  ;;  %2036 = vmatprep.subr.mxu0 %v1123_v39  ;;  %v780_v30 = vld [vmem:[%s4169_s23 + $0x960] sm:$0xff]  ;;  %v517_v32 = vld [vmem:[%s4169_s23 + $0x128] sm:$0xff] }
 0x1a0   : > { %2107 = vmatprep.subr.mxu1 %v1379_v40  ;;  %2037 = vmatpush2.msra.mxu0 %v1122_v42  ;;  %v773_v33 = vld [vmem:[%s4169_s23 + $0x928] sm:$0xff]  ;;  %v516_v35 = vld [vmem:[%s4169_s23 + $0x120] sm:$0xff] }
 0x1a1   : > { %2038 = vmatprep.mubr.f32.mxu0 %v4482_v59  ;;  %2108 = vmatpush2.msra.mxu1 %v1378_v44  ;;  %v772_v36 = vld [vmem:[%s4169_s23 + $0x920] sm:$0xff]  ;;  %v509_v37 = vld [vmem:[%s4169_s23 + $0xe8] sm:$0xff] }
 0x1a2   : > { %2039 = vmatmul.mubr.f32.vlgmr.msra.gmra.mxu0 %v4467_v49  ;;  %2109 = vmatprep.mubr.f32.mxu1 %v4488_v62  ;;  %v765_v38 = vld [vmem:[%s4169_s23 + $0x8e8] sm:$0xff]  ;;  %v508_v39 = vld [vmem:[%s4169_s23 + $0xe0] sm:$0xff] }
 0x1a3   : > { %2116 = vmatprep.subr.mxu0 %v605_v45  ;;  %2187 = vmatprep.subr.mxu1 %v861_v46  ;;  %v764_v40 = vld [vmem:[%s4169_s23 + $0x8e0] sm:$0xff]  ;;  %v501_v42 = vld [vmem:[%s4169_s23 + $0xa8] sm:$0xff] }
 0x1a4   : > { %2110 = vmatmul.mubr.f32.vlgmr.msra.gmra.mxu1 %v4474_v54  ;;  %2117 = vmatpush1.msra.mxu0 %v604_v47  ;;  %v757_v44 = vld [vmem:[%s4169_s23 + $0x8a8] sm:$0xff]  ;;  %v500_v45 = vld [vmem:[%s4169_s23 + $0xa0] sm:$0xff] }
 0x1a5   : > { %2188 = vmatpush1.msra.mxu1 %v860_v48  ;;  %2118 = vmatprep.subr.mxu0 %v597_v50  ;;  %v756_v46 = vld [vmem:[%s4169_s23 + $0x8a0] sm:$0xff]  ;;  %v493_v47 = vld [vmem:[%s4169_s23 + $0x68] sm:$0xff] }
 0x1a6   : > { %2189 = vmatprep.subr.mxu1 %v853_v51  ;;  %2119 = vmatpush1.msra.mxu0 %v596_v52  ;;  %v749_v48 = vld [vmem:[%s4169_s23 + $0x868] sm:$0xff]  ;;  %v492_v50 = vld [vmem:[%s4169_s23 + $0x60] sm:$0xff] }
 0x1a7   : > { %2190 = vmatpush1.msra.mxu1 %v852_v53  ;;  %2120 = vmatprep.subr.mxu0 %v589_v55  ;;  %v748_v51 = vld [vmem:[%s4169_s23 + $0x860] sm:$0xff]  ;;  %v485_v52 = vld [vmem:[%s4169_s23 + $0x28] sm:$0xff] }
 0x1a8   : > { %2191 = vmatprep.subr.mxu1 %v845_v56  ;;  %2121 = vmatpush1.msra.mxu0 %v588_v57  ;;  %v741_v53 = vld [vmem:[%s4169_s23 + $0x828] sm:$0xff]  ;;  %v484_v55 = vld [vmem:[%s4169_s23 + $0x20] sm:$0xff] }
 0x1a9   : > { %2192 = vmatpush1.msra.mxu1 %v844_v58  ;;  %2122 = vmatprep.subr.mxu0 %v581_v60  ;;  %v740_v56 = vld [vmem:[%s4169_s23 + $0x820] sm:$0xff]  ;;  %v733_v57 = vld [vmem:[%s4169_s23 + $0x7e8] sm:$0xff] }
 0x1aa   : > { %2193 = vmatprep.subr.mxu1 %v837_v61  ;;  %2123 = vmatpush1.msra.mxu0 %v580_v63  ;;  %v989_v58 = vld [vmem:[%s4169_s23 + $0xfe8] sm:$0xff]  ;;  %v732_v60 = vld [vmem:[%s4169_s23 + $0x7e0] sm:$0xff] }
 0x1ab   : > { %2194 = vmatpush1.msra.mxu1 %v836_v0  ;;  %2124 = vmatprep.subr.mxu0 %v573_v1  ;;  %v988_v61 = vld [vmem:[%s4169_s23 + $0xfe0] sm:$0xff]  ;;  %v725_v63 = vld [vmem:[%s4169_s23 + $0x7a8] sm:$0xff] }
 0x1ac   : > { %2195 = vmatprep.subr.mxu1 %v829_v2  ;;  %2125 = vmatpush1.msra.mxu0 %v572_v3  ;;  %v981_v0 = vld [vmem:[%s4169_s23 + $0xfa8] sm:$0xff]  ;;  %v724_v1 = vld [vmem:[%s4169_s23 + $0x7a0] sm:$0xff] }
 0x1ad   : > { %2196 = vmatpush1.msra.mxu1 %v828_v4  ;;  %2126 = vmatprep.subr.mxu0 %v565_v5  ;;  %v980_v2 = vld [vmem:[%s4169_s23 + $0xfa0] sm:$0xff]  ;;  %v717_v3 = vld [vmem:[%s4169_s23 + $0x768] sm:$0xff] }
 0x1ae   : > { %2197 = vmatprep.subr.mxu1 %v821_v6  ;;  %2127 = vmatpush1.msra.mxu0 %v564_v7  ;;  %v973_v4 = vld [vmem:[%s4169_s23 + $0xf68] sm:$0xff]  ;;  %v716_v5 = vld [vmem:[%s4169_s23 + $0x760] sm:$0xff] }
 0x1af   : > { %2198 = vmatpush1.msra.mxu1 %v820_v8  ;;  %2128 = vmatprep.subr.mxu0 %v557_v9  ;;  %v972_v6 = vld [vmem:[%s4169_s23 + $0xf60] sm:$0xff]  ;;  %v709_v7 = vld [vmem:[%s4169_s23 + $0x728] sm:$0xff] }
 0x1b0   : > { %2199 = vmatprep.subr.mxu1 %v813_v10  ;;  %2129 = vmatpush1.msra.mxu0 %v556_v12  ;;  %v965_v8 = vld [vmem:[%s4169_s23 + $0xf28] sm:$0xff]  ;;  %v708_v9 = vld [vmem:[%s4169_s23 + $0x720] sm:$0xff] }
 0x1b1   : > { %2200 = vmatpush1.msra.mxu1 %v812_v13  ;;  %2130 = vmatprep.subr.mxu0 %v549_v14  ;;  %v964_v10 = vld [vmem:[%s4169_s23 + $0xf20] sm:$0xff]  ;;  %v701_v12 = vld [vmem:[%s4169_s23 + $0x6e8] sm:$0xff] }
 0x1b2   : > { %2201 = vmatprep.subr.mxu1 %v805_v15  ;;  %2131 = vmatpush1.msra.mxu0 %v548_v16  ;;  %v957_v13 = vld [vmem:[%s4169_s23 + $0xee8] sm:$0xff]  ;;  %v700_v14 = vld [vmem:[%s4169_s23 + $0x6e0] sm:$0xff] }
 0x1b3   : > { %2202 = vmatpush1.msra.mxu1 %v804_v17  ;;  %2132 = vmatprep.subr.mxu0 %v541_v18  ;;  %v956_v15 = vld [vmem:[%s4169_s23 + $0xee0] sm:$0xff]  ;;  %v693_v16 = vld [vmem:[%s4169_s23 + $0x6a8] sm:$0xff] }
 0x1b4   : > { %2203 = vmatprep.subr.mxu1 %v797_v19  ;;  %2133 = vmatpush1.msra.mxu0 %v540_v20  ;;  %v949_v17 = vld [vmem:[%s4169_s23 + $0xea8] sm:$0xff]  ;;  %v692_v18 = vld [vmem:[%s4169_s23 + $0x6a0] sm:$0xff] }
 0x1b5   : > { %2204 = vmatpush1.msra.mxu1 %v796_v22  ;;  %2134 = vmatprep.subr.mxu0 %v533_v23  ;;  %v948_v19 = vld [vmem:[%s4169_s23 + $0xea0] sm:$0xff]  ;;  %v685_v20 = vld [vmem:[%s4169_s23 + $0x668] sm:$0xff] }
 0x1b6   : > { %2205 = vmatprep.subr.mxu1 %v789_v24  ;;  %2135 = vmatpush1.msra.mxu0 %v532_v25  ;;  %v941_v22 = vld [vmem:[%s4169_s23 + $0xe68] sm:$0xff]  ;;  %v684_v23 = vld [vmem:[%s4169_s23 + $0x660] sm:$0xff] }
 0x1b7   : > { %2206 = vmatpush1.msra.mxu1 %v788_v26  ;;  %2136 = vmatprep.subr.mxu0 %v525_v27  ;;  %v940_v24 = vld [vmem:[%s4169_s23 + $0xe60] sm:$0xff]  ;;  %v677_v25 = vld [vmem:[%s4169_s23 + $0x628] sm:$0xff] }
 0x1b8   : > { %2207 = vmatprep.subr.mxu1 %v781_v28  ;;  %2137 = vmatpush1.msra.mxu0 %v524_v29  ;;  %v933_v26 = vld [vmem:[%s4169_s23 + $0xe28] sm:$0xff]  ;;  %v676_v27 = vld [vmem:[%s4169_s23 + $0x620] sm:$0xff] }
 0x1b9   : > { %2208 = vmatpush1.msra.mxu1 %v780_v30  ;;  %2138 = vmatprep.subr.mxu0 %v517_v32  ;;  %v932_v28 = vld [vmem:[%s4169_s23 + $0xe20] sm:$0xff]  ;;  %v669_v29 = vld [vmem:[%s4169_s23 + $0x5e8] sm:$0xff] }
 0x1ba   : > { %2209 = vmatprep.subr.mxu1 %v773_v33  ;;  %2139 = vmatpush1.msra.mxu0 %v516_v35  ;;  %v925_v30 = vld [vmem:[%s4169_s23 + $0xde8] sm:$0xff]  ;;  %v668_v32 = vld [vmem:[%s4169_s23 + $0x5e0] sm:$0xff] }
 0x1bb   : > { %2210 = vmatpush1.msra.mxu1 %v772_v36  ;;  %2140 = vmatprep.subr.mxu0 %v509_v37  ;;  %v924_v33 = vld [vmem:[%s4169_s23 + $0xde0] sm:$0xff]  ;;  %v661_v35 = vld [vmem:[%s4169_s23 + $0x5a8] sm:$0xff] }
 0x1bc   : > { %2211 = vmatprep.subr.mxu1 %v765_v38  ;;  %2141 = vmatpush1.msra.mxu0 %v508_v39  ;;  %v917_v36 = vld [vmem:[%s4169_s23 + $0xda8] sm:$0xff]  ;;  %v660_v37 = vld [vmem:[%s4169_s23 + $0x5a0] sm:$0xff] }
 0x1bd   : > { %2212 = vmatpush1.msra.mxu1 %v764_v40  ;;  %2142 = vmatprep.subr.mxu0 %v501_v42  ;;  %v916_v38 = vld [vmem:[%s4169_s23 + $0xda0] sm:$0xff]  ;;  %v653_v39 = vld [vmem:[%s4169_s23 + $0x568] sm:$0xff] }
 0x1be   : > { %2213 = vmatprep.subr.mxu1 %v757_v44  ;;  %2143 = vmatpush1.msra.mxu0 %v500_v45  ;;  %v909_v40 = vld [vmem:[%s4169_s23 + $0xd68] sm:$0xff]  ;;  %v652_v42 = vld [vmem:[%s4169_s23 + $0x560] sm:$0xff] }
 0x1bf   : > { %2214 = vmatpush1.msra.mxu1 %v756_v46  ;;  %2144 = vmatprep.subr.mxu0 %v493_v47  ;;  %v908_v44 = vld [vmem:[%s4169_s23 + $0xd60] sm:$0xff]  ;;  %v645_v45 = vld [vmem:[%s4169_s23 + $0x528] sm:$0xff] }
 0x1c0   : > { %2215 = vmatprep.subr.mxu1 %v749_v48  ;;  %2145 = vmatpush1.msra.mxu0 %v492_v50  ;;  %v901_v46 = vld [vmem:[%s4169_s23 + $0xd28] sm:$0xff]  ;;  %v644_v47 = vld [vmem:[%s4169_s23 + $0x520] sm:$0xff] }
 0x1c1   : > { %2216 = vmatpush1.msra.mxu1 %v748_v51  ;;  %2146 = vmatprep.subr.mxu0 %v485_v52  ;;  %v900_v48 = vld [vmem:[%s4169_s23 + $0xd20] sm:$0xff]  ;;  %v637_v50 = vld [vmem:[%s4169_s23 + $0x4e8] sm:$0xff] }
 0x1c2   : > { %2217 = vmatprep.subr.mxu1 %v741_v53  ;;  %2147 = vmatpush1.msra.mxu0 %v484_v55  ;;  %v893_v51 = vld [vmem:[%s4169_s23 + $0xce8] sm:$0xff]  ;;  %v636_v52 = vld [vmem:[%s4169_s23 + $0x4e0] sm:$0xff] }
 0x1c3   : > { %2218 = vmatpush1.msra.mxu1 %v740_v56  ;;  %2148 = vmatprep.subr.mxu0 %v733_v57  ;;  %v892_v53 = vld [vmem:[%s4169_s23 + $0xce0] sm:$0xff]  ;;  %v629_v55 = vld [vmem:[%s4169_s23 + $0x4a8] sm:$0xff] }
 0x1c4   : > { %2219 = vmatprep.subr.mxu1 %v989_v58  ;;  %2149 = vmatpush2.msra.mxu0 %v732_v60  ;;  %v885_v56 = vld [vmem:[%s4169_s23 + $0xca8] sm:$0xff]  ;;  %v628_v57 = vld [vmem:[%s4169_s23 + $0x4a0] sm:$0xff] }
 0x1c5   : > { %2220 = vmatpush2.msra.mxu1 %v988_v61  ;;  %2150 = vmatprep.subr.mxu0 %v725_v63  ;;  %v884_v58 = vld [vmem:[%s4169_s23 + $0xca0] sm:$0xff]  ;;  %v621_v60 = vld [vmem:[%s4169_s23 + $0x468] sm:$0xff] }
 0x1c6   : > { %2221 = vmatprep.subr.mxu1 %v981_v0  ;;  %2151 = vmatpush2.msra.mxu0 %v724_v1  ;;  %v877_v61 = vld [vmem:[%s4169_s23 + $0xc68] sm:$0xff]  ;;  %v620_v63 = vld [vmem:[%s4169_s23 + $0x460] sm:$0xff] }
 0x1c7   : > { %2222 = vmatpush2.msra.mxu1 %v980_v2  ;;  %2152 = vmatprep.subr.mxu0 %v717_v3  ;;  %v876_v0 = vld [vmem:[%s4169_s23 + $0xc60] sm:$0xff]  ;;  %v613_v1 = vld [vmem:[%s4169_s23 + $0x428] sm:$0xff] }
 0x1c8   : > { %2223 = vmatprep.subr.mxu1 %v973_v4  ;;  %2153 = vmatpush2.msra.mxu0 %v716_v5  ;;  %v869_v2 = vld [vmem:[%s4169_s23 + $0xc28] sm:$0xff]  ;;  %v612_v3 = vld [vmem:[%s4169_s23 + $0x420] sm:$0xff] }
 0x1c9   : > { %2224 = vmatpush2.msra.mxu1 %v972_v6  ;;  %2154 = vmatprep.subr.mxu0 %v709_v7  ;;  %v868_v4 = vld [vmem:[%s4169_s23 + $0xc20] sm:$0xff]  ;;  %v1117_v5 = vld [vmem:[%s4169_s23 + $0x13e8] sm:$0xff] }
 0x1ca   : > { %2225 = vmatprep.subr.mxu1 %v965_v8  ;;  %2155 = vmatpush2.msra.mxu0 %v708_v9  ;;  %v1373_v6 = vld [vmem:[%s4169_s23 + $0x1be8] sm:$0xff]  ;;  %v1116_v7 = vld [vmem:[%s4169_s23 + $0x13e0] sm:$0xff] }
 0x1cb   : > { %2226 = vmatpush2.msra.mxu1 %v964_v10  ;;  %2156 = vmatprep.subr.mxu0 %v701_v12  ;;  %v1372_v8 = vld [vmem:[%s4169_s23 + $0x1be0] sm:$0xff]  ;;  %v1109_v9 = vld [vmem:[%s4169_s23 + $0x13a8] sm:$0xff] }
 0x1cc   : > { %2227 = vmatprep.subr.mxu1 %v957_v13  ;;  %2157 = vmatpush2.msra.mxu0 %v700_v14  ;;  %v1365_v10 = vld [vmem:[%s4169_s23 + $0x1ba8] sm:$0xff]  ;;  %v1108_v12 = vld [vmem:[%s4169_s23 + $0x13a0] sm:$0xff] }
 0x1cd   : > { %2228 = vmatpush2.msra.mxu1 %v956_v15  ;;  %2158 = vmatprep.subr.mxu0 %v693_v16  ;;  %v1364_v13 = vld [vmem:[%s4169_s23 + $0x1ba0] sm:$0xff]  ;;  %v1101_v14 = vld [vmem:[%s4169_s23 + $0x1368] sm:$0xff] }
 0x1ce   : > { %2229 = vmatprep.subr.mxu1 %v949_v17  ;;  %2159 = vmatpush2.msra.mxu0 %v692_v18  ;;  %v1357_v15 = vld [vmem:[%s4169_s23 + $0x1b68] sm:$0xff]  ;;  %v1100_v16 = vld [vmem:[%s4169_s23 + $0x1360] sm:$0xff] }
 0x1cf   : > { %2230 = vmatpush2.msra.mxu1 %v948_v19  ;;  %2160 = vmatprep.subr.mxu0 %v685_v20  ;;  %v1356_v17 = vld [vmem:[%s4169_s23 + $0x1b60] sm:$0xff]  ;;  %v1093_v18 = vld [vmem:[%s4169_s23 + $0x1328] sm:$0xff] }
 0x1d0   : > { %2231 = vmatprep.subr.mxu1 %v941_v22  ;;  %2161 = vmatpush2.msra.mxu0 %v684_v23  ;;  %v1349_v19 = vld [vmem:[%s4169_s23 + $0x1b28] sm:$0xff]  ;;  %v1092_v20 = vld [vmem:[%s4169_s23 + $0x1320] sm:$0xff] }
 0x1d1   : > { %2232 = vmatpush2.msra.mxu1 %v940_v24  ;;  %2162 = vmatprep.subr.mxu0 %v677_v25  ;;  %v1348_v22 = vld [vmem:[%s4169_s23 + $0x1b20] sm:$0xff]  ;;  %v1085_v23 = vld [vmem:[%s4169_s23 + $0x12e8] sm:$0xff] }
 0x1d2   : > { %2233 = vmatprep.subr.mxu1 %v933_v26  ;;  %2163 = vmatpush2.msra.mxu0 %v676_v27  ;;  %v1341_v24 = vld [vmem:[%s4169_s23 + $0x1ae8] sm:$0xff]  ;;  %v1084_v25 = vld [vmem:[%s4169_s23 + $0x12e0] sm:$0xff] }
 0x1d3   : > { %2234 = vmatpush2.msra.mxu1 %v932_v28  ;;  %2164 = vmatprep.subr.mxu0 %v669_v29  ;;  %v1340_v26 = vld [vmem:[%s4169_s23 + $0x1ae0] sm:$0xff]  ;;  %v1077_v27 = vld [vmem:[%s4169_s23 + $0x12a8] sm:$0xff] }
 0x1d4   : > { %2235 = vmatprep.subr.mxu1 %v925_v30  ;;  %2165 = vmatpush2.msra.mxu0 %v668_v32  ;;  %v1333_v28 = vld [vmem:[%s4169_s23 + $0x1aa8] sm:$0xff]  ;;  %v1076_v29 = vld [vmem:[%s4169_s23 + $0x12a0] sm:$0xff] }
 0x1d5   : > { %2236 = vmatpush2.msra.mxu1 %v924_v33  ;;  %2166 = vmatprep.subr.mxu0 %v661_v35  ;;  %v1332_v30 = vld [vmem:[%s4169_s23 + $0x1aa0] sm:$0xff]  ;;  %v1069_v32 = vld [vmem:[%s4169_s23 + $0x1268] sm:$0xff] }
 0x1d6   : > { %2237 = vmatprep.subr.mxu1 %v917_v36  ;;  %2167 = vmatpush2.msra.mxu0 %v660_v37  ;;  %v1325_v33 = vld [vmem:[%s4169_s23 + $0x1a68] sm:$0xff]  ;;  %v1068_v35 = vld [vmem:[%s4169_s23 + $0x1260] sm:$0xff] }
 0x1d7   : > { %2238 = vmatpush2.msra.mxu1 %v916_v38  ;;  %2168 = vmatprep.subr.mxu0 %v653_v39  ;;  %v1324_v36 = vld [vmem:[%s4169_s23 + $0x1a60] sm:$0xff]  ;;  %v1061_v37 = vld [vmem:[%s4169_s23 + $0x1228] sm:$0xff] }
 0x1d8   : > { %2239 = vmatprep.subr.mxu1 %v909_v40  ;;  %2169 = vmatpush2.msra.mxu0 %v652_v42  ;;  %v1317_v38 = vld [vmem:[%s4169_s23 + $0x1a28] sm:$0xff]  ;;  %v1060_v39 = vld [vmem:[%s4169_s23 + $0x1220] sm:$0xff] }
 0x1d9   : > { %2240 = vmatpush2.msra.mxu1 %v908_v44  ;;  %2170 = vmatprep.subr.mxu0 %v645_v45  ;;  %v1316_v40 = vld [vmem:[%s4169_s23 + $0x1a20] sm:$0xff]  ;;  %v1053_v42 = vld [vmem:[%s4169_s23 + $0x11e8] sm:$0xff] }
 0x1da   : > { %2241 = vmatprep.subr.mxu1 %v901_v46  ;;  %2171 = vmatpush2.msra.mxu0 %v644_v47  ;;  %v1309_v44 = vld [vmem:[%s4169_s23 + $0x19e8] sm:$0xff]  ;;  %v1052_v45 = vld [vmem:[%s4169_s23 + $0x11e0] sm:$0xff] }
 0x1db   : > { %2242 = vmatpush2.msra.mxu1 %v900_v48  ;;  %2172 = vmatprep.subr.mxu0 %v637_v50  ;;  %v1308_v46 = vld [vmem:[%s4169_s23 + $0x19e0] sm:$0xff]  ;;  %v1045_v47 = vld [vmem:[%s4169_s23 + $0x11a8] sm:$0xff] }
 0x1dc   : > { %2243 = vmatprep.subr.mxu1 %v893_v51  ;;  %2173 = vmatpush2.msra.mxu0 %v636_v52  ;;  %v1301_v48 = vld [vmem:[%s4169_s23 + $0x19a8] sm:$0xff]  ;;  %v1044_v50 = vld [vmem:[%s4169_s23 + $0x11a0] sm:$0xff] }
 0x1dd   : > { %2244 = vmatpush2.msra.mxu1 %v892_v53  ;;  %2174 = vmatprep.subr.mxu0 %v629_v55  ;;  %v1300_v51 = vld [vmem:[%s4169_s23 + $0x19a0] sm:$0xff]  ;;  %v1037_v52 = vld [vmem:[%s4169_s23 + $0x1168] sm:$0xff] }
 0x1de   : > { %2245 = vmatprep.subr.mxu1 %v885_v56  ;;  %2175 = vmatpush2.msra.mxu0 %v628_v57  ;;  %v1293_v53 = vld [vmem:[%s4169_s23 + $0x1968] sm:$0xff]  ;;  %v1036_v55 = vld [vmem:[%s4169_s23 + $0x1160] sm:$0xff] }
 0x1df   : > { %2246 = vmatpush2.msra.mxu1 %v884_v58  ;;  %2176 = vmatprep.subr.mxu0 %v621_v60  ;;  %v1292_v56 = vld [vmem:[%s4169_s23 + $0x1960] sm:$0xff]  ;;  %v1029_v57 = vld [vmem:[%s4169_s23 + $0x1128] sm:$0xff] }
 0x1e0   : > { %2247 = vmatprep.subr.mxu1 %v877_v61  ;;  %2177 = vmatpush2.msra.mxu0 %v620_v63  ;;  %v1285_v58 = vld [vmem:[%s4169_s23 + $0x1928] sm:$0xff]  ;;  %v1028_v60 = vld [vmem:[%s4169_s23 + $0x1120] sm:$0xff] }
 0x1e1   : > { %2248 = vmatpush2.msra.mxu1 %v876_v0  ;;  %2178 = vmatprep.subr.mxu0 %v613_v1  ;;  %v1284_v61 = vld [vmem:[%s4169_s23 + $0x1920] sm:$0xff]  ;;  %v1021_v63 = vld [vmem:[%s4169_s23 + $0x10e8] sm:$0xff] }
 0x1e2   : > { %2249 = vmatprep.subr.mxu1 %v869_v2  ;;  %2179 = vmatpush2.msra.mxu0 %v612_v3  ;;  %v1277_v0 = vld [vmem:[%s4169_s23 + $0x18e8] sm:$0xff]  ;;  %v1020_v1 = vld [vmem:[%s4169_s23 + $0x10e0] sm:$0xff] }
 0x1e3   : > { %2180 = vmatprep.mubr.f32.mxu0 %v4335_v41  ;;  %2250 = vmatpush2.msra.mxu1 %v868_v4  ;;  %v1276_v2 = vld [vmem:[%s4169_s23 + $0x18e0] sm:$0xff]  ;;  %v1013_v3 = vld [vmem:[%s4169_s23 + $0x10a8] sm:$0xff] }
 0x1e4   : > { %2251 = vmatprep.mubr.f32.mxu1 %v4340_v43  ;;  %2181 = vmatmul.mubr.f32.vlgmr.msra.gmra.mxu0 %v4320_v31  ;;  %v1269_v4 = vld [vmem:[%s4169_s23 + $0x18a8] sm:$0xff] }
 0x1e5   : > { %2252 = vmatmul.mubr.f32.vlgmr.msra.gmra.mxu1 %v4325_v34  ;;  %2258 = vmatprep.subr.mxu0 %v1117_v5  ;;  %v1012_v5 = vld [vmem:[%s4169_s23 + $0x10a0] sm:$0xff] }
 0x1e6   : > { %2329 = vmatprep.subr.mxu1 %v1373_v6  ;;  %2259 = vmatpush1.msra.mxu0 %v1116_v7  ;;  %v1268_v6 = vld [vmem:[%s4169_s23 + $0x18a0] sm:$0xff]  ;;  %v1005_v7 = vld [vmem:[%s4169_s23 + $0x1068] sm:$0xff] }
 0x1e7   : > { %2330 = vmatpush1.msra.mxu1 %v1372_v8  ;;  %2260 = vmatprep.subr.mxu0 %v1109_v9  ;;  %v1261_v8 = vld [vmem:[%s4169_s23 + $0x1868] sm:$0xff]  ;;  %v1004_v9 = vld [vmem:[%s4169_s23 + $0x1060] sm:$0xff] }
 0x1e8   : > { %2331 = vmatprep.subr.mxu1 %v1365_v10  ;;  %2261 = vmatpush1.msra.mxu0 %v1108_v12  ;;  %v1260_v10 = vld [vmem:[%s4169_s23 + $0x1860] sm:$0xff]  ;;  %v997_v12 = vld [vmem:[%s4169_s23 + $0x1028] sm:$0xff] }
 0x1e9   : > { %2332 = vmatpush1.msra.mxu1 %v1364_v13  ;;  %2262 = vmatprep.subr.mxu0 %v1101_v14  ;;  %v1253_v13 = vld [vmem:[%s4169_s23 + $0x1828] sm:$0xff]  ;;  %v996_v14 = vld [vmem:[%s4169_s23 + $0x1020] sm:$0xff] }
 0x1ea   : > { %2333 = vmatprep.subr.mxu1 %v1357_v15  ;;  %2263 = vmatpush1.msra.mxu0 %v1100_v16  ;;  %v1252_v15 = vld [vmem:[%s4169_s23 + $0x1820] sm:$0xff]  ;;  %v1245_v16 = vld [vmem:[%s4169_s23 + $0x17e8] sm:$0xff] }
 0x1eb   : > { %2334 = vmatpush1.msra.mxu1 %v1356_v17  ;;  %2264 = vmatprep.subr.mxu0 %v1093_v18  ;;  %v1501_v17 = vld [vmem:[%s4169_s23 + $0x1fe8] sm:$0xff]  ;;  %v1244_v18 = vld [vmem:[%s4169_s23 + $0x17e0] sm:$0xff] }
 0x1ec   : > { %2335 = vmatprep.subr.mxu1 %v1349_v19  ;;  %2265 = vmatpush1.msra.mxu0 %v1092_v20  ;;  %v1500_v19 = vld [vmem:[%s4169_s23 + $0x1fe0] sm:$0xff]  ;;  %v1237_v20 = vld [vmem:[%s4169_s23 + $0x17a8] sm:$0xff] }
 0x1ed   : > { %2336 = vmatpush1.msra.mxu1 %v1348_v22  ;;  %2266 = vmatprep.subr.mxu0 %v1085_v23  ;;  %v1493_v22 = vld [vmem:[%s4169_s23 + $0x1fa8] sm:$0xff]  ;;  %v1236_v23 = vld [vmem:[%s4169_s23 + $0x17a0] sm:$0xff] }
 0x1ee   : > { %2337 = vmatprep.subr.mxu1 %v1341_v24  ;;  %2267 = vmatpush1.msra.mxu0 %v1084_v25  ;;  %v1492_v24 = vld [vmem:[%s4169_s23 + $0x1fa0] sm:$0xff]  ;;  %v1229_v25 = vld [vmem:[%s4169_s23 + $0x1768] sm:$0xff] }
 0x1ef   : > { %2338 = vmatpush1.msra.mxu1 %v1340_v26  ;;  %2268 = vmatprep.subr.mxu0 %v1077_v27  ;;  %v1485_v26 = vld [vmem:[%s4169_s23 + $0x1f68] sm:$0xff]  ;;  %v1228_v27 = vld [vmem:[%s4169_s23 + $0x1760] sm:$0xff] }
 0x1f0   : > { %2339 = vmatprep.subr.mxu1 %v1333_v28  ;;  %2269 = vmatpush1.msra.mxu0 %v1076_v29  ;;  %v1484_v28 = vld [vmem:[%s4169_s23 + $0x1f60] sm:$0xff]  ;;  %v1221_v29 = vld [vmem:[%s4169_s23 + $0x1728] sm:$0xff] }
 0x1f1   : > { %2340 = vmatpush1.msra.mxu1 %v1332_v30  ;;  %2270 = vmatprep.subr.mxu0 %v1069_v32  ;;  %v1477_v30 = vld [vmem:[%s4169_s23 + $0x1f28] sm:$0xff]  ;;  %v1220_v32 = vld [vmem:[%s4169_s23 + $0x1720] sm:$0xff] }
 0x1f2   : > { %2341 = vmatprep.subr.mxu1 %v1325_v33  ;;  %2271 = vmatpush1.msra.mxu0 %v1068_v35  ;;  %v1476_v33 = vld [vmem:[%s4169_s23 + $0x1f20] sm:$0xff]  ;;  %v1213_v35 = vld [vmem:[%s4169_s23 + $0x16e8] sm:$0xff] }
 0x1f3   : > { %2342 = vmatpush1.msra.mxu1 %v1324_v36  ;;  %2272 = vmatprep.subr.mxu0 %v1061_v37  ;;  %v1469_v36 = vld [vmem:[%s4169_s23 + $0x1ee8] sm:$0xff]  ;;  %v1212_v37 = vld [vmem:[%s4169_s23 + $0x16e0] sm:$0xff] }
 0x1f4   : > { %2343 = vmatprep.subr.mxu1 %v1317_v38  ;;  %2273 = vmatpush1.msra.mxu0 %v1060_v39  ;;  %v1468_v38 = vld [vmem:[%s4169_s23 + $0x1ee0] sm:$0xff]  ;;  %v1205_v39 = vld [vmem:[%s4169_s23 + $0x16a8] sm:$0xff] }
 0x1f5   : > { %2344 = vmatpush1.msra.mxu1 %v1316_v40  ;;  %2274 = vmatprep.subr.mxu0 %v1053_v42  ;;  %v1461_v40 = vld [vmem:[%s4169_s23 + $0x1ea8] sm:$0xff]  ;;  %v1204_v42 = vld [vmem:[%s4169_s23 + $0x16a0] sm:$0xff] }
 0x1f6   : > { %2345 = vmatprep.subr.mxu1 %v1309_v44  ;;  %2275 = vmatpush1.msra.mxu0 %v1052_v45  ;;  %v1460_v44 = vld [vmem:[%s4169_s23 + $0x1ea0] sm:$0xff]  ;;  %v1197_v45 = vld [vmem:[%s4169_s23 + $0x1668] sm:$0xff] }
 0x1f7   : > { %2346 = vmatpush1.msra.mxu1 %v1308_v46  ;;  %2276 = vmatprep.subr.mxu0 %v1045_v47  ;;  %v1453_v46 = vld [vmem:[%s4169_s23 + $0x1e68] sm:$0xff]  ;;  %v1196_v47 = vld [vmem:[%s4169_s23 + $0x1660] sm:$0xff] }
 0x1f8   : > { %2347 = vmatprep.subr.mxu1 %v1301_v48  ;;  %2277 = vmatpush1.msra.mxu0 %v1044_v50  ;;  %v1452_v48 = vld [vmem:[%s4169_s23 + $0x1e60] sm:$0xff]  ;;  %v1189_v50 = vld [vmem:[%s4169_s23 + $0x1628] sm:$0xff] }
 0x1f9   : > { %2348 = vmatpush1.msra.mxu1 %v1300_v51  ;;  %2278 = vmatprep.subr.mxu0 %v1037_v52  ;;  %v1445_v51 = vld [vmem:[%s4169_s23 + $0x1e28] sm:$0xff]  ;;  %v1188_v52 = vld [vmem:[%s4169_s23 + $0x1620] sm:$0xff] }
 0x1fa   : > { %2349 = vmatprep.subr.mxu1 %v1293_v53  ;;  %2279 = vmatpush1.msra.mxu0 %v1036_v55  ;;  %v1444_v53 = vld [vmem:[%s4169_s23 + $0x1e20] sm:$0xff]  ;;  %v1181_v55 = vld [vmem:[%s4169_s23 + $0x15e8] sm:$0xff] }
 0x1fb   : > { %2350 = vmatpush1.msra.mxu1 %v1292_v56  ;;  %2280 = vmatprep.subr.mxu0 %v1029_v57  ;;  %v1437_v56 = vld [vmem:[%s4169_s23 + $0x1de8] sm:$0xff]  ;;  %v1180_v57 = vld [vmem:[%s4169_s23 + $0x15e0] sm:$0xff] }
 0x1fc   : > { %2351 = vmatprep.subr.mxu1 %v1285_v58  ;;  %2281 = vmatpush1.msra.mxu0 %v1028_v60  ;;  %v1436_v58 = vld [vmem:[%s4169_s23 + $0x1de0] sm:$0xff]  ;;  %v1173_v60 = vld [vmem:[%s4169_s23 + $0x15a8] sm:$0xff] }
 0x1fd   : > { %2352 = vmatpush1.msra.mxu1 %v1284_v61  ;;  %2282 = vmatprep.subr.mxu0 %v1021_v63  ;;  %v1429_v61 = vld [vmem:[%s4169_s23 + $0x1da8] sm:$0xff]  ;;  %v1172_v63 = vld [vmem:[%s4169_s23 + $0x15a0] sm:$0xff] }
 0x1fe   : > { %2353 = vmatprep.subr.mxu1 %v1277_v0  ;;  %2283 = vmatpush1.msra.mxu0 %v1020_v1  ;;  %v1428_v0 = vld [vmem:[%s4169_s23 + $0x1da0] sm:$0xff]  ;;  %v1165_v1 = vld [vmem:[%s4169_s23 + $0x1568] sm:$0xff] }
 0x1ff   : > { %2354 = vmatpush1.msra.mxu1 %v1276_v2  ;;  %2284 = vmatprep.subr.mxu0 %v1013_v3  ;;  %v1421_v2 = vld [vmem:[%s4169_s23 + $0x1d68] sm:$0xff]  ;;  %v1164_v3 = vld [vmem:[%s4169_s23 + $0x1560] sm:$0xff] }
 0x200   : > { %2355 = vmatprep.subr.mxu1 %v1269_v4  ;;  %2285 = vmatpush1.msra.mxu0 %v1012_v5  ;;  %v1420_v4 = vld [vmem:[%s4169_s23 + $0x1d60] sm:$0xff]  ;;  %v1157_v5 = vld [vmem:[%s4169_s23 + $0x1528] sm:$0xff] }
 0x201   : > { %2356 = vmatpush1.msra.mxu1 %v1268_v6  ;;  %2286 = vmatprep.subr.mxu0 %v1005_v7  ;;  %v1413_v6 = vld [vmem:[%s4169_s23 + $0x1d28] sm:$0xff]  ;;  %v1156_v7 = vld [vmem:[%s4169_s23 + $0x1520] sm:$0xff] }
 0x202   : > { %2357 = vmatprep.subr.mxu1 %v1261_v8  ;;  %2287 = vmatpush1.msra.mxu0 %v1004_v9  ;;  %v1412_v8 = vld [vmem:[%s4169_s23 + $0x1d20] sm:$0xff]  ;;  %v1149_v9 = vld [vmem:[%s4169_s23 + $0x14e8] sm:$0xff] }
 0x203   : > { %2358 = vmatpush1.msra.mxu1 %v1260_v10  ;;  %2288 = vmatprep.subr.mxu0 %v997_v12  ;;  %v1405_v10 = vld [vmem:[%s4169_s23 + $0x1ce8] sm:$0xff]  ;;  %v1148_v12 = vld [vmem:[%s4169_s23 + $0x14e0] sm:$0xff] }
 0x204   : > { %2359 = vmatprep.subr.mxu1 %v1253_v13  ;;  %2289 = vmatpush1.msra.mxu0 %v996_v14  ;;  %v1404_v13 = vld [vmem:[%s4169_s23 + $0x1ce0] sm:$0xff]  ;;  %v1141_v14 = vld [vmem:[%s4169_s23 + $0x14a8] sm:$0xff] }
 0x205   : > { %2360 = vmatpush1.msra.mxu1 %v1252_v15  ;;  %2290 = vmatprep.subr.mxu0 %v1245_v16  ;;  %v1397_v15 = vld [vmem:[%s4169_s23 + $0x1ca8] sm:$0xff]  ;;  %v1140_v16 = vld [vmem:[%s4169_s23 + $0x14a0] sm:$0xff] }
 0x206   : > { %2361 = vmatprep.subr.mxu1 %v1501_v17  ;;  %2291 = vmatpush2.msra.mxu0 %v1244_v18  ;;  %v1396_v17 = vld [vmem:[%s4169_s23 + $0x1ca0] sm:$0xff]  ;;  %v1133_v18 = vld [vmem:[%s4169_s23 + $0x1468] sm:$0xff] }
 0x207   : > { %2362 = vmatpush2.msra.mxu1 %v1500_v19  ;;  %2292 = vmatprep.subr.mxu0 %v1237_v20  ;;  %v1389_v19 = vld [vmem:[%s4169_s23 + $0x1c68] sm:$0xff]  ;;  %v1132_v20 = vld [vmem:[%s4169_s23 + $0x1460] sm:$0xff] }
 0x208   : > { %2363 = vmatprep.subr.mxu1 %v1493_v22  ;;  %2293 = vmatpush2.msra.mxu0 %v1236_v23  ;;  %v1388_v22 = vld [vmem:[%s4169_s23 + $0x1c60] sm:$0xff]  ;;  %v1125_v23 = vld [vmem:[%s4169_s23 + $0x1428] sm:$0xff] }
 0x209   : > { %2364 = vmatpush2.msra.mxu1 %v1492_v24  ;;  %2294 = vmatprep.subr.mxu0 %v1229_v25  ;;  %v1381_v24 = vld [vmem:[%s4169_s23 + $0x1c28] sm:$0xff]  ;;  %v1124_v25 = vld [vmem:[%s4169_s23 + $0x1420] sm:$0xff] }
 0x20a   : > { %2365 = vmatprep.subr.mxu1 %v1485_v26  ;;  %2295 = vmatpush2.msra.mxu0 %v1228_v27  ;;  %v1380_v26 = vld [vmem:[%s4169_s23 + $0x1c20] sm:$0xff]  ;;  %v607_v27 = vld [vmem:[%s4169_s23 + $0x3f8] sm:$0xff] }
 0x20b   : > { %2366 = vmatpush2.msra.mxu1 %v1484_v28  ;;  %2296 = vmatprep.subr.mxu0 %v1221_v29  ;;  %v863_v28 = vld [vmem:[%s4169_s23 + $0xbf8] sm:$0xff]  ;;  %v606_v29 = vld [vmem:[%s4169_s23 + $0x3f0] sm:$0xff] }
 0x20c   : > { %2367 = vmatprep.subr.mxu1 %v1477_v30  ;;  %2297 = vmatpush2.msra.mxu0 %v1220_v32  ;;  %v862_v30 = vld [vmem:[%s4169_s23 + $0xbf0] sm:$0xff]  ;;  %v599_v32 = vld [vmem:[%s4169_s23 + $0x3b8] sm:$0xff] }
 0x20d   : > { %2368 = vmatpush2.msra.mxu1 %v1476_v33  ;;  %2298 = vmatprep.subr.mxu0 %v1213_v35  ;;  %v855_v33 = vld [vmem:[%s4169_s23 + $0xbb8] sm:$0xff]  ;;  %v598_v35 = vld [vmem:[%s4169_s23 + $0x3b0] sm:$0xff] }
 0x20e   : > { %2369 = vmatprep.subr.mxu1 %v1469_v36  ;;  %2299 = vmatpush2.msra.mxu0 %v1212_v37  ;;  %v854_v36 = vld [vmem:[%s4169_s23 + $0xbb0] sm:$0xff]  ;;  %v591_v37 = vld [vmem:[%s4169_s23 + $0x378] sm:$0xff] }
 0x20f   : > { %2370 = vmatpush2.msra.mxu1 %v1468_v38  ;;  %2300 = vmatprep.subr.mxu0 %v1205_v39  ;;  %v847_v38 = vld [vmem:[%s4169_s23 + $0xb78] sm:$0xff]  ;;  %v590_v39 = vld [vmem:[%s4169_s23 + $0x370] sm:$0xff] }
 0x210   : > { %2371 = vmatprep.subr.mxu1 %v1461_v40  ;;  %2301 = vmatpush2.msra.mxu0 %v1204_v42  ;;  %v846_v40 = vld [vmem:[%s4169_s23 + $0xb70] sm:$0xff]  ;;  %v583_v42 = vld [vmem:[%s4169_s23 + $0x338] sm:$0xff] }
 0x211   : > { %2372 = vmatpush2.msra.mxu1 %v1460_v44  ;;  %2302 = vmatprep.subr.mxu0 %v1197_v45  ;;  %v839_v44 = vld [vmem:[%s4169_s23 + $0xb38] sm:$0xff]  ;;  %v582_v45 = vld [vmem:[%s4169_s23 + $0x330] sm:$0xff] }
 0x212   : > { %2373 = vmatprep.subr.mxu1 %v1453_v46  ;;  %2303 = vmatpush2.msra.mxu0 %v1196_v47  ;;  %v838_v46 = vld [vmem:[%s4169_s23 + $0xb30] sm:$0xff]  ;;  %v575_v47 = vld [vmem:[%s4169_s23 + $0x2f8] sm:$0xff] }
 0x213   : > { %2374 = vmatpush2.msra.mxu1 %v1452_v48  ;;  %2304 = vmatprep.subr.mxu0 %v1189_v50  ;;  %v831_v48 = vld [vmem:[%s4169_s23 + $0xaf8] sm:$0xff]  ;;  %v574_v50 = vld [vmem:[%s4169_s23 + $0x2f0] sm:$0xff] }
 0x214   : > { %2375 = vmatprep.subr.mxu1 %v1445_v51  ;;  %2305 = vmatpush2.msra.mxu0 %v1188_v52  ;;  %v830_v51 = vld [vmem:[%s4169_s23 + $0xaf0] sm:$0xff]  ;;  %v567_v52 = vld [vmem:[%s4169_s23 + $0x2b8] sm:$0xff] }
 0x215   : > { %2376 = vmatpush2.msra.mxu1 %v1444_v53  ;;  %2306 = vmatprep.subr.mxu0 %v1181_v55  ;;  %v823_v53 = vld [vmem:[%s4169_s23 + $0xab8] sm:$0xff]  ;;  %v566_v55 = vld [vmem:[%s4169_s23 + $0x2b0] sm:$0xff] }
 0x216   : > { %2377 = vmatprep.subr.mxu1 %v1437_v56  ;;  %2307 = vmatpush2.msra.mxu0 %v1180_v57  ;;  %v822_v56 = vld [vmem:[%s4169_s23 + $0xab0] sm:$0xff]  ;;  %v559_v57 = vld [vmem:[%s4169_s23 + $0x278] sm:$0xff] }
 0x217   : > { %2378 = vmatpush2.msra.mxu1 %v1436_v58  ;;  %2308 = vmatprep.subr.mxu0 %v1173_v60  ;;  %v815_v58 = vld [vmem:[%s4169_s23 + $0xa78] sm:$0xff]  ;;  %v558_v60 = vld [vmem:[%s4169_s23 + $0x270] sm:$0xff] }
 0x218   : > { %2379 = vmatprep.subr.mxu1 %v1429_v61  ;;  %2309 = vmatpush2.msra.mxu0 %v1172_v63  ;;  %v814_v61 = vld [vmem:[%s4169_s23 + $0xa70] sm:$0xff]  ;;  %v551_v63 = vld [vmem:[%s4169_s23 + $0x238] sm:$0xff] }
 0x219   : > { %2380 = vmatpush2.msra.mxu1 %v1428_v0  ;;  %2310 = vmatprep.subr.mxu0 %v1165_v1  ;;  %v807_v0 = vld [vmem:[%s4169_s23 + $0xa38] sm:$0xff]  ;;  %v550_v1 = vld [vmem:[%s4169_s23 + $0x230] sm:$0xff] }
 0x21a   : > { %2381 = vmatprep.subr.mxu1 %v1421_v2  ;;  %2311 = vmatpush2.msra.mxu0 %v1164_v3  ;;  %v806_v2 = vld [vmem:[%s4169_s23 + $0xa30] sm:$0xff]  ;;  %v543_v3 = vld [vmem:[%s4169_s23 + $0x1f8] sm:$0xff] }
 0x21b   : > { %2382 = vmatpush2.msra.mxu1 %v1420_v4  ;;  %2312 = vmatprep.subr.mxu0 %v1157_v5  ;;  %v799_v4 = vld [vmem:[%s4169_s23 + $0x9f8] sm:$0xff]  ;;  %v542_v5 = vld [vmem:[%s4169_s23 + $0x1f0] sm:$0xff] }
 0x21c   : > { %2383 = vmatprep.subr.mxu1 %v1413_v6  ;;  %2313 = vmatpush2.msra.mxu0 %v1156_v7  ;;  %v798_v6 = vld [vmem:[%s4169_s23 + $0x9f0] sm:$0xff]  ;;  %v535_v7 = vld [vmem:[%s4169_s23 + $0x1b8] sm:$0xff] }
 0x21d   : > { %2384 = vmatpush2.msra.mxu1 %v1412_v8  ;;  %2314 = vmatprep.subr.mxu0 %v1149_v9  ;;  %v791_v8 = vld [vmem:[%s4169_s23 + $0x9b8] sm:$0xff]  ;;  %v534_v9 = vld [vmem:[%s4169_s23 + $0x1b0] sm:$0xff] }
 0x21e   : > { %2385 = vmatprep.subr.mxu1 %v1405_v10  ;;  %2315 = vmatpush2.msra.mxu0 %v1148_v12  ;;  %v790_v10 = vld [vmem:[%s4169_s23 + $0x9b0] sm:$0xff]  ;;  %v527_v12 = vld [vmem:[%s4169_s23 + $0x178] sm:$0xff] }
 0x21f   : > { %2386 = vmatpush2.msra.mxu1 %v1404_v13  ;;  %2316 = vmatprep.subr.mxu0 %v1141_v14  ;;  %v783_v13 = vld [vmem:[%s4169_s23 + $0x978] sm:$0xff]  ;;  %v526_v14 = vld [vmem:[%s4169_s23 + $0x170] sm:$0xff] }
 0x220   : > { %2387 = vmatprep.subr.mxu1 %v1397_v15  ;;  %2317 = vmatpush2.msra.mxu0 %v1140_v16  ;;  %v782_v15 = vld [vmem:[%s4169_s23 + $0x970] sm:$0xff]  ;;  %v519_v16 = vld [vmem:[%s4169_s23 + $0x138] sm:$0xff] }
 0x221   : > { %2388 = vmatpush2.msra.mxu1 %v1396_v17  ;;  %2318 = vmatprep.subr.mxu0 %v1133_v18  ;;  %v775_v17 = vld [vmem:[%s4169_s23 + $0x938] sm:$0xff]  ;;  %v518_v18 = vld [vmem:[%s4169_s23 + $0x130] sm:$0xff] }
 0x222   : > { %2389 = vmatprep.subr.mxu1 %v1389_v19  ;;  %2319 = vmatpush2.msra.mxu0 %v1132_v20  ;;  %v774_v19 = vld [vmem:[%s4169_s23 + $0x930] sm:$0xff]  ;;  %v511_v20 = vld [vmem:[%s4169_s23 + $0xf8] sm:$0xff] }
 0x223   : > { %2390 = vmatpush2.msra.mxu1 %v1388_v22  ;;  %2320 = vmatprep.subr.mxu0 %v1125_v23  ;;  %v767_v22 = vld [vmem:[%s4169_s23 + $0x8f8] sm:$0xff]  ;;  %v510_v23 = vld [vmem:[%s4169_s23 + $0xf0] sm:$0xff] }
 0x224   : > { %2391 = vmatprep.subr.mxu1 %v1381_v24  ;;  %2321 = vmatpush2.msra.mxu0 %v1124_v25  ;;  %v766_v24 = vld [vmem:[%s4169_s23 + $0x8f0] sm:$0xff]  ;;  %v503_v25 = vld [vmem:[%s4169_s23 + $0xb8] sm:$0xff] }
 0x225   : > { %2322 = vmatprep.mubr.f32.mxu0 %v4482_v59  ;;  %2392 = vmatpush2.msra.mxu1 %v1380_v26  ;;  %v759_v26 = vld [vmem:[%s4169_s23 + $0x8b8] sm:$0xff] }
 0x226   : > { %2323 = vmatmul.mubr.f32.vlgmr.msra.gmra.mxu0 %v4467_v49  ;;  %2393 = vmatprep.mubr.f32.mxu1 %v4488_v62 }
 0x227   : > { %2400 = vmatprep.subr.mxu0 %v607_v27  ;;  %2471 = vmatprep.subr.mxu1 %v863_v28  ;;  %v502_v27 = vld [vmem:[%s4169_s23 + $0xb0] sm:$0xff] }
 0x228   : > { %2394 = vmatmul.mubr.f32.vlgmr.msra.gmra.mxu1 %v4474_v54  ;;  %2401 = vmatpush1.msra.mxu0 %v606_v29  ;;  %v758_v28 = vld [vmem:[%s4169_s23 + $0x8b0] sm:$0xff]  ;;  %v495_v29 = vld [vmem:[%s4169_s23 + $0x78] sm:$0xff] }
 0x229   : > { %2472 = vmatpush1.msra.mxu1 %v862_v30  ;;  %2402 = vmatprep.subr.mxu0 %v599_v32  ;;  %v751_v30 = vld [vmem:[%s4169_s23 + $0x878] sm:$0xff]  ;;  %v494_v32 = vld [vmem:[%s4169_s23 + $0x70] sm:$0xff] }
 0x22a   : > { %2473 = vmatprep.subr.mxu1 %v855_v33  ;;  %2403 = vmatpush1.msra.mxu0 %v598_v35  ;;  %v750_v33 = vld [vmem:[%s4169_s23 + $0x870] sm:$0xff]  ;;  %v487_v35 = vld [vmem:[%s4169_s23 + $0x38] sm:$0xff] }
 0x22b   : > { %2474 = vmatpush1.msra.mxu1 %v854_v36  ;;  %2404 = vmatprep.subr.mxu0 %v591_v37  ;;  %v743_v36 = vld [vmem:[%s4169_s23 + $0x838] sm:$0xff]  ;;  %v486_v37 = vld [vmem:[%s4169_s23 + $0x30] sm:$0xff] }
 0x22c   : > { %2475 = vmatprep.subr.mxu1 %v847_v38  ;;  %2405 = vmatpush1.msra.mxu0 %v590_v39  ;;  %v742_v38 = vld [vmem:[%s4169_s23 + $0x830] sm:$0xff]  ;;  %v735_v39 = vld [vmem:[%s4169_s23 + $0x7f8] sm:$0xff] }
 0x22d   : > { %2476 = vmatpush1.msra.mxu1 %v846_v40  ;;  %2406 = vmatprep.subr.mxu0 %v583_v42  ;;  %v991_v40 = vld [vmem:[%s4169_s23 + $0xff8] sm:$0xff]  ;;  %v734_v42 = vld [vmem:[%s4169_s23 + $0x7f0] sm:$0xff] }
 0x22e   : > { %2477 = vmatprep.subr.mxu1 %v839_v44  ;;  %2407 = vmatpush1.msra.mxu0 %v582_v45  ;;  %v990_v44 = vld [vmem:[%s4169_s23 + $0xff0] sm:$0xff]  ;;  %v727_v45 = vld [vmem:[%s4169_s23 + $0x7b8] sm:$0xff] }
 0x22f   : > { %2478 = vmatpush1.msra.mxu1 %v838_v46  ;;  %2408 = vmatprep.subr.mxu0 %v575_v47  ;;  %v983_v46 = vld [vmem:[%s4169_s23 + $0xfb8] sm:$0xff]  ;;  %v726_v47 = vld [vmem:[%s4169_s23 + $0x7b0] sm:$0xff] }
 0x230   : > { %2479 = vmatprep.subr.mxu1 %v831_v48  ;;  %2409 = vmatpush1.msra.mxu0 %v574_v50  ;;  %v982_v48 = vld [vmem:[%s4169_s23 + $0xfb0] sm:$0xff]  ;;  %v719_v50 = vld [vmem:[%s4169_s23 + $0x778] sm:$0xff] }
 0x231   : > { %2480 = vmatpush1.msra.mxu1 %v830_v51  ;;  %2410 = vmatprep.subr.mxu0 %v567_v52  ;;  %v975_v51 = vld [vmem:[%s4169_s23 + $0xf78] sm:$0xff]  ;;  %v718_v52 = vld [vmem:[%s4169_s23 + $0x770] sm:$0xff] }
 0x232   : > { %2481 = vmatprep.subr.mxu1 %v823_v53  ;;  %2411 = vmatpush1.msra.mxu0 %v566_v55  ;;  %v974_v53 = vld [vmem:[%s4169_s23 + $0xf70] sm:$0xff]  ;;  %v711_v55 = vld [vmem:[%s4169_s23 + $0x738] sm:$0xff] }
 0x233   : > { %2482 = vmatpush1.msra.mxu1 %v822_v56  ;;  %2412 = vmatprep.subr.mxu0 %v559_v57  ;;  %v967_v56 = vld [vmem:[%s4169_s23 + $0xf38] sm:$0xff]  ;;  %v710_v57 = vld [vmem:[%s4169_s23 + $0x730] sm:$0xff] }
 0x234   : > { %2483 = vmatprep.subr.mxu1 %v815_v58  ;;  %2413 = vmatpush1.msra.mxu0 %v558_v60  ;;  %v966_v58 = vld [vmem:[%s4169_s23 + $0xf30] sm:$0xff]  ;;  %v703_v60 = vld [vmem:[%s4169_s23 + $0x6f8] sm:$0xff] }
 0x235   : > { %2484 = vmatpush1.msra.mxu1 %v814_v61  ;;  %2414 = vmatprep.subr.mxu0 %v551_v63  ;;  %v959_v61 = vld [vmem:[%s4169_s23 + $0xef8] sm:$0xff]  ;;  %v702_v63 = vld [vmem:[%s4169_s23 + $0x6f0] sm:$0xff] }
 0x236   : > { %2485 = vmatprep.subr.mxu1 %v807_v0  ;;  %2415 = vmatpush1.msra.mxu0 %v550_v1  ;;  %v958_v0 = vld [vmem:[%s4169_s23 + $0xef0] sm:$0xff]  ;;  %v695_v1 = vld [vmem:[%s4169_s23 + $0x6b8] sm:$0xff] }
 0x237   : > { %2486 = vmatpush1.msra.mxu1 %v806_v2  ;;  %2416 = vmatprep.subr.mxu0 %v543_v3  ;;  %v951_v2 = vld [vmem:[%s4169_s23 + $0xeb8] sm:$0xff]  ;;  %v5108_v3 = vpop.f32.mrf.mxu0 }
 0x238   : > { %2487 = vmatprep.subr.mxu1 %v799_v4  ;;  %2417 = vmatpush1.msra.mxu0 %v542_v5  ;;  %v5110_v4 = vpop.f32.mrf.mxu1  ;;  %v694_v5 = vld [vmem:[%s4169_s23 + $0x6b0] sm:$0xff] }
 0x239   : > { %2488 = vmatpush1.msra.mxu1 %v798_v6  ;;  %2418 = vmatprep.subr.mxu0 %v535_v7  ;;  %v950_v6 = vld [vmem:[%s4169_s23 + $0xeb0] sm:$0xff]  ;;  %v687_v7 = vld [vmem:[%s4169_s23 + $0x678] sm:$0xff] }
 0x23a   : > { %2489 = vmatprep.subr.mxu1 %v791_v8  ;;  %2419 = vmatpush1.msra.mxu0 %v534_v9  ;;  %v943_v8 = vld [vmem:[%s4169_s23 + $0xe78] sm:$0xff]  ;;  %v686_v9 = vld [vmem:[%s4169_s23 + $0x670] sm:$0xff] }
 0x23b   : > { %2490 = vmatpush1.msra.mxu1 %v790_v10  ;;  %2420 = vmatprep.subr.mxu0 %v527_v12  ;;  %v942_v10 = vld [vmem:[%s4169_s23 + $0xe70] sm:$0xff]  ;;  %v679_v12 = vld [vmem:[%s4169_s23 + $0x638] sm:$0xff] }
 0x23c   : > { %2491 = vmatprep.subr.mxu1 %v783_v13  ;;  %2421 = vmatpush1.msra.mxu0 %v526_v14  ;;  %v935_v13 = vld [vmem:[%s4169_s23 + $0xe38] sm:$0xff]  ;;  %v1616_v14 = vpop.f32.mrf.mxu0 }
 0x23d   : > { %2492 = vmatpush1.msra.mxu1 %v782_v15  ;;  %2422 = vmatprep.subr.mxu0 %v519_v16  ;;  %v1687_v15 = vpop.f32.mrf.mxu1  ;;  %v678_v16 = vld [vmem:[%s4169_s23 + $0x630] sm:$0xff] }
 0x23e   : > { %2493 = vmatprep.subr.mxu1 %v775_v17  ;;  %2423 = vmatpush1.msra.mxu0 %v518_v18  ;;  %v934_v17 = vld [vmem:[%s4169_s23 + $0xe30] sm:$0xff]  ;;  %v671_v18 = vld [vmem:[%s4169_s23 + $0x5f8] sm:$0xff] }
 0x23f   : > { %2494 = vmatpush1.msra.mxu1 %v774_v19  ;;  %2424 = vmatprep.subr.mxu0 %v511_v20  ;;  %v927_v19 = vld [vmem:[%s4169_s23 + $0xdf8] sm:$0xff]  ;;  %v1756_v20 = vpop.f32.mrf.mxu0 }
 0x240   : > { %2495 = vmatprep.subr.mxu1 %v767_v22  ;;  %2425 = vmatpush1.msra.mxu0 %v510_v23  ;;  %v5124_v22 = vpop.f32.mrf.mxu1  ;;  %v670_v23 = vld [vmem:[%s4169_s23 + $0x5f0] sm:$0xff] }
 0x241   : > { %2496 = vmatpush1.msra.mxu1 %v766_v24  ;;  %2426 = vmatprep.subr.mxu0 %v503_v25  ;;  %v926_v24 = vld [vmem:[%s4169_s23 + $0xdf0] sm:$0xff]  ;;  %v663_v25 = vld [vmem:[%s4169_s23 + $0x5b8] sm:$0xff] }
 0x242   : > { %2497 = vmatprep.subr.mxu1 %v759_v26  ;;  %2427 = vmatpush1.msra.mxu0 %v502_v27  ;;  %v919_v26 = vld [vmem:[%s4169_s23 + $0xdb8] sm:$0xff]  ;;  %v662_v27 = vld [vmem:[%s4169_s23 + $0x5b0] sm:$0xff] }
 0x243   : > { %2498 = vmatpush1.msra.mxu1 %v758_v28  ;;  %2428 = vmatprep.subr.mxu0 %v495_v29  ;;  %v918_v28 = vld [vmem:[%s4169_s23 + $0xdb0] sm:$0xff]  ;;  %v655_v29 = vld [vmem:[%s4169_s23 + $0x578] sm:$0xff] }
 0x244   : > { %2499 = vmatprep.subr.mxu1 %v751_v30  ;;  %2429 = vmatpush1.msra.mxu0 %v494_v32  ;;  %v911_v30 = vld [vmem:[%s4169_s23 + $0xd78] sm:$0xff]  ;;  %v1758_v32 = vpop.f32.mrf.mxu0 }
 0x245   : > { %2500 = vmatpush1.msra.mxu1 %v750_v33  ;;  %2430 = vmatprep.subr.mxu0 %v487_v35  ;;  %v1829_v33 = vpop.f32.mrf.mxu1  ;;  %v654_v35 = vld [vmem:[%s4169_s23 + $0x570] sm:$0xff] }
 0x246   : > { %2501 = vmatprep.subr.mxu1 %v743_v36  ;;  %2431 = vmatpush1.msra.mxu0 %v486_v37  ;;  %v910_v36 = vld [vmem:[%s4169_s23 + $0xd70] sm:$0xff]  ;;  %v647_v37 = vld [vmem:[%s4169_s23 + $0x538] sm:$0xff] }
 0x247   : > { %2502 = vmatpush1.msra.mxu1 %v742_v38  ;;  %2432 = vmatprep.subr.mxu0 %v735_v39  ;;  %v903_v38 = vld [vmem:[%s4169_s23 + $0xd38] sm:$0xff]  ;;  %v1898_v39 = vpop.f32.mrf.mxu0 }
 0x248   : > { %2503 = vmatprep.subr.mxu1 %v991_v40  ;;  %2433 = vmatpush2.msra.mxu0 %v734_v42  ;;  %v1969_v40 = vpop.f32.mrf.mxu1  ;;  %v646_v42 = vld [vmem:[%s4169_s23 + $0x530] sm:$0xff] }
 0x249   : > { %2504 = vmatpush2.msra.mxu1 %v990_v44  ;;  %2434 = vmatprep.subr.mxu0 %v727_v45  ;;  %v902_v44 = vld [vmem:[%s4169_s23 + $0xd30] sm:$0xff]  ;;  %v1688_v45 = vadd.f32 %v1687_v15, %v1616_v14 }
 0x24a   : > { %2505 = vmatprep.subr.mxu1 %v983_v46  ;;  %2435 = vmatpush2.msra.mxu0 %v726_v47  ;;  %v639_v46 = vld [vmem:[%s4169_s23 + $0x4f8] sm:$0xff]  ;;  %v870_v15 = vld [vmem:[%s4169_s23 + $0xc30] sm:$0xff] }
 0x24b   : > { %2506 = vmatpush2.msra.mxu1 %v982_v48  ;;  %2436 = vmatprep.subr.mxu0 %v719_v50  ;;  %v895_v47 = vld [vmem:[%s4169_s23 + $0xcf8] sm:$0xff]  ;;  %v638_v48 = vld [vmem:[%s4169_s23 + $0x4f0] sm:$0xff] }
 0x24c   : > { %2507 = vmatprep.subr.mxu1 %v975_v51  ;;  %2437 = vmatpush2.msra.mxu0 %v718_v52  ;;  %v894_v50 = vld [vmem:[%s4169_s23 + $0xcf0] sm:$0xff]  ;;  %v1686_v51 = vadd.f32 %v5110_v4, %v5108_v3  ;;  %v1759_v52 = vadd.f32 %v1758_v32, %v1688_v45  ;;  %v1343_v45 = vld [vmem:[%s4169_s23 + $0x1af8] sm:$0xff] }
 0x24d   : > { %2508 = vmatpush2.msra.mxu1 %v974_v53  ;;  %2438 = vmatprep.subr.mxu0 %v711_v55  ;;  %v631_v53 = vld [vmem:[%s4169_s23 + $0x4b8] sm:$0xff]  ;;  %v878_v3 = vld [vmem:[%s4169_s23 + $0xc70] sm:$0xff] }
 0x24e   : > { %2509 = vmatprep.subr.mxu1 %v967_v56  ;;  %2439 = vmatpush2.msra.mxu0 %v710_v57  ;;  %v887_v55 = vld [vmem:[%s4169_s23 + $0xcb8] sm:$0xff]  ;;  %v1900_v56 = vpop.f32.mrf.mxu0  ;;  %v1971_v57 = vpop.f32.mrf.mxu1  ;;  %v476_v32 = vld [vmem:[#allocation2] sm:$0xff] }
 0x24f   : > { %2510 = vmatpush2.msra.mxu1 %v966_v58  ;;  %2440 = vmatprep.subr.mxu0 %v703_v60  ;;  %v630_v58 = vld [vmem:[%s4169_s23 + $0x4b0] sm:$0xff] }
 0x250   : > { %2511 = vmatprep.subr.mxu1 %v959_v61  ;;  %2441 = vmatpush2.msra.mxu0 %v702_v63  ;;  %v886_v60 = vld [vmem:[%s4169_s23 + $0xcb0] sm:$0xff]  ;;  %v1757_v61 = vadd.f32 %v1756_v20, %v1686_v51  ;;  %v1970_v63 = vadd.f32 %v1969_v40, %v1898_v39  ;;  %v1375_v20 = vld [vmem:[%s4169_s23 + $0x1bf8] sm:$0xff] }
 0x251   : > { %2512 = vmatpush2.msra.mxu1 %v958_v0  ;;  %2442 = vmatprep.subr.mxu0 %v695_v1  ;;  %v623_v0 = vld [vmem:[%s4169_s23 + $0x478] sm:$0xff]  ;;  %v1094_v39 = vld [vmem:[%s4169_s23 + $0x1330] sm:$0xff] }
 0x252   : > { %2513 = vmatprep.subr.mxu1 %v951_v2  ;;  %2443 = vmatpush2.msra.mxu0 %v694_v5  ;;  %v879_v1 = vld [vmem:[%s4169_s23 + $0xc78] sm:$0xff]  ;;  %v622_v2 = vld [vmem:[%s4169_s23 + $0x470] sm:$0xff]  ;;  %v1830_v5 = vadd.f32 %v1829_v33, %v1759_v52  ;;  %v1828_v14 = vadd.f32 %v5124_v22, %v1757_v61 }
 0x253   : > { %2514 = vmatpush2.msra.mxu1 %v950_v6  ;;  %2444 = vmatprep.subr.mxu0 %v687_v7  ;;  %v1972_v6 = vadd.f32 %v1971_v57, %v1900_v56  ;;  %v615_v7 = vld [vmem:[%s4169_s23 + $0x438] sm:$0xff]  ;;  %v1102_v33 = vld [vmem:[%s4169_s23 + $0x1370] sm:$0xff] }
 0x254   : > { %2515 = vmatprep.subr.mxu1 %v943_v8  ;;  %2445 = vmatpush2.msra.mxu0 %v686_v9  ;;  %v871_v8 = vld [vmem:[%s4169_s23 + $0xc38] sm:$0xff]  ;;  %v1350_v40 = vld [vmem:[%s4169_s23 + $0x1b30] sm:$0xff] }
 0x255   : > { %2516 = vmatpush2.msra.mxu1 %v942_v10  ;;  %2446 = vmatprep.subr.mxu0 %v679_v12  ;;  %v614_v10 = vld [vmem:[%s4169_s23 + $0x430] sm:$0xff] }
 0x256   : > { %2517 = vmatprep.subr.mxu1 %v935_v13  ;;  %2447 = vmatpush2.msra.mxu0 %v678_v16  ;;  %v1078_v51 = vld [vmem:[%s4169_s23 + $0x12b0] sm:$0xff] }
 0x257   : > { %2518 = vmatpush2.msra.mxu1 %v934_v17  ;;  %2448 = vmatprep.subr.mxu0 %v671_v18  ;;  %v2692_v18 = vcombine.low %v1828_v14, %v1830_v5  ;;  %v1334_v52 = vld [vmem:[%s4169_s23 + $0x1ab0] sm:$0xff]  ;;  %v1303_v5 = vld [vmem:[%s4169_s23 + $0x19b8] sm:$0xff] }
 0x258   : > { %2519 = vmatprep.subr.mxu1 %v927_v19  ;;  %2449 = vmatpush2.msra.mxu0 %v670_v23  ;;  %v1119_v19 = vld [vmem:[%s4169_s23 + $0x13f8] sm:$0xff]  ;;  %v1070_v56 = vld [vmem:[%s4169_s23 + $0x1270] sm:$0xff] }
 0x259   : > { %2520 = vmatpush2.msra.mxu1 %v926_v24  ;;  %2450 = vmatprep.subr.mxu0 %v663_v25  ;;  %v1118_v24 = vld [vmem:[%s4169_s23 + $0x13f0] sm:$0xff]  ;;  %v1287_v14 = vld [vmem:[%s4169_s23 + $0x1938] sm:$0xff] }
 0x25a   : > { %2521 = vmatprep.subr.mxu1 %v919_v26  ;;  %2451 = vmatpush2.msra.mxu0 %v662_v27  ;;  %v1374_v25 = vld [vmem:[%s4169_s23 + $0x1bf0] sm:$0xff]  ;;  %v1111_v26 = vld [vmem:[%s4169_s23 + $0x13b8] sm:$0xff] }
 0x25b   : > { %2522 = vmatpush2.msra.mxu1 %v918_v28  ;;  %2452 = vmatprep.subr.mxu0 %v655_v29  ;;  %v1110_v28 = vld [vmem:[%s4169_s23 + $0x13b0] sm:$0xff] }
 0x25c   : > { %2523 = vmatprep.subr.mxu1 %v911_v30  ;;  %2453 = vmatpush2.msra.mxu0 %v654_v35  ;;  %v1366_v29 = vld [vmem:[%s4169_s23 + $0x1bb0] sm:$0xff]  ;;  %v1359_v30 = vld [vmem:[%s4169_s23 + $0x1b78] sm:$0xff] }
 0x25d   : > { %2524 = vmatpush2.msra.mxu1 %v910_v36  ;;  %2454 = vmatprep.subr.mxu0 %v647_v37  ;;  %v1358_v35 = vld [vmem:[%s4169_s23 + $0x1b70] sm:$0xff]  ;;  %v1095_v37 = vld [vmem:[%s4169_s23 + $0x1338] sm:$0xff] }
 0x25e   : > { %2525 = vmatprep.subr.mxu1 %v903_v38  ;;  %2455 = vmatpush2.msra.mxu0 %v646_v42  ;;  %v1351_v38 = vld [vmem:[%s4169_s23 + $0x1b38] sm:$0xff]  ;;  %v1326_v57 = vld [vmem:[%s4169_s23 + $0x1a70] sm:$0xff] }
 0x25f   : > { %2526 = vmatpush2.msra.mxu1 %v902_v44  ;;  %2456 = vmatprep.subr.mxu0 %v639_v46  ;;  %v1087_v44 = vld [vmem:[%s4169_s23 + $0x12f8] sm:$0xff]  ;;  %v1086_v46 = vld [vmem:[%s4169_s23 + $0x12f0] sm:$0xff] }
 0x260   : > { %2527 = vmatprep.subr.mxu1 %v895_v47  ;;  %2457 = vmatpush2.msra.mxu0 %v638_v48  ;;  %v1342_v47 = vld [vmem:[%s4169_s23 + $0x1af0] sm:$0xff]  ;;  %v1079_v48 = vld [vmem:[%s4169_s23 + $0x12b8] sm:$0xff] }
 0x261   : > { %2528 = vmatpush2.msra.mxu1 %v894_v50  ;;  %2458 = vmatprep.subr.mxu0 %v631_v53  ;;  %v1335_v50 = vld [vmem:[%s4169_s23 + $0x1ab8] sm:$0xff]  ;;  %v1062_v61 = vld [vmem:[%s4169_s23 + $0x1230] sm:$0xff] }
 0x262   : > { %2529 = vmatprep.subr.mxu1 %v887_v55  ;;  %v2040_v4 = vpop.f32.mrf.mxu0  ;;  %2459 = vmatpush2.msra.mxu0 %v630_v58  ;;  %v1071_v53 = vld [vmem:[%s4169_s23 + $0x1278] sm:$0xff] }
 0x263   : > { %2530 = vmatpush2.msra.mxu1 %v886_v60  ;;  %v2041_v9 = vadd.f32 %v2040_v4, %v1970_v63  ;;  %2460 = vmatprep.subr.mxu0 %v623_v0  ;;  %v1327_v55 = vld [vmem:[%s4169_s23 + $0x1a78] sm:$0xff]  ;;  %v1318_v63 = vld [vmem:[%s4169_s23 + $0x1a30] sm:$0xff] }
 0x264   : > { %2531 = vmatprep.subr.mxu1 %v879_v1  ;;  %v2111_v12 = vpop.f32.mrf.mxu1  ;;  %v2042_v13 = vpop.f32.mrf.mxu0  ;;  %2461 = vmatpush2.msra.mxu0 %v622_v2  ;;  %v1063_v58 = vld [vmem:[%s4169_s23 + $0x1238] sm:$0xff]  ;;  %v1054_v2 = vld [vmem:[%s4169_s23 + $0x11f0] sm:$0xff] }
 0x265   : > { %2532 = vmatpush2.msra.mxu1 %v878_v3  ;;  %v2043_v16 = vadd.f32 %v2042_v13, %v1972_v6  ;;  %2462 = vmatprep.subr.mxu0 %v615_v7  ;;  %v2112_v22 = vadd.f32 %v2111_v12, %v2041_v9  ;;  %v1319_v60 = vld [vmem:[%s4169_s23 + $0x1a38] sm:$0xff]  ;;  %v1310_v3 = vld [vmem:[%s4169_s23 + $0x19f0] sm:$0xff] }
 0x266   : > { %2533 = vmatprep.subr.mxu1 %v871_v8  ;;  %v2113_v17 = vpop.f32.mrf.mxu1  ;;  %2463 = vmatpush2.msra.mxu0 %v614_v10  ;;  %v1055_v0 = vld [vmem:[%s4169_s23 + $0x11f8] sm:$0xff]  ;;  %v1046_v6 = vld [vmem:[%s4169_s23 + $0x11b0] sm:$0xff] }
 0x267   : > { %2464 = vmatprep.mubr.f32.mxu0 %v4335_v41  ;;  %v2114_v23 = vadd.f32 %v2113_v17, %v2043_v16  ;;  %2534 = vmatpush2.msra.mxu1 %v870_v15  ;;  %v1367_v41 = vld [vmem:[%s4169_s23 + $0x1bb8] sm:$0xff]  ;;  %v1302_v7 = vld [vmem:[%s4169_s23 + $0x19b0] sm:$0xff] }
 0x268   : > { %2535 = vmatprep.mubr.f32.mxu1 %v4340_v43  ;;  %2465 = vmatmul.mubr.f32.vlgmr.msra.gmra.mxu0 %v4320_v31  ;;  %v2700_v43 = vrot.slane %v2692_v18, %v4309_v21  ;;  %v1311_v1 = vld [vmem:[%s4169_s23 + $0x19f8] sm:$0xff]  ;;  %v1038_v10 = vld [vmem:[%s4169_s23 + $0x1170] sm:$0xff] }
 0x269   : > { %2536 = vmatmul.mubr.f32.vlgmr.msra.gmra.mxu1 %v4325_v34  ;;  %v2693_v27 = vcombine.low %v2112_v22, %v2114_v23  ;;  %2542 = vmatprep.subr.mxu0 %v1119_v19  ;;  %v1103_v34 = vld [vmem:[%s4169_s23 + $0x1378] sm:$0xff]  ;;  %v1294_v12 = vld [vmem:[%s4169_s23 + $0x1970] sm:$0xff] }
 0x26a   : > { %2613 = vmatprep.subr.mxu1 %v1375_v20  ;;  %2543 = vmatpush1.msra.mxu0 %v1118_v24  ;;  %v1047_v4 = vld [vmem:[%s4169_s23 + $0x11b8] sm:$0xff]  ;;  %v1030_v15 = vld [vmem:[%s4169_s23 + $0x1130] sm:$0xff] }
 0x26b   : > { %2614 = vmatpush1.msra.mxu1 %v1374_v25  ;;  %v2707_v31 = vrot.slane %v2693_v27, %v4309_v21  ;;  %2544 = vmatprep.subr.mxu0 %v1111_v26  ;;  %v1039_v8 = vld [vmem:[%s4169_s23 + $0x1178] sm:$0xff]  ;;  %v1286_v16 = vld [vmem:[%s4169_s23 + $0x1930] sm:$0xff] }
 0x26c   : > { %2615 = vmatprep.subr.mxu1 %v1367_v41  ;;  %2545 = vmatpush1.msra.mxu0 %v1110_v28  ;;  %v1295_v9 = vld [vmem:[%s4169_s23 + $0x1978] sm:$0xff]  ;;  %v1022_v19 = vld [vmem:[%s4169_s23 + $0x10f0] sm:$0xff] }
 0x26d   : > { %v2708_v36 = vcombine.low %v2700_v43, %v2707_v31  ;;  %2616 = vmatpush1.msra.mxu1 %v1366_v29  ;;  %2546 = vmatprep.subr.mxu0 %v1103_v34  ;;  %v1031_v13 = vld [vmem:[%s4169_s23 + $0x1138] sm:$0xff]  ;;  %v1278_v20 = vld [vmem:[%s4169_s23 + $0x18f0] sm:$0xff] }
 0x26e   : > { %2617 = vmatprep.subr.mxu1 %v1359_v30  ;;  %2547 = vmatpush1.msra.mxu0 %v1102_v33  ;;  %v1023_v17 = vld [vmem:[%s4169_s23 + $0x10f8] sm:$0xff]  ;;  %v1014_v24 = vld [vmem:[%s4169_s23 + $0x10b0] sm:$0xff] }
 0x26f   : > { %v2728_v42 = vadd.f32 %v2708_v36, %v476_v32  ;;  %2618 = vmatpush1.msra.mxu1 %v1358_v35  ;;  %2548 = vmatprep.subr.mxu0 %v1095_v37  ;;  %v1279_v18 = vld [vmem:[%s4169_s23 + $0x18f8] sm:$0xff]  ;;  %v1270_v25 = vld [vmem:[%s4169_s23 + $0x18b0] sm:$0xff] }
 0x270   : > { %2619 = vmatprep.subr.mxu1 %v1351_v38  ;;  %2549 = vmatpush1.msra.mxu0 %v1094_v39  ;;  %v1015_v22 = vld [vmem:[%s4169_s23 + $0x10b8] sm:$0xff]  ;;  %v1006_v27 = vld [vmem:[%s4169_s23 + $0x1070] sm:$0xff] }
 0x271   : > { %2730 = vst [vmem:[#allocation2] sm:$0xff] %v2728_v42  ;;  %2620 = vmatpush1.msra.mxu1 %v1350_v40  ;;  %2550 = vmatprep.subr.mxu0 %v1087_v44  ;;  %v1271_v23 = vld [vmem:[%s4169_s23 + $0x18b8] sm:$0xff]  ;;  %v1262_v28 = vld [vmem:[%s4169_s23 + $0x1870] sm:$0xff] }
 0x272   : > { %2621 = vmatprep.subr.mxu1 %v1343_v45  ;;  %2551 = vmatpush1.msra.mxu0 %v1086_v46  ;;  %v1007_v26 = vld [vmem:[%s4169_s23 + $0x1078] sm:$0xff]  ;;  %v998_v31 = vld [vmem:[%s4169_s23 + $0x1030] sm:$0xff] }
 0x273   : > { %2622 = vmatpush1.msra.mxu1 %v1342_v47  ;;  %2552 = vmatprep.subr.mxu0 %v1079_v48  ;;  %v1263_v41 = vld [vmem:[%s4169_s23 + $0x1878] sm:$0xff]  ;;  %v1254_v34 = vld [vmem:[%s4169_s23 + $0x1830] sm:$0xff] }
 0x274   : > { %2623 = vmatprep.subr.mxu1 %v1335_v50  ;;  %2553 = vmatpush1.msra.mxu0 %v1078_v51  ;;  %v999_v29 = vld [vmem:[%s4169_s23 + $0x1038] sm:$0xff]  ;;  %v1246_v33 = vld [vmem:[%s4169_s23 + $0x17f0] sm:$0xff] }
 0x275   : > { %2624 = vmatpush1.msra.mxu1 %v1334_v52  ;;  %2554 = vmatprep.subr.mxu0 %v1071_v53  ;;  %v1255_v43 = vld [vmem:[%s4169_s23 + $0x1838] sm:$0xff]  ;;  %v1502_v35 = vld [vmem:[%s4169_s23 + $0x1ff0] sm:$0xff] }
 0x276   : > { %2625 = vmatprep.subr.mxu1 %v1327_v55  ;;  %2555 = vmatpush1.msra.mxu0 %v1070_v56  ;;  %v1247_v30 = vld [vmem:[%s4169_s23 + $0x17f8] sm:$0xff]  ;;  %v1238_v38 = vld [vmem:[%s4169_s23 + $0x17b0] sm:$0xff] }
 0x277   : > { %2626 = vmatpush1.msra.mxu1 %v1326_v57  ;;  %2556 = vmatprep.subr.mxu0 %v1063_v58  ;;  %v1503_v32 = vld [vmem:[%s4169_s23 + $0x1ff8] sm:$0xff]  ;;  %v1494_v39 = vld [vmem:[%s4169_s23 + $0x1fb0] sm:$0xff] }
 0x278   : > { %2627 = vmatprep.subr.mxu1 %v1319_v60  ;;  %2557 = vmatpush1.msra.mxu0 %v1062_v61  ;;  %v1239_v36 = vld [vmem:[%s4169_s23 + $0x17b8] sm:$0xff]  ;;  %v1230_v44 = vld [vmem:[%s4169_s23 + $0x1770] sm:$0xff] }
 0x279   : > { %2628 = vmatpush1.msra.mxu1 %v1318_v63  ;;  %2558 = vmatprep.subr.mxu0 %v1055_v0  ;;  %v1495_v37 = vld [vmem:[%s4169_s23 + $0x1fb8] sm:$0xff]  ;;  %v1486_v45 = vld [vmem:[%s4169_s23 + $0x1f70] sm:$0xff] }
 0x27a   : > { %2629 = vmatprep.subr.mxu1 %v1311_v1  ;;  %2559 = vmatpush1.msra.mxu0 %v1054_v2  ;;  %v1231_v40 = vld [vmem:[%s4169_s23 + $0x1778] sm:$0xff]  ;;  %v1222_v48 = vld [vmem:[%s4169_s23 + $0x1730] sm:$0xff] }
 0x27b   : > { %2630 = vmatpush1.msra.mxu1 %v1310_v3  ;;  %2560 = vmatprep.subr.mxu0 %v1047_v4  ;;  %v1487_v42 = vld [vmem:[%s4169_s23 + $0x1f78] sm:$0xff]  ;;  %v1478_v50 = vld [vmem:[%s4169_s23 + $0x1f30] sm:$0xff] }
 0x27c   : > { %2631 = vmatprep.subr.mxu1 %v1303_v5  ;;  %2561 = vmatpush1.msra.mxu0 %v1046_v6  ;;  %v1223_v46 = vld [vmem:[%s4169_s23 + $0x1738] sm:$0xff]  ;;  %v1214_v53 = vld [vmem:[%s4169_s23 + $0x16f0] sm:$0xff] }
 0x27d   : > { %2632 = vmatpush1.msra.mxu1 %v1302_v7  ;;  %2562 = vmatprep.subr.mxu0 %v1039_v8  ;;  %v1479_v47 = vld [vmem:[%s4169_s23 + $0x1f38] sm:$0xff]  ;;  %v1470_v55 = vld [vmem:[%s4169_s23 + $0x1ef0] sm:$0xff] }
 0x27e   : > { %2633 = vmatprep.subr.mxu1 %v1295_v9  ;;  %2563 = vmatpush1.msra.mxu0 %v1038_v10  ;;  %v1215_v51 = vld [vmem:[%s4169_s23 + $0x16f8] sm:$0xff]  ;;  %v1206_v58 = vld [vmem:[%s4169_s23 + $0x16b0] sm:$0xff] }
 0x27f   : > { %2634 = vmatpush1.msra.mxu1 %v1294_v12  ;;  %2564 = vmatprep.subr.mxu0 %v1031_v13  ;;  %v1471_v52 = vld [vmem:[%s4169_s23 + $0x1ef8] sm:$0xff]  ;;  %v1462_v60 = vld [vmem:[%s4169_s23 + $0x1eb0] sm:$0xff] }
 0x280   : > { %2635 = vmatprep.subr.mxu1 %v1287_v14  ;;  %2565 = vmatpush1.msra.mxu0 %v1030_v15  ;;  %v1207_v56 = vld [vmem:[%s4169_s23 + $0x16b8] sm:$0xff]  ;;  %v1198_v0 = vld [vmem:[%s4169_s23 + $0x1670] sm:$0xff] }
 0x281   : > { %2636 = vmatpush1.msra.mxu1 %v1286_v16  ;;  %2566 = vmatprep.subr.mxu0 %v1023_v17  ;;  %v1463_v57 = vld [vmem:[%s4169_s23 + $0x1eb8] sm:$0xff]  ;;  %v1454_v1 = vld [vmem:[%s4169_s23 + $0x1e70] sm:$0xff] }
 0x282   : > { %2637 = vmatprep.subr.mxu1 %v1279_v18  ;;  %2567 = vmatpush1.msra.mxu0 %v1022_v19  ;;  %v1199_v61 = vld [vmem:[%s4169_s23 + $0x1678] sm:$0xff]  ;;  %v1190_v4 = vld [vmem:[%s4169_s23 + $0x1630] sm:$0xff] }
 0x283   : > { %2638 = vmatpush1.msra.mxu1 %v1278_v20  ;;  %2568 = vmatprep.subr.mxu0 %v1015_v22  ;;  %v1455_v63 = vld [vmem:[%s4169_s23 + $0x1e78] sm:$0xff]  ;;  %v1446_v5 = vld [vmem:[%s4169_s23 + $0x1e30] sm:$0xff] }
 0x284   : > { %2639 = vmatprep.subr.mxu1 %v1271_v23  ;;  %2569 = vmatpush1.msra.mxu0 %v1014_v24  ;;  %v1191_v2 = vld [vmem:[%s4169_s23 + $0x1638] sm:$0xff]  ;;  %v1182_v8 = vld [vmem:[%s4169_s23 + $0x15f0] sm:$0xff] }
 0x285   : > { %2640 = vmatpush1.msra.mxu1 %v1270_v25  ;;  %2570 = vmatprep.subr.mxu0 %v1007_v26  ;;  %v1447_v3 = vld [vmem:[%s4169_s23 + $0x1e38] sm:$0xff]  ;;  %v1438_v9 = vld [vmem:[%s4169_s23 + $0x1df0] sm:$0xff] }
 0x286   : > { %2641 = vmatprep.subr.mxu1 %v1263_v41  ;;  %2571 = vmatpush1.msra.mxu0 %v1006_v27  ;;  %v1183_v6 = vld [vmem:[%s4169_s23 + $0x15f8] sm:$0xff]  ;;  %v1174_v13 = vld [vmem:[%s4169_s23 + $0x15b0] sm:$0xff] }
 0x287   : > { %2642 = vmatpush1.msra.mxu1 %v1262_v28  ;;  %2572 = vmatprep.subr.mxu0 %v999_v29  ;;  %v1439_v7 = vld [vmem:[%s4169_s23 + $0x1df8] sm:$0xff]  ;;  %v1430_v14 = vld [vmem:[%s4169_s23 + $0x1db0] sm:$0xff] }
 0x288   : > { %2643 = vmatprep.subr.mxu1 %v1255_v43  ;;  %2573 = vmatpush1.msra.mxu0 %v998_v31  ;;  %v1175_v10 = vld [vmem:[%s4169_s23 + $0x15b8] sm:$0xff]  ;;  %v1166_v17 = vld [vmem:[%s4169_s23 + $0x1570] sm:$0xff] }
 0x289   : > { %2644 = vmatpush1.msra.mxu1 %v1254_v34  ;;  %2574 = vmatprep.subr.mxu0 %v1247_v30  ;;  %v1431_v12 = vld [vmem:[%s4169_s23 + $0x1db8] sm:$0xff]  ;;  %v1422_v18 = vld [vmem:[%s4169_s23 + $0x1d70] sm:$0xff] }
 0x28a   : > { %2645 = vmatprep.subr.mxu1 %v1503_v32  ;;  %2575 = vmatpush2.msra.mxu0 %v1246_v33  ;;  %v1167_v15 = vld [vmem:[%s4169_s23 + $0x1578] sm:$0xff]  ;;  %v1158_v22 = vld [vmem:[%s4169_s23 + $0x1530] sm:$0xff] }
 0x28b   : > { %2646 = vmatpush2.msra.mxu1 %v1502_v35  ;;  %2576 = vmatprep.subr.mxu0 %v1239_v36  ;;  %v1423_v16 = vld [vmem:[%s4169_s23 + $0x1d78] sm:$0xff]  ;;  %v1414_v23 = vld [vmem:[%s4169_s23 + $0x1d30] sm:$0xff] }
 0x28c   : > { %2647 = vmatprep.subr.mxu1 %v1495_v37  ;;  %2577 = vmatpush2.msra.mxu0 %v1238_v38  ;;  %v1159_v19 = vld [vmem:[%s4169_s23 + $0x1538] sm:$0xff]  ;;  %v1150_v26 = vld [vmem:[%s4169_s23 + $0x14f0] sm:$0xff] }
 0x28d   : > { %2648 = vmatpush2.msra.mxu1 %v1494_v39  ;;  %2578 = vmatprep.subr.mxu0 %v1231_v40  ;;  %v1415_v20 = vld [vmem:[%s4169_s23 + $0x1d38] sm:$0xff]  ;;  %v1406_v41 = vld [vmem:[%s4169_s23 + $0x1cf0] sm:$0xff] }
 0x28e   : > { %2649 = vmatprep.subr.mxu1 %v1487_v42  ;;  %2579 = vmatpush2.msra.mxu0 %v1230_v44  ;;  %v1151_v24 = vld [vmem:[%s4169_s23 + $0x14f8] sm:$0xff]  ;;  %v1142_v29 = vld [vmem:[%s4169_s23 + $0x14b0] sm:$0xff] }
 0x28f   : > { %2650 = vmatpush2.msra.mxu1 %v1486_v45  ;;  %2580 = vmatprep.subr.mxu0 %v1223_v46  ;;  %v1407_v25 = vld [vmem:[%s4169_s23 + $0x1cf8] sm:$0xff]  ;;  %v1398_v43 = vld [vmem:[%s4169_s23 + $0x1cb0] sm:$0xff] }
 0x290   : > { %2651 = vmatprep.subr.mxu1 %v1479_v47  ;;  %2581 = vmatpush2.msra.mxu0 %v1222_v48  ;;  %v1143_v27 = vld [vmem:[%s4169_s23 + $0x14b8] sm:$0xff]  ;;  %v1134_v30 = vld [vmem:[%s4169_s23 + $0x1470] sm:$0xff] }
 0x291   : > { %2652 = vmatpush2.msra.mxu1 %v1478_v50  ;;  %2582 = vmatprep.subr.mxu0 %v1215_v51  ;;  %v1399_v28 = vld [vmem:[%s4169_s23 + $0x1cb8] sm:$0xff]  ;;  %v1390_v32 = vld [vmem:[%s4169_s23 + $0x1c70] sm:$0xff] }
 0x292   : > { %2653 = vmatprep.subr.mxu1 %v1471_v52  ;;  %2583 = vmatpush2.msra.mxu0 %v1214_v53  ;;  %v1135_v31 = vld [vmem:[%s4169_s23 + $0x1478] sm:$0xff]  ;;  %v1126_v36 = vld [vmem:[%s4169_s23 + $0x1430] sm:$0xff] }
 0x293   : > { %2654 = vmatpush2.msra.mxu1 %v1470_v55  ;;  %2584 = vmatprep.subr.mxu0 %v1207_v56  ;;  %v1391_v34 = vld [vmem:[%s4169_s23 + $0x1c78] sm:$0xff]  ;;  %v1382_v37 = vld [vmem:[%s4169_s23 + $0x1c30] sm:$0xff] }
 0x294   : > { %2655 = vmatprep.subr.mxu1 %v1463_v57  ;;  %2585 = vmatpush2.msra.mxu0 %v1206_v58  ;;  %v1127_v33 = vld [vmem:[%s4169_s23 + $0x1438] sm:$0xff] }
 0x295   : > { %2656 = vmatpush2.msra.mxu1 %v1462_v60  ;;  %2586 = vmatprep.subr.mxu0 %v1199_v61  ;;  %v1383_v35 = vld [vmem:[%s4169_s23 + $0x1c38] sm:$0xff] }
 0x296   : > { %2657 = vmatprep.subr.mxu1 %v1455_v63  ;;  %2587 = vmatpush2.msra.mxu0 %v1198_v0 }
 0x297   : > { %2658 = vmatpush2.msra.mxu1 %v1454_v1  ;;  %2588 = vmatprep.subr.mxu0 %v1191_v2 }
 0x298   : > { %2659 = vmatprep.subr.mxu1 %v1447_v3  ;;  %2589 = vmatpush2.msra.mxu0 %v1190_v4 }
 0x299   : > { %2660 = vmatpush2.msra.mxu1 %v1446_v5  ;;  %2590 = vmatprep.subr.mxu0 %v1183_v6 }
 0x29a   : > { %2661 = vmatprep.subr.mxu1 %v1439_v7  ;;  %2591 = vmatpush2.msra.mxu0 %v1182_v8  ;;  %v477_v8 = vld [vmem:[#allocation2 + $0x8] sm:$0xff] }
 0x29b   : > { %2662 = vmatpush2.msra.mxu1 %v1438_v9  ;;  %2592 = vmatprep.subr.mxu0 %v1175_v10 }
 0x29c   : > { %2663 = vmatprep.subr.mxu1 %v1431_v12  ;;  %2593 = vmatpush2.msra.mxu0 %v1174_v13 }
 0x29d   : > { %2664 = vmatpush2.msra.mxu1 %v1430_v14  ;;  %2594 = vmatprep.subr.mxu0 %v1167_v15 }
 0x29e   : > { %2665 = vmatprep.subr.mxu1 %v1423_v16  ;;  %2595 = vmatpush2.msra.mxu0 %v1166_v17 }
 0x29f   : > { %2666 = vmatpush2.msra.mxu1 %v1422_v18  ;;  %2596 = vmatprep.subr.mxu0 %v1159_v19 }
 0x2a0   : > { %2667 = vmatprep.subr.mxu1 %v1415_v20  ;;  %2597 = vmatpush2.msra.mxu0 %v1158_v22 }
 0x2a1   : > { %2668 = vmatpush2.msra.mxu1 %v1414_v23  ;;  %2598 = vmatprep.subr.mxu0 %v1151_v24 }
 0x2a2   : > { %2669 = vmatprep.subr.mxu1 %v1407_v25  ;;  %2599 = vmatpush2.msra.mxu0 %v1150_v26 }
 0x2a3   : > { %2670 = vmatpush2.msra.mxu1 %v1406_v41  ;;  %2600 = vmatprep.subr.mxu0 %v1143_v27 }
 0x2a4   : > { %2671 = vmatprep.subr.mxu1 %v1399_v28  ;;  %2601 = vmatpush2.msra.mxu0 %v1142_v29  ;;  %v2182_v38 = vpop.f32.mrf.mxu0 }
 0x2a5   : > { %2672 = vmatpush2.msra.mxu1 %v1398_v43  ;;  %2602 = vmatprep.subr.mxu0 %v1135_v31  ;;  %v2253_v39 = vpop.f32.mrf.mxu1 }
 0x2a6   : > { %2673 = vmatprep.subr.mxu1 %v1391_v34  ;;  %2603 = vmatpush2.msra.mxu0 %v1134_v30  ;;  %v2184_v40 = vpop.f32.mrf.mxu0  ;;  %v2254_v52 = vadd.f32 %v2253_v39, %v2182_v38 }
 0x2a7   : > { %2674 = vmatpush2.msra.mxu1 %v1390_v32  ;;  %2604 = vmatprep.subr.mxu0 %v1127_v33  ;;  %v2255_v42 = vpop.f32.mrf.mxu1 }
 0x2a8   : > { %2675 = vmatprep.subr.mxu1 %v1383_v35  ;;  %2605 = vmatpush2.msra.mxu0 %v1126_v36  ;;  %v2256_v51 = vadd.f32 %v2255_v42, %v2184_v40 }
 0x2a9   : > { %2606 = vmatprep.mubr.f32.mxu0 %v4482_v59  ;;  %2676 = vmatpush2.msra.mxu1 %v1382_v37 }
 0x2aa   : > { %2677 = vmatprep.mubr.f32.mxu1 %v4488_v62  ;;  %2607 = vmatmul.mubr.f32.vlgmr.msra.gmra.mxu0 %v4467_v49 }
 0x2ab   : > { %2678 = vmatmul.mubr.f32.vlgmr.msra.gmra.mxu1 %v4474_v54 }
 0x2e6   : > { %v2324_v44 = vpop.f32.mrf.mxu0 }
 0x2e7   : > { %v2325_v62 = vadd.f32 %v2324_v44, %v2254_v52 }
 0x2e8   : > { %v2395_v45 = vpop.f32.mrf.mxu1  ;;  %v2326_v46 = vpop.f32.mrf.mxu0 }
 0x2e9   : > { %v2327_v59 = vadd.f32 %v2326_v46, %v2256_v51  ;;  %v2396_v63 = vadd.f32 %v2395_v45, %v2325_v62 }
 0x2ea   : > { %v2397_v47 = vpop.f32.mrf.mxu1 }
 0x2eb   : > { %v2398_v54 = vadd.f32 %v2397_v47, %v2327_v59 }
 0x2ed   : > { %v2709_v2 = vcombine.low %v2396_v63, %v2398_v54 }
 0x2ef   : > { %v2717_v6 = vrot.slane %v2709_v2, %v4309_v21 }
 0x328   : > { %v2466_v48 = vpop.f32.mrf.mxu0 }
 0x329   : > { %v2537_v50 = vpop.f32.mrf.mxu1 }
 0x32a   : > { %v2468_v53 = vpop.f32.mrf.mxu0  ;;  %v2538_v56 = vadd.f32 %v2537_v50, %v2466_v48 }
 0x32b   : > { %v2539_v55 = vpop.f32.mrf.mxu1 }
 0x32c   : > { %v2540_v58 = vadd.f32 %v2539_v55, %v2468_v53 }
 0x36a   : > { %v2608_v49 = vpop.f32.mrf.mxu0 }
 0x36b   : > { %v2679_v57 = vpop.f32.mrf.mxu1  ;;  %v2609_v60 = vadd.f32 %v2608_v49, %v2538_v56 }
 0x36c   : > { %v2610_v61 = vpop.f32.mrf.mxu0 }
 0x36d   : > { %v2611_v0 = vadd.f32 %v2610_v61, %v2540_v58  ;;  %v2681_v1 = vpop.f32.mrf.mxu1  ;;  %v2680_v3 = vadd.f32 %v2679_v57, %v2609_v60 }
 0x36f   : > { %v2682_v4 = vadd.f32 %v2681_v1, %v2611_v0 }
 0x371   : > { %v2710_v5 = vcombine.low %v2680_v3, %v2682_v4 }
 0x373   : > { %v2724_v7 = vrot.slane %v2710_v5, %v4309_v21 }
 0x375   : > { %v2725_v9 = vcombine.low %v2717_v6, %v2724_v7  ;;  %2735 = sbr.rel (%p3583_p11) target bundleno = 1422 (0x58e), region = 80 }
 0x377   : > { %v2729_v10 = vadd.f32 %v2725_v9, %v477_v8 }
 0x379   : > { %2731 = vst [vmem:[#allocation2 + $0x8] sm:$0xff] %v2729_v10 }
 0x37a   : > { %v2769_v12 = vld [vmem:[#allocation8 + $0xf8] sm:$0xff]  ;;  %v2768_v14 = vld [vmem:[#allocation8 + $0xf0] sm:$0xff]  ;;  %v2767_v16 = vld [vmem:[#allocation8 + $0xe8] sm:$0xff] }
 0x37b   : > { %v2833_v13 = vld [vmem:[#allocation8 + $0x2f8] sm:$0xff]  ;;  %3050 = vmatprep.subr.mxu0 %v2769_v12  ;;  %v2832_v15 = vld [vmem:[#allocation8 + $0x2f0] sm:$0xff]  ;;  %v2831_v17 = vld [vmem:[#allocation8 + $0x2e8] sm:$0xff] }
 0x37c   : > { %3121 = vmatprep.subr.mxu1 %v2833_v13  ;;  %3051 = vmatpush1.msra.mxu0 %v2768_v14  ;;  %v2766_v18 = vld [vmem:[#allocation8 + $0xe0] sm:$0xff]  ;;  %v2765_v20 = vld [vmem:[#allocation8 + $0xd8] sm:$0xff]  ;;  %v2764_v23 = vld [vmem:[#allocation8 + $0xd0] sm:$0xff] }
 0x37d   : > { %3122 = vmatpush1.msra.mxu1 %v2832_v15  ;;  %v2830_v19 = vld [vmem:[#allocation8 + $0x2e0] sm:$0xff]  ;;  %3052 = vmatprep.subr.mxu0 %v2767_v16  ;;  %v2829_v22 = vld [vmem:[#allocation8 + $0x2d8] sm:$0xff]  ;;  %v2828_v24 = vld [vmem:[#allocation8 + $0x2d0] sm:$0xff] }
 0x37e   : > { %3123 = vmatprep.subr.mxu1 %v2831_v17  ;;  %3053 = vmatpush1.msra.mxu0 %v2766_v18  ;;  %v2763_v25 = vld [vmem:[#allocation8 + $0xc8] sm:$0xff]  ;;  %v2762_v41 = vld [vmem:[#allocation8 + $0xc0] sm:$0xff]  ;;  %v2761_v28 = vld [vmem:[#allocation8 + $0xb8] sm:$0xff] }
 0x37f   : > { %3124 = vmatpush1.msra.mxu1 %v2830_v19  ;;  %v2827_v26 = vld [vmem:[#allocation8 + $0x2c8] sm:$0xff]  ;;  %3054 = vmatprep.subr.mxu0 %v2765_v20  ;;  %v2826_v27 = vld [vmem:[#allocation8 + $0x2c0] sm:$0xff]  ;;  %v2825_v29 = vld [vmem:[#allocation8 + $0x2b8] sm:$0xff] }
 0x380   : > { %3125 = vmatprep.subr.mxu1 %v2829_v22  ;;  %3055 = vmatpush1.msra.mxu0 %v2764_v23  ;;  %v2760_v43 = vld [vmem:[#allocation8 + $0xb0] sm:$0xff]  ;;  %v2759_v34 = vld [vmem:[#allocation8 + $0xa8] sm:$0xff]  ;;  %v2758_v32 = vld [vmem:[#allocation8 + $0xa0] sm:$0xff] }
 0x381   : > { %3126 = vmatpush1.msra.mxu1 %v2828_v24  ;;  %3056 = vmatprep.subr.mxu0 %v2763_v25  ;;  %v2824_v31 = vld [vmem:[#allocation8 + $0x2b0] sm:$0xff]  ;;  %v2823_v30 = vld [vmem:[#allocation8 + $0x2a8] sm:$0xff]  ;;  %v2822_v33 = vld [vmem:[#allocation8 + $0x2a0] sm:$0xff] }
 0x382   : > { %3127 = vmatprep.subr.mxu1 %v2827_v26  ;;  %3057 = vmatpush1.msra.mxu0 %v2762_v41  ;;  %v2757_v35 = vld [vmem:[#allocation8 + $0x98] sm:$0xff]  ;;  %v2756_v37 = vld [vmem:[#allocation8 + $0x90] sm:$0xff]  ;;  %v2755_v39 = vld [vmem:[#allocation8 + $0x88] sm:$0xff] }
 0x383   : > { %3128 = vmatpush1.msra.mxu1 %v2826_v27  ;;  %3058 = vmatprep.subr.mxu0 %v2761_v28  ;;  %v2821_v36 = vld [vmem:[#allocation8 + $0x298] sm:$0xff]  ;;  %v2820_v38 = vld [vmem:[#allocation8 + $0x290] sm:$0xff]  ;;  %v2819_v40 = vld [vmem:[#allocation8 + $0x288] sm:$0xff] }
 0x384   : > { %3129 = vmatprep.subr.mxu1 %v2825_v29  ;;  %3059 = vmatpush1.msra.mxu0 %v2760_v43  ;;  %v2754_v42 = vld [vmem:[#allocation8 + $0x80] sm:$0xff]  ;;  %v2753_v45 = vld [vmem:[#allocation8 + $0x78] sm:$0xff]  ;;  %v2752_v47 = vld [vmem:[#allocation8 + $0x70] sm:$0xff] }
 0x385   : > { %3130 = vmatpush1.msra.mxu1 %v2824_v31  ;;  %3060 = vmatprep.subr.mxu0 %v2759_v34  ;;  %v2818_v44 = vld [vmem:[#allocation8 + $0x280] sm:$0xff]  ;;  %v2817_v46 = vld [vmem:[#allocation8 + $0x278] sm:$0xff]  ;;  %v2816_v48 = vld [vmem:[#allocation8 + $0x270] sm:$0xff] }
 0x386   : > { %3131 = vmatprep.subr.mxu1 %v2823_v30  ;;  %3061 = vmatpush1.msra.mxu0 %v2758_v32  ;;  %v2751_v50 = vld [vmem:[#allocation8 + $0x68] sm:$0xff]  ;;  %v2750_v52 = vld [vmem:[#allocation8 + $0x60] sm:$0xff]  ;;  %v2749_v53 = vld [vmem:[#allocation8 + $0x58] sm:$0xff] }
 0x387   : > { %3132 = vmatpush1.msra.mxu1 %v2822_v33  ;;  %3062 = vmatprep.subr.mxu0 %v2757_v35  ;;  %v2815_v51 = vld [vmem:[#allocation8 + $0x268] sm:$0xff]  ;;  %v2814_v59 = vld [vmem:[#allocation8 + $0x260] sm:$0xff]  ;;  %v2813_v55 = vld [vmem:[#allocation8 + $0x258] sm:$0xff] }
 0x388   : > { %3133 = vmatprep.subr.mxu1 %v2821_v36  ;;  %3063 = vmatpush1.msra.mxu0 %v2756_v37  ;;  %v2748_v62 = vld [vmem:[#allocation8 + $0x50] sm:$0xff]  ;;  %v2747_v49 = vld [vmem:[#allocation8 + $0x48] sm:$0xff]  ;;  %v2746_v54 = vld [vmem:[#allocation8 + $0x40] sm:$0xff] }
 0x389   : > { %3134 = vmatpush1.msra.mxu1 %v2820_v38  ;;  %3064 = vmatprep.subr.mxu0 %v2755_v39  ;;  %v2812_v56 = vld [vmem:[#allocation8 + $0x250] sm:$0xff]  ;;  %v2811_v57 = vld [vmem:[#allocation8 + $0x248] sm:$0xff]  ;;  %v2810_v58 = vld [vmem:[#allocation8 + $0x240] sm:$0xff] }
 0x38a   : > { %3135 = vmatprep.subr.mxu1 %v2819_v40  ;;  %3065 = vmatpush1.msra.mxu0 %v2754_v42  ;;  %v2745_v60 = vld [vmem:[#allocation8 + $0x38] sm:$0xff]  ;;  %v2744_v63 = vld [vmem:[#allocation8 + $0x30] sm:$0xff]  ;;  %v2743_v1 = vld [vmem:[#allocation8 + $0x28] sm:$0xff] }
 0x38b   : > { %3136 = vmatpush1.msra.mxu1 %v2818_v44  ;;  %3066 = vmatprep.subr.mxu0 %v2753_v45  ;;  %v2809_v61 = vld [vmem:[#allocation8 + $0x238] sm:$0xff]  ;;  %v2808_v0 = vld [vmem:[#allocation8 + $0x230] sm:$0xff]  ;;  %v2807_v2 = vld [vmem:[#allocation8 + $0x228] sm:$0xff] }
 0x38c   : > { %3137 = vmatprep.subr.mxu1 %v2817_v46  ;;  %3067 = vmatpush1.msra.mxu0 %v2752_v47  ;;  %v2742_v3 = vld [vmem:[#allocation8 + $0x20] sm:$0xff]  ;;  %v2741_v5 = vld [vmem:[#allocation8 + $0x18] sm:$0xff]  ;;  %v2740_v7 = vld [vmem:[#allocation8 + $0x10] sm:$0xff] }
 0x38d   : > { %3138 = vmatpush1.msra.mxu1 %v2816_v48  ;;  %3068 = vmatprep.subr.mxu0 %v2751_v50  ;;  %v2806_v4 = vld [vmem:[#allocation8 + $0x220] sm:$0xff]  ;;  %v2805_v6 = vld [vmem:[#allocation8 + $0x218] sm:$0xff]  ;;  %v2804_v8 = vld [vmem:[#allocation8 + $0x210] sm:$0xff] }
 0x38e   : > { %3139 = vmatprep.subr.mxu1 %v2815_v51  ;;  %3069 = vmatpush1.msra.mxu0 %v2750_v52  ;;  %v2739_v9 = vld [vmem:[#allocation8 + $0x8] sm:$0xff]  ;;  %v2738_v12 = vld [vmem:[#allocation8] sm:$0xff]  ;;  %v2801_v14 = vld [vmem:[#allocation8 + $0x1f8] sm:$0xff] }
 0x38f   : > { %3140 = vmatpush1.msra.mxu1 %v2814_v59  ;;  %3070 = vmatprep.subr.mxu0 %v2749_v53  ;;  %v2803_v10 = vld [vmem:[#allocation8 + $0x208] sm:$0xff]  ;;  %v2802_v13 = vld [vmem:[#allocation8 + $0x200] sm:$0xff]  ;;  %v2865_v15 = vld [vmem:[#allocation8 + $0x3f8] sm:$0xff] }
 0x390   : > { %3141 = vmatprep.subr.mxu1 %v2813_v55  ;;  %3071 = vmatpush1.msra.mxu0 %v2748_v62  ;;  %v2800_v16 = vld [vmem:[#allocation8 + $0x1f0] sm:$0xff]  ;;  %v2799_v18 = vld [vmem:[#allocation8 + $0x1e8] sm:$0xff]  ;;  %v2798_v20 = vld [vmem:[#allocation8 + $0x1e0] sm:$0xff] }
 0x391   : > { %3142 = vmatpush1.msra.mxu1 %v2812_v56  ;;  %3072 = vmatprep.subr.mxu0 %v2747_v49  ;;  %v2864_v17 = vld [vmem:[#allocation8 + $0x3f0] sm:$0xff]  ;;  %v2863_v19 = vld [vmem:[#allocation8 + $0x3e8] sm:$0xff]  ;;  %v2862_v22 = vld [vmem:[#allocation8 + $0x3e0] sm:$0xff] }
 0x392   : > { %3143 = vmatprep.subr.mxu1 %v2811_v57  ;;  %3073 = vmatpush1.msra.mxu0 %v2746_v54  ;;  %v2797_v23 = vld [vmem:[#allocation8 + $0x1d8] sm:$0xff]  ;;  %v2796_v25 = vld [vmem:[#allocation8 + $0x1d0] sm:$0xff]  ;;  %v2795_v41 = vld [vmem:[#allocation8 + $0x1c8] sm:$0xff] }
 0x393   : > { %3144 = vmatpush1.msra.mxu1 %v2810_v58  ;;  %3074 = vmatprep.subr.mxu0 %v2745_v60  ;;  %v2861_v24 = vld [vmem:[#allocation8 + $0x3d8] sm:$0xff]  ;;  %v2860_v26 = vld [vmem:[#allocation8 + $0x3d0] sm:$0xff]  ;;  %v2859_v27 = vld [vmem:[#allocation8 + $0x3c8] sm:$0xff] }
 0x394   : > { %3145 = vmatprep.subr.mxu1 %v2809_v61  ;;  %3075 = vmatpush1.msra.mxu0 %v2744_v63  ;;  %v2794_v28 = vld [vmem:[#allocation8 + $0x1c0] sm:$0xff]  ;;  %v2793_v43 = vld [vmem:[#allocation8 + $0x1b8] sm:$0xff]  ;;  %v2792_v34 = vld [vmem:[#allocation8 + $0x1b0] sm:$0xff] }
 0x395   : > { %3146 = vmatpush1.msra.mxu1 %v2808_v0  ;;  %3076 = vmatprep.subr.mxu0 %v2743_v1  ;;  %v2858_v29 = vld [vmem:[#allocation8 + $0x3c0] sm:$0xff]  ;;  %v2857_v31 = vld [vmem:[#allocation8 + $0x3b8] sm:$0xff]  ;;  %v2856_v30 = vld [vmem:[#allocation8 + $0x3b0] sm:$0xff] }
 0x396   : > { %3147 = vmatprep.subr.mxu1 %v2807_v2  ;;  %3077 = vmatpush1.msra.mxu0 %v2742_v3  ;;  %v2791_v32 = vld [vmem:[#allocation8 + $0x1a8] sm:$0xff]  ;;  %v2790_v35 = vld [vmem:[#allocation8 + $0x1a0] sm:$0xff]  ;;  %v2789_v37 = vld [vmem:[#allocation8 + $0x198] sm:$0xff] }
 0x397   : > { %3148 = vmatpush1.msra.mxu1 %v2806_v4  ;;  %3078 = vmatprep.subr.mxu0 %v2741_v5  ;;  %v2855_v33 = vld [vmem:[#allocation8 + $0x3a8] sm:$0xff]  ;;  %v2854_v36 = vld [vmem:[#allocation8 + $0x3a0] sm:$0xff]  ;;  %v2853_v38 = vld [vmem:[#allocation8 + $0x398] sm:$0xff] }
 0x398   : > { %3149 = vmatprep.subr.mxu1 %v2805_v6  ;;  %3079 = vmatpush1.msra.mxu0 %v2740_v7  ;;  %v2788_v39 = vld [vmem:[#allocation8 + $0x190] sm:$0xff]  ;;  %v2787_v42 = vld [vmem:[#allocation8 + $0x188] sm:$0xff]  ;;  %v2786_v45 = vld [vmem:[#allocation8 + $0x180] sm:$0xff] }
 0x399   : > { %3150 = vmatpush1.msra.mxu1 %v2804_v8  ;;  %3080 = vmatprep.subr.mxu0 %v2739_v9  ;;  %v2852_v40 = vld [vmem:[#allocation8 + $0x390] sm:$0xff]  ;;  %v2851_v44 = vld [vmem:[#allocation8 + $0x388] sm:$0xff]  ;;  %v2850_v46 = vld [vmem:[#allocation8 + $0x380] sm:$0xff] }
 0x39a   : > { %3151 = vmatprep.subr.mxu1 %v2803_v10  ;;  %3081 = vmatpush1.msra.mxu0 %v2738_v12  ;;  %v2785_v47 = vld [vmem:[#allocation8 + $0x178] sm:$0xff]  ;;  %v2784_v50 = vld [vmem:[#allocation8 + $0x170] sm:$0xff]  ;;  %v2783_v52 = vld [vmem:[#allocation8 + $0x168] sm:$0xff] }
 0x39b   : > { %3152 = vmatpush1.msra.mxu1 %v2802_v13  ;;  %3082 = vmatprep.subr.mxu0 %v2801_v14  ;;  %v2849_v48 = vld [vmem:[#allocation8 + $0x378] sm:$0xff]  ;;  %v2848_v51 = vld [vmem:[#allocation8 + $0x370] sm:$0xff]  ;;  %v2847_v59 = vld [vmem:[#allocation8 + $0x368] sm:$0xff] }
 0x39c   : > { %3153 = vmatprep.subr.mxu1 %v2865_v15  ;;  %3083 = vmatpush2.msra.mxu0 %v2800_v16  ;;  %v2782_v53 = vld [vmem:[#allocation8 + $0x160] sm:$0xff]  ;;  %v2781_v62 = vld [vmem:[#allocation8 + $0x158] sm:$0xff]  ;;  %v2780_v49 = vld [vmem:[#allocation8 + $0x150] sm:$0xff] }
 0x39d   : > { %3154 = vmatpush2.msra.mxu1 %v2864_v17  ;;  %3084 = vmatprep.subr.mxu0 %v2799_v18  ;;  %v2846_v55 = vld [vmem:[#allocation8 + $0x360] sm:$0xff]  ;;  %v2845_v56 = vld [vmem:[#allocation8 + $0x358] sm:$0xff]  ;;  %v2844_v57 = vld [vmem:[#allocation8 + $0x350] sm:$0xff] }
 0x39e   : > { %3155 = vmatprep.subr.mxu1 %v2863_v19  ;;  %3085 = vmatpush2.msra.mxu0 %v2798_v20  ;;  %v2736_v54 = vld [vmem:[#allocation2] sm:$0xff]  ;;  %v2778_v61 = vld [vmem:[#allocation8 + $0x140] sm:$0xff]  ;;  %v2777_v0 = vld [vmem:[#allocation8 + $0x138] sm:$0xff] }
 0x39f   : > { %3156 = vmatpush2.msra.mxu1 %v2862_v22  ;;  %3086 = vmatprep.subr.mxu0 %v2797_v23  ;;  %v2779_v58 = vld [vmem:[#allocation8 + $0x148] sm:$0xff]  ;;  %v2842_v63 = vld [vmem:[#allocation8 + $0x340] sm:$0xff]  ;;  %v2841_v1 = vld [vmem:[#allocation8 + $0x338] sm:$0xff]  ;;  %v3008_v2 = vcombine.high %v2736_v54, %v2736_v54  ;;  %v3015_v7 = vrot.slane %v2736_v54, %v4309_v21 }
 0x3a0   : > { %3157 = vmatprep.subr.mxu1 %v2861_v24  ;;  %3087 = vmatpush2.msra.mxu0 %v2796_v25  ;;  %v2843_v60 = vld [vmem:[#allocation8 + $0x348] sm:$0xff]  ;;  %v2776_v3 = vld [vmem:[#allocation8 + $0x130] sm:$0xff]  ;;  %v2774_v8 = vld [vmem:[#allocation8 + $0x120] sm:$0xff] }
 0x3a1   : > { %3158 = vmatpush2.msra.mxu1 %v2860_v26  ;;  %3088 = vmatprep.subr.mxu0 %v2795_v41  ;;  %v2840_v4 = vld [vmem:[#allocation8 + $0x330] sm:$0xff]  ;;  %v2775_v5 = vld [vmem:[#allocation8 + $0x128] sm:$0xff]  ;;  %v2838_v9 = vld [vmem:[#allocation8 + $0x320] sm:$0xff]  ;;  %v3022_v13 = vrot.slane %v3008_v2, %v4309_v21  ;;  %v3023_v18 = vcombine.high %v3015_v7, %v3015_v7 }
 0x3a2   : > { %3159 = vmatprep.subr.mxu1 %v2859_v27  ;;  %3089 = vmatpush2.msra.mxu0 %v2794_v28  ;;  %v2839_v6 = vld [vmem:[#allocation8 + $0x328] sm:$0xff]  ;;  %v2773_v10 = vld [vmem:[#allocation8 + $0x118] sm:$0xff]  ;;  %v2772_v14 = vld [vmem:[#allocation8 + $0x110] sm:$0xff] }
 0x3a3   : > { %3160 = vmatpush2.msra.mxu1 %v2858_v29  ;;  %3090 = vmatprep.subr.mxu0 %v2793_v43  ;;  %v2837_v12 = vld [vmem:[#allocation8 + $0x318] sm:$0xff]  ;;  %v2836_v15 = vld [vmem:[#allocation8 + $0x310] sm:$0xff]  ;;  %v2771_v16 = vld [vmem:[#allocation8 + $0x108] sm:$0xff]  ;;  %v3024_v22 = vcombine.high %v3022_v13, %v3022_v13 }
 0x3a4   : > { %3161 = vmatprep.subr.mxu1 %v2857_v31  ;;  %3091 = vmatpush2.msra.mxu0 %v2792_v34  ;;  %v2835_v17 = vld [vmem:[#allocation8 + $0x308] sm:$0xff]  ;;  %v2770_v19 = vld [vmem:[#allocation8 + $0x100] sm:$0xff]  ;;  %v2897_v23 = vld [vmem:[#allocation8 + $0x4f8] sm:$0xff] }
 0x3a5   : > { %3162 = vmatpush2.msra.mxu1 %v2856_v30  ;;  %3092 = vmatprep.subr.mxu0 %v2791_v32  ;;  %v2834_v20 = vld [vmem:[#allocation8 + $0x300] sm:$0xff]  ;;  %v2961_v24 = vld [vmem:[#allocation8 + $0x6f8] sm:$0xff]  ;;  %v2896_v25 = vld [vmem:[#allocation8 + $0x4f0] sm:$0xff] }
 0x3a6   : > { %3163 = vmatprep.subr.mxu1 %v2855_v33  ;;  %3093 = vmatpush2.msra.mxu0 %v2790_v35  ;;  %v2960_v26 = vld [vmem:[#allocation8 + $0x6f0] sm:$0xff]  ;;  %v2895_v41 = vld [vmem:[#allocation8 + $0x4e8] sm:$0xff]  ;;  %v2894_v28 = vld [vmem:[#allocation8 + $0x4e0] sm:$0xff] }
 0x3a7   : > { %3164 = vmatpush2.msra.mxu1 %v2854_v36  ;;  %3094 = vmatprep.subr.mxu0 %v2789_v37  ;;  %v2959_v27 = vld [vmem:[#allocation8 + $0x6e8] sm:$0xff]  ;;  %v2958_v29 = vld [vmem:[#allocation8 + $0x6e0] sm:$0xff]  ;;  %v2893_v43 = vld [vmem:[#allocation8 + $0x4d8] sm:$0xff] }
 0x3a8   : > { %3165 = vmatprep.subr.mxu1 %v2853_v38  ;;  %3095 = vmatpush2.msra.mxu0 %v2788_v39  ;;  %v2957_v31 = vld [vmem:[#allocation8 + $0x6d8] sm:$0xff]  ;;  %v2892_v34 = vld [vmem:[#allocation8 + $0x4d0] sm:$0xff]  ;;  %v2891_v32 = vld [vmem:[#allocation8 + $0x4c8] sm:$0xff] }
 0x3a9   : > { %3166 = vmatpush2.msra.mxu1 %v2852_v40  ;;  %3096 = vmatprep.subr.mxu0 %v2787_v42  ;;  %v2956_v30 = vld [vmem:[#allocation8 + $0x6d0] sm:$0xff]  ;;  %v2955_v33 = vld [vmem:[#allocation8 + $0x6c8] sm:$0xff]  ;;  %v2890_v35 = vld [vmem:[#allocation8 + $0x4c0] sm:$0xff] }
 0x3aa   : > { %3167 = vmatprep.subr.mxu1 %v2851_v44  ;;  %3097 = vmatpush2.msra.mxu0 %v2786_v45  ;;  %v2954_v36 = vld [vmem:[#allocation8 + $0x6c0] sm:$0xff]  ;;  %v2889_v37 = vld [vmem:[#allocation8 + $0x4b8] sm:$0xff]  ;;  %v2888_v39 = vld [vmem:[#allocation8 + $0x4b0] sm:$0xff] }
 0x3ab   : > { %3168 = vmatpush2.msra.mxu1 %v2850_v46  ;;  %3098 = vmatprep.subr.mxu0 %v2785_v47  ;;  %v2953_v38 = vld [vmem:[#allocation8 + $0x6b8] sm:$0xff]  ;;  %v2952_v40 = vld [vmem:[#allocation8 + $0x6b0] sm:$0xff]  ;;  %v2887_v42 = vld [vmem:[#allocation8 + $0x4a8] sm:$0xff] }
 0x3ac   : > { %3169 = vmatprep.subr.mxu1 %v2849_v48  ;;  %3099 = vmatpush2.msra.mxu0 %v2784_v50  ;;  %v2951_v44 = vld [vmem:[#allocation8 + $0x6a8] sm:$0xff]  ;;  %v2886_v45 = vld [vmem:[#allocation8 + $0x4a0] sm:$0xff]  ;;  %v2885_v47 = vld [vmem:[#allocation8 + $0x498] sm:$0xff] }
 0x3ad   : > { %3170 = vmatpush2.msra.mxu1 %v2848_v51  ;;  %3100 = vmatprep.subr.mxu0 %v2783_v52  ;;  %v2950_v46 = vld [vmem:[#allocation8 + $0x6a0] sm:$0xff]  ;;  %v2949_v48 = vld [vmem:[#allocation8 + $0x698] sm:$0xff]  ;;  %v2884_v50 = vld [vmem:[#allocation8 + $0x490] sm:$0xff] }
 0x3ae   : > { %3171 = vmatprep.subr.mxu1 %v2847_v59  ;;  %3101 = vmatpush2.msra.mxu0 %v2782_v53  ;;  %v2948_v51 = vld [vmem:[#allocation8 + $0x690] sm:$0xff]  ;;  %v2883_v52 = vld [vmem:[#allocation8 + $0x488] sm:$0xff]  ;;  %v2882_v53 = vld [vmem:[#allocation8 + $0x480] sm:$0xff] }
 0x3af   : > { %3172 = vmatpush2.msra.mxu1 %v2846_v55  ;;  %3102 = vmatprep.subr.mxu0 %v2781_v62  ;;  %v2947_v59 = vld [vmem:[#allocation8 + $0x688] sm:$0xff]  ;;  %v2946_v55 = vld [vmem:[#allocation8 + $0x680] sm:$0xff]  ;;  %v2881_v62 = vld [vmem:[#allocation8 + $0x478] sm:$0xff] }
 0x3b0   : > { %3173 = vmatprep.subr.mxu1 %v2845_v56  ;;  %3103 = vmatpush2.msra.mxu0 %v2780_v49  ;;  %v2945_v56 = vld [vmem:[#allocation8 + $0x678] sm:$0xff]  ;;  %v2880_v49 = vld [vmem:[#allocation8 + $0x470] sm:$0xff]  ;;  %v2879_v54 = vld [vmem:[#allocation8 + $0x468] sm:$0xff] }
 0x3b1   : > { %3174 = vmatpush2.msra.mxu1 %v2844_v57  ;;  %3104 = vmatprep.subr.mxu0 %v2779_v58  ;;  %v2944_v57 = vld [vmem:[#allocation8 + $0x670] sm:$0xff]  ;;  %v2943_v58 = vld [vmem:[#allocation8 + $0x668] sm:$0xff] }
 0x3b2   : > { %3175 = vmatprep.subr.mxu1 %v2843_v60  ;;  %3105 = vmatpush2.msra.mxu0 %v2778_v61  ;;  %v2878_v60 = vld [vmem:[#allocation8 + $0x460] sm:$0xff]  ;;  %v2940_v2 = vld [vmem:[#allocation8 + $0x650] sm:$0xff] }
 0x3b3   : > { %3176 = vmatpush2.msra.mxu1 %v2842_v63  ;;  %3106 = vmatprep.subr.mxu0 %v2777_v0  ;;  %v2942_v61 = vld [vmem:[#allocation8 + $0x660] sm:$0xff]  ;;  %v2877_v63 = vld [vmem:[#allocation8 + $0x458] sm:$0xff] }
 0x3b4   : > { %3177 = vmatprep.subr.mxu1 %v2841_v1  ;;  %3107 = vmatpush2.msra.mxu0 %v2776_v3  ;;  %v2941_v0 = vld [vmem:[#allocation8 + $0x658] sm:$0xff]  ;;  %v2876_v1 = vld [vmem:[#allocation8 + $0x450] sm:$0xff]  ;;  %v2875_v3 = vld [vmem:[#allocation8 + $0x448] sm:$0xff] }
 0x3b5   : > { %3178 = vmatpush2.msra.mxu1 %v2840_v4  ;;  %3108 = vmatprep.subr.mxu0 %v2775_v5  ;;  %v2939_v4 = vld [vmem:[#allocation8 + $0x648] sm:$0xff]  ;;  %v2874_v5 = vld [vmem:[#allocation8 + $0x440] sm:$0xff] }
 0x3b6   : > { %3179 = vmatprep.subr.mxu1 %v2839_v6  ;;  %3109 = vmatpush2.msra.mxu0 %v2774_v8  ;;  %v2938_v6 = vld [vmem:[#allocation8 + $0x640] sm:$0xff]  ;;  %v2937_v8 = vld [vmem:[#allocation8 + $0x638] sm:$0xff] }
 0x3b7   : > { %3180 = vmatpush2.msra.mxu1 %v2838_v9  ;;  %3110 = vmatprep.subr.mxu0 %v2773_v10  ;;  %v2872_v9 = vld [vmem:[#allocation8 + $0x430] sm:$0xff] }
 0x3b8   : > { %3181 = vmatprep.subr.mxu1 %v2837_v12  ;;  %3111 = vmatpush2.msra.mxu0 %v2772_v14  ;;  %v2936_v10 = vld [vmem:[#allocation8 + $0x630] sm:$0xff]  ;;  %v2871_v12 = vld [vmem:[#allocation8 + $0x428] sm:$0xff]  ;;  %v2870_v14 = vld [vmem:[#allocation8 + $0x420] sm:$0xff] }
 0x3b9   : > { %3182 = vmatpush2.msra.mxu1 %v2836_v15  ;;  %3112 = vmatprep.subr.mxu0 %v2771_v16  ;;  %v2934_v15 = vld [vmem:[#allocation8 + $0x620] sm:$0xff]  ;;  %v2869_v16 = vld [vmem:[#allocation8 + $0x418] sm:$0xff] }
 0x3ba   : > { %3183 = vmatprep.subr.mxu1 %v2835_v17  ;;  %3113 = vmatpush2.msra.mxu0 %v2770_v19  ;;  %v2933_v17 = vld [vmem:[#allocation8 + $0x618] sm:$0xff]  ;;  %v2932_v19 = vld [vmem:[#allocation8 + $0x610] sm:$0xff] }
 0x3bb   : > { %3114 = vmatprep.mubr.f32.mxu0 %v3023_v18  ;;  %3184 = vmatpush2.msra.mxu1 %v2834_v20  ;;  %v2868_v18 = vld [vmem:[#allocation8 + $0x410] sm:$0xff]  ;;  %v2867_v20 = vld [vmem:[#allocation8 + $0x408] sm:$0xff] }
 0x3bc   : > { %3115 = vmatmul.mubr.f32.vlgmr.msra.gmra.mxu0 %v3015_v7  ;;  %3185 = vmatprep.mubr.f32.mxu1 %v3024_v22  ;;  %v2873_v7 = vld [vmem:[#allocation8 + $0x438] sm:$0xff]  ;;  %v2931_v22 = vld [vmem:[#allocation8 + $0x608] sm:$0xff] }
 0x3bd   : > { %3192 = vmatprep.subr.mxu0 %v2897_v23  ;;  %3263 = vmatprep.subr.mxu1 %v2961_v24  ;;  %v2866_v23 = vld [vmem:[#allocation8 + $0x400] sm:$0xff] }
 0x3be   : > { %3186 = vmatmul.mubr.f32.vlgmr.msra.gmra.mxu1 %v3022_v13  ;;  %3193 = vmatpush1.msra.mxu0 %v2896_v25  ;;  %v2935_v13 = vld [vmem:[#allocation8 + $0x628] sm:$0xff]  ;;  %v2930_v24 = vld [vmem:[#allocation8 + $0x600] sm:$0xff]  ;;  %v2929_v25 = vld [vmem:[#allocation8 + $0x5f8] sm:$0xff] }
 0x3bf   : > { %3264 = vmatpush1.msra.mxu1 %v2960_v26  ;;  %3194 = vmatprep.subr.mxu0 %v2895_v41  ;;  %v2993_v26 = vld [vmem:[#allocation8 + $0x7f8] sm:$0xff]  ;;  %v2928_v41 = vld [vmem:[#allocation8 + $0x5f0] sm:$0xff] }
 0x3c0   : > { %3265 = vmatprep.subr.mxu1 %v2959_v27  ;;  %3195 = vmatpush1.msra.mxu0 %v2894_v28  ;;  %v2992_v27 = vld [vmem:[#allocation8 + $0x7f0] sm:$0xff]  ;;  %v2927_v28 = vld [vmem:[#allocation8 + $0x5e8] sm:$0xff] }
 0x3c1   : > { %3266 = vmatpush1.msra.mxu1 %v2958_v29  ;;  %3196 = vmatprep.subr.mxu0 %v2893_v43  ;;  %v2991_v29 = vld [vmem:[#allocation8 + $0x7e8] sm:$0xff]  ;;  %v2926_v43 = vld [vmem:[#allocation8 + $0x5e0] sm:$0xff] }
 0x3c2   : > { %3267 = vmatprep.subr.mxu1 %v2957_v31  ;;  %3197 = vmatpush1.msra.mxu0 %v2892_v34  ;;  %v2990_v31 = vld [vmem:[#allocation8 + $0x7e0] sm:$0xff]  ;;  %v2925_v34 = vld [vmem:[#allocation8 + $0x5d8] sm:$0xff] }
 0x3c3   : > { %3268 = vmatpush1.msra.mxu1 %v2956_v30  ;;  %3198 = vmatprep.subr.mxu0 %v2891_v32  ;;  %v2989_v30 = vld [vmem:[#allocation8 + $0x7d8] sm:$0xff]  ;;  %v2924_v32 = vld [vmem:[#allocation8 + $0x5d0] sm:$0xff] }
 0x3c4   : > { %3269 = vmatprep.subr.mxu1 %v2955_v33  ;;  %3199 = vmatpush1.msra.mxu0 %v2890_v35  ;;  %v2988_v33 = vld [vmem:[#allocation8 + $0x7d0] sm:$0xff]  ;;  %v2923_v35 = vld [vmem:[#allocation8 + $0x5c8] sm:$0xff] }
 0x3c5   : > { %3270 = vmatpush1.msra.mxu1 %v2954_v36  ;;  %3200 = vmatprep.subr.mxu0 %v2889_v37  ;;  %v2987_v36 = vld [vmem:[#allocation8 + $0x7c8] sm:$0xff]  ;;  %v2922_v37 = vld [vmem:[#allocation8 + $0x5c0] sm:$0xff] }
 0x3c6   : > { %3271 = vmatprep.subr.mxu1 %v2953_v38  ;;  %3201 = vmatpush1.msra.mxu0 %v2888_v39  ;;  %v2986_v38 = vld [vmem:[#allocation8 + $0x7c0] sm:$0xff]  ;;  %v2921_v39 = vld [vmem:[#allocation8 + $0x5b8] sm:$0xff] }
 0x3c7   : > { %3272 = vmatpush1.msra.mxu1 %v2952_v40  ;;  %3202 = vmatprep.subr.mxu0 %v2887_v42  ;;  %v2985_v40 = vld [vmem:[#allocation8 + $0x7b8] sm:$0xff]  ;;  %v2920_v42 = vld [vmem:[#allocation8 + $0x5b0] sm:$0xff] }
 0x3c8   : > { %3273 = vmatprep.subr.mxu1 %v2951_v44  ;;  %3203 = vmatpush1.msra.mxu0 %v2886_v45  ;;  %v2984_v44 = vld [vmem:[#allocation8 + $0x7b0] sm:$0xff]  ;;  %v2919_v45 = vld [vmem:[#allocation8 + $0x5a8] sm:$0xff] }
 0x3c9   : > { %3274 = vmatpush1.msra.mxu1 %v2950_v46  ;;  %3204 = vmatprep.subr.mxu0 %v2885_v47  ;;  %v2983_v46 = vld [vmem:[#allocation8 + $0x7a8] sm:$0xff]  ;;  %v2918_v47 = vld [vmem:[#allocation8 + $0x5a0] sm:$0xff] }
 0x3ca   : > { %3275 = vmatprep.subr.mxu1 %v2949_v48  ;;  %3205 = vmatpush1.msra.mxu0 %v2884_v50  ;;  %v2982_v48 = vld [vmem:[#allocation8 + $0x7a0] sm:$0xff]  ;;  %v2917_v50 = vld [vmem:[#allocation8 + $0x598] sm:$0xff] }
 0x3cb   : > { %3276 = vmatpush1.msra.mxu1 %v2948_v51  ;;  %3206 = vmatprep.subr.mxu0 %v2883_v52  ;;  %v2981_v51 = vld [vmem:[#allocation8 + $0x798] sm:$0xff]  ;;  %v2916_v52 = vld [vmem:[#allocation8 + $0x590] sm:$0xff] }
 0x3cc   : > { %3277 = vmatprep.subr.mxu1 %v2947_v59  ;;  %3207 = vmatpush1.msra.mxu0 %v2882_v53  ;;  %v2980_v59 = vld [vmem:[#allocation8 + $0x790] sm:$0xff]  ;;  %v2915_v53 = vld [vmem:[#allocation8 + $0x588] sm:$0xff] }
 0x3cd   : > { %3278 = vmatpush1.msra.mxu1 %v2946_v55  ;;  %3208 = vmatprep.subr.mxu0 %v2881_v62  ;;  %v2979_v55 = vld [vmem:[#allocation8 + $0x788] sm:$0xff]  ;;  %v2914_v62 = vld [vmem:[#allocation8 + $0x580] sm:$0xff] }
 0x3ce   : > { %3279 = vmatprep.subr.mxu1 %v2945_v56  ;;  %3209 = vmatpush1.msra.mxu0 %v2880_v49  ;;  %v2978_v56 = vld [vmem:[#allocation8 + $0x780] sm:$0xff]  ;;  %v2913_v49 = vld [vmem:[#allocation8 + $0x578] sm:$0xff] }
 0x3cf   : > { %3280 = vmatpush1.msra.mxu1 %v2944_v57  ;;  %3210 = vmatprep.subr.mxu0 %v2879_v54  ;;  %v2977_v57 = vld [vmem:[#allocation8 + $0x778] sm:$0xff]  ;;  %v2912_v54 = vld [vmem:[#allocation8 + $0x570] sm:$0xff] }
 0x3d0   : > { %3281 = vmatprep.subr.mxu1 %v2943_v58  ;;  %3211 = vmatpush1.msra.mxu0 %v2878_v60  ;;  %v2976_v58 = vld [vmem:[#allocation8 + $0x770] sm:$0xff]  ;;  %v2911_v60 = vld [vmem:[#allocation8 + $0x568] sm:$0xff] }
 0x3d1   : > { %3282 = vmatpush1.msra.mxu1 %v2942_v61  ;;  %3212 = vmatprep.subr.mxu0 %v2877_v63  ;;  %v2975_v61 = vld [vmem:[#allocation8 + $0x768] sm:$0xff]  ;;  %v2910_v63 = vld [vmem:[#allocation8 + $0x560] sm:$0xff] }
 0x3d2   : > { %3283 = vmatprep.subr.mxu1 %v2941_v0  ;;  %3213 = vmatpush1.msra.mxu0 %v2876_v1  ;;  %v2974_v0 = vld [vmem:[#allocation8 + $0x760] sm:$0xff]  ;;  %v2909_v1 = vld [vmem:[#allocation8 + $0x558] sm:$0xff] }
 0x3d3   : > { %3284 = vmatpush1.msra.mxu1 %v2940_v2  ;;  %3214 = vmatprep.subr.mxu0 %v2875_v3  ;;  %v2973_v2 = vld [vmem:[#allocation8 + $0x758] sm:$0xff]  ;;  %v2737_v3 = vld [vmem:[#allocation2 + $0x8] sm:$0xff] }
 0x3d4   : > { %3285 = vmatprep.subr.mxu1 %v2939_v4  ;;  %3215 = vmatpush1.msra.mxu0 %v2874_v5  ;;  %v2908_v4 = vld [vmem:[#allocation8 + $0x550] sm:$0xff] }
 0x3d5   : > { %3286 = vmatpush1.msra.mxu1 %v2938_v6  ;;  %3216 = vmatprep.subr.mxu0 %v2873_v7  ;;  %v2972_v5 = vld [vmem:[#allocation8 + $0x750] sm:$0xff]  ;;  %v2907_v6 = vld [vmem:[#allocation8 + $0x548] sm:$0xff] }
 0x3d6   : > { %3287 = vmatprep.subr.mxu1 %v2937_v8  ;;  %3217 = vmatpush1.msra.mxu0 %v2872_v9  ;;  %v2971_v7 = vld [vmem:[#allocation8 + $0x748] sm:$0xff]  ;;  %v2906_v8 = vld [vmem:[#allocation8 + $0x540] sm:$0xff] }
 0x3d7   : > { %3288 = vmatpush1.msra.mxu1 %v2936_v10  ;;  %3218 = vmatprep.subr.mxu0 %v2871_v12  ;;  %v2970_v9 = vld [vmem:[#allocation8 + $0x740] sm:$0xff]  ;;  %v3025_v10 = vcombine.high %v2737_v3, %v2737_v3  ;;  %v2905_v12 = vld [vmem:[#allocation8 + $0x538] sm:$0xff] }
 0x3d8   : > { %3289 = vmatprep.subr.mxu1 %v2935_v13  ;;  %3219 = vmatpush1.msra.mxu0 %v2870_v14  ;;  %v2969_v13 = vld [vmem:[#allocation8 + $0x738] sm:$0xff]  ;;  %v2904_v14 = vld [vmem:[#allocation8 + $0x530] sm:$0xff] }
 0x3d9   : > { %3290 = vmatpush1.msra.mxu1 %v2934_v15  ;;  %3220 = vmatprep.subr.mxu0 %v2869_v16  ;;  %v2968_v15 = vld [vmem:[#allocation8 + $0x730] sm:$0xff]  ;;  %v2903_v16 = vld [vmem:[#allocation8 + $0x528] sm:$0xff] }
 0x3da   : > { %3291 = vmatprep.subr.mxu1 %v2933_v17  ;;  %3221 = vmatpush1.msra.mxu0 %v2868_v18  ;;  %v2967_v17 = vld [vmem:[#allocation8 + $0x728] sm:$0xff]  ;;  %v3032_v18 = vrot.slane %v2737_v3, %v4309_v21 }
 0x3db   : > { %3292 = vmatpush1.msra.mxu1 %v2932_v19  ;;  %3222 = vmatprep.subr.mxu0 %v2867_v20  ;;  %v2902_v19 = vld [vmem:[#allocation8 + $0x520] sm:$0xff] }
 0x3dc   : > { %3293 = vmatprep.subr.mxu1 %v2931_v22  ;;  %3223 = vmatpush1.msra.mxu0 %v2866_v23  ;;  %v2966_v20 = vld [vmem:[#allocation8 + $0x720] sm:$0xff]  ;;  %v3039_v22 = vrot.slane %v3025_v10, %v4309_v21  ;;  %v2901_v23 = vld [vmem:[#allocation8 + $0x518] sm:$0xff] }
 0x3dd   : > { %3294 = vmatpush1.msra.mxu1 %v2930_v24  ;;  %3224 = vmatprep.subr.mxu0 %v2929_v25  ;;  %v2965_v24 = vld [vmem:[#allocation8 + $0x718] sm:$0xff]  ;;  %v2900_v25 = vld [vmem:[#allocation8 + $0x510] sm:$0xff]  ;;  %v2962_v21 = vld [vmem:[#allocation8 + $0x700] sm:$0xff] }
 0x3de   : > { %3295 = vmatprep.subr.mxu1 %v2993_v26  ;;  %3225 = vmatpush2.msra.mxu0 %v2928_v41  ;;  %v2964_v26 = vld [vmem:[#allocation8 + $0x710] sm:$0xff]  ;;  %v2899_v41 = vld [vmem:[#allocation8 + $0x508] sm:$0xff] }
 0x3df   : > { %3296 = vmatpush2.msra.mxu1 %v2992_v27  ;;  %3226 = vmatprep.subr.mxu0 %v2927_v28  ;;  %v2963_v27 = vld [vmem:[#allocation8 + $0x708] sm:$0xff]  ;;  %v3040_v28 = vcombine.high %v3032_v18, %v3032_v18 }
 0x3e0   : > { %3297 = vmatprep.subr.mxu1 %v2991_v29  ;;  %3227 = vmatpush2.msra.mxu0 %v2926_v43  ;;  %v2898_v29 = vld [vmem:[#allocation8 + $0x500] sm:$0xff]  ;;  %v3041_v43 = vcombine.high %v3039_v22, %v3039_v22 }
 0x3e1   : > { %3298 = vmatpush2.msra.mxu1 %v2990_v31  ;;  %3228 = vmatprep.subr.mxu0 %v2925_v34  ;;  %v3365_v31 = vld [vmem:[#allocation11 + $0xf8] sm:$0xff] }
 0x3e2   : > { %3299 = vmatprep.subr.mxu1 %v2989_v30  ;;  %3229 = vmatpush2.msra.mxu0 %v2924_v32  ;;  %v3349_v34 = vld [vmem:[#allocation11 + $0x78] sm:$0xff]  ;;  %v3364_v30 = vld [vmem:[#allocation11 + $0xf0] sm:$0xff] }
 0x3e3   : > { %3300 = vmatpush2.msra.mxu1 %v2988_v33  ;;  %3230 = vmatprep.subr.mxu0 %v2923_v35  ;;  %v3348_v32 = vld [vmem:[#allocation11 + $0x70] sm:$0xff]  ;;  %v3363_v33 = vld [vmem:[#allocation11 + $0xe8] sm:$0xff] }
 0x3e4   : > { %3301 = vmatprep.subr.mxu1 %v2987_v36  ;;  %3231 = vmatpush2.msra.mxu0 %v2922_v37  ;;  %v3347_v35 = vld [vmem:[#allocation11 + $0x68] sm:$0xff]  ;;  %v3362_v36 = vld [vmem:[#allocation11 + $0xe0] sm:$0xff] }
 0x3e5   : > { %3302 = vmatpush2.msra.mxu1 %v2986_v38  ;;  %3232 = vmatprep.subr.mxu0 %v2921_v39  ;;  %v3346_v37 = vld [vmem:[#allocation11 + $0x60] sm:$0xff]  ;;  %v3361_v38 = vld [vmem:[#allocation11 + $0xd8] sm:$0xff] }
 0x3e6   : > { %3303 = vmatprep.subr.mxu1 %v2985_v40  ;;  %3233 = vmatpush2.msra.mxu0 %v2920_v42  ;;  %v3345_v39 = vld [vmem:[#allocation11 + $0x58] sm:$0xff]  ;;  %v3360_v40 = vld [vmem:[#allocation11 + $0xd0] sm:$0xff] }
 0x3e7   : > { %3304 = vmatpush2.msra.mxu1 %v2984_v44  ;;  %3234 = vmatprep.subr.mxu0 %v2919_v45  ;;  %v3344_v42 = vld [vmem:[#allocation11 + $0x50] sm:$0xff]  ;;  %v3359_v44 = vld [vmem:[#allocation11 + $0xc8] sm:$0xff] }
 0x3e8   : > { %3305 = vmatprep.subr.mxu1 %v2983_v46  ;;  %3235 = vmatpush2.msra.mxu0 %v2918_v47  ;;  %v3343_v45 = vld [vmem:[#allocation11 + $0x48] sm:$0xff]  ;;  %v3358_v46 = vld [vmem:[#allocation11 + $0xc0] sm:$0xff] }
 0x3e9   : > { %3306 = vmatpush2.msra.mxu1 %v2982_v48  ;;  %3236 = vmatprep.subr.mxu0 %v2917_v50  ;;  %v3342_v47 = vld [vmem:[#allocation11 + $0x40] sm:$0xff]  ;;  %v3357_v48 = vld [vmem:[#allocation11 + $0xb8] sm:$0xff] }
 0x3ea   : > { %3307 = vmatprep.subr.mxu1 %v2981_v51  ;;  %3237 = vmatpush2.msra.mxu0 %v2916_v52  ;;  %v3341_v50 = vld [vmem:[#allocation11 + $0x38] sm:$0xff]  ;;  %v3356_v51 = vld [vmem:[#allocation11 + $0xb0] sm:$0xff] }
 0x3eb   : > { %3308 = vmatpush2.msra.mxu1 %v2980_v59  ;;  %3238 = vmatprep.subr.mxu0 %v2915_v53  ;;  %v3340_v52 = vld [vmem:[#allocation11 + $0x30] sm:$0xff]  ;;  %v3355_v59 = vld [vmem:[#allocation11 + $0xa8] sm:$0xff] }
 0x3ec   : > { %3309 = vmatprep.subr.mxu1 %v2979_v55  ;;  %3239 = vmatpush2.msra.mxu0 %v2914_v62  ;;  %v3339_v53 = vld [vmem:[#allocation11 + $0x28] sm:$0xff]  ;;  %v3354_v55 = vld [vmem:[#allocation11 + $0xa0] sm:$0xff] }
 0x3ed   : > { %3310 = vmatpush2.msra.mxu1 %v2978_v56  ;;  %3240 = vmatprep.subr.mxu0 %v2913_v49  ;;  %v3338_v62 = vld [vmem:[#allocation11 + $0x20] sm:$0xff]  ;;  %v3353_v56 = vld [vmem:[#allocation11 + $0x98] sm:$0xff] }
 0x3ee   : > { %3311 = vmatprep.subr.mxu1 %v2977_v57  ;;  %3241 = vmatpush2.msra.mxu0 %v2912_v54  ;;  %v3337_v49 = vld [vmem:[#allocation11 + $0x18] sm:$0xff]  ;;  %v3352_v57 = vld [vmem:[#allocation11 + $0x90] sm:$0xff] }
 0x3ef   : > { %3312 = vmatpush2.msra.mxu1 %v2976_v58  ;;  %3242 = vmatprep.subr.mxu0 %v2911_v60  ;;  %v3336_v54 = vld [vmem:[#allocation11 + $0x10] sm:$0xff]  ;;  %v3351_v58 = vld [vmem:[#allocation11 + $0x88] sm:$0xff] }
 0x3f0   : > { %3313 = vmatprep.subr.mxu1 %v2975_v61  ;;  %3243 = vmatpush2.msra.mxu0 %v2910_v63  ;;  %v3335_v60 = vld [vmem:[#allocation11 + $0x8] sm:$0xff]  ;;  %v3350_v61 = vld [vmem:[#allocation11 + $0x80] sm:$0xff] }
 0x3f1   : > { %3314 = vmatpush2.msra.mxu1 %v2974_v0  ;;  %3244 = vmatprep.subr.mxu0 %v2909_v1  ;;  %v3334_v63 = vld [vmem:[#allocation11] sm:$0xff]  ;;  %v2998_v0 = vsub.s32 0, %v4297_v11  ;;  %v2994_v1 = vld [vmem:[#allocation9] sm:$0x3] }
 0x3f2   : > { %3315 = vmatprep.subr.mxu1 %v2973_v2  ;;  %3245 = vmatpush2.msra.mxu0 %v2908_v4  ;;  %v3002_v2 = vsub.s32 1, %v4297_v11 }
 0x3f3   : > { %3316 = vmatpush2.msra.mxu1 %v2972_v5  ;;  %3246 = vmatprep.subr.mxu0 %v2907_v6  ;;  %v2999_v4 = vrot.slane %v2994_v1, %v2998_v0 }
 0x3f4   : > { %3317 = vmatprep.subr.mxu1 %v2971_v7  ;;  %3247 = vmatpush2.msra.mxu0 %v2906_v8  ;;  %v3003_v5 = vrot.slane %v2994_v1, %v3002_v2 }
 0x3f5   : > { %3318 = vmatpush2.msra.mxu1 %v2970_v9  ;;  %3248 = vmatprep.subr.mxu0 %v2905_v12 }
 0x3f6   : > { %3319 = vmatprep.subr.mxu1 %v2969_v13  ;;  %3249 = vmatpush2.msra.mxu0 %v2904_v14 }
 0x3f7   : > { %3320 = vmatpush2.msra.mxu1 %v2968_v15  ;;  %3250 = vmatprep.subr.mxu0 %v2903_v16 }
 0x3f8   : > { %3321 = vmatprep.subr.mxu1 %v2967_v17  ;;  %3251 = vmatpush2.msra.mxu0 %v2902_v19 }
 0x3f9   : > { %3322 = vmatpush2.msra.mxu1 %v2966_v20  ;;  %3252 = vmatprep.subr.mxu0 %v2901_v23  ;;  %v3584_v23 = vld [vmem:[#allocation12] ss:$0 sm:$0xff] }
 0x3fa   : > { %3323 = vmatprep.subr.mxu1 %v2965_v24  ;;  %3253 = vmatpush2.msra.mxu0 %v2900_v25 }
 0x3fb   : > { %3324 = vmatpush2.msra.mxu1 %v2964_v26  ;;  %3254 = vmatprep.subr.mxu0 %v2899_v41 }
 0x3fc   : > { %3325 = vmatprep.subr.mxu1 %v2963_v27  ;;  %3255 = vmatpush2.msra.mxu0 %v2898_v29 }
 0x3fd   : > { %3256 = vmatprep.mubr.f32.mxu0 %v3040_v28  ;;  %3326 = vmatpush2.msra.mxu1 %v2962_v21 }
 0x3fe   : > { %3327 = vmatprep.mubr.f32.mxu1 %v3041_v43  ;;  %3257 = vmatmul.mubr.f32.vlgmr.msra.gmra.mxu0 %v3032_v18 }
 0x3ff   : > { %3328 = vmatmul.mubr.f32.vlgmr.msra.gmra.mxu1 %v3039_v22  ;;  %3591 = vmatprep.subr.mxu0 %v3365_v31 }
 0x400   : > { %3592 = vmatpush3.msra.mxu0 %v3349_v34 }
 0x401   : > { %3593 = vmatprep.subr.mxu0 %v3364_v30 }
 0x402   : > { %3594 = vmatpush3.msra.mxu0 %v3348_v32 }
 0x403   : > { %3595 = vmatprep.subr.mxu0 %v3363_v33 }
 0x404   : > { %3596 = vmatpush3.msra.mxu0 %v3347_v35 }
 0x405   : > { %3597 = vmatprep.subr.mxu0 %v3362_v36 }
 0x406   : > { %3598 = vmatpush3.msra.mxu0 %v3346_v37 }
 0x407   : > { %3599 = vmatprep.subr.mxu0 %v3361_v38 }
 0x408   : > { %3600 = vmatpush3.msra.mxu0 %v3345_v39 }
 0x409   : > { %3601 = vmatprep.subr.mxu0 %v3360_v40 }
 0x40a   : > { %3602 = vmatpush3.msra.mxu0 %v3344_v42 }
 0x40b   : > { %3603 = vmatprep.subr.mxu0 %v3359_v44 }
 0x40c   : > { %3604 = vmatpush3.msra.mxu0 %v3343_v45 }
 0x40d   : > { %3605 = vmatprep.subr.mxu0 %v3358_v46 }
 0x40e   : > { %3606 = vmatpush3.msra.mxu0 %v3342_v47 }
 0x40f   : > { %3607 = vmatprep.subr.mxu0 %v3357_v48 }
 0x410   : > { %3608 = vmatpush3.msra.mxu0 %v3341_v50 }
 0x411   : > { %3609 = vmatprep.subr.mxu0 %v3356_v51 }
 0x412   : > { %3610 = vmatpush3.msra.mxu0 %v3340_v52 }
 0x413   : > { %3611 = vmatprep.subr.mxu0 %v3355_v59 }
 0x414   : > { %3612 = vmatpush3.msra.mxu0 %v3339_v53 }
 0x415   : > { %3613 = vmatprep.subr.mxu0 %v3354_v55 }
 0x416   : > { %3614 = vmatpush3.msra.mxu0 %v3338_v62 }
 0x417   : > { %3615 = vmatprep.subr.mxu0 %v3353_v56 }
 0x418   : > { %3616 = vmatpush3.msra.mxu0 %v3337_v49 }
 0x419   : > { %3617 = vmatprep.subr.mxu0 %v3352_v57 }
 0x41a   : > { %3618 = vmatpush3.msra.mxu0 %v3336_v54 }
 0x41b   : > { %3619 = vmatprep.subr.mxu0 %v3351_v58 }
 0x41c   : > { %3620 = vmatpush3.msra.mxu0 %v3335_v60 }
 0x41d   : > { %3621 = vmatprep.subr.mxu0 %v3350_v61 }
 0x41e   : > { %3622 = vmatpush3.msra.mxu0 %v3334_v63 }
 0x47c   : > { %v3116_v3 = vpop.f32.mrf.mxu0 }
 0x47d   : > { %v3117_v8 = vadd.f32 %v3116_v3, %v2999_v4 }
 0x47e   : > { %v3187_v6 = vpop.f32.mrf.mxu1  ;;  %v3118_v7 = vpop.f32.mrf.mxu0 }
 0x47f   : > { %v3119_v9 = vadd.f32 %v3118_v7, %v3003_v5  ;;  %v3188_v12 = vadd.f32 %v3187_v6, %v3117_v8 }
 0x480   : > { %v3189_v10 = vpop.f32.mrf.mxu1 }
 0x481   : > { %v3190_v15 = vadd.f32 %v3189_v10, %v3119_v9 }
 0x4be   : > { %v3258_v13 = vpop.f32.mrf.mxu0 }
 0x4bf   : > { %v3329_v14 = vpop.f32.mrf.mxu1  ;;  %v3259_v16 = vadd.f32 %v3258_v13, %v3188_v12 }
 0x4c0   : > { %v3260_v17 = vpop.f32.mrf.mxu0 }
 0x4c1   : > { %v3261_v18 = vadd.f32 %v3260_v17, %v3190_v15  ;;  %v3331_v19 = vpop.f32.mrf.mxu1  ;;  %v3330_v22 = vadd.f32 %v3329_v14, %v3259_v16 }
 0x4c3   : > { %v3332_v20 = vadd.f32 %v3331_v19, %v3261_v18 }
 0x4c5   : > { %3437 = vmatprep.mubr.f32.mxu0 %v3332_v20 }
 0x4c6   : > { %3438 = vmatmul.mubr.f32.vlgmr.msra.gmra.mxu0 %v3330_v22 }
 0x586   : > { %v3623_v11 = vpop.f32.mrf.mxu0 }
 0x588   : > { %v3624_v24 = vpop.f32.mrf.mxu0 }
 0x589   : > { %v3625_v25 = vadd.f32 %v3624_v24, %v3623_v11 }
 0x58b   : > { %v3440_v26 = vadd.f32 %v3625_v25, %v3584_v23 }
 0x58d   : > { %3443 = vst [vmem:[#allocation14] sm:$0x3] %v3440_v26 }
 0x58e PF: > { %p3683_p13 = scmp.eq.s32.totalorder %s4045_s30, 7  ;;  %s3983_s20 = smov [#allocation14]  }
 0x58f   : > { %s3451_s13 = sshll.u32 %s3983_s20, 4  ;;  %s3452_s13 = int_to_ptr.vmem [resolvable:$true] %s3451_s13 }
 0x590   : > { %s3893_s28 = scalar_lea.vmem %s3452_s13, 32  ;;  %p3900_p0 = scmp.lt.s32.totalorder %s3452_s13, %s3452_s13 }
 0x591   : > { %p3894_p1 = scmp.ne.s32.totalorder %s3452_s13, %s3893_s28  ;;  %p3901_p12 = scmp.lt.s32.totalorder %s3893_s28, %s3893_s28 }
 0x593   : > { %p3895_p4 = pnand %p3894_p1, %p3683_p13  ;;  %p3902_p6 = por %p3901_p12, %p3900_p0 }
 0x595   : > { %p3896_p3 = pneg %p3895_p4 }
 0x597   : > { %p3903_p2 = pnand %p3902_p6, %p3896_p3 }
 0x599   : > { %3906 = shalt.err (!%p3903_p2)
}
 0x59a   : > { %3649 = dma.vmem_to_hbm [thread:$0]  (%p3683_p13), %s3452_s13, 32, %s5338_s7, [#allocation5]  }
 0x59b   : > { %3950 = dma.done.wait (%p3683_p13), [#allocation5], 32  }
 0x59c   : > { %3952 = vsyncadd (%p3683_p13), [#allocation5], 4294967264 }
 0x59d PF: > { %p21_p7 = scmp.ge.s32.totalorder %s4112_s14, 10   ;;  %s5357_s24 = smov %s3959_s25 }
 0x59e   : > { %s5358_s25 = smov %s3963_s26  ;;  %s5359_s26 = smov %s4123_s29 }
 0x59f   : > { %s5360_s27 = smov %s4112_s14  ;;  %23 = sbr.rel (!%p21_p7) target bundleno = 7 (0x7), region = 116 }
 0x5a4   :  { %3464 = vsyncpa [#allocation4], 1 }
 0x5a5   :  { %3466 = vsyncpa [#allocation4 + $0x1], 1 }
 0x5a6   :  { %3467 = vsyncpa [#allocation7], 1 }
 0x5a7   :  { %3468 = vsyncpa [#allocation10], 1 }
 0x5a8   :  { %3469 = vsyncpa [#allocation13], 1 }
 0x5a9   :  { %3470 = vsyncpa [#allocation5], 1 }
 0x5aa   :  { %3472 = vsyncpa [#allocation5 + $0x1], 1 }

</bundles_post_ra>
